<compile_context>
chip_gen: v7x
topology: tpu7x:2x2x1
jax: 0.10.0
libtpu: 0.0.40
codegen_flags: <defaults>
</compile_context>

<pallas_src>
import jax
import jax.numpy as jnp
import numpy as np
from jax.experimental import pallas as pl
from jax.experimental.pallas import tpu as pltpu

EPS = 1e-5  # nn.GroupNorm default eps


def _round_up(x, m):
    return -(-x // m) * m


# ----------------------------- in-kernel math ------------------------------
def _erf(x):
    # Abramowitz & Stegun 7.1.26 (|err| < 1.5e-7); exp + approx-reciprocal only
    # (VPU + EUP friendly).
    a1, a2, a3, a4, a5 = 0.254829592, -0.284496736, 1.421413741, -1.453152027, 1.061405429
    p = 0.3275911
    ax = jnp.abs(x)
    t = pl.reciprocal(1.0 + p * ax, approx=True)      # EUP slot, ~free
    poly = ((((a5 * t + a4) * t + a3) * t + a2) * t + a1) * t
    y = 1.0 - poly * jnp.exp(-ax * ax)
    return jnp.where(x < 0.0, -y, y)


def _gelu(x):
    # PyTorch nn.GELU() default (exact, erf-based).
    return 0.5 * x * (1.0 + _erf(x * 0.7071067811865476))


def _gn1(y, g, b, inv_count):
    # GroupNorm(num_groups=1), single-pass stats: sum and sum-of-squares in one
    # traversal; divide by the true element count P*C (guard columns of y are
    # exactly zero, so they contribute nothing to either sum).
    s1 = jnp.sum(y)
    s2 = jnp.sum(y * y)
    mu = s1 * inv_count
    var = jnp.maximum(s2 * inv_count - mu * mu, 0.0)
    return (y - mu) * jax.lax.rsqrt(var + EPS) * g + b


# ------------------------------ fused kernel -------------------------------
def _make_down_kernel(WS, OFF, PS, PADROWS, P, Cin, Cout):
    inv_ci = 1.0 / (P * Cin)
    inv_co = 1.0 / (P * Cout)

    def kernel(p0_ref, emb_ref, gm_ref,
               wd_ref, bd_ref,
               w1a_ref, g1a_ref, b1a_ref,
               w1b_ref, g1b_ref, b1b_ref,
               w2a_ref, g2a_ref, b2a_ref,
               w2b_ref, g2b_ref, b2b_ref,
               o_ref, pad_ref, slab_ref):
        cmax = pad_ref.shape[1]
        # Zero only the halo (guard) rows; the interior [OFF, OFF+PS) is fully
        # rewritten (masked) before every conv's reads.
        pad_ref[0:OFF, :] = jnp.zeros((OFF, cmax), pad_ref.dtype)
        pad_ref[OFF + PS:PADROWS, :] = jnp.zeros((PADROWS - OFF - PS, cmax),
                                                 pad_ref.dtype)

        gm = gm_ref[...]                                # (PS, 1) guard-col mask

        def conv3(x, w_ref, c_in):
            # 3x3 "same" conv in the row-strided layout: pixel (r,c) sits at
            # flat row r*WS + c; columns [W2, WS) are zero guards so the +/-1
            # dx shifts never wrap a row edge (no per-tap masks needed).
            pad_ref[OFF:OFF + PS, :c_in] = x * gm       # masked interior write
            # im2col pack: 9 shifted windows -> one (PS, 9*c_in) bf16 slab.
            for k in range(9):                          # statically unrolled
                ky, kx = k // 3, k % 3
                start = OFF + (ky - 1) * WS + (kx - 1)  # dy offsets 8-aligned
                slab_ref[:, k * c_in:(k + 1) * c_in] = (
                    pad_ref[start:start + PS, :c_in].astype(jnp.bfloat16))
            # Single big-K MXU contraction (bf16 x bf16 -> f32 accumulate).
            y = jnp.dot(slab_ref[:, :9 * c_in], w_ref[...],
                        preferred_element_type=jnp.float32)
            return y * gm                               # zero guards -> exact GN stats

        # maxpool_conv[0]: Conv2d(Cin, Cin, k=2, s=2, bias=True) via
        # space-to-depth patches @ weight + bias.
        x0 = jnp.dot(p0_ref[0], wd_ref[...],
                     preferred_element_type=jnp.float32) + bd_ref[...]

        # DoubleConv(Cin, Cin, residual=True)
        h = _gelu(_gn1(conv3(x0, w1a_ref, Cin), g1a_ref[...], b1a_ref[...], inv_ci))
        x1 = _gelu(x0 + _gn1(conv3(h, w1b_ref, Cin), g1b_ref[...], b1b_ref[...], inv_ci))

        # DoubleConv(Cin, Cout)
        h2 = _gelu(_gn1(conv3(x1, w2a_ref, Cin), g2a_ref[...], b2a_ref[...], inv_co))
        y = _gn1(conv3(h2, w2b_ref, Cout), g2b_ref[...], b2b_ref[...], inv_co)

        # + hoisted time-embedding projection, broadcast over spatial positions.
        # Guard columns carry junk; the host slices them off.
        o_ref[0] = (y + emb_ref[0]).astype(o_ref.dtype)

    return kernel


# ------------------------------ host-side glue -----------------------------
def down_forward(x_nhwc, t, p):
    B, H, W, Cin = x_nhwc.shape
    H2, W2 = H // 2, W // 2
    P = H2 * W2
    Cout = p["w2b"].shape[-1]
    CMAX = max(Cin, Cout)

    WS = _round_up(W2 + 1, 8)           # row stride: >=1 zero guard col, 8-aligned
    PS = H2 * WS                        # strided spatial length
    OFF = WS + 8                        # interior start (>= WS+1, 8-aligned)
    PADROWS = _round_up(OFF + PS + WS + 1, 8)

    # Space-to-depth patches for the k=2,s=2 down-conv, laid out in the strided
    # (H2, WS) spatial layout with zero guard columns; bf16 MXU operands.
    s2d = (x_nhwc.reshape(B, H2, 2, W2, 2, Cin)
           .transpose(0, 1, 3, 2, 4, 5)
           .reshape(B, H2, W2, 4 * Cin))
    p0 = jnp.pad(s2d, ((0, 0), (0, 0), (0, WS - W2), (0, 0)))
    p0 = p0.reshape(B, PS, 4 * Cin).astype(jnp.bfloat16)

    # Hoisted emb_layer: Linear(GELU(t)), exact GELU like nn.GELU().
    emb = (jax.nn.gelu(t, approximate=False) @ p["we"] + p["be_emb"]).reshape(B, 1, Cout)
    emb = emb.astype(jnp.float32)

    # Guard-column mask for the strided layout.
    gmask = jnp.asarray((np.arange(PS) % WS < W2).astype(np.float32).reshape(PS, 1))

    bf = jnp.bfloat16
    row = lambda v: v.reshape(1, -1).astype(jnp.float32)
    args = [
        p0, emb, gmask,
        p["wd"].reshape(4 * Cin, Cin).astype(bf), row(p["bd"]),
        p["w1a"].reshape(9 * Cin, Cin).astype(bf), row(p["g1a"]), row(p["be1a"]),
        p["w1b"].reshape(9 * Cin, Cin).astype(bf), row(p["g1b"]), row(p["be1b"]),
        p["w2a"].reshape(9 * Cin, Cout).astype(bf), row(p["g2a"]), row(p["be2a"]),
        p["w2b"].reshape(9 * Cout, Cout).astype(bf), row(p["g2b"]), row(p["be2b"]),
    ]

    def per_sample(a):
        n = a.ndim - 1
        return pl.BlockSpec((1,) + tuple(a.shape[1:]), lambda b, _n=n: (b,) + (0,) * _n)

    def const_spec(a):
        # Grid-invariant block: single-buffered (no 2x VMEM for weights/scales
        # whose block index never changes across the batch grid).
        z = (0,) * a.ndim
        return pl.BlockSpec(a.shape, lambda b, _z=z: _z,
                            pipeline_mode=pl.Buffered(1))

    in_specs = [per_sample(p0), per_sample(emb)] + [const_spec(a) for a in args[2:]]

    out = pl.pallas_call(
        _make_down_kernel(WS, OFF, PS, PADROWS, P, Cin, Cout),
        out_shape=jax.ShapeDtypeStruct((B, PS, Cout), jnp.float32),
        grid=(B,),
        in_specs=in_specs,
        out_specs=pl.BlockSpec((1, PS, Cout), lambda b: (b, 0, 0)),
        scratch_shapes=[
            pltpu.VMEM((PADROWS, CMAX), jnp.float32),    # padded strided input
            pltpu.VMEM((PS, 9 * CMAX), jnp.bfloat16),    # im2col slab (bf16)
        ],
        compiler_params=pltpu.CompilerParams(
            dimension_semantics=("parallel",),           # split batch over TCs
            vmem_limit_bytes=32 * 1024 * 1024,           # portable v5e/v6e/v7x
        ),
    )(*args)

    # Drop the guard columns of the strided layout -> NHWC.
    return out.reshape(B, H2, WS, Cout)[:, :, :W2, :]


# ------------------------- pure-JAX reference check ------------------------
def ref_forward(x_nhwc, t, p):
    dn = ('NHWC', 'HWIO', 'NHWC')
    conv = lambda x, w, s, pad: jax.lax.conv_general_dilated(x, w, (s, s), pad,
                                                             dimension_numbers=dn)

    def gn(x, g, b):
        mu = jnp.mean(x, axis=(1, 2, 3), keepdims=True)
        var = jnp.mean((x - mu) ** 2, axis=(1, 2, 3), keepdims=True)
        return (x - mu) * jax.lax.rsqrt(var + EPS) * g + b

    gelu = lambda v: jax.nn.gelu(v, approximate=False)
    x0 = conv(x_nhwc, p["wd"], 2, 'VALID') + p["bd"]
    h = gelu(gn(conv(x0, p["w1a"], 1, 'SAME'), p["g1a"], p["be1a"]))
    x1 = gelu(x0 + gn(conv(h, p["w1b"], 1, 'SAME'), p["g1b"], p["be1b"]))
    h2 = gelu(gn(conv(x1, p["w2a"], 1, 'SAME'), p["g2a"], p["be2a"]))
    x2 = gn(conv(h2, p["w2b"], 1, 'SAME'), p["g2b"], p["be2b"])
    emb = gelu(t) @ p["we"] + p["be_emb"]
    return x2 + emb[:, None, None, :]


# ------------------------------- parameters --------------------------------
def make_params(key, Cin, Cout, emb_dim):
    ks = jax.random.split(key, 16)
    n = lambda i, shape, s=0.2: s * jax.random.normal(ks[i], shape, jnp.float32)
    return dict(
        wd=n(0, (2, 2, Cin, Cin), 0.3), bd=n(1, (Cin,), 0.1),
        w1a=n(2, (3, 3, Cin, Cin)), g1a=1.0 + n(3, (Cin,), 0.1), be1a=n(4, (Cin,), 0.1),
        w1b=n(5, (3, 3, Cin, Cin)), g1b=1.0 + n(6, (Cin,), 0.1), be1b=n(7, (Cin,), 0.1),
        w2a=n(8, (3, 3, Cin, Cout)), g2a=1.0 + n(9, (Cout,), 0.1), be2a=n(10, (Cout,), 0.1),
        w2b=n(11, (3, 3, Cout, Cout)), g2b=1.0 + n(12, (Cout,), 0.1), be2b=n(13, (Cout,), 0.1),
        we=n(14, (emb_dim, Cout), 0.15), be_emb=n(15, (Cout,), 0.1),
    )


if __name__ == "__main__":
    B, Cin, Cout, H, W, EMB = 2, 4, 8, 16, 16, 32
    key = jax.random.PRNGKey(0)
    kp, kx, kt = jax.random.split(key, 3)
    params = make_params(kp, Cin, Cout, EMB)

    x_nchw = jax.random.normal(kx, (B, Cin, H, W), jnp.float32)  # PyTorch-style input
    t = jax.random.normal(kt, (B, EMB), jnp.float32)
    x_nhwc = jnp.transpose(x_nchw, (0, 2, 3, 1))

    out = jax.jit(down_forward)(x_nhwc, t, params)
    out = jax.block_until_ready(out)
    assert out.shape == (B, H // 2, W // 2, Cout)

    ref = ref_forward(x_nhwc, t, params)
    # Tolerance relaxed vs. the f32 version: matmul operands are bf16 (MXU-native).
    if not jnp.allclose(out, ref, atol=1e-1, rtol=1e-1):
        err = float(jnp.max(jnp.abs(out - ref)))
        raise AssertionError(f"Pallas output does not match reference (max abs err {err:.3e})")

    print("KERNEL_OK")
</pallas_src>

<mosaic_0001>
module attributes {stable_mosaic.version = 11 : i64} {
  func.func @kernel(%arg0: i32, %arg1: memref<1x128x16xbf16, #tpu.memory_space<vmem>>, %arg2: memref<1x1x8xf32, #tpu.memory_space<vmem>>, %arg3: memref<128x1xf32, #tpu.memory_space<vmem>>, %arg4: memref<16x4xbf16, #tpu.memory_space<vmem>>, %arg5: memref<1x4xf32, #tpu.memory_space<vmem>>, %arg6: memref<36x4xbf16, #tpu.memory_space<vmem>>, %arg7: memref<1x4xf32, #tpu.memory_space<vmem>>, %arg8: memref<1x4xf32, #tpu.memory_space<vmem>>, %arg9: memref<36x4xbf16, #tpu.memory_space<vmem>>, %arg10: memref<1x4xf32, #tpu.memory_space<vmem>>, %arg11: memref<1x4xf32, #tpu.memory_space<vmem>>, %arg12: memref<36x8xbf16, #tpu.memory_space<vmem>>, %arg13: memref<1x8xf32, #tpu.memory_space<vmem>>, %arg14: memref<1x8xf32, #tpu.memory_space<vmem>>, %arg15: memref<72x8xbf16, #tpu.memory_space<vmem>>, %arg16: memref<1x8xf32, #tpu.memory_space<vmem>>, %arg17: memref<1x8xf32, #tpu.memory_space<vmem>>, %arg18: memref<1x128x8xf32, #tpu.memory_space<vmem>>, %arg19: memref<176x8xf32, #tpu.memory_space<vmem>>, %arg20: memref<128x72xbf16, #tpu.memory_space<vmem>>) attributes {dimension_semantics = [#tpu.dimension_semantics<parallel>], iteration_bounds = array<i64: 2>, scalar_prefetch = 0 : i64, scratch_operands = 2 : i64, tpu.core_type = #tpu.core_type<tc>, window_params = [{transform_indices = @transform_0, window_bounds = array<i64: 1, 128, 16>}, {transform_indices = @transform_1, window_bounds = array<i64: 1, 1, 8>}, {pipeline_mode = #tpu.pipeline_mode<synchronous>, transform_indices = @transform_2, window_bounds = array<i64: 128, 1>}, {pipeline_mode = #tpu.pipeline_mode<synchronous>, transform_indices = @transform_3, window_bounds = array<i64: 16, 4>}, {pipeline_mode = #tpu.pipeline_mode<synchronous>, transform_indices = @transform_4, window_bounds = array<i64: 1, 4>}, {pipeline_mode = #tpu.pipeline_mode<synchronous>, transform_indices = @transform_5, window_bounds = array<i64: 36, 4>}, {pipeline_mode = #tpu.pipeline_mode<synchronous>, transform_indices = @transform_6, window_bounds = array<i64: 1, 4>}, {pipeline_mode = #tpu.pipeline_mode<synchronous>, transform_indices = @transform_7, window_bounds = array<i64: 1, 4>}, {pipeline_mode = #tpu.pipeline_mode<synchronous>, transform_indices = @transform_8, window_bounds = array<i64: 36, 4>}, {pipeline_mode = #tpu.pipeline_mode<synchronous>, transform_indices = @transform_9, window_bounds = array<i64: 1, 4>}, {pipeline_mode = #tpu.pipeline_mode<synchronous>, transform_indices = @transform_10, window_bounds = array<i64: 1, 4>}, {pipeline_mode = #tpu.pipeline_mode<synchronous>, transform_indices = @transform_11, window_bounds = array<i64: 36, 8>}, {pipeline_mode = #tpu.pipeline_mode<synchronous>, transform_indices = @transform_12, window_bounds = array<i64: 1, 8>}, {pipeline_mode = #tpu.pipeline_mode<synchronous>, transform_indices = @transform_13, window_bounds = array<i64: 1, 8>}, {pipeline_mode = #tpu.pipeline_mode<synchronous>, transform_indices = @transform_14, window_bounds = array<i64: 72, 8>}, {pipeline_mode = #tpu.pipeline_mode<synchronous>, transform_indices = @transform_15, window_bounds = array<i64: 1, 8>}, {pipeline_mode = #tpu.pipeline_mode<synchronous>, transform_indices = @transform_16, window_bounds = array<i64: 1, 8>}, {transform_indices = @transform_17, window_bounds = array<i64: 1, 128, 8>}]} {
    %cst = arith.constant 0.000000e+00 : f32
    %0 = vector.broadcast %cst : f32 to vector<24x8xf32>
    %c0 = arith.constant 0 : index
    %c0_0 = arith.constant 0 : index
    %1 = vector.load %arg19[%c0, %c0_0] : memref<176x8xf32, #tpu.memory_space<vmem>>, vector<24x8xf32>
    tpu.vector_store %arg19[%c0, %c0_0], %0 {strides = array<i32>} : memref<176x8xf32, #tpu.memory_space<vmem>>, vector<24x8xf32>,
    %cst_1 = arith.constant 0.000000e+00 : f32
    %2 = vector.broadcast %cst_1 : f32 to vector<24x8xf32>
    %c152 = arith.constant 152 : index
    %c0_2 = arith.constant 0 : index
    %3 = vector.load %arg19[%c152, %c0_2] : memref<176x8xf32, #tpu.memory_space<vmem>>, vector<24x8xf32>
    tpu.vector_store %arg19[%c152, %c0_2], %2 {strides = array<i32>} : memref<176x8xf32, #tpu.memory_space<vmem>>, vector<24x8xf32>,
    %c0_3 = arith.constant 0 : index
    %c0_4 = arith.constant 0 : index
    %4 = vector.load %arg3[%c0_3, %c0_4] : memref<128x1xf32, #tpu.memory_space<vmem>>, vector<128x1xf32>
    %c0_5 = arith.constant 0 : index
    %c0_6 = arith.constant 0 : index
    %c0_7 = arith.constant 0 : index
    %5 = vector.load %arg1[%c0_5, %c0_6, %c0_7] : memref<1x128x16xbf16, #tpu.memory_space<vmem>>, vector<1x128x16xbf16>
    %6 = vector.shape_cast %5 : vector<1x128x16xbf16> to vector<128x16xbf16>
    %c0_8 = arith.constant 0 : index
    %c0_9 = arith.constant 0 : index
    %7 = vector.load %arg4[%c0_8, %c0_9] : memref<16x4xbf16, #tpu.memory_space<vmem>>, vector<16x4xbf16>
    %cst_10 = arith.constant dense<0.000000e+00> : vector<128x4xf32>
    %8 = tpu.matmul %6, %7, %cst_10 {dimension_numbers = #tpu.dot_dimension_numbers<[1], [0], [0], [1], [0, 0, 1, 1], [], []>} : vector<128x16xbf16>, vector<16x4xbf16>, vector<128x4xf32> -> vector<128x4xf32>
    %c0_11 = arith.constant 0 : index
    %c0_12 = arith.constant 0 : index
    %9 = vector.load %arg5[%c0_11, %c0_12] : memref<1x4xf32, #tpu.memory_space<vmem>>, vector<1x4xf32>
    %10 = vector.broadcast %9 : vector<1x4xf32> to vector<128x4xf32>
    %11 = arith.addf %8, %10 : vector<128x4xf32>
    %12 = vector.broadcast %4 : vector<128x1xf32> to vector<128x4xf32>
    %13 = arith.mulf %11, %12 : vector<128x4xf32>
    %c24 = arith.constant 24 : index
    %c0_13 = arith.constant 0 : index
    %14 = vector.load %arg19[%c24, %c0_13] : memref<176x8xf32, #tpu.memory_space<vmem>>, vector<128x4xf32>
    tpu.vector_store %arg19[%c24, %c0_13], %13 {strides = array<i32>} : memref<176x8xf32, #tpu.memory_space<vmem>>, vector<128x4xf32>,
    %c7 = arith.constant 7 : index
    %c0_14 = arith.constant 0 : index
    %15 = vector.load %arg19[%c7, %c0_14] : memref<176x8xf32, #tpu.memory_space<vmem>>, vector<128x4xf32>
    %16 = arith.truncf %15 : vector<128x4xf32> to vector<128x4xbf16>
    %c0_15 = arith.constant 0 : index
    %c0_16 = arith.constant 0 : index
    %17 = vector.load %arg20[%c0_15, %c0_16] : memref<128x72xbf16, #tpu.memory_space<vmem>>, vector<128x4xbf16>
    tpu.vector_store %arg20[%c0_15, %c0_16], %16 {strides = array<i32>} : memref<128x72xbf16, #tpu.memory_space<vmem>>, vector<128x4xbf16>,
    %c8 = arith.constant 8 : index
    %c0_17 = arith.constant 0 : index
    %18 = vector.load %arg19[%c8, %c0_17] : memref<176x8xf32, #tpu.memory_space<vmem>>, vector<128x4xf32>
    %19 = arith.truncf %18 : vector<128x4xf32> to vector<128x4xbf16>
    %c0_18 = arith.constant 0 : index
    %c4 = arith.constant 4 : index
    %20 = vector.load %arg20[%c0_18, %c4] : memref<128x72xbf16, #tpu.memory_space<vmem>>, vector<128x4xbf16>
    tpu.vector_store %arg20[%c0_18, %c4], %19 {strides = array<i32>} : memref<128x72xbf16, #tpu.memory_space<vmem>>, vector<128x4xbf16>,
    %c9 = arith.constant 9 : index
    %c0_19 = arith.constant 0 : index
    %21 = vector.load %arg19[%c9, %c0_19] : memref<176x8xf32, #tpu.memory_space<vmem>>, vector<128x4xf32>
    %22 = arith.truncf %21 : vector<128x4xf32> to vector<128x4xbf16>
    %c0_20 = arith.constant 0 : index
    %c8_21 = arith.constant 8 : index
    %23 = vector.load %arg20[%c0_20, %c8_21] : memref<128x72xbf16, #tpu.memory_space<vmem>>, vector<128x4xbf16>
    tpu.vector_store %arg20[%c0_20, %c8_21], %22 {strides = array<i32>} : memref<128x72xbf16, #tpu.memory_space<vmem>>, vector<128x4xbf16>,
    %c23 = arith.constant 23 : index
    %c0_22 = arith.constant 0 : index
    %24 = vector.load %arg19[%c23, %c0_22] : memref<176x8xf32, #tpu.memory_space<vmem>>, vector<128x4xf32>
    %25 = arith.truncf %24 : vector<128x4xf32> to vector<128x4xbf16>
    %c0_23 = arith.constant 0 : index
    %c12 = arith.constant 12 : index
    %26 = vector.load %arg20[%c0_23, %c12] : memref<128x72xbf16, #tpu.memory_space<vmem>>, vector<128x4xbf16>
    tpu.vector_store %arg20[%c0_23, %c12], %25 {strides = array<i32>} : memref<128x72xbf16, #tpu.memory_space<vmem>>, vector<128x4xbf16>,
    %c24_24 = arith.constant 24 : index
    %c0_25 = arith.constant 0 : index
    %27 = vector.load %arg19[%c24_24, %c0_25] : memref<176x8xf32, #tpu.memory_space<vmem>>, vector<128x4xf32>
    %28 = arith.truncf %27 : vector<128x4xf32> to vector<128x4xbf16>
    %c0_26 = arith.constant 0 : index
    %c16 = arith.constant 16 : index
    %29 = vector.load %arg20[%c0_26, %c16] : memref<128x72xbf16, #tpu.memory_space<vmem>>, vector<128x4xbf16>
    tpu.vector_store %arg20[%c0_26, %c16], %28 {strides = array<i32>} : memref<128x72xbf16, #tpu.memory_space<vmem>>, vector<128x4xbf16>,
    %c25 = arith.constant 25 : index
    %c0_27 = arith.constant 0 : index
    %30 = vector.load %arg19[%c25, %c0_27] : memref<176x8xf32, #tpu.memory_space<vmem>>, vector<128x4xf32>
    %31 = arith.truncf %30 : vector<128x4xf32> to vector<128x4xbf16>
    %c0_28 = arith.constant 0 : index
    %c20 = arith.constant 20 : index
    %32 = vector.load %arg20[%c0_28, %c20] : memref<128x72xbf16, #tpu.memory_space<vmem>>, vector<128x4xbf16>
    tpu.vector_store %arg20[%c0_28, %c20], %31 {strides = array<i32>} : memref<128x72xbf16, #tpu.memory_space<vmem>>, vector<128x4xbf16>,
    %c39 = arith.constant 39 : index
    %c0_29 = arith.constant 0 : index
    %33 = vector.load %arg19[%c39, %c0_29] : memref<176x8xf32, #tpu.memory_space<vmem>>, vector<128x4xf32>
    %34 = arith.truncf %33 : vector<128x4xf32> to vector<128x4xbf16>
    %c0_30 = arith.constant 0 : index
    %c24_31 = arith.constant 24 : index
    %35 = vector.load %arg20[%c0_30, %c24_31] : memref<128x72xbf16, #tpu.memory_space<vmem>>, vector<128x4xbf16>
    tpu.vector_store %arg20[%c0_30, %c24_31], %34 {strides = array<i32>} : memref<128x72xbf16, #tpu.memory_space<vmem>>, vector<128x4xbf16>,
    %c40 = arith.constant 40 : index
    %c0_32 = arith.constant 0 : index
    %36 = vector.load %arg19[%c40, %c0_32] : memref<176x8xf32, #tpu.memory_space<vmem>>, vector<128x4xf32>
    %37 = arith.truncf %36 : vector<128x4xf32> to vector<128x4xbf16>
    %c0_33 = arith.constant 0 : index
    %c28 = arith.constant 28 : index
    %38 = vector.load %arg20[%c0_33, %c28] : memref<128x72xbf16, #tpu.memory_space<vmem>>, vector<128x4xbf16>
    tpu.vector_store %arg20[%c0_33, %c28], %37 {strides = array<i32>} : memref<128x72xbf16, #tpu.memory_space<vmem>>, vector<128x4xbf16>,
    %c41 = arith.constant 41 : index
    %c0_34 = arith.constant 0 : index
    %39 = vector.load %arg19[%c41, %c0_34] : memref<176x8xf32, #tpu.memory_space<vmem>>, vector<128x4xf32>
    %40 = arith.truncf %39 : vector<128x4xf32> to vector<128x4xbf16>
    %c0_35 = arith.constant 0 : index
    %c32 = arith.constant 32 : index
    %41 = vector.load %arg20[%c0_35, %c32] : memref<128x72xbf16, #tpu.memory_space<vmem>>, vector<128x4xbf16>
    tpu.vector_store %arg20[%c0_35, %c32], %40 {strides = array<i32>} : memref<128x72xbf16, #tpu.memory_space<vmem>>, vector<128x4xbf16>,
    %c0_36 = arith.constant 0 : index
    %c0_37 = arith.constant 0 : index
    %42 = vector.load %arg20[%c0_36, %c0_37] : memref<128x72xbf16, #tpu.memory_space<vmem>>, vector<128x36xbf16>
    %c0_38 = arith.constant 0 : index
    %c0_39 = arith.constant 0 : index
    %43 = vector.load %arg6[%c0_38, %c0_39] : memref<36x4xbf16, #tpu.memory_space<vmem>>, vector<36x4xbf16>
    %cst_40 = arith.constant dense<0.000000e+00> : vector<128x4xf32>
    %44 = tpu.matmul %42, %43, %cst_40 {dimension_numbers = #tpu.dot_dimension_numbers<[1], [0], [0], [1], [0, 0, 1, 1], [], []>} : vector<128x36xbf16>, vector<36x4xbf16>, vector<128x4xf32> -> vector<128x4xf32>
    %45 = vector.broadcast %4 : vector<128x1xf32> to vector<128x4xf32>
    %46 = arith.mulf %44, %45 : vector<128x4xf32>
    %c0_41 = arith.constant 0 : index
    %c0_42 = arith.constant 0 : index
    %47 = vector.load %arg7[%c0_41, %c0_42] : memref<1x4xf32, #tpu.memory_space<vmem>>, vector<1x4xf32>
    %c0_43 = arith.constant 0 : index
    %c0_44 = arith.constant 0 : index
    %48 = vector.load %arg8[%c0_43, %c0_44] : memref<1x4xf32, #tpu.memory_space<vmem>>, vector<1x4xf32>
    %49 = vector.shape_cast %46 : vector<128x4xf32> to vector<1x128x4xf32>
    %cst_45 = arith.constant dense<0.000000e+00> : vector<1xf32>
    %50 = vector.multi_reduction <add>, %49, %cst_45 [1, 2] : vector<1x128x4xf32> to vector<1xf32>
    %51 = vector.shape_cast %50 : vector<1xf32> to vector<1x1x1xf32>
    %52 = vector.extract %51[0, 0, 0] : f32 from vector<1x1x1xf32>
    %53 = arith.mulf %46, %46 : vector<128x4xf32>
    %54 = vector.shape_cast %53 : vector<128x4xf32> to vector<1x128x4xf32>
    %cst_46 = arith.constant dense<0.000000e+00> : vector<1xf32>
    %55 = vector.multi_reduction <add>, %54, %cst_46 [1, 2] : vector<1x128x4xf32> to vector<1xf32>
    %56 = vector.shape_cast %55 : vector<1xf32> to vector<1x1x1xf32>
    %57 = vector.extract %56[0, 0, 0] : f32 from vector<1x1x1xf32>
    %cst_47 = arith.constant 3.906250e-03 : f32
    %58 = arith.mulf %52, %cst_47 : f32
    %cst_48 = arith.constant 3.906250e-03 : f32
    %59 = arith.mulf %57, %cst_48 : f32
    %60 = arith.mulf %58, %58 : f32
    %61 = arith.subf %59, %60 : f32
    %cst_49 = arith.constant 0.000000e+00 : f32
    %62 = arith.maximumf %61, %cst_49 : f32
    %63 = vector.broadcast %58 : f32 to vector<128x4xf32>
    %64 = arith.subf %46, %63 : vector<128x4xf32>
    %cst_50 = arith.constant 9.99999974E-6 : f32
    %65 = arith.addf %62, %cst_50 : f32
    %66 = math.rsqrt %65 : f32
    %67 = vector.broadcast %66 : f32 to vector<128x4xf32>
    %68 = arith.mulf %64, %67 : vector<128x4xf32>
    %69 = vector.broadcast %47 : vector<1x4xf32> to vector<128x4xf32>
    %70 = arith.mulf %68, %69 : vector<128x4xf32>
    %71 = vector.broadcast %48 : vector<1x4xf32> to vector<128x4xf32>
    %72 = arith.addf %70, %71 : vector<128x4xf32>
    %cst_51 = arith.constant 5.000000e-01 : f32
    %73 = vector.broadcast %cst_51 : f32 to vector<128x4xf32>
    %74 = arith.mulf %73, %72 : vector<128x4xf32>
    %cst_52 = arith.constant 0.707106769 : f32
    %75 = vector.broadcast %cst_52 : f32 to vector<128x4xf32>
    %76 = arith.mulf %72, %75 : vector<128x4xf32>
    %77 = math.absf %76 : vector<128x4xf32>
    %cst_53 = arith.constant 0.327591091 : f32
    %78 = vector.broadcast %cst_53 : f32 to vector<128x4xf32>
    %79 = arith.mulf %78, %77 : vector<128x4xf32>
    %cst_54 = arith.constant 1.000000e+00 : f32
    %80 = vector.broadcast %cst_54 : f32 to vector<128x4xf32>
    %81 = arith.addf %80, %79 : vector<128x4xf32>
    %82 = tpu.reciprocal %81 {approx = true} : vector<128x4xf32> -> vector<128x4xf32>
    %cst_55 = arith.constant 1.06140542 : f32
    %83 = vector.broadcast %cst_55 : f32 to vector<128x4xf32>
    %84 = arith.mulf %83, %82 : vector<128x4xf32>
    %cst_56 = arith.constant -1.45315206 : f32
    %85 = vector.broadcast %cst_56 : f32 to vector<128x4xf32>
    %86 = arith.addf %84, %85 : vector<128x4xf32>
    %87 = arith.mulf %86, %82 : vector<128x4xf32>
    %cst_57 = arith.constant 1.42141378 : f32
    %88 = vector.broadcast %cst_57 : f32 to vector<128x4xf32>
    %89 = arith.addf %87, %88 : vector<128x4xf32>
    %90 = arith.mulf %89, %82 : vector<128x4xf32>
    %cst_58 = arith.constant -0.284496725 : f32
    %91 = vector.broadcast %cst_58 : f32 to vector<128x4xf32>
    %92 = arith.addf %90, %91 : vector<128x4xf32>
    %93 = arith.mulf %92, %82 : vector<128x4xf32>
    %cst_59 = arith.constant 0.254829586 : f32
    %94 = vector.broadcast %cst_59 : f32 to vector<128x4xf32>
    %95 = arith.addf %93, %94 : vector<128x4xf32>
    %96 = arith.mulf %95, %82 : vector<128x4xf32>
    %cst_60 = arith.constant 0.000000e+00 : f32
    %97 = vector.broadcast %cst_60 : f32 to vector<128x4xf32>
    %98 = arith.subf %97, %77 : vector<128x4xf32>
    %99 = arith.mulf %98, %77 : vector<128x4xf32>
    %100 = math.exp %99 : vector<128x4xf32>
    %101 = arith.mulf %96, %100 : vector<128x4xf32>
    %cst_61 = arith.constant 1.000000e+00 : f32
    %102 = vector.broadcast %cst_61 : f32 to vector<128x4xf32>
    %103 = arith.subf %102, %101 : vector<128x4xf32>
    %cst_62 = arith.constant 0.000000e+00 : f32
    %104 = vector.broadcast %cst_62 : f32 to vector<128x4xf32>
    %105 = arith.cmpf olt, %76, %104 : vector<128x4xf32>
    %cst_63 = arith.constant 0.000000e+00 : f32
    %106 = vector.broadcast %cst_63 : f32 to vector<128x4xf32>
    %107 = arith.subf %106, %103 : vector<128x4xf32>
    %108 = arith.select %105, %107, %103 : vector<128x4xi1>, vector<128x4xf32>
    %cst_64 = arith.constant 1.000000e+00 : f32
    %109 = vector.broadcast %cst_64 : f32 to vector<128x4xf32>
    %110 = arith.addf %109, %108 : vector<128x4xf32>
    %111 = arith.mulf %74, %110 : vector<128x4xf32>
    %112 = vector.broadcast %4 : vector<128x1xf32> to vector<128x4xf32>
    %113 = arith.mulf %111, %112 : vector<128x4xf32>
    %c24_65 = arith.constant 24 : index
    %c0_66 = arith.constant 0 : index
    %114 = vector.load %arg19[%c24_65, %c0_66] : memref<176x8xf32, #tpu.memory_space<vmem>>, vector<128x4xf32>
    tpu.vector_store %arg19[%c24_65, %c0_66], %113 {strides = array<i32>} : memref<176x8xf32, #tpu.memory_space<vmem>>, vector<128x4xf32>,
    %c7_67 = arith.constant 7 : index
    %c0_68 = arith.constant 0 : index
    %115 = vector.load %arg19[%c7_67, %c0_68] : memref<176x8xf32, #tpu.memory_space<vmem>>, vector<128x4xf32>
    %116 = arith.truncf %115 : vector<128x4xf32> to vector<128x4xbf16>
    %c0_69 = arith.constant 0 : index
    %c0_70 = arith.constant 0 : index
    %117 = vector.load %arg20[%c0_69, %c0_70] : memref<128x72xbf16, #tpu.memory_space<vmem>>, vector<128x4xbf16>
    tpu.vector_store %arg20[%c0_69, %c0_70], %116 {strides = array<i32>} : memref<128x72xbf16, #tpu.memory_space<vmem>>, vector<128x4xbf16>,
    %c8_71 = arith.constant 8 : index
    %c0_72 = arith.constant 0 : index
    %118 = vector.load %arg19[%c8_71, %c0_72] : memref<176x8xf32, #tpu.memory_space<vmem>>, vector<128x4xf32>
    %119 = arith.truncf %118 : vector<128x4xf32> to vector<128x4xbf16>
    %c0_73 = arith.constant 0 : index
    %c4_74 = arith.constant 4 : index
    %120 = vector.load %arg20[%c0_73, %c4_74] : memref<128x72xbf16, #tpu.memory_space<vmem>>, vector<128x4xbf16>
    tpu.vector_store %arg20[%c0_73, %c4_74], %119 {strides = array<i32>} : memref<128x72xbf16, #tpu.memory_space<vmem>>, vector<128x4xbf16>,
    %c9_75 = arith.constant 9 : index
    %c0_76 = arith.constant 0 : index
    %121 = vector.load %arg19[%c9_75, %c0_76] : memref<176x8xf32, #tpu.memory_space<vmem>>, vector<128x4xf32>
    %122 = arith.truncf %121 : vector<128x4xf32> to vector<128x4xbf16>
    %c0_77 = arith.constant 0 : index
    %c8_78 = arith.constant 8 : index
    %123 = vector.load %arg20[%c0_77, %c8_78] : memref<128x72xbf16, #tpu.memory_space<vmem>>, vector<128x4xbf16>
    tpu.vector_store %arg20[%c0_77, %c8_78], %122 {strides = array<i32>} : memref<128x72xbf16, #tpu.memory_space<vmem>>, vector<128x4xbf16>,
    %c23_79 = arith.constant 23 : index
    %c0_80 = arith.constant 0 : index
    %124 = vector.load %arg19[%c23_79, %c0_80] : memref<176x8xf32, #tpu.memory_space<vmem>>, vector<128x4xf32>
    %125 = arith.truncf %124 : vector<128x4xf32> to vector<128x4xbf16>
    %c0_81 = arith.constant 0 : index
    %c12_82 = arith.constant 12 : index
    %126 = vector.load %arg20[%c0_81, %c12_82] : memref<128x72xbf16, #tpu.memory_space<vmem>>, vector<128x4xbf16>
    tpu.vector_store %arg20[%c0_81, %c12_82], %125 {strides = array<i32>} : memref<128x72xbf16, #tpu.memory_space<vmem>>, vector<128x4xbf16>,
    %c24_83 = arith.constant 24 : index
    %c0_84 = arith.constant 0 : index
    %127 = vector.load %arg19[%c24_83, %c0_84] : memref<176x8xf32, #tpu.memory_space<vmem>>, vector<128x4xf32>
    %128 = arith.truncf %127 : vector<128x4xf32> to vector<128x4xbf16>
    %c0_85 = arith.constant 0 : index
    %c16_86 = arith.constant 16 : index
    %129 = vector.load %arg20[%c0_85, %c16_86] : memref<128x72xbf16, #tpu.memory_space<vmem>>, vector<128x4xbf16>
    tpu.vector_store %arg20[%c0_85, %c16_86], %128 {strides = array<i32>} : memref<128x72xbf16, #tpu.memory_space<vmem>>, vector<128x4xbf16>,
    %c25_87 = arith.constant 25 : index
    %c0_88 = arith.constant 0 : index
    %130 = vector.load %arg19[%c25_87, %c0_88] : memref<176x8xf32, #tpu.memory_space<vmem>>, vector<128x4xf32>
    %131 = arith.truncf %130 : vector<128x4xf32> to vector<128x4xbf16>
    %c0_89 = arith.constant 0 : index
    %c20_90 = arith.constant 20 : index
    %132 = vector.load %arg20[%c0_89, %c20_90] : memref<128x72xbf16, #tpu.memory_space<vmem>>, vector<128x4xbf16>
    tpu.vector_store %arg20[%c0_89, %c20_90], %131 {strides = array<i32>} : memref<128x72xbf16, #tpu.memory_space<vmem>>, vector<128x4xbf16>,
    %c39_91 = arith.constant 39 : index
    %c0_92 = arith.constant 0 : index
    %133 = vector.load %arg19[%c39_91, %c0_92] : memref<176x8xf32, #tpu.memory_space<vmem>>, vector<128x4xf32>
    %134 = arith.truncf %133 : vector<128x4xf32> to vector<128x4xbf16>
    %c0_93 = arith.constant 0 : index
    %c24_94 = arith.constant 24 : index
    %135 = vector.load %arg20[%c0_93, %c24_94] : memref<128x72xbf16, #tpu.memory_space<vmem>>, vector<128x4xbf16>
    tpu.vector_store %arg20[%c0_93, %c24_94], %134 {strides = array<i32>} : memref<128x72xbf16, #tpu.memory_space<vmem>>, vector<128x4xbf16>,
    %c40_95 = arith.constant 40 : index
    %c0_96 = arith.constant 0 : index
    %136 = vector.load %arg19[%c40_95, %c0_96] : memref<176x8xf32, #tpu.memory_space<vmem>>, vector<128x4xf32>
    %137 = arith.truncf %136 : vector<128x4xf32> to vector<128x4xbf16>
    %c0_97 = arith.constant 0 : index
    %c28_98 = arith.constant 28 : index
    %138 = vector.load %arg20[%c0_97, %c28_98] : memref<128x72xbf16, #tpu.memory_space<vmem>>, vector<128x4xbf16>
    tpu.vector_store %arg20[%c0_97, %c28_98], %137 {strides = array<i32>} : memref<128x72xbf16, #tpu.memory_space<vmem>>, vector<128x4xbf16>,
    %c41_99 = arith.constant 41 : index
    %c0_100 = arith.constant 0 : index
    %139 = vector.load %arg19[%c41_99, %c0_100] : memref<176x8xf32, #tpu.memory_space<vmem>>, vector<128x4xf32>
    %140 = arith.truncf %139 : vector<128x4xf32> to vector<128x4xbf16>
    %c0_101 = arith.constant 0 : index
    %c32_102 = arith.constant 32 : index
    %141 = vector.load %arg20[%c0_101, %c32_102] : memref<128x72xbf16, #tpu.memory_space<vmem>>, vector<128x4xbf16>
    tpu.vector_store %arg20[%c0_101, %c32_102], %140 {strides = array<i32>} : memref<128x72xbf16, #tpu.memory_space<vmem>>, vector<128x4xbf16>,
    %c0_103 = arith.constant 0 : index
    %c0_104 = arith.constant 0 : index
    %142 = vector.load %arg20[%c0_103, %c0_104] : memref<128x72xbf16, #tpu.memory_space<vmem>>, vector<128x36xbf16>
    %c0_105 = arith.constant 0 : index
    %c0_106 = arith.constant 0 : index
    %143 = vector.load %arg9[%c0_105, %c0_106] : memref<36x4xbf16, #tpu.memory_space<vmem>>, vector<36x4xbf16>
    %cst_107 = arith.constant dense<0.000000e+00> : vector<128x4xf32>
    %144 = tpu.matmul %142, %143, %cst_107 {dimension_numbers = #tpu.dot_dimension_numbers<[1], [0], [0], [1], [0, 0, 1, 1], [], []>} : vector<128x36xbf16>, vector<36x4xbf16>, vector<128x4xf32> -> vector<128x4xf32>
    %145 = vector.broadcast %4 : vector<128x1xf32> to vector<128x4xf32>
    %146 = arith.mulf %144, %145 : vector<128x4xf32>
    %c0_108 = arith.constant 0 : index
    %c0_109 = arith.constant 0 : index
    %147 = vector.load %arg10[%c0_108, %c0_109] : memref<1x4xf32, #tpu.memory_space<vmem>>, vector<1x4xf32>
    %c0_110 = arith.constant 0 : index
    %c0_111 = arith.constant 0 : index
    %148 = vector.load %arg11[%c0_110, %c0_111] : memref<1x4xf32, #tpu.memory_space<vmem>>, vector<1x4xf32>
    %149 = vector.shape_cast %146 : vector<128x4xf32> to vector<1x128x4xf32>
    %cst_112 = arith.constant dense<0.000000e+00> : vector<1xf32>
    %150 = vector.multi_reduction <add>, %149, %cst_112 [1, 2] : vector<1x128x4xf32> to vector<1xf32>
    %151 = vector.shape_cast %150 : vector<1xf32> to vector<1x1x1xf32>
    %152 = vector.extract %151[0, 0, 0] : f32 from vector<1x1x1xf32>
    %153 = arith.mulf %146, %146 : vector<128x4xf32>
    %154 = vector.shape_cast %153 : vector<128x4xf32> to vector<1x128x4xf32>
    %cst_113 = arith.constant dense<0.000000e+00> : vector<1xf32>
    %155 = vector.multi_reduction <add>, %154, %cst_113 [1, 2] : vector<1x128x4xf32> to vector<1xf32>
    %156 = vector.shape_cast %155 : vector<1xf32> to vector<1x1x1xf32>
    %157 = vector.extract %156[0, 0, 0] : f32 from vector<1x1x1xf32>
    %cst_114 = arith.constant 3.906250e-03 : f32
    %158 = arith.mulf %152, %cst_114 : f32
    %cst_115 = arith.constant 3.906250e-03 : f32
    %159 = arith.mulf %157, %cst_115 : f32
    %160 = arith.mulf %158, %158 : f32
    %161 = arith.subf %159, %160 : f32
    %cst_116 = arith.constant 0.000000e+00 : f32
    %162 = arith.maximumf %161, %cst_116 : f32
    %163 = vector.broadcast %158 : f32 to vector<128x4xf32>
    %164 = arith.subf %146, %163 : vector<128x4xf32>
    %cst_117 = arith.constant 9.99999974E-6 : f32
    %165 = arith.addf %162, %cst_117 : f32
    %166 = math.rsqrt %165 : f32
    %167 = vector.broadcast %166 : f32 to vector<128x4xf32>
    %168 = arith.mulf %164, %167 : vector<128x4xf32>
    %169 = vector.broadcast %147 : vector<1x4xf32> to vector<128x4xf32>
    %170 = arith.mulf %168, %169 : vector<128x4xf32>
    %171 = vector.broadcast %148 : vector<1x4xf32> to vector<128x4xf32>
    %172 = arith.addf %170, %171 : vector<128x4xf32>
    %173 = arith.addf %11, %172 : vector<128x4xf32>
    %cst_118 = arith.constant 5.000000e-01 : f32
    %174 = vector.broadcast %cst_118 : f32 to vector<128x4xf32>
    %175 = arith.mulf %174, %173 : vector<128x4xf32>
    %cst_119 = arith.constant 0.707106769 : f32
    %176 = vector.broadcast %cst_119 : f32 to vector<128x4xf32>
    %177 = arith.mulf %173, %176 : vector<128x4xf32>
    %178 = math.absf %177 : vector<128x4xf32>
    %cst_120 = arith.constant 0.327591091 : f32
    %179 = vector.broadcast %cst_120 : f32 to vector<128x4xf32>
    %180 = arith.mulf %179, %178 : vector<128x4xf32>
    %cst_121 = arith.constant 1.000000e+00 : f32
    %181 = vector.broadcast %cst_121 : f32 to vector<128x4xf32>
    %182 = arith.addf %181, %180 : vector<128x4xf32>
    %183 = tpu.reciprocal %182 {approx = true} : vector<128x4xf32> -> vector<128x4xf32>
    %cst_122 = arith.constant 1.06140542 : f32
    %184 = vector.broadcast %cst_122 : f32 to vector<128x4xf32>
    %185 = arith.mulf %184, %183 : vector<128x4xf32>
    %cst_123 = arith.constant -1.45315206 : f32
    %186 = vector.broadcast %cst_123 : f32 to vector<128x4xf32>
    %187 = arith.addf %185, %186 : vector<128x4xf32>
    %188 = arith.mulf %187, %183 : vector<128x4xf32>
    %cst_124 = arith.constant 1.42141378 : f32
    %189 = vector.broadcast %cst_124 : f32 to vector<128x4xf32>
    %190 = arith.addf %188, %189 : vector<128x4xf32>
    %191 = arith.mulf %190, %183 : vector<128x4xf32>
    %cst_125 = arith.constant -0.284496725 : f32
    %192 = vector.broadcast %cst_125 : f32 to vector<128x4xf32>
    %193 = arith.addf %191, %192 : vector<128x4xf32>
    %194 = arith.mulf %193, %183 : vector<128x4xf32>
    %cst_126 = arith.constant 0.254829586 : f32
    %195 = vector.broadcast %cst_126 : f32 to vector<128x4xf32>
    %196 = arith.addf %194, %195 : vector<128x4xf32>
    %197 = arith.mulf %196, %183 : vector<128x4xf32>
    %cst_127 = arith.constant 0.000000e+00 : f32
    %198 = vector.broadcast %cst_127 : f32 to vector<128x4xf32>
    %199 = arith.subf %198, %178 : vector<128x4xf32>
    %200 = arith.mulf %199, %178 : vector<128x4xf32>
    %201 = math.exp %200 : vector<128x4xf32>
    %202 = arith.mulf %197, %201 : vector<128x4xf32>
    %cst_128 = arith.constant 1.000000e+00 : f32
    %203 = vector.broadcast %cst_128 : f32 to vector<128x4xf32>
    %204 = arith.subf %203, %202 : vector<128x4xf32>
    %cst_129 = arith.constant 0.000000e+00 : f32
    %205 = vector.broadcast %cst_129 : f32 to vector<128x4xf32>
    %206 = arith.cmpf olt, %177, %205 : vector<128x4xf32>
    %cst_130 = arith.constant 0.000000e+00 : f32
    %207 = vector.broadcast %cst_130 : f32 to vector<128x4xf32>
    %208 = arith.subf %207, %204 : vector<128x4xf32>
    %209 = arith.select %206, %208, %204 : vector<128x4xi1>, vector<128x4xf32>
    %cst_131 = arith.constant 1.000000e+00 : f32
    %210 = vector.broadcast %cst_131 : f32 to vector<128x4xf32>
    %211 = arith.addf %210, %209 : vector<128x4xf32>
    %212 = arith.mulf %175, %211 : vector<128x4xf32>
    %213 = vector.broadcast %4 : vector<128x1xf32> to vector<128x4xf32>
    %214 = arith.mulf %212, %213 : vector<128x4xf32>
    %c24_132 = arith.constant 24 : index
    %c0_133 = arith.constant 0 : index
    %215 = vector.load %arg19[%c24_132, %c0_133] : memref<176x8xf32, #tpu.memory_space<vmem>>, vector<128x4xf32>
    tpu.vector_store %arg19[%c24_132, %c0_133], %214 {strides = array<i32>} : memref<176x8xf32, #tpu.memory_space<vmem>>, vector<128x4xf32>,
    %c7_134 = arith.constant 7 : index
    %c0_135 = arith.constant 0 : index
    %216 = vector.load %arg19[%c7_134, %c0_135] : memref<176x8xf32, #tpu.memory_space<vmem>>, vector<128x4xf32>
    %217 = arith.truncf %216 : vector<128x4xf32> to vector<128x4xbf16>
    %c0_136 = arith.constant 0 : index
    %c0_137 = arith.constant 0 : index
    %218 = vector.load %arg20[%c0_136, %c0_137] : memref<128x72xbf16, #tpu.memory_space<vmem>>, vector<128x4xbf16>
    tpu.vector_store %arg20[%c0_136, %c0_137], %217 {strides = array<i32>} : memref<128x72xbf16, #tpu.memory_space<vmem>>, vector<128x4xbf16>,
    %c8_138 = arith.constant 8 : index
    %c0_139 = arith.constant 0 : index
    %219 = vector.load %arg19[%c8_138, %c0_139] : memref<176x8xf32, #tpu.memory_space<vmem>>, vector<128x4xf32>
    %220 = arith.truncf %219 : vector<128x4xf32> to vector<128x4xbf16>
    %c0_140 = arith.constant 0 : index
    %c4_141 = arith.constant 4 : index
    %221 = vector.load %arg20[%c0_140, %c4_141] : memref<128x72xbf16, #tpu.memory_space<vmem>>, vector<128x4xbf16>
    tpu.vector_store %arg20[%c0_140, %c4_141], %220 {strides = array<i32>} : memref<128x72xbf16, #tpu.memory_space<vmem>>, vector<128x4xbf16>,
    %c9_142 = arith.constant 9 : index
    %c0_143 = arith.constant 0 : index
    %222 = vector.load %arg19[%c9_142, %c0_143] : memref<176x8xf32, #tpu.memory_space<vmem>>, vector<128x4xf32>
    %223 = arith.truncf %222 : vector<128x4xf32> to vector<128x4xbf16>
    %c0_144 = arith.constant 0 : index
    %c8_145 = arith.constant 8 : index
    %224 = vector.load %arg20[%c0_144, %c8_145] : memref<128x72xbf16, #tpu.memory_space<vmem>>, vector<128x4xbf16>
    tpu.vector_store %arg20[%c0_144, %c8_145], %223 {strides = array<i32>} : memref<128x72xbf16, #tpu.memory_space<vmem>>, vector<128x4xbf16>,
    %c23_146 = arith.constant 23 : index
    %c0_147 = arith.constant 0 : index
    %225 = vector.load %arg19[%c23_146, %c0_147] : memref<176x8xf32, #tpu.memory_space<vmem>>, vector<128x4xf32>
    %226 = arith.truncf %225 : vector<128x4xf32> to vector<128x4xbf16>
    %c0_148 = arith.constant 0 : index
    %c12_149 = arith.constant 12 : index
    %227 = vector.load %arg20[%c0_148, %c12_149] : memref<128x72xbf16, #tpu.memory_space<vmem>>, vector<128x4xbf16>
    tpu.vector_store %arg20[%c0_148, %c12_149], %226 {strides = array<i32>} : memref<128x72xbf16, #tpu.memory_space<vmem>>, vector<128x4xbf16>,
    %c24_150 = arith.constant 24 : index
    %c0_151 = arith.constant 0 : index
    %228 = vector.load %arg19[%c24_150, %c0_151] : memref<176x8xf32, #tpu.memory_space<vmem>>, vector<128x4xf32>
    %229 = arith.truncf %228 : vector<128x4xf32> to vector<128x4xbf16>
    %c0_152 = arith.constant 0 : index
    %c16_153 = arith.constant 16 : index
    %230 = vector.load %arg20[%c0_152, %c16_153] : memref<128x72xbf16, #tpu.memory_space<vmem>>, vector<128x4xbf16>
    tpu.vector_store %arg20[%c0_152, %c16_153], %229 {strides = array<i32>} : memref<128x72xbf16, #tpu.memory_space<vmem>>, vector<128x4xbf16>,
    %c25_154 = arith.constant 25 : index
    %c0_155 = arith.constant 0 : index
    %231 = vector.load %arg19[%c25_154, %c0_155] : memref<176x8xf32, #tpu.memory_space<vmem>>, vector<128x4xf32>
    %232 = arith.truncf %231 : vector<128x4xf32> to vector<128x4xbf16>
    %c0_156 = arith.constant 0 : index
    %c20_157 = arith.constant 20 : index
    %233 = vector.load %arg20[%c0_156, %c20_157] : memref<128x72xbf16, #tpu.memory_space<vmem>>, vector<128x4xbf16>
    tpu.vector_store %arg20[%c0_156, %c20_157], %232 {strides = array<i32>} : memref<128x72xbf16, #tpu.memory_space<vmem>>, vector<128x4xbf16>,
    %c39_158 = arith.constant 39 : index
    %c0_159 = arith.constant 0 : index
    %234 = vector.load %arg19[%c39_158, %c0_159] : memref<176x8xf32, #tpu.memory_space<vmem>>, vector<128x4xf32>
    %235 = arith.truncf %234 : vector<128x4xf32> to vector<128x4xbf16>
    %c0_160 = arith.constant 0 : index
    %c24_161 = arith.constant 24 : index
    %236 = vector.load %arg20[%c0_160, %c24_161] : memref<128x72xbf16, #tpu.memory_space<vmem>>, vector<128x4xbf16>
    tpu.vector_store %arg20[%c0_160, %c24_161], %235 {strides = array<i32>} : memref<128x72xbf16, #tpu.memory_space<vmem>>, vector<128x4xbf16>,
    %c40_162 = arith.constant 40 : index
    %c0_163 = arith.constant 0 : index
    %237 = vector.load %arg19[%c40_162, %c0_163] : memref<176x8xf32, #tpu.memory_space<vmem>>, vector<128x4xf32>
    %238 = arith.truncf %237 : vector<128x4xf32> to vector<128x4xbf16>
    %c0_164 = arith.constant 0 : index
    %c28_165 = arith.constant 28 : index
    %239 = vector.load %arg20[%c0_164, %c28_165] : memref<128x72xbf16, #tpu.memory_space<vmem>>, vector<128x4xbf16>
    tpu.vector_store %arg20[%c0_164, %c28_165], %238 {strides = array<i32>} : memref<128x72xbf16, #tpu.memory_space<vmem>>, vector<128x4xbf16>,
    %c41_166 = arith.constant 41 : index
    %c0_167 = arith.constant 0 : index
    %240 = vector.load %arg19[%c41_166, %c0_167] : memref<176x8xf32, #tpu.memory_space<vmem>>, vector<128x4xf32>
    %241 = arith.truncf %240 : vector<128x4xf32> to vector<128x4xbf16>
    %c0_168 = arith.constant 0 : index
    %c32_169 = arith.constant 32 : index
    %242 = vector.load %arg20[%c0_168, %c32_169] : memref<128x72xbf16, #tpu.memory_space<vmem>>, vector<128x4xbf16>
    tpu.vector_store %arg20[%c0_168, %c32_169], %241 {strides = array<i32>} : memref<128x72xbf16, #tpu.memory_space<vmem>>, vector<128x4xbf16>,
    %c0_170 = arith.constant 0 : index
    %c0_171 = arith.constant 0 : index
    %243 = vector.load %arg20[%c0_170, %c0_171] : memref<128x72xbf16, #tpu.memory_space<vmem>>, vector<128x36xbf16>
    %c0_172 = arith.constant 0 : index
    %c0_173 = arith.constant 0 : index
    %244 = vector.load %arg12[%c0_172, %c0_173] : memref<36x8xbf16, #tpu.memory_space<vmem>>, vector<36x8xbf16>
    %cst_174 = arith.constant dense<0.000000e+00> : vector<128x8xf32>
    %245 = tpu.matmul %243, %244, %cst_174 {dimension_numbers = #tpu.dot_dimension_numbers<[1], [0], [0], [1], [0, 0, 1, 1], [], []>} : vector<128x36xbf16>, vector<36x8xbf16>, vector<128x8xf32> -> vector<128x8xf32>
    %246 = vector.broadcast %4 : vector<128x1xf32> to vector<128x8xf32>
    %247 = arith.mulf %245, %246 : vector<128x8xf32>
    %c0_175 = arith.constant 0 : index
    %c0_176 = arith.constant 0 : index
    %248 = vector.load %arg13[%c0_175, %c0_176] : memref<1x8xf32, #tpu.memory_space<vmem>>, vector<1x8xf32>
    %c0_177 = arith.constant 0 : index
    %c0_178 = arith.constant 0 : index
    %249 = vector.load %arg14[%c0_177, %c0_178] : memref<1x8xf32, #tpu.memory_space<vmem>>, vector<1x8xf32>
    %250 = vector.shape_cast %247 : vector<128x8xf32> to vector<1x128x8xf32>
    %cst_179 = arith.constant dense<0.000000e+00> : vector<1xf32>
    %251 = vector.multi_reduction <add>, %250, %cst_179 [1, 2] : vector<1x128x8xf32> to vector<1xf32>
    %252 = vector.shape_cast %251 : vector<1xf32> to vector<1x1x1xf32>
    %253 = vector.extract %252[0, 0, 0] : f32 from vector<1x1x1xf32>
    %254 = arith.mulf %247, %247 : vector<128x8xf32>
    %255 = vector.shape_cast %254 : vector<128x8xf32> to vector<1x128x8xf32>
    %cst_180 = arith.constant dense<0.000000e+00> : vector<1xf32>
    %256 = vector.multi_reduction <add>, %255, %cst_180 [1, 2] : vector<1x128x8xf32> to vector<1xf32>
    %257 = vector.shape_cast %256 : vector<1xf32> to vector<1x1x1xf32>
    %258 = vector.extract %257[0, 0, 0] : f32 from vector<1x1x1xf32>
    %cst_181 = arith.constant 0.001953125 : f32
    %259 = arith.mulf %253, %cst_181 : f32
    %cst_182 = arith.constant 0.001953125 : f32
    %260 = arith.mulf %258, %cst_182 : f32
    %261 = arith.mulf %259, %259 : f32
    %262 = arith.subf %260, %261 : f32
    %cst_183 = arith.constant 0.000000e+00 : f32
    %263 = arith.maximumf %262, %cst_183 : f32
    %264 = vector.broadcast %259 : f32 to vector<128x8xf32>
    %265 = arith.subf %247, %264 : vector<128x8xf32>
    %cst_184 = arith.constant 9.99999974E-6 : f32
    %266 = arith.addf %263, %cst_184 : f32
    %267 = math.rsqrt %266 : f32
    %268 = vector.broadcast %267 : f32 to vector<128x8xf32>
    %269 = arith.mulf %265, %268 : vector<128x8xf32>
    %270 = vector.broadcast %248 : vector<1x8xf32> to vector<128x8xf32>
    %271 = arith.mulf %269, %270 : vector<128x8xf32>
    %272 = vector.broadcast %249 : vector<1x8xf32> to vector<128x8xf32>
    %273 = arith.addf %271, %272 : vector<128x8xf32>
    %cst_185 = arith.constant 5.000000e-01 : f32
    %274 = vector.broadcast %cst_185 : f32 to vector<128x8xf32>
    %275 = arith.mulf %274, %273 : vector<128x8xf32>
    %cst_186 = arith.constant 0.707106769 : f32
    %276 = vector.broadcast %cst_186 : f32 to vector<128x8xf32>
    %277 = arith.mulf %273, %276 : vector<128x8xf32>
    %278 = math.absf %277 : vector<128x8xf32>
    %cst_187 = arith.constant 0.327591091 : f32
    %279 = vector.broadcast %cst_187 : f32 to vector<128x8xf32>
    %280 = arith.mulf %279, %278 : vector<128x8xf32>
    %cst_188 = arith.constant 1.000000e+00 : f32
    %281 = vector.broadcast %cst_188 : f32 to vector<128x8xf32>
    %282 = arith.addf %281, %280 : vector<128x8xf32>
    %283 = tpu.reciprocal %282 {approx = true} : vector<128x8xf32> -> vector<128x8xf32>
    %cst_189 = arith.constant 1.06140542 : f32
    %284 = vector.broadcast %cst_189 : f32 to vector<128x8xf32>
    %285 = arith.mulf %284, %283 : vector<128x8xf32>
    %cst_190 = arith.constant -1.45315206 : f32
    %286 = vector.broadcast %cst_190 : f32 to vector<128x8xf32>
    %287 = arith.addf %285, %286 : vector<128x8xf32>
    %288 = arith.mulf %287, %283 : vector<128x8xf32>
    %cst_191 = arith.constant 1.42141378 : f32
    %289 = vector.broadcast %cst_191 : f32 to vector<128x8xf32>
    %290 = arith.addf %288, %289 : vector<128x8xf32>
    %291 = arith.mulf %290, %283 : vector<128x8xf32>
    %cst_192 = arith.constant -0.284496725 : f32
    %292 = vector.broadcast %cst_192 : f32 to vector<128x8xf32>
    %293 = arith.addf %291, %292 : vector<128x8xf32>
    %294 = arith.mulf %293, %283 : vector<128x8xf32>
    %cst_193 = arith.constant 0.254829586 : f32
    %295 = vector.broadcast %cst_193 : f32 to vector<128x8xf32>
    %296 = arith.addf %294, %295 : vector<128x8xf32>
    %297 = arith.mulf %296, %283 : vector<128x8xf32>
    %cst_194 = arith.constant 0.000000e+00 : f32
    %298 = vector.broadcast %cst_194 : f32 to vector<128x8xf32>
    %299 = arith.subf %298, %278 : vector<128x8xf32>
    %300 = arith.mulf %299, %278 : vector<128x8xf32>
    %301 = math.exp %300 : vector<128x8xf32>
    %302 = arith.mulf %297, %301 : vector<128x8xf32>
    %cst_195 = arith.constant 1.000000e+00 : f32
    %303 = vector.broadcast %cst_195 : f32 to vector<128x8xf32>
    %304 = arith.subf %303, %302 : vector<128x8xf32>
    %cst_196 = arith.constant 0.000000e+00 : f32
    %305 = vector.broadcast %cst_196 : f32 to vector<128x8xf32>
    %306 = arith.cmpf olt, %277, %305 : vector<128x8xf32>
    %cst_197 = arith.constant 0.000000e+00 : f32
    %307 = vector.broadcast %cst_197 : f32 to vector<128x8xf32>
    %308 = arith.subf %307, %304 : vector<128x8xf32>
    %309 = arith.select %306, %308, %304 : vector<128x8xi1>, vector<128x8xf32>
    %cst_198 = arith.constant 1.000000e+00 : f32
    %310 = vector.broadcast %cst_198 : f32 to vector<128x8xf32>
    %311 = arith.addf %310, %309 : vector<128x8xf32>
    %312 = arith.mulf %275, %311 : vector<128x8xf32>
    %313 = vector.broadcast %4 : vector<128x1xf32> to vector<128x8xf32>
    %314 = arith.mulf %312, %313 : vector<128x8xf32>
    %c24_199 = arith.constant 24 : index
    %c0_200 = arith.constant 0 : index
    %315 = vector.load %arg19[%c24_199, %c0_200] : memref<176x8xf32, #tpu.memory_space<vmem>>, vector<128x8xf32>
    tpu.vector_store %arg19[%c24_199, %c0_200], %314 {strides = array<i32>} : memref<176x8xf32, #tpu.memory_space<vmem>>, vector<128x8xf32>,
    %c7_201 = arith.constant 7 : index
    %c0_202 = arith.constant 0 : index
    %316 = vector.load %arg19[%c7_201, %c0_202] : memref<176x8xf32, #tpu.memory_space<vmem>>, vector<128x8xf32>
    %317 = arith.truncf %316 : vector<128x8xf32> to vector<128x8xbf16>
    %c0_203 = arith.constant 0 : index
    %c0_204 = arith.constant 0 : index
    %318 = vector.load %arg20[%c0_203, %c0_204] : memref<128x72xbf16, #tpu.memory_space<vmem>>, vector<128x8xbf16>
    tpu.vector_store %arg20[%c0_203, %c0_204], %317 {strides = array<i32>} : memref<128x72xbf16, #tpu.memory_space<vmem>>, vector<128x8xbf16>,
    %c8_205 = arith.constant 8 : index
    %c0_206 = arith.constant 0 : index
    %319 = vector.load %arg19[%c8_205, %c0_206] : memref<176x8xf32, #tpu.memory_space<vmem>>, vector<128x8xf32>
    %320 = arith.truncf %319 : vector<128x8xf32> to vector<128x8xbf16>
    %c0_207 = arith.constant 0 : index
    %c8_208 = arith.constant 8 : index
    %321 = vector.load %arg20[%c0_207, %c8_208] : memref<128x72xbf16, #tpu.memory_space<vmem>>, vector<128x8xbf16>
    tpu.vector_store %arg20[%c0_207, %c8_208], %320 {strides = array<i32>} : memref<128x72xbf16, #tpu.memory_space<vmem>>, vector<128x8xbf16>,
    %c9_209 = arith.constant 9 : index
    %c0_210 = arith.constant 0 : index
    %322 = vector.load %arg19[%c9_209, %c0_210] : memref<176x8xf32, #tpu.memory_space<vmem>>, vector<128x8xf32>
    %323 = arith.truncf %322 : vector<128x8xf32> to vector<128x8xbf16>
    %c0_211 = arith.constant 0 : index
    %c16_212 = arith.constant 16 : index
    %324 = vector.load %arg20[%c0_211, %c16_212] : memref<128x72xbf16, #tpu.memory_space<vmem>>, vector<128x8xbf16>
    tpu.vector_store %arg20[%c0_211, %c16_212], %323 {strides = array<i32>} : memref<128x72xbf16, #tpu.memory_space<vmem>>, vector<128x8xbf16>,
    %c23_213 = arith.constant 23 : index
    %c0_214 = arith.constant 0 : index
    %325 = vector.load %arg19[%c23_213, %c0_214] : memref<176x8xf32, #tpu.memory_space<vmem>>, vector<128x8xf32>
    %326 = arith.truncf %325 : vector<128x8xf32> to vector<128x8xbf16>
    %c0_215 = arith.constant 0 : index
    %c24_216 = arith.constant 24 : index
    %327 = vector.load %arg20[%c0_215, %c24_216] : memref<128x72xbf16, #tpu.memory_space<vmem>>, vector<128x8xbf16>
    tpu.vector_store %arg20[%c0_215, %c24_216], %326 {strides = array<i32>} : memref<128x72xbf16, #tpu.memory_space<vmem>>, vector<128x8xbf16>,
    %c24_217 = arith.constant 24 : index
    %c0_218 = arith.constant 0 : index
    %328 = vector.load %arg19[%c24_217, %c0_218] : memref<176x8xf32, #tpu.memory_space<vmem>>, vector<128x8xf32>
    %329 = arith.truncf %328 : vector<128x8xf32> to vector<128x8xbf16>
    %c0_219 = arith.constant 0 : index
    %c32_220 = arith.constant 32 : index
    %330 = vector.load %arg20[%c0_219, %c32_220] : memref<128x72xbf16, #tpu.memory_space<vmem>>, vector<128x8xbf16>
    tpu.vector_store %arg20[%c0_219, %c32_220], %329 {strides = array<i32>} : memref<128x72xbf16, #tpu.memory_space<vmem>>, vector<128x8xbf16>,
    %c25_221 = arith.constant 25 : index
    %c0_222 = arith.constant 0 : index
    %331 = vector.load %arg19[%c25_221, %c0_222] : memref<176x8xf32, #tpu.memory_space<vmem>>, vector<128x8xf32>
    %332 = arith.truncf %331 : vector<128x8xf32> to vector<128x8xbf16>
    %c0_223 = arith.constant 0 : index
    %c40_224 = arith.constant 40 : index
    %333 = vector.load %arg20[%c0_223, %c40_224] : memref<128x72xbf16, #tpu.memory_space<vmem>>, vector<128x8xbf16>
    tpu.vector_store %arg20[%c0_223, %c40_224], %332 {strides = array<i32>} : memref<128x72xbf16, #tpu.memory_space<vmem>>, vector<128x8xbf16>,
    %c39_225 = arith.constant 39 : index
    %c0_226 = arith.constant 0 : index
    %334 = vector.load %arg19[%c39_225, %c0_226] : memref<176x8xf32, #tpu.memory_space<vmem>>, vector<128x8xf32>
    %335 = arith.truncf %334 : vector<128x8xf32> to vector<128x8xbf16>
    %c0_227 = arith.constant 0 : index
    %c48 = arith.constant 48 : index
    %336 = vector.load %arg20[%c0_227, %c48] : memref<128x72xbf16, #tpu.memory_space<vmem>>, vector<128x8xbf16>
    tpu.vector_store %arg20[%c0_227, %c48], %335 {strides = array<i32>} : memref<128x72xbf16, #tpu.memory_space<vmem>>, vector<128x8xbf16>,
    %c40_228 = arith.constant 40 : index
    %c0_229 = arith.constant 0 : index
    %337 = vector.load %arg19[%c40_228, %c0_229] : memref<176x8xf32, #tpu.memory_space<vmem>>, vector<128x8xf32>
    %338 = arith.truncf %337 : vector<128x8xf32> to vector<128x8xbf16>
    %c0_230 = arith.constant 0 : index
    %c56 = arith.constant 56 : index
    %339 = vector.load %arg20[%c0_230, %c56] : memref<128x72xbf16, #tpu.memory_space<vmem>>, vector<128x8xbf16>
    tpu.vector_store %arg20[%c0_230, %c56], %338 {strides = array<i32>} : memref<128x72xbf16, #tpu.memory_space<vmem>>, vector<128x8xbf16>,
    %c41_231 = arith.constant 41 : index
    %c0_232 = arith.constant 0 : index
    %340 = vector.load %arg19[%c41_231, %c0_232] : memref<176x8xf32, #tpu.memory_space<vmem>>, vector<128x8xf32>
    %341 = arith.truncf %340 : vector<128x8xf32> to vector<128x8xbf16>
    %c0_233 = arith.constant 0 : index
    %c64 = arith.constant 64 : index
    %342 = vector.load %arg20[%c0_233, %c64] : memref<128x72xbf16, #tpu.memory_space<vmem>>, vector<128x8xbf16>
    tpu.vector_store %arg20[%c0_233, %c64], %341 {strides = array<i32>} : memref<128x72xbf16, #tpu.memory_space<vmem>>, vector<128x8xbf16>,
    %c0_234 = arith.constant 0 : index
    %c0_235 = arith.constant 0 : index
    %343 = vector.load %arg20[%c0_234, %c0_235] : memref<128x72xbf16, #tpu.memory_space<vmem>>, vector<128x72xbf16>
    %c0_236 = arith.constant 0 : index
    %c0_237 = arith.constant 0 : index
    %344 = vector.load %arg15[%c0_236, %c0_237] : memref<72x8xbf16, #tpu.memory_space<vmem>>, vector<72x8xbf16>
    %cst_238 = arith.constant dense<0.000000e+00> : vector<128x8xf32>
    %345 = tpu.matmul %343, %344, %cst_238 {dimension_numbers = #tpu.dot_dimension_numbers<[1], [0], [0], [1], [0, 0, 1, 1], [], []>} : vector<128x72xbf16>, vector<72x8xbf16>, vector<128x8xf32> -> vector<128x8xf32>
    %346 = vector.broadcast %4 : vector<128x1xf32> to vector<128x8xf32>
    %347 = arith.mulf %345, %346 : vector<128x8xf32>
    %c0_239 = arith.constant 0 : index
    %c0_240 = arith.constant 0 : index
    %348 = vector.load %arg16[%c0_239, %c0_240] : memref<1x8xf32, #tpu.memory_space<vmem>>, vector<1x8xf32>
    %c0_241 = arith.constant 0 : index
    %c0_242 = arith.constant 0 : index
    %349 = vector.load %arg17[%c0_241, %c0_242] : memref<1x8xf32, #tpu.memory_space<vmem>>, vector<1x8xf32>
    %350 = vector.shape_cast %347 : vector<128x8xf32> to vector<1x128x8xf32>
    %cst_243 = arith.constant dense<0.000000e+00> : vector<1xf32>
    %351 = vector.multi_reduction <add>, %350, %cst_243 [1, 2] : vector<1x128x8xf32> to vector<1xf32>
    %352 = vector.shape_cast %351 : vector<1xf32> to vector<1x1x1xf32>
    %353 = vector.extract %352[0, 0, 0] : f32 from vector<1x1x1xf32>
    %354 = arith.mulf %347, %347 : vector<128x8xf32>
    %355 = vector.shape_cast %354 : vector<128x8xf32> to vector<1x128x8xf32>
    %cst_244 = arith.constant dense<0.000000e+00> : vector<1xf32>
    %356 = vector.multi_reduction <add>, %355, %cst_244 [1, 2] : vector<1x128x8xf32> to vector<1xf32>
    %357 = vector.shape_cast %356 : vector<1xf32> to vector<1x1x1xf32>
    %358 = vector.extract %357[0, 0, 0] : f32 from vector<1x1x1xf32>
    %cst_245 = arith.constant 0.001953125 : f32
    %359 = arith.mulf %353, %cst_245 : f32
    %cst_246 = arith.constant 0.001953125 : f32
    %360 = arith.mulf %358, %cst_246 : f32
    %361 = arith.mulf %359, %359 : f32
    %362 = arith.subf %360, %361 : f32
    %cst_247 = arith.constant 0.000000e+00 : f32
    %363 = arith.maximumf %362, %cst_247 : f32
    %364 = vector.broadcast %359 : f32 to vector<128x8xf32>
    %365 = arith.subf %347, %364 : vector<128x8xf32>
    %cst_248 = arith.constant 9.99999974E-6 : f32
    %366 = arith.addf %363, %cst_248 : f32
    %367 = math.rsqrt %366 : f32
    %368 = vector.broadcast %367 : f32 to vector<128x8xf32>
    %369 = arith.mulf %365, %368 : vector<128x8xf32>
    %370 = vector.broadcast %348 : vector<1x8xf32> to vector<128x8xf32>
    %371 = arith.mulf %369, %370 : vector<128x8xf32>
    %372 = vector.broadcast %349 : vector<1x8xf32> to vector<128x8xf32>
    %373 = arith.addf %371, %372 : vector<128x8xf32>
    %c0_249 = arith.constant 0 : index
    %c0_250 = arith.constant 0 : index
    %c0_251 = arith.constant 0 : index
    %374 = vector.load %arg2[%c0_249, %c0_250, %c0_251] : memref<1x1x8xf32, #tpu.memory_space<vmem>>, vector<1x1x8xf32>
    %375 = vector.shape_cast %374 : vector<1x1x8xf32> to vector<1x8xf32>
    %376 = vector.broadcast %375 : vector<1x8xf32> to vector<128x8xf32>
    %377 = arith.addf %373, %376 : vector<128x8xf32>
    %c0_252 = arith.constant 0 : index
    %c0_253 = arith.constant 0 : index
    %c0_254 = arith.constant 0 : index
    %378 = vector.load %arg18[%c0_252, %c0_253, %c0_254] : memref<1x128x8xf32, #tpu.memory_space<vmem>>, vector<1x128x8xf32>
    %379 = vector.shape_cast %378 : vector<1x128x8xf32> to vector<128x8xf32>
    %380 = vector.shape_cast %377 : vector<128x8xf32> to vector<1x128x8xf32>
    tpu.vector_store %arg18[%c0_252, %c0_253, %c0_254], %380 {strides = array<i32>} : memref<1x128x8xf32, #tpu.memory_space<vmem>>, vector<1x128x8xf32>,
    return
  }
  func.func @transform_0(%arg0: i32) -> (i32, i32, i32) {
    %c0_i32 = arith.constant 0 : i32
    %c0_i32_0 = arith.constant 0 : i32
    %c0_i32_1 = arith.constant 0 : i32
    return %arg0, %c0_i32, %c0_i32_0 : i32, i32, i32
  }
  func.func @transform_1(%arg0: i32) -> (i32, i32, i32) {
    %c0_i32 = arith.constant 0 : i32
    %c0_i32_0 = arith.constant 0 : i32
    %c0_i32_1 = arith.constant 0 : i32
    return %arg0, %c0_i32, %c0_i32_0 : i32, i32, i32
  }
  func.func @transform_2(%arg0: i32) -> (i32, i32) {
    %c0_i32 = arith.constant 0 : i32
    %c0_i32_0 = arith.constant 0 : i32
    %c0_i32_1 = arith.constant 0 : i32
    return %c0_i32, %c0_i32_0 : i32, i32
  }
  func.func @transform_3(%arg0: i32) -> (i32, i32) {
    %c0_i32 = arith.constant 0 : i32
    %c0_i32_0 = arith.constant 0 : i32
    %c0_i32_1 = arith.constant 0 : i32
    return %c0_i32, %c0_i32_0 : i32, i32
  }
  func.func @transform_4(%arg0: i32) -> (i32, i32) {
    %c0_i32 = arith.constant 0 : i32
    %c0_i32_0 = arith.constant 0 : i32
    %c0_i32_1 = arith.constant 0 : i32
    return %c0_i32, %c0_i32_0 : i32, i32
  }
  func.func @transform_5(%arg0: i32) -> (i32, i32) {
    %c0_i32 = arith.constant 0 : i32
    %c0_i32_0 = arith.constant 0 : i32
    %c0_i32_1 = arith.constant 0 : i32
    return %c0_i32, %c0_i32_0 : i32, i32
  }
  func.func @transform_6(%arg0: i32) -> (i32, i32) {
    %c0_i32 = arith.constant 0 : i32
    %c0_i32_0 = arith.constant 0 : i32
    %c0_i32_1 = arith.constant 0 : i32
    return %c0_i32, %c0_i32_0 : i32, i32
  }
  func.func @transform_7(%arg0: i32) -> (i32, i32) {
    %c0_i32 = arith.constant 0 : i32
    %c0_i32_0 = arith.constant 0 : i32
    %c0_i32_1 = arith.constant 0 : i32
    return %c0_i32, %c0_i32_0 : i32, i32
  }
  func.func @transform_8(%arg0: i32) -> (i32, i32) {
    %c0_i32 = arith.constant 0 : i32
    %c0_i32_0 = arith.constant 0 : i32
    %c0_i32_1 = arith.constant 0 : i32
    return %c0_i32, %c0_i32_0 : i32, i32
  }
  func.func @transform_9(%arg0: i32) -> (i32, i32) {
    %c0_i32 = arith.constant 0 : i32
    %c0_i32_0 = arith.constant 0 : i32
    %c0_i32_1 = arith.constant 0 : i32
    return %c0_i32, %c0_i32_0 : i32, i32
  }
  func.func @transform_10(%arg0: i32) -> (i32, i32) {
    %c0_i32 = arith.constant 0 : i32
    %c0_i32_0 = arith.constant 0 : i32
    %c0_i32_1 = arith.constant 0 : i32
    return %c0_i32, %c0_i32_0 : i32, i32
  }
  func.func @transform_11(%arg0: i32) -> (i32, i32) {
    %c0_i32 = arith.constant 0 : i32
    %c0_i32_0 = arith.constant 0 : i32
    %c0_i32_1 = arith.constant 0 : i32
    return %c0_i32, %c0_i32_0 : i32, i32
  }
  func.func @transform_12(%arg0: i32) -> (i32, i32) {
    %c0_i32 = arith.constant 0 : i32
    %c0_i32_0 = arith.constant 0 : i32
    %c0_i32_1 = arith.constant 0 : i32
    return %c0_i32, %c0_i32_0 : i32, i32
  }
  func.func @transform_13(%arg0: i32) -> (i32, i32) {
    %c0_i32 = arith.constant 0 : i32
    %c0_i32_0 = arith.constant 0 : i32
    %c0_i32_1 = arith.constant 0 : i32
    return %c0_i32, %c0_i32_0 : i32, i32
  }
  func.func @transform_14(%arg0: i32) -> (i32, i32) {
    %c0_i32 = arith.constant 0 : i32
    %c0_i32_0 = arith.constant 0 : i32
    %c0_i32_1 = arith.constant 0 : i32
    return %c0_i32, %c0_i32_0 : i32, i32
  }
  func.func @transform_15(%arg0: i32) -> (i32, i32) {
    %c0_i32 = arith.constant 0 : i32
    %c0_i32_0 = arith.constant 0 : i32
    %c0_i32_1 = arith.constant 0 : i32
    return %c0_i32, %c0_i32_0 : i32, i32
  }
  func.func @transform_16(%arg0: i32) -> (i32, i32) {
    %c0_i32 = arith.constant 0 : i32
    %c0_i32_0 = arith.constant 0 : i32
    %c0_i32_1 = arith.constant 0 : i32
    return %c0_i32, %c0_i32_0 : i32, i32
  }
  func.func @transform_17(%arg0: i32) -> (i32, i32, i32) {
    %c0_i32 = arith.constant 0 : i32
    %c0_i32_0 = arith.constant 0 : i32
    %c0_i32_1 = arith.constant 0 : i32
    return %arg0, %c0_i32, %c0_i32_0 : i32, i32, i32
  }
}

</mosaic_0001>

<bundles_post_ra>
// kernel: down_forward.1
= control target key start
LH: loop header
LB: loop body
LE: loop exit
PB: predicated region body
PF: predicated region fallthrough
CT: control target
= control target key end

     0   :  { %s6622_s24 = smov 0   ;;  %s9608_s0 = inlined_call_operand.vmem [shape: bf16[2,128,16], index: 0, kind: input, shape index: {}]   ;;  %s9609_s1 = inlined_call_operand.vmem [shape: f32[2,1,8], index: 1, kind: input, shape index: {}]   ;;  %s9610_s2 = inlined_call_operand.vmem [shape: f32[128,1], index: 2, kind: input, shape index: {}]   ;;  %s9611_s3 = inlined_call_operand.vmem [shape: bf16[16,4], index: 3, kind: input, shape index: {}]   ;;  %s9612_s4 = inlined_call_operand.vmem [shape: f32[1,4], index: 4, kind: input, shape index: {}]   ;;  %s9613_s5 = inlined_call_operand.vmem [shape: bf16[36,4], index: 5, kind: input, shape index: {}]   ;;  %s9614_s6 = inlined_call_operand.vmem [shape: f32[1,4], index: 6, kind: input, shape index: {}]   ;;  %s9615_s7 = inlined_call_operand.vmem [shape: f32[1,4], index: 7, kind: input, shape index: {}]   ;;  %s9616_s8 = inlined_call_operand.vmem [shape: bf16[36,4], index: 8, kind: input, shape index: {}]   ;;  %s9617_s9 = inlined_call_operand.vmem [shape: f32[1,4], index: 9, kind: input, shape index: {}]   ;;  %s9618_s10 = inlined_call_operand.vmem [shape: f32[1,4], index: 10, kind: input, shape index: {}]   ;;  %s9619_s11 = inlined_call_operand.vmem [shape: bf16[36,8], index: 11, kind: input, shape index: {}]   ;;  %s9620_s12 = inlined_call_operand.vmem [shape: f32[1,8], index: 12, kind: input, shape index: {}]   ;;  %s9621_s13 = inlined_call_operand.vmem [shape: f32[1,8], index: 13, kind: input, shape index: {}]   ;;  %s9622_s14 = inlined_call_operand.vmem [shape: bf16[72,8], index: 14, kind: input, shape index: {}]   ;;  %s9623_s15 = inlined_call_operand.vmem [shape: f32[1,8], index: 15, kind: input, shape index: {}]   ;;  %s9624_s16 = inlined_call_operand.vmem [shape: f32[1,8], index: 16, kind: input, shape index: {}]   ;;  %s9625_s17 = inlined_call_operand.vmem [shape: f32[2,128,8], index: 17, kind: output, shape index: {}]  }
   0x1   :  { %9828 = sst [smem:[#allocation68_spill]] %s9608_s0 }
   0x2   :  { %9829 = sst [smem:[#allocation69_spill]] %s9609_s1 }
   0x3   :  { %9830 = sst [smem:[#allocation70_spill]] %s9610_s2 }
   0x4   :  { %9831 = sst [smem:[#allocation71_spill]] %s9611_s3 }
   0x5 LB: > { %s5980_s25 = sadd.s32 4294967295, %s6515_s24   ;;  %p5984_p0 = scmp.ge.s32.totalorder %s6515_s24, 1  ;;  %s6515_s24 = sphi %s6622_s24, %s27_s24  }
   0x6   : > { %p495_p1 = scmp.lt.s32.totalorder %s6515_s24, 3 }
   0x8   : > { %p496_p2 = pnand %p5984_p0, %p495_p1 }
   0xa   : > { %499 = sbr.rel (%p496_p2) target bundleno = 3682 (0xe62), region = 88 }
  0x11   : > { %s9832_s3 = sld [smem:[#allocation71_spill]]  ;;  %p550_p3 = scmp.lt.s32.totalorder %s5980_s25, 1  ;;  %v6517_v3 = vmov 0   ;;  %vm658_vm0 = vcmask 130048   ;;  %vm9716_vm1 = vcmask 64512   ;;  %v6518_v26 = vmov 0.0  }
  0x12   : > { %s9833_s2 = sld [smem:[#allocation70_spill]]  ;;  %6285 = vset.pattern.permute.xlu1 %v6517_v3  ;;  %6284 = vset.pattern.permute.xlu0 %v6517_v3  ;;  %s9834_s20 = sld [smem:[#allocation68_spill]]  ;;  %566 = vst.msk [vmem:[#allocation2 + $0x8] sm:$0xff] %vm9716_vm1, %v6518_v26  ;;  %567 = vst.msk [vmem:[#allocation2 + $0x10] sm:$0xff] %vm9716_vm1, %v6518_v26  ;;  %v6731_v45 = vld [vmem:[%s9612_s4] ss:$0 sm:$0xff] }
  0x13   : > { %s10334_s25 = smov (!%p550_p3, %s5980_s25), 1  ;;  %565 = vst.msk [vmem:[#allocation2] sm:$0xff] %vm9716_vm1, %v6518_v26  ;;  %568 = vst.msk [vmem:[#allocation2 + $0x98] sm:$0xff] %vm9716_vm1, %v6518_v26  ;;  %s9728_s27 = smov 4   ;;  %vm981_vm2 = vcmask 64544   ;;  %vm876_vm3 = vcmask 31744  }
  0x14   : > { %s6064_s18 = sshll.u32 %s10334_s25, 6  ;;  %569 = vst.msk [vmem:[#allocation2 + $0xa0] sm:$0xff] %vm9716_vm1, %v6518_v26  ;;  %570 = vst.msk [vmem:[#allocation2 + $0xa8] sm:$0xff] %vm9716_vm1, %v6518_v26  ;;  %s9638_s0 = smov 16   ;;  %vm1498_vm4 = vcmask 1041408   ;;  %vm1046_vm5 = vcmask 97344  }
  0x15   : > { %s9730_s30 = smov 28   ;;  %s9636_s19 = smov 20   ;;  %vm9723_vm6 = vcmask 130144   ;;  %vm9722_vm7 = vcmask 162944   ;;  %vm9721_vm8 = vcmask 195744   ;;  %vm9720_vm9 = vcmask 228544  }
  0x16   : > { %s9634_s1 = smov 24   ;;  %vm9719_vm10 = vcmask 261344   ;;  %vm9718_vm11 = vcmask 294144   ;;  %vm9717_vm12 = vcmask 293888  }
  0x17   : > { %v6286_v0 = vld [vmem:[%s9832_s3] sm:$0xff]  }
  0x18   : > { %6121 = vmatprep.subr.bf16.mxu0 %v6286_v0  ;;  %6231 = vmatprep.subr.bf16.mxu1 %v6286_v0  ;;  %v573_v1 = vld [vmem:[%s9833_s2 + $0x10] sm:$0xff]  ;;  %v571_v2 = vld [vmem:[%s9833_s2] sm:$0xff]  ;;  %s554_s21 = scalar_lea.vmem %s9834_s20, %s6064_s18  ;;  %v574_v4 = vld [vmem:[%s9833_s2 + $0x18] sm:$0xff]  ;;  %s9640_s18 = smov 12  }
  0x19   : > { %6122 = vmatpush3.bf16.msra.mxu0 %v6286_v0  ;;  %6232 = vmatpush3.bf16.msra.mxu1 %v6286_v0  ;;  %v572_v5 = vld [vmem:[%s9833_s2 + $0x8] sm:$0xff]  ;;  %v6287_v6 = vld [vmem:[%s554_s21] sm:$0xff]   ;;  %v6291_v12 = vld [vmem:[%s554_s21 + $0x10] sm:$0xff]   ;;  %s9632_s20 = smov 32  }
  0x1a   : > { %792 = vperm.xlu1 %6285, %v573_v1   ;;  %782 = vperm.xlu0 %6284, %v571_v2   ;;  %v6288_v7 = vld [vmem:[%s554_s21 + $0x20] sm:$0xff]   ;;  %v6289_v8 = vld [vmem:[%s554_s21 + $0x8] sm:$0xff]   ;;  %v6292_v13 = vld [vmem:[%s554_s21 + $0x30] sm:$0xff]  }
  0x1b   : > { %6123 = vmatprep.mubr.msk.bf16.mxu0 %vm658_vm0, %v6287_v6  ;;  %v576_v9 = vld [vmem:[%s9833_s2 + $0x28] sm:$0xff]  ;;  %6131 = vmatprep.mubr.msk.bf16.mxu1 %vm658_vm0, %v6288_v7  ;;  %v575_v11 = vld [vmem:[%s9833_s2 + $0x20] sm:$0xff]  ;;  %v578_v14 = vld [vmem:[%s9833_s2 + $0x38] sm:$0xff] }
  0x1c   : > { %v6290_v10 = vld [vmem:[%s554_s21 + $0x28] sm:$0xff]   ;;  %6124 = vmatmul.mubr.msk.bf16.vlgmr.msra.gmra.mrb[0].mxu0 %vm658_vm0, %v6289_v8  ;;  %v577_v15 = vld [vmem:[%s9833_s2 + $0x30] sm:$0xff]  ;;  %v6293_v16 = vld [vmem:[%s554_s21 + $0x18] sm:$0xff]  }
  0x1d   : > { %6132 = vmatmul.mubr.msk.bf16.vlgmr.msra.gmra.mrb[0].mxu1 %vm658_vm0, %v6290_v10  ;;  %6127 = vmatprep.mubr.msk.bf16.mxu0 %vm658_vm0, %v6291_v12  ;;  %v6294_v17 = vld [vmem:[%s554_s21 + $0x38] sm:$0xff]   ;;  %v580_v18 = vld [vmem:[%s9833_s2 + $0x48] sm:$0xff]  ;;  %v579_v19 = vld [vmem:[%s9833_s2 + $0x40] sm:$0xff]  ;;  %s9726_s21 = smov 8  }
  0x1e   : > { %797 = vperm.xlu1 %6285, %v574_v4   ;;  %787 = vperm.xlu0 %6284, %v572_v5   ;;  %v582_v20 = vld [vmem:[%s9833_s2 + $0x58] sm:$0xff]  ;;  %v581_v21 = vld [vmem:[%s9833_s2 + $0x50] sm:$0xff]  ;;  %v584_v22 = vld [vmem:[%s9833_s2 + $0x68] sm:$0xff] }
  0x1f   : > { %6135 = vmatprep.mubr.msk.bf16.mxu1 %vm658_vm0, %v6292_v13  ;;  %v583_v23 = vld [vmem:[%s9833_s2 + $0x60] sm:$0xff]  ;;  %v586_v24 = vld [vmem:[%s9833_s2 + $0x78] sm:$0xff]  ;;  %v585_v25 = vld [vmem:[%s9833_s2 + $0x70] sm:$0xff] }
  0x20   : > { %v925_v27 = vld [vmem:[#allocation2 + $0x8] sm:$0xff]  ;;  %v926_v28 = vld [vmem:[#allocation2 + $0x10] sm:$0xff] }
  0x21   : > { %v941_v29 = vpack.c.bf16 %v926_v28, %v925_v27  ;;  %v893_v43 = vld [vmem:[#allocation2 + $0x7] sm:$0xff]  ;;  %v894_v44 = vld [vmem:[#allocation2 + $0xf] sm:$0xff] }
  0x22   : > { %807 = vperm.xlu1 %6285, %v576_v9   ;;  %802 = vperm.xlu0 %6284, %v575_v11   ;;  %v909_v46 = vpack.c.bf16 %v894_v44, %v893_v43 }
  0x24   : > { %6128 = vmatmul.mubr.msk.bf16.gmra.mrb[4].mxu0 %vm658_vm0, %v6293_v16  ;;  %917 = vst.msk [vmem:[#allocation3] sm:$0xff] %vm876_vm3, %v909_v46 }
  0x25   : > { %6136 = vmatmul.mubr.msk.bf16.gmra.mrb[4].mxu1 %vm658_vm0, %v6294_v17 }
  0x26   : > { %817 = vperm.xlu1 %6285, %v578_v14   ;;  %812 = vperm.xlu0 %6284, %v577_v15  }
  0x2a   : > { %827 = vperm.xlu1 %6285, %v580_v18   ;;  %822 = vperm.xlu0 %6284, %v579_v19  }
  0x2e   : > { %837 = vperm.xlu1 %6285, %v582_v20   ;;  %832 = vperm.xlu0 %6284, %v581_v21  }
  0x32   : > { %847 = vperm.xlu1 %6285, %v584_v22   ;;  %842 = vperm.xlu0 %6284, %v583_v23   ;;  %v990_v23 = vld [vmem:[#allocation2 + $0x9] sm:$0xff] }
  0x36   : > { %857 = vperm.xlu1 %6285, %v586_v24   ;;  %852 = vperm.xlu0 %6284, %v585_v25  }
  0x3a   : > { %957 = vrot.lane.b32.xlu0 %v941_v29, %s9728_s27 }
  0x99   : > { %v6702_v30 = vpop.permute.xlu0 %782  ;;  %v6708_v33 = vpop.permute.xlu1 %792 }
  0x9a   : > { %9835 = vst [vmem:[#allocation4_spill] sm:$0xff] %v6702_v30  ;;  %9838 = vst [vmem:[#allocation7_spill] sm:$0xff] %v6708_v33 }
  0x9d   : > { %v6704_v31 = vpop.permute.xlu0 %787  ;;  %v6712_v35 = vpop.permute.xlu1 %797 }
  0x9e   : > { %9836 = vst [vmem:[#allocation5_spill] sm:$0xff] %v6704_v31  ;;  %9840 = vst [vmem:[#allocation9_spill] sm:$0xff] %v6712_v35 }
  0xa1   : > { %v6706_v32 = vpop.permute.xlu0 %802  ;;  %v6716_v37 = vpop.permute.xlu1 %807 }
  0xa2   : > { %9837 = vst [vmem:[#allocation6_spill] sm:$0xff] %v6706_v32  ;;  %9842 = vst [vmem:[#allocation11_spill] sm:$0xff] %v6716_v37 }
  0xa5   : > { %v6710_v34 = vpop.permute.xlu0 %812  ;;  %v6720_v39 = vpop.permute.xlu1 %817 }
  0xa6   : > { %9839 = vst [vmem:[#allocation8_spill] sm:$0xff] %v6710_v34  ;;  %9844 = vst [vmem:[#allocation13_spill] sm:$0xff] %v6720_v39 }
  0xa9   : > { %v6714_v36 = vpop.permute.xlu0 %822  ;;  %v6724_v41 = vpop.permute.xlu1 %827 }
  0xaa   : > { %9841 = vst [vmem:[#allocation10_spill] sm:$0xff] %v6714_v36  ;;  %9846 = vst [vmem:[#allocation15_spill] sm:$0xff] %v6724_v41 }
  0xad   : > { %v6718_v38 = vpop.permute.xlu0 %832  ;;  %v6733_v47 = vpop.permute.xlu1 %837 }
  0xae   : > { %9843 = vst [vmem:[#allocation12_spill] sm:$0xff] %v6718_v38  ;;  %9848 = vst [vmem:[#allocation17_spill] sm:$0xff] %v6733_v47 }
  0xb1   : > { %v6722_v40 = vpop.permute.xlu0 %842  ;;  %v6778_v8 = vpop.permute.xlu1 %847 }
  0xb2   : > { %9845 = vst [vmem:[#allocation14_spill] sm:$0xff] %v6722_v40  ;;  %9857 = vst [vmem:[#allocation26_spill] sm:$0xff] %v6778_v8 }
  0xb5   : > { %v6726_v42 = vpop.permute.xlu0 %852  ;;  %v6814_v29 = vpop.permute.xlu1 %857 }
  0xb6   : > { %9847 = vst [vmem:[#allocation16_spill] sm:$0xff] %v6726_v42  ;;  %9865 = vst [vmem:[#allocation34_spill] sm:$0xff] %v6814_v29 }
  0xb9   : > { %v958_v49 = vpop.permute.xlu0 %957 }
  0xba   : > { %982 = vst.msk [vmem:[#allocation3] sm:$0xff] %vm981_vm2, %v958_v49 }
  0xef   : > { %v6125_v48 = vpop.f32.mrb[0].mxu0 }
  0xf0   : > { %v6737_v50 = vadd.f32 %v6125_v48, %v6731_v45  ;;  %v6133_v51 = vpop.f32.mrb[0].mxu1  ;;  %v717_v52 = vpop.f32.mrb[1].mxu0 }
  0xf1   : > { %v6741_v53 = vadd.f32 %v6133_v51, %v6731_v45  ;;  %v6744_v54 = vadd.f32 %v6731_v45, %v717_v52  ;;  %v749_v55 = vpop.f32.mrb[1].mxu1  ;;  %v6126_v56 = vpop.f32.mrb[2].mxu0 }
  0xf2   : > { %9849 = vst [vmem:[#allocation18_spill] sm:$0xff] %v6737_v50  ;;  %v862_v57 = vmul.f32 %v6708_v33, %v6737_v50  ;;  %v6749_v58 = vadd.f32 %v6731_v45, %v749_v55  ;;  %v6752_v59 = vadd.f32 %v6126_v56, %v6731_v45  ;;  %v6134_v60 = vpop.f32.mrb[2].mxu1  ;;  %v720_v61 = vpop.f32.mrb[3].mxu0 }
  0xf3   : > { %9850 = vst [vmem:[#allocation19_spill] sm:$0xff] %v6741_v53  ;;  %9851 = vst [vmem:[#allocation20_spill] sm:$0xff] %v6744_v54  ;;  %v870_v62 = vmul.f32 %v6718_v38, %v6741_v53  ;;  %v860_v63 = vmul.f32 %v6702_v30, %v6744_v54  ;;  %v6759_v0 = vadd.f32 %v6134_v60, %v6731_v45  ;;  %v752_v2 = vpop.f32.mrb[3].mxu1 }
  0xf4   : > { %9852 = vst [vmem:[#allocation21_spill] sm:$0xff] %v6749_v58  ;;  %9853 = vst [vmem:[#allocation22_spill] sm:$0xff] %v6752_v59  ;;  %v6762_v1 = vadd.f32 %v6731_v45, %v720_v61  ;;  %v868_v3 = vmul.f32 %v6714_v36, %v6749_v58  ;;  %v863_v4 = vmul.f32 %v6712_v35, %v6752_v59 }
  0xf5   : > { %9854 = vst [vmem:[#allocation23_spill] sm:$0xff] %v6759_v0  ;;  %879 = vst.msk [vmem:[#allocation2 + $0x28] sm:$0xff] %vm876_vm3, %v862_v57  ;;  %v6770_v5 = vadd.f32 %v6731_v45, %v752_v2  ;;  %v871_v6 = vmul.f32 %v6733_v47, %v6759_v0 }
  0xf6   : > { %9855 = vst [vmem:[#allocation24_spill] sm:$0xff] %v6762_v1  ;;  %887 = vst.msk [vmem:[#allocation2 + $0x68] sm:$0xff] %vm876_vm3, %v870_v62  ;;  %v861_v7 = vmul.f32 %v6704_v31, %v6762_v1 }
  0xf7   : > { %9856 = vst [vmem:[#allocation25_spill] sm:$0xff] %v6770_v5  ;;  %877 = vst.msk [vmem:[#allocation2 + $0x18] sm:$0xff] %vm876_vm3, %v860_v63  ;;  %v869_v9 = vmul.f32 %v6724_v41, %v6770_v5  ;;  %v6129_v10 = vpop.f32.mrb[4].mxu0 }
  0xf8   : > { %885 = vst.msk [vmem:[#allocation2 + $0x58] sm:$0xff] %vm876_vm3, %v868_v3  ;;  %880 = vst.msk [vmem:[#allocation2 + $0x30] sm:$0xff] %vm876_vm3, %v863_v4  ;;  %v6788_v11 = vadd.f32 %v6129_v10, %v6731_v45  ;;  %v6137_v12 = vpop.f32.mrb[4].mxu1  ;;  %v733_v13 = vpop.f32.mrb[5].mxu0 }
  0xf9   : > { %888 = vst.msk [vmem:[#allocation2 + $0x70] sm:$0xff] %vm876_vm3, %v871_v6  ;;  %878 = vst.msk [vmem:[#allocation2 + $0x20] sm:$0xff] %vm876_vm3, %v861_v7  ;;  %v6791_v14 = vadd.f32 %v6137_v12, %v6731_v45  ;;  %v6794_v15 = vadd.f32 %v6731_v45, %v733_v13  ;;  %v765_v16 = vpop.f32.mrb[5].mxu1  ;;  %v6130_v17 = vpop.f32.mrb[6].mxu0 }
  0xfa   : > { %886 = vst.msk [vmem:[#allocation2 + $0x60] sm:$0xff] %vm876_vm3, %v869_v9  ;;  %9858 = vst [vmem:[#allocation27_spill] sm:$0xff] %v6788_v11  ;;  %v866_v18 = vmul.f32 %v6710_v34, %v6788_v11  ;;  %v6799_v19 = vadd.f32 %v6731_v45, %v765_v16  ;;  %v6802_v20 = vadd.f32 %v6130_v17, %v6731_v45  ;;  %v6138_v21 = vpop.f32.mrb[6].mxu1  ;;  %v736_v22 = vpop.f32.mrb[7].mxu0 }
  0xfb   : > { %9859 = vst [vmem:[#allocation28_spill] sm:$0xff] %v6791_v14  ;;  %9860 = vst [vmem:[#allocation29_spill] sm:$0xff] %v6794_v15  ;;  %v874_v24 = vmul.f32 %v6726_v42, %v6791_v14  ;;  %v864_v25 = vmul.f32 %v6706_v32, %v6794_v15  ;;  %v6809_v26 = vadd.f32 %v6138_v21, %v6731_v45  ;;  %v768_v28 = vpop.f32.mrb[7].mxu1 }
  0xfc   : > { %9861 = vst [vmem:[#allocation30_spill] sm:$0xff] %v6799_v19  ;;  %9862 = vst [vmem:[#allocation31_spill] sm:$0xff] %v6802_v20  ;;  %v6812_v27 = vadd.f32 %v6731_v45, %v736_v22  ;;  %v872_v43 = vmul.f32 %v6722_v40, %v6799_v19  ;;  %v867_v44 = vmul.f32 %v6720_v39, %v6802_v20  ;;  %v1122_v55 = vld [vmem:[#allocation2 + $0x28] sm:$0xff] }
  0xfd   : > { %9863 = vst [vmem:[#allocation32_spill] sm:$0xff] %v6809_v26  ;;  %883 = vst.msk [vmem:[#allocation2 + $0x48] sm:$0xff] %vm876_vm3, %v866_v18  ;;  %v6822_v46 = vadd.f32 %v6731_v45, %v768_v28  ;;  %v875_v49 = vmul.f32 %v6814_v29, %v6809_v26  ;;  %v1323_v10 = vld [vmem:[#allocation2 + $0x68] sm:$0xff] }
  0xfe   : > { %9864 = vst [vmem:[#allocation33_spill] sm:$0xff] %v6812_v27  ;;  %v991_v48 = vld [vmem:[#allocation2 + $0x11] sm:$0xff]  ;;  %891 = vst.msk [vmem:[#allocation2 + $0x88] sm:$0xff] %vm876_vm3, %v874_v24  ;;  %v865_v51 = vmul.f32 %v6716_v37, %v6812_v27 }
  0xff   : > { %9866 = vst [vmem:[#allocation35_spill] sm:$0xff] %v6822_v46  ;;  %881 = vst.msk [vmem:[#allocation2 + $0x38] sm:$0xff] %vm876_vm3, %v864_v25  ;;  %v1006_v52 = vpack.c.bf16 %v991_v48, %v990_v23  ;;  %v1123_v56 = vld [vmem:[#allocation2 + $0x30] sm:$0xff]  ;;  %v873_v45 = vmul.f32 %v6778_v8, %v6822_v46  ;;  %v1120_v48 = vld [vmem:[#allocation2 + $0x18] sm:$0xff] }
 0x100   : > { %v1251_v57 = vld [vmem:[#allocation2 + $0x2f] sm:$0xff]  ;;  %889 = vst.msk [vmem:[#allocation2 + $0x78] sm:$0xff] %vm876_vm3, %v872_v43  ;;  %884 = vst.msk [vmem:[#allocation2 + $0x50] sm:$0xff] %vm876_vm3, %v867_v44  ;;  %v1137_v60 = vpack.c.bf16 %v1123_v56, %v1122_v55  ;;  %v1055_v61 = vld [vmem:[#allocation2 + $0x17] sm:$0xff] }
 0x101   : > { %v1056_v62 = vld [vmem:[#allocation2 + $0x1f] sm:$0xff]  ;;  %892 = vst.msk [vmem:[#allocation2 + $0x90] sm:$0xff] %vm876_vm3, %v875_v49  ;;  %882 = vst.msk [vmem:[#allocation2 + $0x40] sm:$0xff] %vm876_vm3, %v865_v51  ;;  %1022 = vrot.lane.b32.xlu0 %v1006_v52, %s9726_s21  ;;  %v1250_v2 = vld [vmem:[#allocation2 + $0x27] sm:$0xff] }
 0x102   : > { %v1071_v63 = vpack.c.bf16 %v1056_v62, %v1055_v61  ;;  %890 = vst.msk [vmem:[#allocation2 + $0x80] sm:$0xff] %vm876_vm3, %v873_v45  ;;  %1154 = vrot.lane.b32.xlu1 %v1137_v60, %s9638_s0  ;;  %v1266_v3 = vpack.c.bf16 %v1251_v57, %v1250_v2  ;;  %v1258_v4 = vld [vmem:[#allocation2 + $0x67] sm:$0xff]  ;;  %v1259_v6 = vld [vmem:[#allocation2 + $0x6f] sm:$0xff]  ;;  %v1257_v16 = vld [vmem:[#allocation2 + $0x5f] sm:$0xff] }
 0x103   : > { %v1324_v7 = vld [vmem:[#allocation2 + $0x70] sm:$0xff]  ;;  %v1270_v9 = vpack.c.bf16 %v1259_v6, %v1258_v4  ;;  %v1121_v24 = vld [vmem:[#allocation2 + $0x20] sm:$0xff]  ;;  %v1321_v62 = vld [vmem:[#allocation2 + $0x58] sm:$0xff] }
 0x104   : > { %918 = vst.msk [vmem:[#allocation3 + $0x8] sm:$0xff] %vm876_vm3, %v1071_v63  ;;  %919 = vst.msk [vmem:[#allocation3 + $0x10] sm:$0xff] %vm876_vm3, %v1266_v3  ;;  %v1335_v12 = vpack.c.bf16 %v1324_v7, %v1323_v10  ;;  %v1136_v51 = vpack.c.bf16 %v1121_v24, %v1120_v48  ;;  %v1185_v52 = vld [vmem:[#allocation2 + $0x19] sm:$0xff]  ;;  %v1186_v55 = vld [vmem:[#allocation2 + $0x21] sm:$0xff] }
 0x105   : > { %1347 = vrot.lane.b32.xlu0 %v1137_v60, %s9730_s30  ;;  %923 = vst.msk [vmem:[#allocation3 + $0x30] sm:$0xff] %vm876_vm3, %v1270_v9  ;;  %v1201_v56 = vpack.c.bf16 %v1186_v55, %v1185_v52  ;;  %v1386_v57 = vld [vmem:[#allocation2 + $0x59] sm:$0xff]  ;;  %v1387_v45 = vld [vmem:[#allocation2 + $0x61] sm:$0xff]  ;;  %v1195_v7 = vld [vmem:[#allocation2 + $0x69] sm:$0xff] }
 0x106   : > { %961 = vrot.lane.b32.xlu1 %v1137_v60, %s9728_s27  ;;  %v1252_v18 = vld [vmem:[#allocation2 + $0x37] sm:$0xff]  ;;  %v1322_v60 = vld [vmem:[#allocation2 + $0x60] sm:$0xff]  ;;  %v1399_v61 = vpack.c.bf16 %v1387_v45, %v1386_v57  ;;  %v1134_v24 = vld [vmem:[#allocation2 + $0x88] sm:$0xff] }
 0x107   : > { %v1256_v13 = vld [vmem:[#allocation2 + $0x57] sm:$0xff]  ;;  %v1255_v25 = vld [vmem:[#allocation2 + $0x4f] sm:$0xff]  ;;  %v6295_v48 = vld [vmem:[%s9613_s5] sm:$0xff]  }
 0x108   : > { %v6845_v17 = vpack.c.bf16 %v1257_v16, %v1256_v13  ;;  %v1253_v21 = vld [vmem:[#allocation2 + $0x3f] sm:$0xff]  ;;  %v1254_v23 = vld [vmem:[#allocation2 + $0x47] sm:$0xff]  ;;  %v1260_v43 = vld [vmem:[#allocation2 + $0x77] sm:$0xff]  ;;  %6139 = vmatprep.subr.bf16.mxu1 %v6295_v48 }
 0x109   : > { %1355 = vrot.lane.b32.xlu0 %v1335_v12, %s9730_s30  ;;  %v6848_v22 = vpack.c.bf16 %v1253_v21, %v1252_v18  ;;  %v6853_v28 = vpack.c.bf16 %v1255_v25, %v1254_v23  ;;  %v1261_v44 = vld [vmem:[#allocation2 + $0x7f] sm:$0xff]  ;;  %v1381_v2 = vld [vmem:[#allocation2 + $0x31] sm:$0xff]  ;;  %v1126_v13 = vld [vmem:[#allocation2 + $0x48] sm:$0xff]  ;;  %6140 = vmatpush3.bf16.msra.mxu1 %v6295_v48 }
 0x10a   : > { %1162 = vrot.lane.b32.xlu1 %v1335_v12, %s9638_s0  ;;  %922 = vst.msk [vmem:[#allocation3 + $0x28] sm:$0xff] %vm876_vm3, %v6845_v17  ;;  %v6858_v49 = vpack.c.bf16 %v1261_v44, %v1260_v43  ;;  %v1196_v6 = vld [vmem:[#allocation2 + $0x71] sm:$0xff]  ;;  %v1191_v18 = vld [vmem:[#allocation2 + $0x49] sm:$0xff]  ;;  %v1265_v55 = vld [vmem:[#allocation2 + $0x9f] sm:$0xff] }
 0x10b   : > { %920 = vst.msk [vmem:[#allocation3 + $0x18] sm:$0xff] %vm876_vm3, %v6848_v22  ;;  %921 = vst.msk [vmem:[#allocation3 + $0x20] sm:$0xff] %vm876_vm3, %v6853_v28  ;;  %v1206_v10 = vpack.c.bf16 %v1196_v6, %v1195_v7  ;;  %v1135_v23 = vld [vmem:[#allocation2 + $0x90] sm:$0xff]  ;;  %v1382_v45 = vld [vmem:[#allocation2 + $0x39] sm:$0xff] }
 0x10c   : > { %924 = vst.msk [vmem:[#allocation3 + $0x38] sm:$0xff] %vm876_vm3, %v6858_v49  ;;  %v1143_v25 = vpack.c.bf16 %v1135_v23, %v1134_v24  ;;  %v1199_v43 = vld [vmem:[#allocation2 + $0x89] sm:$0xff]  ;;  %v1200_v44 = vld [vmem:[#allocation2 + $0x91] sm:$0xff]  ;;  %v1391_v6 = vld [vmem:[#allocation2 + $0x81] sm:$0xff] }
 0x10d   : > { %1087 = vrot.lane.b32.xlu0 %v1071_v63, %s9640_s18  ;;  %v1334_v63 = vpack.c.bf16 %v1322_v60, %v1321_v62  ;;  %v1264_v52 = vld [vmem:[#allocation2 + $0x97] sm:$0xff]  ;;  %v1383_v60 = vld [vmem:[#allocation2 + $0x41] sm:$0xff] }
 0x10e   : > { %969 = vrot.lane.b32.xlu1 %v1335_v12, %s9728_s27  ;;  %v1127_v12 = vld [vmem:[#allocation2 + $0x50] sm:$0xff]  ;;  %v1273_v57 = vpack.c.bf16 %v1265_v55, %v1264_v52 }
 0x10f   : > { %v1139_v16 = vpack.c.bf16 %v1127_v12, %v1126_v13  ;;  %v1262_v13 = vld [vmem:[#allocation2 + $0x87] sm:$0xff] }
 0x111   : > { %1152 = vrot.lane.b32.xlu0 %v1136_v51, %s9638_s0 }
 0x112   : > { %959 = vrot.lane.b32.xlu1 %v1136_v51, %s9728_s27  ;;  %v6896_v51 = vpack.c.bf16 %v1200_v44, %v1199_v43  ;;  %v1395_v43 = vld [vmem:[#allocation2 + $0xa1] sm:$0xff] }
 0x115   : > { %1217 = vrot.lane.b32.xlu0 %v1201_v56, %s9636_s19 }
 0x116   : > { %1024 = vrot.lane.b32.xlu1 %v1201_v56, %s9726_s21  ;;  %v6296_v56 = vld [vmem:[%s9613_s5 + $0x8] sm:$0xff]  }
 0x117   : > { %6141 = vmatprep.subr.bf16.mxu1 %v6296_v56 }
 0x118   : > { %6142 = vmatpush3.bf16.msra.mxu1 %v6296_v56 }
 0x119   : > { %1282 = vrot.lane.b32.xlu0 %v1266_v3, %s9634_s1 }
 0x11a   : > { %1089 = vrot.lane.b32.xlu1 %v1266_v3, %s9640_s18  ;;  %v1380_v3 = vld [vmem:[#allocation2 + $0x29] sm:$0xff] }
 0x11b   : > { %v1396_v4 = vpack.c.bf16 %v1381_v2, %v1380_v3  ;;  %v1317_v2 = vld [vmem:[#allocation2 + $0x38] sm:$0xff] }
 0x11d   : > { %1418 = vrot.lane.b32.xlu0 %v1399_v61, %s9632_s20 }
 0x11e   : > { %1353 = vrot.lane.b32.xlu1 %v1334_v63, %s9730_s30 }
 0x121   : > { %1160 = vrot.lane.b32.xlu0 %v1334_v63, %s9638_s0 }
 0x122   : > { %967 = vrot.lane.b32.xlu1 %v1334_v63, %s9728_s27  ;;  %v1318_v63 = vld [vmem:[#allocation2 + $0x40] sm:$0xff] }
 0x123   : > { %v1332_v3 = vpack.c.bf16 %v1318_v63, %v1317_v2 }
 0x125   : > { %1225 = vrot.lane.b32.xlu0 %v1399_v61, %s9636_s19 }
 0x126   : > { %1032 = vrot.lane.b32.xlu1 %v1399_v61, %s9726_s21  ;;  %v1397_v61 = vpack.c.bf16 %v1383_v60, %v1382_v45 }
 0x129   : > { %1290 = vrot.lane.b32.xlu0 %v1270_v9, %s9634_s1 }
 0x12a   : > { %1097 = vrot.lane.b32.xlu1 %v1270_v9, %s9640_s18  ;;  %v1192_v9 = vld [vmem:[#allocation2 + $0x51] sm:$0xff] }
 0x12b   : > { %v1204_v21 = vpack.c.bf16 %v1192_v9, %v1191_v18  ;;  %v1329_v9 = vld [vmem:[#allocation2 + $0x98] sm:$0xff] }
 0x12d   : > { %1412 = vrot.lane.b32.xlu0 %v1396_v4, %s9632_s20 }
 0x12e   : > { %1219 = vrot.lane.b32.xlu1 %v1396_v4, %s9636_s19 }
 0x131   : > { %1026 = vrot.lane.b32.xlu0 %v1396_v4, %s9726_s21  ;;  %v1390_v4 = vld [vmem:[#allocation2 + $0x79] sm:$0xff] }
 0x132   : > { %1227 = vrot.lane.b32.xlu1 %v1206_v10, %s9636_s19  ;;  %v1401_v7 = vpack.c.bf16 %v1391_v6, %v1390_v4 }
 0x135   : > { %1420 = vrot.lane.b32.xlu0 %v1206_v10, %s9632_s20 }
 0x136   : > { %1158 = vrot.lane.b32.xlu1 %v1139_v16, %s9638_s0 }
 0x139   : > { %1034 = vrot.lane.b32.xlu0 %v1206_v10, %s9726_s21  ;;  %v1325_v10 = vld [vmem:[#allocation2 + $0x78] sm:$0xff] }
 0x13a   : > { %1223 = vrot.lane.b32.xlu1 %v1204_v21, %s9636_s19 }
 0x13d   : > { %1351 = vrot.lane.b32.xlu0 %v1139_v16, %s9730_s30 }
 0x13e   : > { %1288 = vrot.lane.b32.xlu1 %v6845_v17, %s9634_s1 }
 0x141   : > { %1416 = vrot.lane.b32.xlu0 %v1204_v21, %s9632_s20 }
 0x142   : > { %965 = vrot.lane.b32.xlu1 %v1139_v16, %s9728_s27 }
 0x145   : > { %1030 = vrot.lane.b32.xlu0 %v1204_v21, %s9726_s21  ;;  %v1330_v21 = vld [vmem:[#allocation2 + $0xa0] sm:$0xff] }
 0x146   : > { %1166 = vrot.lane.b32.xlu1 %v1143_v25, %s9638_s0  ;;  %v1338_v23 = vpack.c.bf16 %v1330_v21, %v1329_v9 }
 0x149   : > { %1095 = vrot.lane.b32.xlu0 %v6845_v17, %s9640_s18  ;;  %v6297_v17 = vld [vmem:[%s9613_s5 + $0x10] ss:$0 sps:$4 sm:$0x33]  }
 0x14a   : > { %1231 = vrot.lane.b32.xlu1 %v6896_v51, %s9636_s19  ;;  %6233 = vmatprep.subr.msk.bf16.mxu1 %vm1498_vm4, %v6297_v17  ;;  %v1500_v62 = vsel %vm1498_vm4, %v6297_v17, 0 }
 0x14b   : > { %6144 = vmatpush3.bf16.msra.mxu1 %v1500_v62 }
 0x14d   : > { %1359 = vrot.lane.b32.xlu0 %v1143_v25, %s9730_s30  ;;  %v1394_v25 = vld [vmem:[#allocation2 + $0x99] sm:$0xff] }
 0x14e   : > { %1296 = vrot.lane.b32.xlu1 %v1273_v57, %s9634_s1  ;;  %v1403_v48 = vpack.c.bf16 %v1395_v43, %v1394_v25 }
 0x151   : > { %1414 = vrot.lane.b32.xlu0 %v1397_v61, %s9632_s20 }
 0x152   : > { %1284 = vrot.lane.b32.xlu1 %v6848_v22, %s9634_s1 }
 0x155   : > { %1091 = vrot.lane.b32.xlu0 %v6848_v22, %s9640_s18  ;;  %v1326_v22 = vld [vmem:[#allocation2 + $0x80] sm:$0xff] }
 0x156   : > { %1349 = vrot.lane.b32.xlu1 %v1332_v3, %s9730_s30  ;;  %v1336_v12 = vpack.c.bf16 %v1326_v22, %v1325_v10 }
 0x159   : > { %1156 = vrot.lane.b32.xlu0 %v1332_v3, %s9638_s0 }
 0x15a   : > { %963 = vrot.lane.b32.xlu1 %v1332_v3, %s9728_s27 }
 0x15d   : > { %1221 = vrot.lane.b32.xlu0 %v1397_v61, %s9636_s19 }
 0x15e   : > { %1028 = vrot.lane.b32.xlu1 %v1397_v61, %s9726_s21 }
 0x161   : > { %1286 = vrot.lane.b32.xlu0 %v6853_v28, %s9634_s1 }
 0x162   : > { %1093 = vrot.lane.b32.xlu1 %v6853_v28, %s9640_s18  ;;  %v1263_v28 = vld [vmem:[#allocation2 + $0x8f] sm:$0xff] }
 0x163   : > { %v1272_v18 = vpack.c.bf16 %v1263_v28, %v1262_v13 }
 0x165   : > { %1422 = vrot.lane.b32.xlu0 %v1401_v7, %s9632_s20 }
 0x166   : > { %1292 = vrot.lane.b32.xlu1 %v6858_v49, %s9634_s1 }
 0x169   : > { %1099 = vrot.lane.b32.xlu0 %v6858_v49, %s9640_s18 }
 0x16a   : > { %1357 = vrot.lane.b32.xlu1 %v1336_v12, %s9730_s30 }
 0x16d   : > { %1164 = vrot.lane.b32.xlu0 %v1336_v12, %s9638_s0 }
 0x16e   : > { %971 = vrot.lane.b32.xlu1 %v1336_v12, %s9728_s27 }
 0x171   : > { %1229 = vrot.lane.b32.xlu0 %v1401_v7, %s9636_s19 }
 0x172   : > { %1036 = vrot.lane.b32.xlu1 %v1401_v7, %s9726_s21 }
 0x173   : > { %v1023_v16 = vpop.permute.xlu0 %1022 }
 0x174   : > { %1047 = vst.msk [vmem:[#allocation3] sm:$0xff] %vm1046_vm5, %v1023_v16  ;;  %v1155_v49 = vpop.permute.xlu1 %1154 }
 0x175   : > { %1294 = vrot.lane.b32.xlu0 %v1272_v18, %s9634_s1  ;;  %s9724_s1 = smov 0.0  }
 0x176   : > { %1101 = vrot.lane.b32.xlu1 %v1272_v18, %s9640_s18 }
 0x177   : > { %v1348_v24 = vpop.permute.xlu0 %1347 }
 0x178   : > { %v962_v44 = vpop.permute.xlu1 %961 }
 0x179   : > { %984 = vst.msk [vmem:[#allocation3 + $0x10] sm:$0xff] %vm981_vm2, %v962_v44  ;;  %1424 = vrot.lane.b32.xlu0 %v6896_v51, %s9632_s20 }
 0x17a   : > { %1361 = vrot.lane.b32.xlu1 %v1338_v23, %s9730_s30 }
 0x17b   : > { %v6943_v52 = vpop.permute.xlu0 %1355 }
 0x17c   : > { %v1163_v55 = vpop.permute.xlu1 %1162 }
 0x17e   : > { %1426 = vrot.lane.b32.xlu1 %v1403_v48, %s9632_s20 }
 0x17f   : > { %v1088_v56 = vpop.permute.xlu0 %1087 }
 0x180   : > { %1112 = vst.msk [vmem:[#allocation3] sm:$0xff] %vm9723_vm6, %v1088_v56  ;;  %v970_v57 = vpop.permute.xlu1 %969 }
 0x181   : > { %988 = vst.msk [vmem:[#allocation3 + $0x30] sm:$0xff] %vm981_vm2, %v970_v57 }
 0x183   : > { %v1153_v45 = vpop.permute.xlu0 %1152 }
 0x184   : > { %1177 = vst.msk [vmem:[#allocation3] sm:$0xff] %vm9722_vm7, %v1153_v45  ;;  %v960_v51 = vpop.permute.xlu1 %959 }
 0x185   : > { %983 = vst.msk [vmem:[#allocation3 + $0x8] sm:$0xff] %vm981_vm2, %v960_v51 }
 0x187   : > { %v1218_v60 = vpop.permute.xlu0 %1217 }
 0x188   : > { %1242 = vst.msk [vmem:[#allocation3] sm:$0xff] %vm9721_vm8, %v1218_v60  ;;  %v1025_v17 = vpop.permute.xlu1 %1024 }
 0x189   : > { %1048 = vst.msk [vmem:[#allocation3 + $0x8] sm:$0xff] %vm1046_vm5, %v1025_v17 }
 0x18b   : > { %v1283_v61 = vpop.permute.xlu0 %1282 }
 0x18c   : > { %1307 = vst.msk [vmem:[#allocation3] sm:$0xff] %vm9720_vm9, %v1283_v61  ;;  %v1090_v62 = vpop.permute.xlu1 %1089 }
 0x18d   : > { %1113 = vst.msk [vmem:[#allocation3 + $0x8] sm:$0xff] %vm9723_vm6, %v1090_v62 }
 0x18e   : > { %1372 = vst.msk [vmem:[#allocation3] sm:$0xff] %vm9719_vm10, %v1348_v24 }
 0x18f   : > { %1178 = vst.msk [vmem:[#allocation3 + $0x8] sm:$0xff] %vm9722_vm7, %v1155_v49  ;;  %v6956_v63 = vpop.permute.xlu0 %1418 }
 0x190   : > { %v6958_v2 = vpop.permute.xlu1 %1353 }
 0x193   : > { %v1161_v3 = vpop.permute.xlu0 %1160 }
 0x194   : > { %v968_v4 = vpop.permute.xlu1 %967 }
 0x195   : > { %987 = vst.msk [vmem:[#allocation3 + $0x28] sm:$0xff] %vm981_vm2, %v968_v4 }
 0x197   : > { %v1226_v6 = vpop.permute.xlu0 %1225 }
 0x198   : > { %v1033_v7 = vpop.permute.xlu1 %1032 }
 0x199   : > { %1052 = vst.msk [vmem:[#allocation3 + $0x28] sm:$0xff] %vm1046_vm5, %v1033_v7 }
 0x19b   : > { %v1291_v22 = vpop.permute.xlu0 %1290 }
 0x19c   : > { %v1098_v10 = vpop.permute.xlu1 %1097 }
 0x19d   : > { %1117 = vst.msk [vmem:[#allocation3 + $0x28] sm:$0xff] %vm9723_vm6, %v1098_v10 }
 0x19e   : > { %1182 = vst.msk [vmem:[#allocation3 + $0x28] sm:$0xff] %vm9722_vm7, %v1163_v55 }
 0x19f   : > { %v1413_v12 = vpop.permute.xlu0 %1412 }
 0x1a0   : > { %1437 = vst.msk [vmem:[#allocation3] sm:$0xff] %vm9718_vm11, %v1413_v12  ;;  %v1220_v13 = vpop.permute.xlu1 %1219 }
 0x1a1   : > { %1243 = vst.msk [vmem:[#allocation3 + $0x8] sm:$0xff] %vm9721_vm8, %v1220_v13 }
 0x1a3   : > { %v1027_v28 = vpop.permute.xlu0 %1026 }
 0x1a4   : > { %1049 = vst.msk [vmem:[#allocation3 + $0x10] sm:$0xff] %vm1046_vm5, %v1027_v28  ;;  %v1228_v16 = vpop.permute.xlu1 %1227 }
 0x1a5   : > { %1247 = vst.msk [vmem:[#allocation3 + $0x28] sm:$0xff] %vm9721_vm8, %v1228_v16 }
 0x1a7   : > { %v1421_v18 = vpop.permute.xlu0 %1420  ;;  %v1445_v9 = vld [vmem:[#allocation3] sm:$0xff] }
 0x1a8   : > { %6145 = vmatprep.mubr.msk.bf16.mxu1 %vm9717_vm12, %v1445_v9  ;;  %v1159_v21 = vpop.permute.xlu1 %1158 }
 0x1ab   : > { %v1035_v49 = vpop.permute.xlu0 %1034 }
 0x1ac   : > { %1053 = vst.msk [vmem:[#allocation3 + $0x30] sm:$0xff] %vm1046_vm5, %v1035_v49  ;;  %v1224_v23 = vpop.permute.xlu1 %1223 }
 0x1af   : > { %v1352_v24 = vpop.permute.xlu0 %1351 }
 0x1b0   : > { %v1289_v25 = vpop.permute.xlu1 %1288 }
 0x1b3   : > { %v1417_v43 = vpop.permute.xlu0 %1416 }
 0x1b4   : > { %v966_v44 = vpop.permute.xlu1 %965 }
 0x1b5   : > { %986 = vst.msk [vmem:[#allocation3 + $0x20] sm:$0xff] %vm981_vm2, %v966_v44 }
 0x1b7   : > { %v1031_v48 = vpop.permute.xlu0 %1030 }
 0x1b8   : > { %1051 = vst.msk [vmem:[#allocation3 + $0x20] sm:$0xff] %vm1046_vm5, %v1031_v48  ;;  %v6972_v55 = vpop.permute.xlu1 %1166 }
 0x1bb   : > { %v1096_v56 = vpop.permute.xlu0 %1095 }
 0x1bc   : > { %1116 = vst.msk [vmem:[#allocation3 + $0x20] sm:$0xff] %vm9723_vm6, %v1096_v56  ;;  %v6975_v57 = vpop.permute.xlu1 %1231 }
 0x1bd   : > { %1181 = vst.msk [vmem:[#allocation3 + $0x20] sm:$0xff] %vm9722_vm7, %v1161_v3 }
 0x1be   : > { %1246 = vst.msk [vmem:[#allocation3 + $0x20] sm:$0xff] %vm9721_vm8, %v1226_v6 }
 0x1bf   : > { %1311 = vst.msk [vmem:[#allocation3 + $0x20] sm:$0xff] %vm9720_vm9, %v1291_v22  ;;  %v1360_v45 = vpop.permute.xlu0 %1359 }
 0x1c0   : > { %1376 = vst.msk [vmem:[#allocation3 + $0x20] sm:$0xff] %vm9719_vm10, %v6943_v52  ;;  %v6982_v51 = vpop.permute.xlu1 %1296 }
 0x1c1   : > { %1441 = vst.msk [vmem:[#allocation3 + $0x20] sm:$0xff] %vm9718_vm11, %v1421_v18 }
 0x1c3   : > { %v1415_v60 = vpop.permute.xlu0 %1414 }
 0x1c4   : > { %v1285_v17 = vpop.permute.xlu1 %1284 }
 0x1c5   : > { %1308 = vst.msk [vmem:[#allocation3 + $0x8] sm:$0xff] %vm9720_vm9, %v1285_v17 }
 0x1c7   : > { %v1092_v61 = vpop.permute.xlu0 %1091 }
 0x1c8   : > { %1114 = vst.msk [vmem:[#allocation3 + $0x10] sm:$0xff] %vm9723_vm6, %v1092_v61  ;;  %v1350_v62 = vpop.permute.xlu1 %1349 }
 0x1c9   : > { %1373 = vst.msk [vmem:[#allocation3 + $0x8] sm:$0xff] %vm9719_vm10, %v1350_v62 }
 0x1ca   : > { %1438 = vst.msk [vmem:[#allocation3 + $0x8] sm:$0xff] %vm9718_vm11, %v1415_v60 }
 0x1cb   : > { %v1157_v3 = vpop.permute.xlu0 %1156 }
 0x1cc   : > { %1179 = vst.msk [vmem:[#allocation3 + $0x10] sm:$0xff] %vm9722_vm7, %v1157_v3  ;;  %v964_v52 = vpop.permute.xlu1 %963 }
 0x1cd   : > { %985 = vst.msk [vmem:[#allocation3 + $0x18] sm:$0xff] %vm981_vm2, %v964_v52 }
 0x1cf   : > { %v1222_v4 = vpop.permute.xlu0 %1221 }
 0x1d0   : > { %1244 = vst.msk [vmem:[#allocation3 + $0x10] sm:$0xff] %vm9721_vm8, %v1222_v4  ;;  %v1029_v6 = vpop.permute.xlu1 %1028 }
 0x1d1   : > { %1050 = vst.msk [vmem:[#allocation3 + $0x18] sm:$0xff] %vm1046_vm5, %v1029_v6  ;;  %v1446_v7 = vld [vmem:[#allocation3 + $0x8] sm:$0xff] }
 0x1d2   : > { %6146 = vmatmul.mubr.msk.bf16.vlgmr.msra.gmra.mrb[8].mxu1 %vm9717_vm12, %v1446_v7 }
 0x1d3   : > { %v1287_v22 = vpop.permute.xlu0 %1286 }
 0x1d4   : > { %1309 = vst.msk [vmem:[#allocation3 + $0x10] sm:$0xff] %vm9720_vm9, %v1287_v22  ;;  %v1094_v10 = vpop.permute.xlu1 %1093 }
 0x1d5   : > { %1374 = vst.msk [vmem:[#allocation3 + $0x10] sm:$0xff] %vm9719_vm10, %v1352_v24 }
 0x1d6   : > { %1115 = vst.msk [vmem:[#allocation3 + $0x18] sm:$0xff] %vm9723_vm6, %v1094_v10 }
 0x1d7   : > { %1439 = vst.msk [vmem:[#allocation3 + $0x10] sm:$0xff] %vm9718_vm11, %v1417_v43  ;;  %v1423_v12 = vpop.permute.xlu0 %1422 }
 0x1d8   : > { %1180 = vst.msk [vmem:[#allocation3 + $0x18] sm:$0xff] %vm9722_vm7, %v1159_v21  ;;  %v1293_v13 = vpop.permute.xlu1 %1292 }
 0x1d9   : > { %1245 = vst.msk [vmem:[#allocation3 + $0x18] sm:$0xff] %vm9721_vm8, %v1224_v23 }
 0x1da   : > { %1310 = vst.msk [vmem:[#allocation3 + $0x18] sm:$0xff] %vm9720_vm9, %v1289_v25  ;;  %1312 = vst.msk [vmem:[#allocation3 + $0x28] sm:$0xff] %vm9720_vm9, %v1293_v13 }
 0x1db   : > { %1375 = vst.msk [vmem:[#allocation3 + $0x18] sm:$0xff] %vm9719_vm10, %v6958_v2  ;;  %v1100_v28 = vpop.permute.xlu0 %1099 }
 0x1dc   : > { %1440 = vst.msk [vmem:[#allocation3 + $0x18] sm:$0xff] %vm9718_vm11, %v6956_v63  ;;  %v1358_v16 = vpop.permute.xlu1 %1357  ;;  %v1449_v63 = vld [vmem:[#allocation3 + $0x20] sm:$0xff] }
 0x1dd   : > { %1118 = vst.msk [vmem:[#allocation3 + $0x30] sm:$0xff] %vm9723_vm6, %v1100_v28 }
 0x1de   : > { %1377 = vst.msk [vmem:[#allocation3 + $0x28] sm:$0xff] %vm9719_vm10, %v1358_v16  ;;  %v1447_v18 = vld [vmem:[#allocation3 + $0x10] sm:$0xff] }
 0x1df   : > { %1442 = vst.msk [vmem:[#allocation3 + $0x28] sm:$0xff] %vm9718_vm11, %v1423_v12  ;;  %6149 = vmatprep.mubr.msk.bf16.mxu1 %vm9717_vm12, %v1447_v18  ;;  %v1165_v9 = vpop.permute.xlu0 %1164 }
 0x1e0   : > { %1183 = vst.msk [vmem:[#allocation3 + $0x30] sm:$0xff] %vm9722_vm7, %v1165_v9  ;;  %v972_v2 = vpop.permute.xlu1 %971 }
 0x1e1   : > { %989 = vst.msk [vmem:[#allocation3 + $0x38] sm:$0xff] %vm981_vm2, %v972_v2 }
 0x1e3   : > { %v1448_v21 = vld [vmem:[#allocation3 + $0x18] sm:$0xff]  ;;  %v1230_v49 = vpop.permute.xlu0 %1229 }
 0x1e4   : > { %6150 = vmatmul.mubr.msk.bf16.gmra.mrb[12].mxu1 %vm9717_vm12, %v1448_v21  ;;  %1248 = vst.msk [vmem:[#allocation3 + $0x30] sm:$0xff] %vm9721_vm8, %v1230_v49  ;;  %v1037_v23 = vpop.permute.xlu1 %1036 }
 0x1e5   : > { %6153 = vmatprep.mubr.msk.bf16.mxu1 %vm9717_vm12, %v1449_v63  ;;  %1054 = vst.msk [vmem:[#allocation3 + $0x38] sm:$0xff] %vm1046_vm5, %v1037_v23 }
 0x1e6   : > { %v1450_v43 = vld [vmem:[#allocation3 + $0x28] sm:$0xff] }
 0x1e7   : > { %v1295_v24 = vpop.permute.xlu0 %1294 }
 0x1e8   : > { %1313 = vst.msk [vmem:[#allocation3 + $0x30] sm:$0xff] %vm9720_vm9, %v1295_v24  ;;  %v1102_v25 = vpop.permute.xlu1 %1101 }
 0x1e9   : > { %1378 = vst.msk [vmem:[#allocation3 + $0x30] sm:$0xff] %vm9719_vm10, %v1360_v45 }
 0x1ea   : > { %1119 = vst.msk [vmem:[#allocation3 + $0x38] sm:$0xff] %vm9723_vm6, %v1102_v25 }
 0x1eb   : > { %1184 = vst.msk [vmem:[#allocation3 + $0x38] sm:$0xff] %vm9722_vm7, %v6972_v55  ;;  %v1425_v44 = vpop.permute.xlu0 %1424 }
 0x1ec   : > { %6154 = vmatmul.mubr.msk.bf16.gmra.mrb[16].mxu1 %vm9717_vm12, %v1450_v43  ;;  %1249 = vst.msk [vmem:[#allocation3 + $0x38] sm:$0xff] %vm9721_vm8, %v6975_v57  ;;  %v1362_v48 = vpop.permute.xlu1 %1361 }
 0x1ed   : > { %1314 = vst.msk [vmem:[#allocation3 + $0x38] sm:$0xff] %vm9720_vm9, %v6982_v51 }
 0x1ee   : > { %1443 = vst.msk [vmem:[#allocation3 + $0x30] sm:$0xff] %vm9718_vm11, %v1425_v44 }
 0x1ef   : > { %1379 = vst.msk [vmem:[#allocation3 + $0x38] sm:$0xff] %vm9719_vm10, %v1362_v48 }
 0x1f0   : > { %v1427_v56 = vpop.permute.xlu1 %1426 }
 0x1f1   : > { %1444 = vst.msk [vmem:[#allocation3 + $0x38] sm:$0xff] %vm9718_vm11, %v1427_v56 }
 0x1f5   : > { %v1451_v45 = vld [vmem:[#allocation3 + $0x30] sm:$0xff] }
 0x1f6   : > { %6157 = vmatprep.mubr.msk.bf16.mxu1 %vm9717_vm12, %v1451_v45 }
 0x1f8   : > { %v1452_v55 = vld [vmem:[#allocation3 + $0x38] sm:$0xff] }
 0x1f9   : > { %6158 = vmatmul.mubr.msk.bf16.gmra.mrb[20].mxu1 %vm9717_vm12, %v1452_v55 }
 0x2a5   : > { %v6147_v60 = vpop.f32.mrb[8].mxu1 }
 0x2a6   : > { %v1536_v57 = vpop.f32.mrb[9].mxu1  ;;  %v7040_v52 = vmul.f32 %v6147_v60, %v6708_v33 }
 0x2a7   : > { %v6148_v17 = vpop.f32.mrb[10].mxu1  ;;  %v7032_v51 = vmul.f32 %v1536_v57, %v6702_v30 }
 0x2a8   : > { %v1539_v61 = vpop.f32.mrb[11].mxu1  ;;  %v7050_v10 = vmul.f32 %v6148_v17, %v6712_v35  ;;  %v1659_v13 = vmul.f32 %v7040_v52, %v7040_v52  ;;  %v1620_v18 = vsel %vm876_vm3, %v7040_v52, 0.0 }
 0x2a9   : > { %v7035_v62 = vmul.f32 %v1539_v61, %v6704_v31  ;;  %v1657_v4 = vmul.f32 %v7032_v51, %v7032_v51  ;;  %v1617_v7 = vsel %vm876_vm3, %v7032_v51, 0.0 }
 0x2aa   : > { %v1660_v9 = vmul.f32 %v7050_v10, %v7050_v10  ;;  %v1676_v21 = vsel %vm876_vm3, %v1659_v13, 0.0  ;;  %v1622_v24 = vsel %vm876_vm3, %v7050_v10, 0.0 }
 0x2ab   : > { %v1658_v3 = vmul.f32 %v7035_v62, %v7035_v62  ;;  %v1618_v6 = vsel %vm876_vm3, %v7035_v62, 0.0  ;;  %v1673_v28 = vsel %vm876_vm3, %v1657_v4, 0.0 }
 0x2ac   : > { %v1619_v12 = vadd.f32 %v1618_v6, %v1617_v7  ;;  %v1678_v48 = vsel %vm876_vm3, %v1660_v9, 0.0 }
 0x2ad   : > { %v1674_v22 = vsel %vm876_vm3, %v1658_v3, 0.0 }
 0x2ae   : > { %v1675_v16 = vadd.f32 %v1674_v22, %v1673_v28  ;;  %v1621_v2 = vadd.f32 %v1620_v18, %v1619_v12 }
 0x2b0   : > { %v1677_v49 = vadd.f32 %v1676_v21, %v1675_v16  ;;  %v1623_v56 = vadd.f32 %v1622_v24, %v1621_v2 }
 0x2b2   : > { %v1679_v3 = vadd.f32 %v1678_v48, %v1677_v49 }
 0x2b7   : > { %v6151_v63 = vpop.f32.mrb[12].mxu1 }
 0x2b8   : > { %v1552_v23 = vpop.f32.mrb[13].mxu1  ;;  %v7063_v25 = vmul.f32 %v6151_v63, %v6710_v34 }
 0x2b9   : > { %v7066_v43 = vmul.f32 %v1552_v23, %v6706_v32  ;;  %v6152_v44 = vpop.f32.mrb[14].mxu1 }
 0x2ba   : > { %v1555_v45 = vpop.f32.mrb[15].mxu1  ;;  %v7074_v57 = vmul.f32 %v6152_v44, %v6720_v39  ;;  %v1663_v4 = vmul.f32 %v7063_v25, %v7063_v25  ;;  %v1628_v28 = vsel %vm876_vm3, %v7063_v25, 0.0 }
 0x2bb   : > { %v1624_v55 = vsel %vm876_vm3, %v7066_v43, 0.0  ;;  %v1661_v60 = vmul.f32 %v7066_v43, %v7066_v43  ;;  %v7077_v17 = vmul.f32 %v1555_v45, %v6716_v37 }
 0x2bc   : > { %v1625_v61 = vadd.f32 %v1624_v55, %v1623_v56  ;;  %v1664_v16 = vmul.f32 %v7074_v57, %v7074_v57  ;;  %v1684_v49 = vsel %vm876_vm3, %v1663_v4, 0.0  ;;  %v1630_v23 = vsel %vm876_vm3, %v7074_v57, 0.0 }
 0x2bd   : > { %v1680_v6 = vsel %vm876_vm3, %v1661_v60, 0.0  ;;  %v1626_v7 = vsel %vm876_vm3, %v7077_v17, 0.0  ;;  %v1662_v22 = vmul.f32 %v7077_v17, %v7077_v17 }
 0x2be   : > { %v1681_v12 = vadd.f32 %v1680_v6, %v1679_v3  ;;  %v1627_v13 = vadd.f32 %v1626_v7, %v1625_v61  ;;  %v1686_v55 = vsel %vm876_vm3, %v1664_v16, 0.0 }
 0x2bf   : > { %v1682_v18 = vsel %vm876_vm3, %v1662_v22, 0.0  ;;  %v6155_v9 = vpop.f32.mrb[16].mxu1 }
 0x2c0   : > { %v1629_v2 = vadd.f32 %v1628_v28, %v1627_v13  ;;  %v1683_v21 = vadd.f32 %v1682_v18, %v1681_v12  ;;  %v1568_v63 = vpop.f32.mrb[17].mxu1  ;;  %v7107_v22 = vmul.f32 %v6155_v9, %v6718_v38 }
 0x2c1   : > { %v7095_v24 = vmul.f32 %v1568_v63, %v6714_v36  ;;  %v6156_v44 = vpop.f32.mrb[18].mxu1 }
 0x2c2   : > { %v1685_v48 = vadd.f32 %v1684_v49, %v1683_v21  ;;  %v1631_v56 = vadd.f32 %v1630_v23, %v1629_v2  ;;  %v1571_v45 = vpop.f32.mrb[19].mxu1  ;;  %v7115_v18 = vmul.f32 %v6156_v44, %v6733_v47  ;;  %v1667_v21 = vmul.f32 %v7107_v22, %v7107_v22 }
 0x2c3   : > { %v1632_v60 = vsel %vm876_vm3, %v7095_v24, 0.0  ;;  %v1665_v61 = vmul.f32 %v7095_v24, %v7095_v24  ;;  %v7103_v3 = vmul.f32 %v1571_v45, %v6724_v41  ;;  %v1636_v9 = vsel %vm876_vm3, %v7107_v22, 0.0 }
 0x2c4   : > { %v1687_v4 = vadd.f32 %v1686_v55, %v1685_v48  ;;  %v1633_v6 = vadd.f32 %v1632_v60, %v1631_v56  ;;  %v1668_v49 = vmul.f32 %v7115_v18, %v7115_v18  ;;  %v1692_v48 = vsel %vm876_vm3, %v1667_v21, 0.0 }
 0x2c5   : > { %v1688_v7 = vsel %vm876_vm3, %v1665_v61, 0.0  ;;  %v1634_v12 = vsel %vm876_vm3, %v7103_v3, 0.0  ;;  %v1666_v13 = vmul.f32 %v7103_v3, %v7103_v3  ;;  %v1638_v44 = vsel %vm876_vm3, %v7115_v18, 0.0 }
 0x2c6   : > { %v1689_v28 = vadd.f32 %v1688_v7, %v1687_v4  ;;  %v1635_v2 = vadd.f32 %v1634_v12, %v1633_v6  ;;  %v1694_v6 = vsel %vm876_vm3, %v1668_v49, 0.0 }
 0x2c7   : > { %v1690_v16 = vsel %vm876_vm3, %v1666_v13, 0.0 }
 0x2c8   : > { %v1691_v63 = vadd.f32 %v1690_v16, %v1689_v28  ;;  %v1637_v23 = vadd.f32 %v1636_v9, %v1635_v2 }
 0x2ca   : > { %v1693_v45 = vadd.f32 %v1692_v48, %v1691_v63  ;;  %v1639_v7 = vadd.f32 %v1638_v44, %v1637_v23 }
 0x2cc   : > { %v6159_v56 = vpop.f32.mrb[20].mxu1  ;;  %v1695_v63 = vadd.f32 %v1694_v6, %v1693_v45 }
 0x2cd   : > { %v1584_v55 = vpop.f32.mrb[21].mxu1  ;;  %v7127_v60 = vmul.f32 %v6159_v56, %v6726_v42 }
 0x2ce   : > { %v7130_v61 = vmul.f32 %v1584_v55, %v6722_v40  ;;  %v6160_v4 = vpop.f32.mrb[22].mxu1 }
 0x2cf   : > { %v1587_v12 = vpop.f32.mrb[23].mxu1  ;;  %v7138_v16 = vmul.f32 %v6160_v4, %v6814_v29  ;;  %v1671_v9 = vmul.f32 %v7127_v60, %v7127_v60  ;;  %v1644_v44 = vsel %vm876_vm3, %v7127_v60, 0.0 }
 0x2d0   : > { %v1640_v13 = vsel %vm876_vm3, %v7130_v61, 0.0  ;;  %v1669_v28 = vmul.f32 %v7130_v61, %v7130_v61  ;;  %v7141_v2 = vmul.f32 %v1587_v12, %v6778_v8 }
 0x2d1   : > { %v1641_v21 = vadd.f32 %v1640_v13, %v1639_v7  ;;  %v1672_v4 = vmul.f32 %v7138_v16, %v7138_v16  ;;  %v1646_v12 = vsel %vm876_vm3, %v7138_v16, 0.0  ;;  %v1700_v13 = vsel %vm876_vm3, %v1671_v9, 0.0 }
 0x2d2   : > { %v1696_v49 = vsel %vm876_vm3, %v1669_v28, 0.0  ;;  %v1642_v23 = vsel %vm876_vm3, %v7141_v2, 0.0  ;;  %v1670_v48 = vmul.f32 %v7141_v2, %v7141_v2 }
 0x2d3   : > { %v1643_v56 = vadd.f32 %v1642_v23, %v1641_v21  ;;  %v1697_v55 = vadd.f32 %v1696_v49, %v1695_v63  ;;  %v1702_v21 = vsel %vm876_vm3, %v1672_v4, 0.0 }
 0x2d4   : > { %v1698_v45 = vsel %vm876_vm3, %v1670_v48, 0.0 }
 0x2d5   : > { %v1645_v6 = vadd.f32 %v1644_v44, %v1643_v56  ;;  %v1699_v7 = vadd.f32 %v1698_v45, %v1697_v55 }
 0x2d7   : > { %v1647_v28 = vadd.f32 %v1646_v12, %v1645_v6  ;;  %v1701_v26 = vadd.f32 %v1700_v13, %v1699_v7 }
 0x2d9   : > { %1648 = vadd.xlane.f32.xlu0 %v1647_v28  ;;  %v1703_v63 = vadd.f32 %v1702_v21, %v1701_v26 }
 0x2db   : > { %1704 = vadd.xlane.f32.xlu1 %v1703_v63 }
 0x366   : > { %v1649_v49 = vpop.xlane.xlu0 %1648 }
 0x367   : > { %v1650_v23 = vrot.slane %v1649_v49, 4 }
 0x368   : > { %v1705_v14 = vpop.xlane.xlu1 %1704 }
 0x369   : > { %v1651_v46 = vadd.f32 %v1650_v23, %v1649_v49  ;;  %v1706_v19 = vrot.slane %v1705_v14, 4 }
 0x36b   : > { %v1707_v48 = vadd.f32 %v1706_v19, %v1705_v14  ;;  %v1652_v56 = vrot.slane %v1651_v46, 2 }
 0x36d   : > { %v1653_v55 = vadd.f32 %v1652_v56, %v1651_v46  ;;  %v1708_v44 = vrot.slane %v1707_v48, 2 }
 0x36f   : > { %v1654_v45 = vrot.slane %v1653_v55, 1  ;;  %v1709_v0 = vadd.f32 %v1708_v44, %v1707_v48 }
 0x371   : > { %v1655_v53 = vadd.f32 %v1654_v45, %v1653_v55  ;;  %v1710_v9 = vrot.slane %v1709_v0, 1 }
 0x373   : > { %6237 = vpush %v1655_v53  ;;  %v1711_v6 = vadd.f32 %v1710_v9, %v1709_v0  ;;  %v2678_v53 = vld [vmem:[#allocation2 + $0x98] sm:$0xff]  ;;  %v2679_v0 = vld [vmem:[#allocation2 + $0xa0] sm:$0xff] }
 0x374   : > { %v2687_v13 = vpack.c.bf16 %v2679_v0, %v2678_v53 }
 0x375   : > { %6239 = vpush %v1711_v6 }
 0x376   : > { %2710 = vrot.lane.b32.xlu1 %v2687_v13, %s9730_s30 }
 0x3a4   : > { %s6238_s23 = spop %6237 }
 0x3a5   : > { %s1713_s26 = smul.f32 0.00390625, %s6238_s23  ;;  %s9950_s23 = smov 12  }
 0x3a6   : > { %s6240_s28 = spop %6239 }
 0x3a7   : > { %s1715_s29 = smul.f32 %s1713_s26, %s1713_s26  ;;  %v1718_v26 = vstv %s1713_s26  ;;  %s9951_s26 = smov 16  }
 0x3a8   : > { %s1714_s22 = smul.f32 0.00390625, %s6240_s28  ;;  %v1719_v46 = vsub.f32 %v7032_v51, %v1718_v26  ;;  %v1720_v4 = vsub.f32 %v7035_v62, %v1718_v26  ;;  %v1721_v7 = vsub.f32 %v7040_v52, %v1718_v26  ;;  %v1722_v12 = vsub.f32 %v7050_v10, %v1718_v26  ;;  %s9952_s28 = smov 20  }
 0x3a9   : > { %v1723_v28 = vsub.f32 %v7066_v43, %v1718_v26  ;;  %v1724_v21 = vsub.f32 %v7077_v17, %v1718_v26  ;;  %v1725_v63 = vsub.f32 %v7063_v25, %v1718_v26  ;;  %v1726_v23 = vsub.f32 %v7074_v57, %v1718_v26 }
 0x3aa   : > { %s1716_s20 = ssub.f32 %s1714_s22, %s1715_s29  ;;  %v1727_v51 = vsub.f32 %v7095_v24, %v1718_v26  ;;  %v1728_v48 = vsub.f32 %v7103_v3, %v1718_v26  ;;  %v1729_v62 = vsub.f32 %v7107_v22, %v1718_v26  ;;  %v1730_v52 = vsub.f32 %v7115_v18, %v1718_v26  ;;  %v6018_v24 = vld [vmem:[%s9614_s6] ss:$0 sm:$0xff]  ;;  %s9954_s29 = smov 32  }
 0x3ab   : > { %v1731_v10 = vsub.f32 %v7130_v61, %v1718_v26  ;;  %v1732_v43 = vsub.f32 %v7141_v2, %v1718_v26  ;;  %v1733_v17 = vsub.f32 %v7127_v60, %v1718_v26  ;;  %v1734_v3 = vsub.f32 %v7138_v16, %v1718_v26 }
 0x3ac   : > { %s1717_s19 = smax.f32 %s9724_s1, %s1716_s20 }
 0x3ad   : > { %s1735_s0 = sadd.f32 1e-05, %s1717_s19  ;;  %s9953_s19 = smov 24  }
 0x3af   : > { %v1736_v14 = vstv %s1735_s0 }
 0x3b0   : > { %6309 = vrsqrt.f32 %v1736_v14 }
 0x3ba   : > { %v6310_v19 = vpop.eup %6309 }
 0x3bb   : > { %6241 = vpush %v6310_v19 }
 0x3ec   : > { %s6242_s18 = spop %6241 }
 0x3ed   : > { %v1739_v49 = vstv %s6242_s18 }
 0x3ee   : > { %v1740_v25 = vmul.f32 %v1739_v49, %v1719_v46  ;;  %v1741_v56 = vmul.f32 %v1739_v49, %v1720_v4  ;;  %v1742_v55 = vmul.f32 %v1739_v49, %v1721_v7  ;;  %v1743_v57 = vmul.f32 %v1739_v49, %v1722_v12  ;;  %v6019_v7 = vld [vmem:[%s9615_s7] ss:$0 sm:$0xff] }
 0x3ef   : > { %v1744_v22 = vmul.f32 %v1739_v49, %v1723_v28  ;;  %v1745_v44 = vmul.f32 %v1739_v49, %v1724_v21  ;;  %v1746_v45 = vmul.f32 %v1739_v49, %v1725_v63  ;;  %v1747_v18 = vmul.f32 %v1739_v49, %v1726_v23 }
 0x3f0   : > { %v1748_v9 = vmul.f32 %v1739_v49, %v1727_v51  ;;  %v1749_v61 = vmul.f32 %v1739_v49, %v1728_v48  ;;  %v1750_v6 = vmul.f32 %v1739_v49, %v1729_v62  ;;  %v1751_v2 = vmul.f32 %v1739_v49, %v1730_v52 }
 0x3f1   : > { %v1752_v14 = vmul.f32 %v1739_v49, %v1731_v10  ;;  %v1753_v60 = vmul.f32 %v1739_v49, %v1732_v43  ;;  %v1754_v19 = vmul.f32 %v1739_v49, %v1733_v17  ;;  %v1762_v46 = vmul.f32 %v6018_v24, %v1740_v25 }
 0x3f2   : > { %v1763_v53 = vmul.f32 %v6018_v24, %v1741_v56  ;;  %v1764_v0 = vmul.f32 %v6018_v24, %v1742_v55  ;;  %v1765_v4 = vmul.f32 %v6018_v24, %v1743_v57  ;;  %v1755_v16 = vmul.f32 %v1739_v49, %v1734_v3 }
 0x3f3   : > { %v1766_v26 = vmul.f32 %v6018_v24, %v1744_v22  ;;  %v1767_v12 = vmul.f32 %v6018_v24, %v1745_v44  ;;  %v1768_v13 = vmul.f32 %v6018_v24, %v1746_v45  ;;  %v1769_v28 = vmul.f32 %v6018_v24, %v1747_v18  ;;  %v2280_v45 = vld [vmem:[#allocation2 + $0x8] sm:$0xff]  ;;  %v2281_v18 = vld [vmem:[#allocation2 + $0x10] sm:$0xff] }
 0x3f4   : > { %v1770_v21 = vmul.f32 %v6018_v24, %v1748_v9  ;;  %v1771_v63 = vmul.f32 %v6018_v24, %v1749_v61  ;;  %v1772_v23 = vmul.f32 %v6018_v24, %v1750_v6  ;;  %v1773_v51 = vmul.f32 %v6018_v24, %v1751_v2 }
 0x3f5   : > { %v1774_v48 = vmul.f32 %v6018_v24, %v1752_v14  ;;  %v1775_v62 = vmul.f32 %v6018_v24, %v1753_v60  ;;  %v1776_v52 = vmul.f32 %v6018_v24, %v1754_v19  ;;  %v1784_v10 = vadd.f32 %v6019_v7, %v1762_v46 }
 0x3f6   : > { %v1785_v43 = vadd.f32 %v6019_v7, %v1763_v53  ;;  %v1786_v17 = vadd.f32 %v6019_v7, %v1764_v0  ;;  %v1787_v25 = vadd.f32 %v6019_v7, %v1765_v4  ;;  %v1777_v56 = vmul.f32 %v6018_v24, %v1755_v16 }
 0x3f7   : > { %v1788_v55 = vadd.f32 %v6019_v7, %v1766_v26  ;;  %v1789_v57 = vadd.f32 %v6019_v7, %v1767_v12  ;;  %v1790_v5 = vadd.f32 %v6019_v7, %v1768_v13  ;;  %v1791_v49 = vadd.f32 %v6019_v7, %v1769_v28 }
 0x3f8   : > { %v1792_v3 = vadd.f32 %v6019_v7, %v1770_v21  ;;  %v1793_v22 = vadd.f32 %v6019_v7, %v1771_v63  ;;  %v1794_v44 = vadd.f32 %v6019_v7, %v1772_v23  ;;  %v1795_v9 = vadd.f32 %v6019_v7, %v1773_v51 }
 0x3f9   : > { %v1796_v61 = vadd.f32 %v6019_v7, %v1774_v48  ;;  %v1797_v6 = vadd.f32 %v6019_v7, %v1775_v62  ;;  %v1798_v2 = vadd.f32 %v6019_v7, %v1776_v52  ;;  %v7183_v14 = vmul.f32 0.5, %v1784_v10 }
 0x3fa   : > { %v7185_v60 = vmul.f32 0.5, %v1785_v43  ;;  %v7187_v19 = vmul.f32 0.5, %v1786_v17  ;;  %v7189_v24 = vmul.f32 0.5, %v1787_v25  ;;  %v7191_v46 = vmul.f32 0.5, %v1788_v55 }
 0x3fb   : > { %9867 = vst [vmem:[#allocation36_spill] sm:$0xff] %v7183_v14  ;;  %v7193_v53 = vmul.f32 0.5, %v1789_v57  ;;  %v7195_v0 = vmul.f32 0.5, %v1790_v5  ;;  %v2296_v4 = vpack.c.bf16 %v2281_v18, %v2280_v45  ;;  %v7197_v16 = vmul.f32 0.5, %v1791_v49 }
 0x3fc   : > { %9868 = vst [vmem:[#allocation37_spill] sm:$0xff] %v7185_v60  ;;  %9869 = vst [vmem:[#allocation38_spill] sm:$0xff] %v7187_v19  ;;  %v7199_v26 = vmul.f32 0.5, %v1792_v3  ;;  %v7201_v12 = vmul.f32 0.5, %v1793_v22  ;;  %v7203_v13 = vmul.f32 0.5, %v1794_v44  ;;  %v7205_v28 = vmul.f32 0.5, %v1795_v9 }
 0x3fd   : > { %9870 = vst [vmem:[#allocation39_spill] sm:$0xff] %v7189_v24  ;;  %9871 = vst [vmem:[#allocation40_spill] sm:$0xff] %v7191_v46  ;;  %v7207_v21 = vmul.f32 0.5, %v1796_v61  ;;  %v7209_v63 = vmul.f32 0.70710677, %v1784_v10  ;;  %2312 = vrot.lane.b32.xlu0 %v2296_v4, %s9728_s27  ;;  %v1799_v51 = vadd.f32 %v6019_v7, %v1777_v56  ;;  %v7299_v34 = vmul.f32 0.5, %v1797_v6 }
 0x3fe   : > { %9872 = vst [vmem:[#allocation41_spill] sm:$0xff] %v7193_v53  ;;  %9873 = vst [vmem:[#allocation42_spill] sm:$0xff] %v7195_v0  ;;  %v7211_v23 = vmul.f32 0.70710677, %v1785_v43  ;;  %v7214_v48 = vmul.f32 0.70710677, %v1786_v17 }
 0x3ff   : > { %9874 = vst [vmem:[#allocation43_spill] sm:$0xff] %v7197_v16  ;;  %9875 = vst [vmem:[#allocation44_spill] sm:$0xff] %v7199_v26  ;;  %v7216_v62 = vmul.f32 0.70710677, %v1787_v25  ;;  %v7218_v52 = vmul.f32 0.70710677, %v1788_v55 }
 0x400   : > { %9876 = vst [vmem:[#allocation45_spill] sm:$0xff] %v7201_v12  ;;  %9877 = vst [vmem:[#allocation46_spill] sm:$0xff] %v7203_v13  ;;  %v7220_v45 = vmul.f32 0.70710677, %v1789_v57  ;;  %v7222_v18 = vmul.f32 0.70710677, %v1790_v5 }
 0x401   : > { %9878 = vst [vmem:[#allocation47_spill] sm:$0xff] %v7205_v28  ;;  %9879 = vst [vmem:[#allocation48_spill] sm:$0xff] %v7207_v21  ;;  %v7224_v58 = vmul.f32 0.70710677, %v1791_v49  ;;  %v7226_v20 = vmul.f32 0.70710677, %v1792_v3 }
 0x402   : > { %9880 = vst [vmem:[#allocation49_spill] sm:$0xff] %v7209_v63  ;;  %9881 = vst [vmem:[#allocation50_spill] sm:$0xff] %v7211_v23  ;;  %v7228_v10 = vmul.f32 0.70710677, %v1793_v22  ;;  %v7230_v43 = vmul.f32 0.70710677, %v1794_v44 }
 0x403   : > { %9882 = vst [vmem:[#allocation51_spill] sm:$0xff] %v7214_v48  ;;  %9883 = vst [vmem:[#allocation52_spill] sm:$0xff] %v7216_v62  ;;  %v7232_v4 = vmul.f32 0.70710677, %v1795_v9  ;;  %v7234_v7 = vmul.f32 0.70710677, %v1796_v61 }
 0x404   : > { %9884 = vst [vmem:[#allocation53_spill] sm:$0xff] %v7218_v52  ;;  %9885 = vst [vmem:[#allocation54_spill] sm:$0xff] %v7220_v45  ;;  %v7236_v17 = vmul.f32 0.70710677, %v1797_v6  ;;  %v7238_v25 = vmul.f32 0.70710677, %v1798_v2 }
 0x405   : > { %9886 = vst [vmem:[#allocation55_spill] sm:$0xff] %v7222_v18  ;;  %9887 = vst [vmem:[#allocation56_spill] sm:$0xff] %v7224_v58  ;;  %v7240_v56 = vmul.f32 0.70710677, %v1799_v51  ;;  %v7243_v5 = vand.u32 2147483647, %v7209_v63 }
 0x406   : > { %9888 = vst [vmem:[#allocation57_spill] sm:$0xff] %v7226_v20  ;;  %9889 = vst [vmem:[#allocation58_spill] sm:$0xff] %v7228_v10  ;;  %v7246_v55 = vand.u32 2147483647, %v7211_v23  ;;  %v7249_v57 = vand.u32 2147483647, %v7214_v48 }
 0x407   : > { %9890 = vst [vmem:[#allocation59_spill] sm:$0xff] %v7230_v43  ;;  %9891 = vst [vmem:[#allocation60_spill] sm:$0xff] %v7232_v4  ;;  %v7252_v49 = vand.u32 2147483647, %v7216_v62  ;;  %v7255_v3 = vand.u32 2147483647, %v7218_v52 }
 0x408   : > { %9892 = vst [vmem:[#allocation61_spill] sm:$0xff] %v7234_v7  ;;  %9893 = vst [vmem:[#allocation62_spill] sm:$0xff] %v7236_v17  ;;  %v7258_v22 = vand.u32 2147483647, %v7220_v45  ;;  %v7261_v44 = vand.u32 2147483647, %v7222_v18 }
 0x409   : > { %9894 = vst [vmem:[#allocation63_spill] sm:$0xff] %v7238_v25  ;;  %9895 = vst [vmem:[#allocation64_spill] sm:$0xff] %v7240_v56  ;;  %v7264_v9 = vand.u32 2147483647, %v7224_v58  ;;  %v7267_v61 = vand.u32 2147483647, %v7226_v20 }
 0x40a   : > { %v7270_v11 = vand.u32 2147483647, %v7228_v10  ;;  %v7273_v27 = vand.u32 2147483647, %v7230_v43  ;;  %v7276_v15 = vand.u32 2147483647, %v7232_v4 }
 0x40b   : > { %v7279_v59 = vand.u32 2147483647, %v7234_v7  ;;  %v7282_v50 = vand.u32 2147483647, %v7236_v17  ;;  %v7285_v1 = vand.u32 2147483647, %v7238_v25 }
 0x40c   : > { %v1848_v54 = vmul.f32 0.3275911, %v7243_v5  ;;  %v7289_v29 = vand.u32 2147483647, %v7240_v56  ;;  %v1849_v42 = vmul.f32 0.3275911, %v7246_v55 }
 0x40d   : > { %v1850_v8 = vmul.f32 0.3275911, %v7249_v57  ;;  %v1851_v40 = vmul.f32 0.3275911, %v7252_v49  ;;  %v1852_v47 = vmul.f32 0.3275911, %v7255_v3 }
 0x40e   : > { %v1853_v38 = vmul.f32 0.3275911, %v7258_v22  ;;  %v1854_v41 = vmul.f32 0.3275911, %v7261_v44  ;;  %v1855_v36 = vmul.f32 0.3275911, %v7264_v9 }
 0x40f   : > { %v1856_v39 = vmul.f32 0.3275911, %v7267_v61  ;;  %9896 = vst [vmem:[#allocation65_spill] sm:$0xff] %v7299_v34  ;;  %v1857_v37 = vmul.f32 0.3275911, %v7270_v11  ;;  %v1864_v35 = vadd.f32 1.0, %v1848_v54 }
 0x410   : > { %v1858_v32 = vmul.f32 0.3275911, %v7273_v27  ;;  %v7303_v33 = vmul.f32 0.5, %v1798_v2  ;;  %v1859_v31 = vmul.f32 0.3275911, %v7276_v15  ;;  %v1865_v21 = vadd.f32 1.0, %v1849_v42 }
 0x411   : > { %v1860_v30 = vmul.f32 0.3275911, %v7279_v59  ;;  %v7307_v28 = vmul.f32 0.5, %v1799_v51  ;;  %v1861_v13 = vmul.f32 0.3275911, %v7282_v50  ;;  %v1866_v6 = vadd.f32 1.0, %v1850_v8 }
 0x412   : > { %9897 = vst [vmem:[#allocation66_spill] sm:$0xff] %v7303_v33  ;;  %v1862_v12 = vmul.f32 0.3275911, %v7285_v1  ;;  %v1863_v34 = vmul.f32 0.3275911, %v7289_v29  ;;  %v1867_v26 = vadd.f32 1.0, %v1851_v40  ;;  %6311 = vrcp.f32 %v1864_v35 }
 0x413   : > { %9898 = vst [vmem:[#allocation67_spill] sm:$0xff] %v7307_v28  ;;  %v1868_v16 = vadd.f32 1.0, %v1852_v47  ;;  %v1869_v0 = vadd.f32 1.0, %v1853_v38  ;;  %v1870_v54 = vadd.f32 1.0, %v1854_v41  ;;  %v1871_v2 = vadd.f32 1.0, %v1855_v36 }
 0x414   : > { %v1872_v33 = vadd.f32 1.0, %v1856_v39  ;;  %v1873_v53 = vadd.f32 1.0, %v1857_v37  ;;  %v1874_v46 = vadd.f32 1.0, %v1858_v32  ;;  %v1875_v24 = vadd.f32 1.0, %v1859_v31 }
 0x415   : > { %6313 = vrcp.f32 %v1865_v21  ;;  %v1876_v42 = vadd.f32 1.0, %v1860_v30  ;;  %v1877_v51 = vadd.f32 1.0, %v1861_v13  ;;  %v1878_v28 = vadd.f32 1.0, %v1862_v12 }
 0x416   : > { %6315 = vrcp.f32 %v1866_v6  ;;  %v1879_v19 = vadd.f32 1.0, %v1863_v34  ;;  %v2040_v8 = vsub.f32 0.0, %v7243_v5  ;;  %v2041_v40 = vsub.f32 0.0, %v7246_v55 }
 0x417   : > { %6317 = vrcp.f32 %v1867_v26  ;;  %v2042_v38 = vsub.f32 0.0, %v7249_v57  ;;  %v2043_v36 = vsub.f32 0.0, %v7252_v49  ;;  %v2044_v35 = vsub.f32 0.0, %v7255_v3 }
 0x418   : > { %6319 = vrcp.f32 %v1868_v16  ;;  %v2045_v31 = vsub.f32 0.0, %v7258_v22  ;;  %v2046_v30 = vsub.f32 0.0, %v7261_v44  ;;  %v2047_v32 = vsub.f32 0.0, %v7264_v9 }
 0x419   : > { %6321 = vrcp.f32 %v1869_v0  ;;  %v2048_v34 = vsub.f32 0.0, %v7267_v61  ;;  %v2049_v37 = vsub.f32 0.0, %v7270_v11  ;;  %v2050_v39 = vsub.f32 0.0, %v7273_v27 }
 0x41a   : > { %6323 = vrcp.f32 %v1870_v54  ;;  %v2051_v41 = vsub.f32 0.0, %v7276_v15  ;;  %v2052_v47 = vsub.f32 0.0, %v7279_v59  ;;  %v2056_v12 = vmul.f32 %v2040_v8, %v7243_v5 }
 0x41b   : > { %6325 = vrcp.f32 %v1871_v2  ;;  %v2057_v13 = vmul.f32 %v2041_v40, %v7246_v55  ;;  %v2058_v21 = vmul.f32 %v2042_v38, %v7249_v57  ;;  %v2059_v6 = vmul.f32 %v2043_v36, %v7252_v49 }
 0x41c   : > { %6327 = vrcp.f32 %v1872_v33  ;;  %v7332_v54 = vpop.eup %6311  ;;  %v2060_v2 = vmul.f32 %v2044_v35, %v7255_v3  ;;  %v2061_v33 = vmul.f32 %v2045_v31, %v7258_v22  ;;  %v2062_v16 = vmul.f32 %v2046_v30, %v7261_v44 }
 0x41d   : > { %6329 = vrcp.f32 %v1873_v53  ;;  %v1896_v53 = vmul.f32 1.0614054, %v7332_v54  ;;  %v7341_v5 = vmul.f32 %v2047_v32, %v7264_v9  ;;  %v7344_v55 = vmul.f32 %v2048_v34, %v7267_v61 }
 0x41e   : > { %6331 = vrcp.f32 %v1874_v46  ;;  %v7350_v49 = vmul.f32 %v2049_v37, %v7270_v11  ;;  %v7353_v3 = vmul.f32 %v2050_v39, %v7273_v27  ;;  %v7358_v9 = vmul.f32 1.442695, %v2056_v12 }
 0x41f   : > { %v7337_v0 = vpop.eup %6313  ;;  %6333 = vrcp.f32 %v1875_v24  ;;  %v1912_v44 = vadd.f32 -1.4531521, %v1896_v53  ;;  %v7363_v40 = vmul.f32 1.442695, %v2057_v13  ;;  %v7373_v31 = vmul.f32 %v2051_v41, %v7276_v15 }
 0x420   : > { %v7346_v57 = vpop.eup %6315  ;;  %6335 = vrcp.f32 %v1876_v42  ;;  %v1897_v46 = vmul.f32 1.0614054, %v7337_v0  ;;  %v7377_v30 = vmul.f32 1.442695, %v2059_v6  ;;  %v7383_v34 = vmul.f32 %v2052_v47, %v7279_v59 }
 0x421   : > { %v7355_v24 = vpop.eup %6317  ;;  %6337 = vrcp.f32 %v1877_v51  ;;  %v1898_v22 = vmul.f32 1.0614054, %v7346_v57  ;;  %v1928_v51 = vmul.f32 %v7332_v54, %v1912_v44  ;;  %v7385_v37 = vmul.f32 1.442695, %v2060_v2 }
 0x422   : > { %v7360_v61 = vpop.eup %6319  ;;  %6339 = vrcp.f32 %v1878_v28  ;;  %v1899_v42 = vmul.f32 1.0614054, %v7355_v24  ;;  %v1913_v8 = vadd.f32 -1.4531521, %v1897_v46  ;;  %v7375_v28 = vmul.f32 1.442695, %v2058_v21 }
 0x423   : > { %v7365_v11 = vpop.eup %6321  ;;  %6341 = vrcp.f32 %v1879_v19  ;;  %v1900_v27 = vmul.f32 1.0614054, %v7360_v61  ;;  %v1914_v38 = vadd.f32 -1.4531521, %v1898_v22  ;;  %v7387_v39 = vmul.f32 1.442695, %v2061_v33 }
 0x424   : > { %v7369_v36 = vpop.eup %6323  ;;  %v1901_v35 = vmul.f32 1.0614054, %v7365_v11  ;;  %v1915_v41 = vadd.f32 -1.4531521, %v1899_v42  ;;  %v1929_v13 = vmul.f32 %v7337_v0, %v1913_v8  ;;  %v7393_v21 = vmul.f32 1.442695, %v2062_v16 }
 0x425   : > { %v7379_v32 = vpop.eup %6325  ;;  %v1902_v19 = vmul.f32 1.0614054, %v7369_v36  ;;  %v1916_v46 = vadd.f32 -1.4531521, %v1900_v27  ;;  %v1930_v59 = vmul.f32 %v7346_v57, %v1914_v38  ;;  %v1944_v47 = vadd.f32 1.4214138, %v1928_v51 }
 0x426   : > { %v7389_v12 = vpop.eup %6327  ;;  %v1903_v15 = vmul.f32 1.0614054, %v7379_v32  ;;  %v1917_v22 = vadd.f32 -1.4531521, %v1901_v35  ;;  %v9899_v42 = vsub.f32 0.0, %v7282_v50  ;;  %v9900_v38 = vsub.f32 0.0, %v7285_v1 }
 0x427   : > { %v7395_v6 = vpop.eup %6329  ;;  %v1904_v53 = vmul.f32 1.0614054, %v7389_v12  ;;  %v1918_v44 = vadd.f32 -1.4531521, %v1902_v19  ;;  %v1931_v56 = vmul.f32 %v7355_v24, %v1915_v41  ;;  %6343 = vpow2.f32 %v7358_v9 }
 0x428   : > { %v7399_v2 = vpop.eup %6331  ;;  %v1905_v33 = vmul.f32 1.0614054, %v7395_v6  ;;  %v7405_v8 = vmul.f32 %v9899_v42, %v7282_v50  ;;  %v1919_v60 = vadd.f32 -1.4531521, %v1903_v15  ;;  %v7413_v51 = vmul.f32 %v9900_v38, %v7285_v1 }
 0x429   : > { %v7407_v16 = vpop.eup %6333  ;;  %v1906_v26 = vmul.f32 1.0614054, %v7399_v2  ;;  %v1920_v27 = vadd.f32 -1.4531521, %v1904_v53  ;;  %v1945_v50 = vadd.f32 1.4214138, %v1929_v13  ;;  %v1932_v15 = vmul.f32 %v7360_v61, %v1916_v46 }
 0x42a   : > { %v7415_v14 = vpop.eup %6335  ;;  %v1907_v35 = vmul.f32 1.0614054, %v7407_v16  ;;  %v1921_v19 = vadd.f32 -1.4531521, %v1905_v33  ;;  %v1946_v53 = vadd.f32 1.4214138, %v1930_v59  ;;  %v1933_v4 = vmul.f32 %v7365_v11, %v1917_v22 }
 0x42b   : > { %v7419_v42 = vpop.eup %6337  ;;  %v1908_v25 = vmul.f32 1.0614054, %v7415_v14  ;;  %v1922_v17 = vadd.f32 -1.4531521, %v1906_v26  ;;  %v1934_v33 = vmul.f32 %v7369_v36, %v1918_v44  ;;  %v1935_v10 = vmul.f32 %v7379_v32, %v1919_v60 }
 0x42c   : > { %v7423_v7 = vpop.eup %6339  ;;  %v1909_v1 = vmul.f32 1.0614054, %v7419_v42  ;;  %v1923_v38 = vadd.f32 -1.4531521, %v1907_v35  ;;  %v1936_v26 = vmul.f32 %v7389_v12, %v1920_v27  ;;  %v1937_v20 = vmul.f32 %v7395_v6, %v1921_v19 }
 0x42d   : > { %v7428_v43 = vpop.eup %6341  ;;  %v1910_v41 = vmul.f32 1.0614054, %v7423_v7  ;;  %v1924_v13 = vadd.f32 -1.4531521, %v1908_v25  ;;  %v1938_v35 = vmul.f32 %v7399_v2, %v1922_v17  ;;  %v1947_v18 = vadd.f32 1.4214138, %v1931_v56 }
 0x42e   : > { %v1911_v46 = vmul.f32 1.0614054, %v7428_v43  ;;  %v1925_v59 = vadd.f32 -1.4531521, %v1909_v1  ;;  %v1939_v22 = vmul.f32 %v7407_v16, %v1923_v38  ;;  %v1948_v52 = vadd.f32 1.4214138, %v1932_v15 }
 0x42f   : > { %v1926_v58 = vadd.f32 -1.4531521, %v1910_v41  ;;  %v1940_v44 = vmul.f32 %v7415_v14, %v1924_v13  ;;  %v1949_v60 = vadd.f32 1.4214138, %v1933_v4  ;;  %v1950_v62 = vadd.f32 1.4214138, %v1934_v33 }
 0x430   : > { %v1927_v45 = vadd.f32 -1.4531521, %v1911_v46  ;;  %v1941_v25 = vmul.f32 %v7419_v42, %v1925_v59  ;;  %v1951_v48 = vadd.f32 1.4214138, %v1935_v10  ;;  %v1952_v1 = vadd.f32 1.4214138, %v1936_v26 }
 0x431   : > { %v1942_v27 = vmul.f32 %v7423_v7, %v1926_v58  ;;  %v1953_v23 = vadd.f32 1.4214138, %v1937_v20  ;;  %v1954_v17 = vadd.f32 1.4214138, %v1938_v35  ;;  %v1960_v41 = vmul.f32 %v7332_v54, %v1944_v47 }
 0x432   : > { %v1943_v19 = vmul.f32 %v7428_v43, %v1927_v45  ;;  %v1955_v38 = vadd.f32 1.4214138, %v1939_v22  ;;  %v1956_v63 = vadd.f32 1.4214138, %v1940_v44  ;;  %v1957_v13 = vadd.f32 1.4214138, %v1941_v25 }
 0x433   : > { %v1961_v56 = vmul.f32 %v7337_v0, %v1945_v50  ;;  %v1958_v46 = vadd.f32 1.4214138, %v1942_v27  ;;  %v1962_v4 = vmul.f32 %v7346_v57, %v1946_v53  ;;  %v1963_v58 = vmul.f32 %v7355_v24, %v1947_v18 }
 0x434   : > { %v1959_v59 = vadd.f32 1.4214138, %v1943_v19  ;;  %v1964_v10 = vmul.f32 %v7360_v61, %v1948_v52  ;;  %v1965_v15 = vmul.f32 %v7365_v11, %v1949_v60  ;;  %v1966_v20 = vmul.f32 %v7369_v36, %v1950_v62 }
 0x435   : > { %v1967_v45 = vmul.f32 %v7379_v32, %v1951_v48  ;;  %v1968_v47 = vmul.f32 %v7389_v12, %v1952_v1  ;;  %v1969_v33 = vmul.f32 %v7395_v6, %v1953_v23  ;;  %v1970_v50 = vmul.f32 %v7399_v2, %v1954_v17 }
 0x436   : > { %v1976_v26 = vadd.f32 -0.28449672, %v1960_v41  ;;  %v1971_v35 = vmul.f32 %v7407_v16, %v1955_v38  ;;  %v1972_v53 = vmul.f32 %v7415_v14, %v1956_v63  ;;  %v1973_v18 = vmul.f32 %v7419_v42, %v1957_v13 }
 0x437   : > { %v1977_v52 = vadd.f32 -0.28449672, %v1961_v56  ;;  %v1974_v22 = vmul.f32 %v7423_v7, %v1958_v46  ;;  %v1975_v62 = vmul.f32 %v7428_v43, %v1959_v59  ;;  %v1978_v44 = vadd.f32 -0.28449672, %v1962_v4 }
 0x438   : > { %v1979_v48 = vadd.f32 -0.28449672, %v1963_v58  ;;  %v1980_v25 = vadd.f32 -0.28449672, %v1964_v10  ;;  %v1981_v60 = vadd.f32 -0.28449672, %v1965_v15  ;;  %v1992_v17 = vmul.f32 %v7332_v54, %v1976_v26 }
 0x439   : > { %v1982_v27 = vadd.f32 -0.28449672, %v1966_v20  ;;  %v1983_v23 = vadd.f32 -0.28449672, %v1967_v45  ;;  %v1984_v1 = vadd.f32 -0.28449672, %v1968_v47  ;;  %v1993_v13 = vmul.f32 %v7337_v0, %v1977_v52 }
 0x43a   : > { %v1985_v19 = vadd.f32 -0.28449672, %v1969_v33  ;;  %v1986_v63 = vadd.f32 -0.28449672, %v1970_v50  ;;  %v1987_v41 = vadd.f32 -0.28449672, %v1971_v35  ;;  %v1994_v4 = vmul.f32 %v7346_v57, %v1978_v44 }
 0x43b   : > { %v1988_v38 = vadd.f32 -0.28449672, %v1972_v53  ;;  %v1989_v56 = vadd.f32 -0.28449672, %v1973_v18  ;;  %v1990_v46 = vadd.f32 -0.28449672, %v1974_v22  ;;  %v1995_v58 = vmul.f32 %v7355_v24, %v1979_v48 }
 0x43c   : > { %v1991_v59 = vadd.f32 -0.28449672, %v1975_v62  ;;  %v1996_v10 = vmul.f32 %v7360_v61, %v1980_v25  ;;  %v1997_v9 = vmul.f32 %v7365_v11, %v1981_v60  ;;  %v1998_v15 = vmul.f32 %v7369_v36, %v1982_v27 }
 0x43d   : > { %v1999_v20 = vmul.f32 %v7379_v32, %v1983_v23  ;;  %v2000_v45 = vmul.f32 %v7389_v12, %v1984_v1  ;;  %v2001_v47 = vmul.f32 %v7395_v6, %v1985_v19  ;;  %6345 = vpow2.f32 %v7363_v40 }
 0x43e   : > { %v2002_v33 = vmul.f32 %v7399_v2, %v1986_v63  ;;  %v2003_v50 = vmul.f32 %v7407_v16, %v1987_v41  ;;  %v2008_v26 = vadd.f32 0.2548296, %v1992_v17  ;;  %6347 = vpow2.f32 %v7375_v28  ;;  %v6344_v28 = vpop.eup %6343 }
 0x43f   : > { %v2004_v35 = vmul.f32 %v7415_v14, %v1988_v38  ;;  %v2005_v53 = vmul.f32 %v7419_v42, %v1989_v56  ;;  %v2006_v18 = vmul.f32 %v7423_v7, %v1990_v46  ;;  %v2009_v52 = vadd.f32 0.2548296, %v1993_v13 }
 0x440   : > { %v2007_v22 = vmul.f32 %v7428_v43, %v1991_v59  ;;  %v2010_v62 = vadd.f32 0.2548296, %v1994_v4  ;;  %v2011_v44 = vadd.f32 0.2548296, %v1995_v58  ;;  %v2012_v48 = vadd.f32 0.2548296, %v1996_v10 }
 0x441   : > { %v2013_v40 = vadd.f32 0.2548296, %v1997_v9  ;;  %v2014_v25 = vadd.f32 0.2548296, %v1998_v15  ;;  %v2015_v60 = vadd.f32 0.2548296, %v1999_v20  ;;  %v2024_v63 = vmul.f32 %v7332_v54, %v2008_v26 }
 0x442   : > { %v9901_v27 = vsub.f32 0.0, %v7289_v29  ;;  %v2016_v1 = vadd.f32 0.2548296, %v2000_v45  ;;  %v2017_v19 = vadd.f32 0.2548296, %v2001_v47  ;;  %v2025_v56 = vmul.f32 %v7337_v0, %v2009_v52  ;;  %v9903_v47 = vld [vmem:[#allocation50_spill] sm:$0xff] }
 0x443   : > { %v2018_v17 = vadd.f32 0.2548296, %v2002_v33  ;;  %v2019_v41 = vadd.f32 0.2548296, %v2003_v50  ;;  %v2020_v38 = vadd.f32 0.2548296, %v2004_v35  ;;  %v2026_v4 = vmul.f32 %v7346_v57, %v2010_v62 }
 0x444   : > { %v2071_v23 = vmul.f32 %v9901_v27, %v7289_v29  ;;  %v2021_v13 = vadd.f32 0.2548296, %v2005_v53  ;;  %v2022_v46 = vadd.f32 0.2548296, %v2006_v18  ;;  %v2023_v59 = vadd.f32 0.2548296, %v2007_v22 }
 0x445   : > { %v2027_v58 = vmul.f32 %v7355_v24, %v2011_v44  ;;  %v2028_v10 = vmul.f32 %v7360_v61, %v2012_v48  ;;  %v2029_v29 = vmul.f32 %v7365_v11, %v2013_v40  ;;  %6349 = vpow2.f32 %v7377_v30  ;;  %v9907_v50 = vld [vmem:[#allocation54_spill] sm:$0xff]  ;;  %v9908_v35 = vld [vmem:[#allocation55_spill] sm:$0xff]  ;;  %v9909_v62 = vld [vmem:[#allocation56_spill] sm:$0xff] }
 0x446   : > { %v2086_v9 = vmul.f32 1.442695, %v7341_v5  ;;  %v2030_v54 = vmul.f32 %v7369_v36, %v2014_v25  ;;  %v7489_v15 = vmul.f32 %v7379_v32, %v2015_v60  ;;  %6351 = vpow2.f32 %v7385_v37  ;;  %v9910_v60 = vld [vmem:[#allocation57_spill] sm:$0xff] }
 0x447   : > { %v2088_v0 = vmul.f32 1.442695, %v7344_v55  ;;  %v6346_v57 = vpop.eup %6345  ;;  %v7494_v24 = vmul.f32 %v7389_v12, %v2016_v1  ;;  %v7497_v61 = vmul.f32 %v7395_v6, %v2017_v19  ;;  %6353 = vpow2.f32 %v7387_v39 }
 0x448   : > { %v2090_v5 = vmul.f32 1.442695, %v7350_v49  ;;  %v6348_v11 = vpop.eup %6347  ;;  %v7502_v36 = vmul.f32 %v7399_v2, %v2018_v17  ;;  %6355 = vpow2.f32 %v7393_v21  ;;  %v2092_v30 = vmul.f32 1.442695, %v7353_v3  ;;  %v9911_v17 = vld [vmem:[#allocation58_spill] sm:$0xff] }
 0x449   : > { %v2104_v55 = vmul.f32 %v6344_v28, %v2024_v63  ;;  %6357 = vpow2.f32 %v2086_v9  ;;  %v2094_v32 = vmul.f32 1.442695, %v7373_v31  ;;  %v2105_v37 = vmul.f32 %v6346_v57, %v2025_v56  ;;  %v9913_v9 = vld [vmem:[#allocation60_spill] sm:$0xff] }
 0x44a   : > { %v2106_v12 = vmul.f32 %v6348_v11, %v2026_v4  ;;  %v7508_v6 = vmul.f32 %v7407_v16, %v2019_v41  ;;  %v7511_v39 = vmul.f32 %v7415_v14, %v2020_v38  ;;  %6359 = vpow2.f32 %v2088_v0 }
 0x44b   : > { %v2096_v49 = vmul.f32 1.442695, %v7383_v34  ;;  %v7515_v2 = vmul.f32 %v7419_v42, %v2021_v13  ;;  %v7518_v3 = vmul.f32 %v7423_v7, %v2022_v46  ;;  %6361 = vpow2.f32 %v2090_v5  ;;  %v9902_v42 = vld [vmem:[#allocation49_spill] sm:$0xff]  ;;  %v9904_v7 = vld [vmem:[#allocation51_spill] sm:$0xff] }
 0x44c   : > { %v2098_v31 = vmul.f32 1.442695, %v7405_v8  ;;  %6363 = vpow2.f32 %v2092_v30  ;;  %v2100_v21 = vmul.f32 1.442695, %v7413_v51  ;;  %v2120_v16 = vsub.f32 1.0, %v2104_v55  ;;  %v9905_v8 = vld [vmem:[#allocation52_spill] sm:$0xff] }
 0x44d   : > { %v2121_v20 = vsub.f32 1.0, %v2105_v37  ;;  %v7523_v14 = vmul.f32 %v7428_v43, %v2023_v59  ;;  %6365 = vpow2.f32 %v2094_v32  ;;  %v2102_v45 = vmul.f32 1.442695, %v2071_v23  ;;  %v9906_v51 = vld [vmem:[#allocation53_spill] sm:$0xff]  ;;  %v9912_v46 = vld [vmem:[#allocation59_spill] sm:$0xff] }
 0x44e   : > { %v2122_v34 = vsub.f32 1.0, %v2106_v12  ;;  %6367 = vpow2.f32 %v2096_v49  ;;  %vm2136_vm13 = vcmp.lt.f32.partialorder %v9902_v42, 0.0  ;;  %vm2137_vm14 = vcmp.lt.f32.partialorder %v9903_v47, 0.0  ;;  %v9915_v12 = vld [vmem:[#allocation62_spill] sm:$0xff] }
 0x44f   : > { %vm2138_vm15 = vcmp.lt.f32.partialorder %v9904_v7, 0.0  ;;  %v6350_v33 = vpop.eup %6349  ;;  %6369 = vpow2.f32 %v2098_v31  ;;  %vm2139_vm0 = vcmp.lt.f32.partialorder %v9905_v8, 0.0  ;;  %vm2140_vm1 = vcmp.lt.f32.partialorder %v9906_v51, 0.0  ;;  %v9917_v7 = vld [vmem:[#allocation64_spill] sm:$0xff] }
 0x450   : > { %vm2141_vm12 = vcmp.lt.f32.partialorder %v9907_v50, 0.0  ;;  %v6352_v43 = vpop.eup %6351  ;;  %6371 = vpow2.f32 %v2100_v21  ;;  %v2107_v26 = vmul.f32 %v6350_v33, %v2027_v58  ;;  %vm2142_vm11 = vcmp.lt.f32.partialorder %v9908_v35, 0.0 }
 0x451   : > { %v2152_v53 = vsub.f32 0.0, %v2120_v16  ;;  %v2153_v18 = vsub.f32 0.0, %v2121_v20  ;;  %v6354_v52 = vpop.eup %6353  ;;  %6373 = vpow2.f32 %v2102_v45  ;;  %v2108_v22 = vmul.f32 %v6352_v43, %v2028_v10 }
 0x452   : > { %vm2143_vm10 = vcmp.lt.f32.partialorder %v9909_v62, 0.0  ;;  %v2154_v44 = vsub.f32 0.0, %v2122_v34  ;;  %v6356_v48 = vpop.eup %6355  ;;  %v2109_v40 = vmul.f32 %v6354_v52, %v2029_v29  ;;  %v2123_v25 = vsub.f32 1.0, %v2107_v26 }
 0x453   : > { %vm2144_vm9 = vcmp.lt.f32.partialorder %v9910_v60, 0.0  ;;  %v2168_v27 = vsel %vm2136_vm13, %v2152_v53, %v2120_v16  ;;  %v2169_v23 = vsel %vm2137_vm14, %v2153_v18, %v2121_v20  ;;  %v6358_v28 = vpop.eup %6357  ;;  %v2110_v1 = vmul.f32 %v6356_v48, %v2030_v54  ;;  %v9916_v20 = vld [vmem:[#allocation63_spill] sm:$0xff] }
 0x454   : > { %v2124_v19 = vsub.f32 1.0, %v2108_v22  ;;  %vm2145_vm8 = vcmp.lt.f32.partialorder %v9911_v17, 0.0  ;;  %v2170_v63 = vsel %vm2138_vm15, %v2154_v44, %v2122_v34  ;;  %v7541_v41 = vadd.f32 1.0, %v2168_v27  ;;  %v6360_v38 = vpop.eup %6359 }
 0x455   : > { %v2111_v13 = vmul.f32 %v6358_v28, %v7489_v15  ;;  %v2125_v56 = vsub.f32 1.0, %v2109_v40  ;;  %vm2146_vm7 = vcmp.lt.f32.partialorder %v9912_v46, 0.0  ;;  %v2155_v59 = vsub.f32 0.0, %v2123_v25  ;;  %v6362_v58 = vpop.eup %6361  ;;  %v9914_v15 = vld [vmem:[#allocation61_spill] sm:$0xff] }
 0x456   : > { %v7545_v4 = vadd.f32 1.0, %v2169_v23  ;;  %v2112_v10 = vmul.f32 %v6360_v38, %v7494_v24  ;;  %v2126_v29 = vsub.f32 1.0, %v2110_v1  ;;  %vm2147_vm13 = vcmp.lt.f32.partialorder %v9913_v9, 0.0  ;;  %v6364_v57 = vpop.eup %6363 }
 0x457   : > { %v2156_v54 = vsub.f32 0.0, %v2124_v19  ;;  %v7549_v0 = vadd.f32 1.0, %v2170_v63  ;;  %v2113_v5 = vmul.f32 %v6362_v58, %v7497_v61  ;;  %v2127_v11 = vsub.f32 1.0, %v2111_v13  ;;  %v6366_v32 = vpop.eup %6365 }
 0x458   : > { %vm2148_vm14 = vcmp.lt.f32.partialorder %v9914_v15, 0.0  ;;  %v2157_v30 = vsub.f32 0.0, %v2125_v56  ;;  %v2171_v55 = vsel %vm2139_vm0, %v2155_v59, %v2123_v25  ;;  %v2114_v37 = vmul.f32 %v6364_v57, %v7502_v36  ;;  %v6368_v21 = vpop.eup %6367 }
 0x459   : > { %v2128_v24 = vsub.f32 1.0, %v2112_v10  ;;  %vm2149_vm15 = vcmp.lt.f32.partialorder %v9915_v12, 0.0  ;;  %v2158_v49 = vsub.f32 0.0, %v2126_v29  ;;  %v2172_v31 = vsel %vm2140_vm1, %v2156_v54, %v2124_v19  ;;  %v6370_v42 = vpop.eup %6369 }
 0x45a   : > { %v2115_v61 = vmul.f32 %v6366_v32, %v7508_v6  ;;  %v2129_v16 = vsub.f32 1.0, %v2113_v5  ;;  %vm2150_vm6 = vcmp.lt.f32.partialorder %v9916_v20, 0.0  ;;  %v2159_v45 = vsub.f32 0.0, %v2127_v11  ;;  %v6372_v51 = vpop.eup %6371  ;;  %v9920_v32 = vld [vmem:[#allocation38_spill] sm:$0xff] }
 0x45b   : > { %v2173_v34 = vsel %vm2141_vm12, %v2157_v30, %v2125_v56  ;;  %v2116_v36 = vmul.f32 %v6368_v21, %v7511_v39  ;;  %v2130_v47 = vsub.f32 1.0, %v2114_v37  ;;  %vm2151_vm0 = vcmp.lt.f32.partialorder %v9917_v7, 0.0  ;;  %v6374_v50 = vpop.eup %6373  ;;  %v9919_v30 = vld [vmem:[#allocation37_spill] sm:$0xff]  ;;  %v9928_v7 = vld [vmem:[#allocation46_spill] sm:$0xff] }
 0x45c   : > { %v2160_v33 = vsub.f32 0.0, %v2128_v24  ;;  %v2174_v8 = vsel %vm2142_vm11, %v2158_v49, %v2126_v29  ;;  %v2117_v6 = vmul.f32 %v6370_v42, %v7515_v2  ;;  %v2131_v43 = vsub.f32 1.0, %v2115_v61  ;;  %v9922_v49 = vld [vmem:[#allocation40_spill] sm:$0xff]  ;;  %v9923_v21 = vld [vmem:[#allocation41_spill] sm:$0xff] }
 0x45d   : > { %v2161_v26 = vsub.f32 0.0, %v2129_v16  ;;  %v2175_v53 = vsel %vm2143_vm10, %v2159_v45, %v2127_v11  ;;  %v2118_v18 = vmul.f32 %v6372_v51, %v7518_v3  ;;  %v2132_v52 = vsub.f32 1.0, %v2116_v36  ;;  %v9918_v11 = vld [vmem:[#allocation36_spill] sm:$0xff]  ;;  %v9925_v45 = vld [vmem:[#allocation43_spill] sm:$0xff] }
 0x45e   : > { %v2162_v39 = vsub.f32 0.0, %v2130_v47  ;;  %v2176_v22 = vsel %vm2144_vm9, %v2160_v33, %v2128_v24  ;;  %v2119_v44 = vmul.f32 %v6374_v50, %v7523_v14  ;;  %v2133_v35 = vsub.f32 1.0, %v2117_v6  ;;  %v9921_v24 = vld [vmem:[#allocation39_spill] sm:$0xff]  ;;  %v9926_v42 = vld [vmem:[#allocation44_spill] sm:$0xff]  ;;  %v9931_v6 = vld [vmem:[#allocation65_spill] sm:$0xff] }
 0x45f   : > { %v2163_v48 = vsub.f32 0.0, %v2131_v43  ;;  %v2177_v2 = vsel %vm2145_vm8, %v2161_v26, %v2129_v16  ;;  %v2134_v40 = vsub.f32 1.0, %v2118_v18  ;;  %v2164_v25 = vsub.f32 0.0, %v2132_v52  ;;  %v9924_v16 = vld [vmem:[#allocation42_spill] sm:$0xff]  ;;  %v9930_v51 = vld [vmem:[#allocation48_spill] sm:$0xff]  ;;  %v9933_v50 = vld [vmem:[#allocation67_spill] sm:$0xff] }
 0x460   : > { %v2178_v62 = vsel %vm2146_vm7, %v2162_v39, %v2130_v47  ;;  %v2187_v27 = vadd.f32 1.0, %v2171_v55  ;;  %v2135_v23 = vsub.f32 1.0, %v2119_v44  ;;  %v2165_v3 = vsub.f32 0.0, %v2133_v35  ;;  %v9927_v47 = vld [vmem:[#allocation45_spill] sm:$0xff]  ;;  %v9932_v26 = vld [vmem:[#allocation66_spill] sm:$0xff] }
 0x461   : > { %v2179_v28 = vsel %vm2147_vm13, %v2163_v48, %v2131_v43  ;;  %v2188_v60 = vadd.f32 1.0, %v2172_v31  ;;  %v2166_v1 = vsub.f32 0.0, %v2134_v40  ;;  %v2180_v14 = vsel %vm2148_vm14, %v2164_v25, %v2132_v52  ;;  %v9934_v52 = vld [vmem:[#allocation4_spill] sm:$0xff]  ;;  %v9938_v25 = vld [vmem:[#allocation6_spill] sm:$0xff] }
 0x462   : > { %v2189_v19 = vadd.f32 1.0, %v2173_v34  ;;  %v2190_v63 = vadd.f32 1.0, %v2174_v8  ;;  %v2167_v17 = vsub.f32 0.0, %v2135_v23  ;;  %v2181_v38 = vsel %vm2149_vm15, %v2165_v3, %v2133_v35  ;;  %v9936_v35 = vld [vmem:[#allocation7_spill] sm:$0xff]  ;;  %v9940_v3 = vld [vmem:[#allocation8_spill] sm:$0xff] }
 0x463   : > { %v2191_v13 = vadd.f32 1.0, %v2175_v53  ;;  %v2192_v56 = vadd.f32 1.0, %v2176_v22  ;;  %v2182_v46 = vsel %vm2150_vm6, %v2166_v1, %v2134_v40  ;;  %v2193_v59 = vadd.f32 1.0, %v2177_v2  ;;  %v9935_v22 = vld [vmem:[#allocation5_spill] sm:$0xff]  ;;  %v2249_v1 = vld [vmem:[#allocation2 + $0xf] sm:$0xff] }
 0x464   : > { %v2194_v58 = vadd.f32 1.0, %v2178_v62  ;;  %v2195_v10 = vadd.f32 1.0, %v2179_v28  ;;  %v2183_v29 = vsel %vm2151_vm0, %v2167_v17, %v2135_v23  ;;  %v2196_v9 = vadd.f32 1.0, %v2180_v14  ;;  %v9937_v2 = vld [vmem:[#allocation9_spill] sm:$0xff] }
 0x465   : > { %v2197_v54 = vadd.f32 1.0, %v2181_v38  ;;  %v2198_v57 = vadd.f32 1.0, %v2182_v46  ;;  %v2199_v5 = vadd.f32 1.0, %v2183_v29  ;;  %v2200_v15 = vmul.f32 %v7541_v41, %v9918_v11  ;;  %v9941_v14 = vld [vmem:[#allocation13_spill] sm:$0xff]  ;;  %v9943_v38 = vld [vmem:[#allocation15_spill] sm:$0xff]  ;;  %v9949_v11 = vld [vmem:[#allocation34_spill] sm:$0xff] }
 0x466   : > { %v2201_v55 = vmul.f32 %v7545_v4, %v9919_v30  ;;  %v2202_v37 = vmul.f32 %v7549_v0, %v9920_v32  ;;  %v2203_v12 = vmul.f32 %v2187_v27, %v9921_v24  ;;  %v2204_v31 = vmul.f32 %v2188_v60, %v9922_v49  ;;  %v9929_v4 = vld [vmem:[#allocation47_spill] sm:$0xff] }
 0x467   : > { %v2205_v61 = vmul.f32 %v2189_v19, %v9923_v21  ;;  %v2206_v20 = vmul.f32 %v2190_v63, %v9924_v16  ;;  %v2207_v34 = vmul.f32 %v2191_v13, %v9925_v45  ;;  %v2208_v36 = vmul.f32 %v2192_v56, %v9926_v42  ;;  %v9939_v27 = vld [vmem:[#allocation11_spill] sm:$0xff]  ;;  %v9942_v63 = vld [vmem:[#allocation10_spill] sm:$0xff]  ;;  %v9944_v56 = vld [vmem:[#allocation12_spill] sm:$0xff] }
 0x468   : > { %v2209_v41 = vmul.f32 %v2193_v59, %v9927_v47  ;;  %v2210_v33 = vmul.f32 %v2194_v58, %v9928_v7  ;;  %v2211_v8 = vmul.f32 %v2195_v10, %v9929_v4  ;;  %v2212_v0 = vmul.f32 %v2196_v9, %v9930_v51  ;;  %v2248_v60 = vld [vmem:[#allocation2 + $0x7] sm:$0xff]  ;;  %v9945_v59 = vld [vmem:[#allocation17_spill] sm:$0xff] }
 0x469   : > { %v2213_v43 = vmul.f32 %v2197_v54, %v9931_v6  ;;  %v2214_v53 = vmul.f32 %v2198_v57, %v9932_v26  ;;  %v2215_v18 = vmul.f32 %v2199_v5, %v9933_v50  ;;  %v2216_v39 = vmul.f32 %v2200_v15, %v9934_v52  ;;  %v9946_v10 = vld [vmem:[#allocation14_spill] sm:$0xff]  ;;  %v9948_v57 = vld [vmem:[#allocation16_spill] sm:$0xff] }
 0x46a   : > { %v2217_v44 = vmul.f32 %v2201_v55, %v9935_v22  ;;  %v2218_v48 = vmul.f32 %v2202_v37, %v9936_v35  ;;  %v2219_v40 = vmul.f32 %v2203_v12, %v9937_v2  ;;  %v2220_v62 = vmul.f32 %v2204_v31, %v9938_v25  ;;  %v9947_v9 = vld [vmem:[#allocation26_spill] sm:$0xff]  ;;  %v2344_v55 = vld [vmem:[#allocation2 + $0x9] sm:$0xff] }
 0x46b   : > { %v2221_v23 = vmul.f32 %v2205_v61, %v9939_v27  ;;  %v2222_v28 = vmul.f32 %v2206_v20, %v9940_v3  ;;  %v2223_v19 = vmul.f32 %v2207_v34, %v9941_v14  ;;  %v2224_v17 = vmul.f32 %v2208_v36, %v9942_v63  ;;  %2232 = vst.msk [vmem:[#allocation2 + $0x18] sm:$0xff] %vm876_vm3, %v2216_v39 }
 0x46c   : > { %v2225_v13 = vmul.f32 %v2209_v41, %v9943_v38  ;;  %v2226_v46 = vmul.f32 %v2210_v33, %v9944_v56  ;;  %2233 = vst.msk [vmem:[#allocation2 + $0x20] sm:$0xff] %vm876_vm3, %v2217_v44  ;;  %2234 = vst.msk [vmem:[#allocation2 + $0x28] sm:$0xff] %vm876_vm3, %v2218_v48  ;;  %v2227_v58 = vmul.f32 %v2211_v8, %v9945_v59  ;;  %vm9955_vm1 = vcmask 130144  }
 0x46d   : > { %v2228_v29 = vmul.f32 %v2212_v0, %v9946_v10  ;;  %v2229_v54 = vmul.f32 %v2213_v43, %v9947_v9  ;;  %v2230_v5 = vmul.f32 %v2214_v53, %v9948_v57  ;;  %2235 = vst.msk [vmem:[#allocation2 + $0x30] sm:$0xff] %vm876_vm3, %v2219_v40  ;;  %2236 = vst.msk [vmem:[#allocation2 + $0x38] sm:$0xff] %vm876_vm3, %v2220_v62  ;;  %vm9957_vm7 = vcmask 162944  }
 0x46e   : > { %2237 = vst.msk [vmem:[#allocation2 + $0x40] sm:$0xff] %vm876_vm3, %v2221_v23  ;;  %2238 = vst.msk [vmem:[#allocation2 + $0x48] sm:$0xff] %vm876_vm3, %v2222_v28  ;;  %v2231_v15 = vmul.f32 %v2215_v18, %v9949_v11  ;;  %v2264_v30 = vpack.c.bf16 %v2249_v1, %v2248_v60  ;;  %v6298_v60 = vld [vmem:[%s9616_s8] sm:$0xff]   ;;  %vm9959_vm9 = vcmask 195744   ;;  %vm9961_vm11 = vcmask 228544  }
 0x46f   : > { %2239 = vst.msk [vmem:[#allocation2 + $0x50] sm:$0xff] %vm876_vm3, %v2223_v19  ;;  %2240 = vst.msk [vmem:[#allocation2 + $0x58] sm:$0xff] %vm876_vm3, %v2224_v17  ;;  %v2313_v36 = vpop.permute.xlu0 %2312  ;;  %6161 = vmatprep.subr.bf16.mxu0 %v6298_v60  ;;  %v6299_v19 = vld [vmem:[%s9616_s8 + $0x8] sm:$0xff]   ;;  %vm9963_vm13 = vcmask 261344   ;;  %vm9965_vm15 = vcmask 294144  }
 0x470   : > { %2241 = vst.msk [vmem:[#allocation2 + $0x60] sm:$0xff] %vm876_vm3, %v2225_v13  ;;  %2242 = vst.msk [vmem:[#allocation2 + $0x68] sm:$0xff] %vm876_vm3, %v2226_v46  ;;  %6162 = vmatpush3.bf16.msra.mxu0 %v6298_v60  ;;  %v6300_v46 = vld [vmem:[%s9616_s8 + $0x10] ss:$0 sps:$4 sm:$0x33]   ;;  %v2743_v60 = vld [vmem:[#allocation2 + $0xa1] sm:$0xff] }
 0x471   : > { %2243 = vst.msk [vmem:[#allocation2 + $0x70] sm:$0xff] %vm876_vm3, %v2227_v58  ;;  %2244 = vst.msk [vmem:[#allocation2 + $0x78] sm:$0xff] %vm876_vm3, %v2228_v29  ;;  %6163 = vmatprep.subr.bf16.mxu0 %v6299_v19  ;;  %v2845_v29 = vsel %vm1498_vm4, %v6300_v46, 0 }
 0x472   : > { %2245 = vst.msk [vmem:[#allocation2 + $0x80] sm:$0xff] %vm876_vm3, %v2229_v54  ;;  %2246 = vst.msk [vmem:[#allocation2 + $0x88] sm:$0xff] %vm876_vm3, %v2230_v5  ;;  %v2345_v32 = vld [vmem:[#allocation2 + $0x11] sm:$0xff] }
 0x473   : > { %2247 = vst.msk [vmem:[#allocation2 + $0x90] sm:$0xff] %vm876_vm3, %v2231_v15  ;;  %2272 = vst.msk [vmem:[#allocation3] sm:$0xff] %vm876_vm3, %v2264_v30  ;;  %v2282_v37 = vld [vmem:[#allocation2 + $0x18] sm:$0xff]  ;;  %v2283_v24 = vld [vmem:[#allocation2 + $0x20] sm:$0xff]  ;;  %v2360_v12 = vpack.c.bf16 %v2345_v32, %v2344_v55 }
 0x474   : > { %v2297_v49 = vpack.c.bf16 %v2283_v24, %v2282_v37  ;;  %v2408_v31 = vld [vmem:[#allocation2 + $0x17] sm:$0xff]  ;;  %v2409_v21 = vld [vmem:[#allocation2 + $0x1f] sm:$0xff]  ;;  %v2410_v45 = vld [vmem:[#allocation2 + $0x27] sm:$0xff]  ;;  %2336 = vst.msk [vmem:[#allocation3] sm:$0xff] %vm981_vm2, %v2313_v36  ;;  %6164 = vmatpush3.bf16.msra.mxu0 %v6299_v19 }
 0x475   : > { %v2346_v61 = vld [vmem:[#allocation2 + $0x19] sm:$0xff]  ;;  %v2424_v16 = vpack.c.bf16 %v2409_v21, %v2408_v31  ;;  %v2347_v20 = vld [vmem:[#allocation2 + $0x21] sm:$0xff]  ;;  %v2411_v34 = vld [vmem:[#allocation2 + $0x2f] sm:$0xff]  ;;  %2376 = vrot.lane.b32.xlu0 %v2360_v12, %s9726_s21  ;;  %6234 = vmatprep.subr.msk.bf16.mxu0 %vm1498_vm4, %v6300_v46 }
 0x476   : > { %2314 = vrot.lane.b32.xlu1 %v2297_v49, %s9728_s27  ;;  %v2425_v42 = vpack.c.bf16 %v2411_v34, %v2410_v45  ;;  %v2602_v47 = vld [vmem:[#allocation2 + $0x37] sm:$0xff]  ;;  %v2603_v41 = vld [vmem:[#allocation2 + $0x3f] sm:$0xff]  ;;  %v2361_v7 = vpack.c.bf16 %v2347_v20, %v2346_v61  ;;  %v2414_v4 = vld [vmem:[#allocation2 + $0x47] sm:$0xff] }
 0x477   : > { %2273 = vst.msk [vmem:[#allocation3 + $0x8] sm:$0xff] %vm876_vm3, %v2424_v16  ;;  %v2617_v33 = vpack.c.bf16 %v2603_v41, %v2602_v47  ;;  %v2415_v8 = vld [vmem:[#allocation2 + $0x4f] sm:$0xff]  ;;  %v2606_v0 = vld [vmem:[#allocation2 + $0x57] sm:$0xff]  ;;  %v2607_v6 = vld [vmem:[#allocation2 + $0x5f] sm:$0xff] }
 0x478   : > { %2274 = vst.msk [vmem:[#allocation3 + $0x10] sm:$0xff] %vm876_vm3, %v2425_v42  ;;  %v7647_v51 = vpack.c.bf16 %v2415_v8, %v2414_v4  ;;  %v2474_v43 = vld [vmem:[#allocation2 + $0x28] sm:$0xff]  ;;  %v7650_v26 = vpack.c.bf16 %v2607_v6, %v2606_v0  ;;  %v2475_v53 = vld [vmem:[#allocation2 + $0x30] sm:$0xff]  ;;  %v2666_v17 = vld [vmem:[#allocation2 + $0x38] sm:$0xff]  ;;  %6166 = vmatpush3.bf16.msra.mxu0 %v2845_v29 }
 0x479   : > { %2440 = vrot.lane.b32.xlu0 %v2424_v16, %s9950_s23  ;;  %2275 = vst.msk [vmem:[#allocation3 + $0x18] sm:$0xff] %vm876_vm3, %v2617_v33  ;;  %v2418_v50 = vld [vmem:[#allocation2 + $0x67] sm:$0xff]  ;;  %v2419_v18 = vld [vmem:[#allocation2 + $0x6f] sm:$0xff]  ;;  %v2610_v44 = vld [vmem:[#allocation2 + $0x77] sm:$0xff]  ;;  %v2489_v40 = vpack.c.bf16 %v2475_v53, %v2474_v43 }
 0x47a   : > { %2378 = vrot.lane.b32.xlu1 %v2361_v7, %s9726_s21  ;;  %2276 = vst.msk [vmem:[#allocation3 + $0x20] sm:$0xff] %vm876_vm3, %v7647_v51  ;;  %v7656_v39 = vpack.c.bf16 %v2419_v18, %v2418_v50  ;;  %2277 = vst.msk [vmem:[#allocation3 + $0x28] sm:$0xff] %vm876_vm3, %v7650_v26  ;;  %v2611_v48 = vld [vmem:[#allocation2 + $0x7f] sm:$0xff]  ;;  %v2538_v23 = vld [vmem:[#allocation2 + $0x29] sm:$0xff] }
 0x47b   : > { %v7660_v62 = vpack.c.bf16 %v2611_v48, %v2610_v44  ;;  %v2539_v28 = vld [vmem:[#allocation2 + $0x31] sm:$0xff]  ;;  %v2667_v13 = vld [vmem:[#allocation2 + $0x40] sm:$0xff]  ;;  %v2478_v30 = vld [vmem:[#allocation2 + $0x48] sm:$0xff]  ;;  %v7735_v48 = vpop.permute.xlu1 %2710 }
 0x47c   : > { %2278 = vst.msk [vmem:[#allocation3 + $0x30] sm:$0xff] %vm876_vm3, %v7656_v39  ;;  %v2553_v1 = vpack.c.bf16 %v2539_v28, %v2538_v23  ;;  %v2681_v58 = vpack.c.bf16 %v2667_v13, %v2666_v17  ;;  %v2730_v54 = vld [vmem:[#allocation2 + $0x39] sm:$0xff]  ;;  %v2731_v5 = vld [vmem:[#allocation2 + $0x41] sm:$0xff]  ;;  %v2479_v55 = vld [vmem:[#allocation2 + $0x50] sm:$0xff] }
 0x47d   : > { %2504 = vrot.lane.b32.xlu0 %v2297_v49, %s9951_s26  ;;  %2279 = vst.msk [vmem:[#allocation3 + $0x38] sm:$0xff] %vm876_vm3, %v7660_v62  ;;  %v2745_v15 = vpack.c.bf16 %v2731_v5, %v2730_v54  ;;  %v2491_v32 = vpack.c.bf16 %v2479_v55, %v2478_v30  ;;  %v2542_v37 = vld [vmem:[#allocation2 + $0x49] sm:$0xff]  ;;  %v2543_v24 = vld [vmem:[#allocation2 + $0x51] sm:$0xff]  ;;  %v2671_v31 = vld [vmem:[#allocation2 + $0x60] sm:$0xff] }
 0x47e   : > { %2442 = vrot.lane.b32.xlu1 %v2425_v42, %s9950_s23  ;;  %v2555_v12 = vpack.c.bf16 %v2543_v24, %v2542_v37  ;;  %v2670_v49 = vld [vmem:[#allocation2 + $0x58] sm:$0xff]  ;;  %v2735_v16 = vld [vmem:[#allocation2 + $0x61] sm:$0xff]  ;;  %v2483_v34 = vld [vmem:[#allocation2 + $0x70] sm:$0xff] }
 0x47f   : > { %v2683_v21 = vpack.c.bf16 %v2671_v31, %v2670_v49  ;;  %v2734_v61 = vld [vmem:[#allocation2 + $0x59] sm:$0xff]  ;;  %v2482_v45 = vld [vmem:[#allocation2 + $0x68] sm:$0xff]  ;;  %v2547_v47 = vld [vmem:[#allocation2 + $0x71] sm:$0xff] }
 0x480   : > { %v2747_v20 = vpack.c.bf16 %v2735_v16, %v2734_v61  ;;  %v2546_v36 = vld [vmem:[#allocation2 + $0x69] sm:$0xff]  ;;  %v2738_v8 = vld [vmem:[#allocation2 + $0x79] sm:$0xff]  ;;  %v2551_v44 = vld [vmem:[#allocation2 + $0x91] sm:$0xff] }
 0x481   : > { %2568 = vrot.lane.b32.xlu0 %v2361_v7, %s9952_s28  ;;  %v2557_v41 = vpack.c.bf16 %v2547_v47, %v2546_v36  ;;  %v2674_v7 = vld [vmem:[#allocation2 + $0x78] sm:$0xff]  ;;  %v2422_v6 = vld [vmem:[#allocation2 + $0x87] sm:$0xff]  ;;  %v2423_v43 = vld [vmem:[#allocation2 + $0x8f] sm:$0xff] }
 0x482   : > { %2506 = vrot.lane.b32.xlu1 %v2489_v40, %s9951_s26  ;;  %v2486_v53 = vld [vmem:[#allocation2 + $0x88] sm:$0xff]  ;;  %v2487_v50 = vld [vmem:[#allocation2 + $0x90] sm:$0xff]  ;;  %v2615_v23 = vld [vmem:[#allocation2 + $0x9f] sm:$0xff] }
 0x483   : > { %v2495_v18 = vpack.c.bf16 %v2487_v50, %v2486_v53  ;;  %v2742_v28 = vld [vmem:[#allocation2 + $0x99] sm:$0xff]  ;;  %vm9956_vm6 = vmmov %vm9955_vm1 }
 0x484   : > { %v2751_v13 = vpack.c.bf16 %v2743_v60, %v2742_v28  ;;  %vm9958_vm8 = vmmov %vm9957_vm7 }
 0x485   : > { %2632 = vrot.lane.b32.xlu0 %v2425_v42, %s9953_s19  ;;  %v2493_v42 = vpack.c.bf16 %v2483_v34, %v2482_v45  ;;  %vm9960_vm10 = vmmov %vm9959_vm9 }
 0x486   : > { %2570 = vrot.lane.b32.xlu1 %v2553_v1, %s9952_s28  ;;  %vm9962_vm12 = vmmov %vm9961_vm11 }
 0x487   : > { %vm9964_vm14 = vmmov %vm9963_vm13 }
 0x488   : > { %vm9966_vm0 = vmmov %vm9965_vm15 }
 0x489   : > { %2696 = vrot.lane.b32.xlu0 %v2489_v40, %s9730_s30 }
 0x48a   : > { %2634 = vrot.lane.b32.xlu1 %v2617_v33, %s9953_s19 }
 0x48d   : > { %2760 = vrot.lane.b32.xlu0 %v2553_v1, %s9954_s29 }
 0x48e   : > { %2698 = vrot.lane.b32.xlu1 %v2681_v58, %s9730_s30 }
 0x491   : > { %2762 = vrot.lane.b32.xlu0 %v2745_v15, %s9954_s29 }
 0x492   : > { %2316 = vrot.lane.b32.xlu1 %v2489_v40, %s9728_s27 }
 0x495   : > { %2380 = vrot.lane.b32.xlu0 %v2553_v1, %s9726_s21 }
 0x496   : > { %2318 = vrot.lane.b32.xlu1 %v2681_v58, %s9728_s27 }
 0x499   : > { %2444 = vrot.lane.b32.xlu0 %v2617_v33, %s9950_s23  ;;  %v2675_v33 = vld [vmem:[#allocation2 + $0x80] sm:$0xff] }
 0x49a   : > { %2382 = vrot.lane.b32.xlu1 %v2745_v15, %s9726_s21  ;;  %v2685_v4 = vpack.c.bf16 %v2675_v33, %v2674_v7 }
 0x49d   : > { %2508 = vrot.lane.b32.xlu0 %v2681_v58, %s9951_s26 }
 0x49e   : > { %2446 = vrot.lane.b32.xlu1 %v7647_v51, %s9950_s23 }
 0x4a1   : > { %2572 = vrot.lane.b32.xlu0 %v2745_v15, %s9952_s28 }
 0x4a2   : > { %2510 = vrot.lane.b32.xlu1 %v2491_v32, %s9951_s26 }
 0x4a5   : > { %2636 = vrot.lane.b32.xlu0 %v7647_v51, %s9953_s19  ;;  %v2739_v51 = vld [vmem:[#allocation2 + $0x81] sm:$0xff] }
 0x4a6   : > { %2574 = vrot.lane.b32.xlu1 %v2555_v12, %s9952_s28  ;;  %v2749_v0 = vpack.c.bf16 %v2739_v51, %v2738_v8 }
 0x4a9   : > { %2700 = vrot.lane.b32.xlu0 %v2491_v32, %s9730_s30 }
 0x4aa   : > { %2638 = vrot.lane.b32.xlu1 %v7650_v26, %s9953_s19 }
 0x4ad   : > { %2764 = vrot.lane.b32.xlu0 %v2555_v12, %s9954_s29 }
 0x4ae   : > { %2702 = vrot.lane.b32.xlu1 %v2683_v21, %s9730_s30 }
 0x4b1   : > { %2766 = vrot.lane.b32.xlu0 %v2747_v20, %s9954_s29 }
 0x4b2   : > { %2320 = vrot.lane.b32.xlu1 %v2491_v32, %s9728_s27 }
 0x4b5   : > { %2384 = vrot.lane.b32.xlu0 %v2555_v12, %s9726_s21 }
 0x4b6   : > { %2322 = vrot.lane.b32.xlu1 %v2683_v21, %s9728_s27 }
 0x4b9   : > { %2448 = vrot.lane.b32.xlu0 %v7650_v26, %s9950_s23  ;;  %v2431_v26 = vpack.c.bf16 %v2423_v43, %v2422_v6 }
 0x4ba   : > { %2386 = vrot.lane.b32.xlu1 %v2747_v20, %s9726_s21 }
 0x4bd   : > { %2512 = vrot.lane.b32.xlu0 %v2683_v21, %s9951_s26 }
 0x4be   : > { %2450 = vrot.lane.b32.xlu1 %v7656_v39, %s9950_s23 }
 0x4c1   : > { %2576 = vrot.lane.b32.xlu0 %v2747_v20, %s9952_s28 }
 0x4c2   : > { %2514 = vrot.lane.b32.xlu1 %v2493_v42, %s9951_s26 }
 0x4c5   : > { %2640 = vrot.lane.b32.xlu0 %v7656_v39, %s9953_s19  ;;  %v2550_v39 = vld [vmem:[#allocation2 + $0x89] sm:$0xff] }
 0x4c6   : > { %2578 = vrot.lane.b32.xlu1 %v2557_v41, %s9952_s28  ;;  %v2559_v40 = vpack.c.bf16 %v2551_v44, %v2550_v39 }
 0x4c9   : > { %2704 = vrot.lane.b32.xlu0 %v2493_v42, %s9730_s30 }
 0x4ca   : > { %2642 = vrot.lane.b32.xlu1 %v7660_v62, %s9953_s19 }
 0x4cd   : > { %2768 = vrot.lane.b32.xlu0 %v2557_v41, %s9954_s29 }
 0x4ce   : > { %2706 = vrot.lane.b32.xlu1 %v2685_v4, %s9730_s30 }
 0x4d1   : > { %2770 = vrot.lane.b32.xlu0 %v2749_v0, %s9954_s29 }
 0x4d2   : > { %2324 = vrot.lane.b32.xlu1 %v2493_v42, %s9728_s27 }
 0x4d5   : > { %2388 = vrot.lane.b32.xlu0 %v2557_v41, %s9726_s21 }
 0x4d6   : > { %2326 = vrot.lane.b32.xlu1 %v2685_v4, %s9728_s27  ;;  %s10005_s27 = smov 0.0  }
 0x4d9   : > { %2452 = vrot.lane.b32.xlu0 %v7660_v62, %s9950_s23  ;;  %v2614_v62 = vld [vmem:[#allocation2 + $0x97] sm:$0xff] }
 0x4da   : > { %2390 = vrot.lane.b32.xlu1 %v2749_v0, %s9726_s21  ;;  %v2623_v17 = vpack.c.bf16 %v2615_v23, %v2614_v62 }
 0x4dd   : > { %2516 = vrot.lane.b32.xlu0 %v2685_v4, %s9951_s26 }
 0x4de   : > { %2454 = vrot.lane.b32.xlu1 %v2431_v26, %s9950_s23 }
 0x4e1   : > { %2580 = vrot.lane.b32.xlu0 %v2749_v0, %s9952_s28 }
 0x4e2   : > { %2518 = vrot.lane.b32.xlu1 %v2495_v18, %s9951_s26 }
 0x4e5   : > { %2644 = vrot.lane.b32.xlu0 %v2431_v26, %s9953_s19 }
 0x4e6   : > { %2582 = vrot.lane.b32.xlu1 %v2559_v40, %s9952_s28 }
 0x4e7   : > { %v2377_v19 = vpop.permute.xlu0 %2376 }
 0x4e8   : > { %v2315_v1 = vpop.permute.xlu1 %2314  ;;  %2400 = vst.msk [vmem:[#allocation3] sm:$0xff] %vm1046_vm5, %v2377_v19 }
 0x4e9   : > { %2337 = vst.msk [vmem:[#allocation3 + $0x8] sm:$0xff] %vm981_vm2, %v2315_v1  ;;  %2708 = vrot.lane.b32.xlu0 %v2495_v18, %s9730_s30 }
 0x4ea   : > { %2646 = vrot.lane.b32.xlu1 %v2623_v17, %s9953_s19 }
 0x4eb   : > { %v2441_v58 = vpop.permute.xlu0 %2440 }
 0x4ec   : > { %v2379_v46 = vpop.permute.xlu1 %2378  ;;  %2464 = vst.msk [vmem:[#allocation3] sm:$0xff] %vm9955_vm1, %v2441_v58  ;;  %vm9967_vm1 = vcmask 293888  }
 0x4ed   : > { %2401 = vst.msk [vmem:[#allocation3 + $0x8] sm:$0xff] %vm1046_vm5, %v2379_v46  ;;  %2772 = vrot.lane.b32.xlu0 %v2559_v40, %s9954_s29 }
 0x4ee   : > { %2774 = vrot.lane.b32.xlu1 %v2751_v13, %s9954_s29 }
 0x4ef   : > { %v2505_v54 = vpop.permute.xlu0 %2504 }
 0x4f0   : > { %v2443_v29 = vpop.permute.xlu1 %2442  ;;  %2528 = vst.msk [vmem:[#allocation3] sm:$0xff] %vm9957_vm7, %v2505_v54  ;;  %vm9968_vm7 = vmmov %vm9967_vm1 }
 0x4f1   : > { %2465 = vst.msk [vmem:[#allocation3 + $0x8] sm:$0xff] %vm9956_vm6, %v2443_v29 }
 0x4f3   : > { %v2569_v15 = vpop.permute.xlu0 %2568 }
 0x4f4   : > { %v2507_v5 = vpop.permute.xlu1 %2506  ;;  %2592 = vst.msk [vmem:[#allocation3] sm:$0xff] %vm9959_vm9, %v2569_v15  ;;  %vm9970_vm9 = vcmask 162944  }
 0x4f5   : > { %2529 = vst.msk [vmem:[#allocation3 + $0x8] sm:$0xff] %vm9958_vm8, %v2507_v5  ;;  %vm9969_vm8 = vmmov %vm9956_vm6 }
 0x4f7   : > { %v2633_v55 = vpop.permute.xlu0 %2632 }
 0x4f8   : > { %v2571_v30 = vpop.permute.xlu1 %2570  ;;  %2656 = vst.msk [vmem:[#allocation3] sm:$0xff] %vm9961_vm11, %v2633_v55  ;;  %vm9972_vm11 = vcmask 195744  }
 0x4f9   : > { %2593 = vst.msk [vmem:[#allocation3 + $0x8] sm:$0xff] %vm9960_vm10, %v2571_v30  ;;  %vm9971_vm10 = vmmov %vm9970_vm9 }
 0x4fb   : > { %v2697_v37 = vpop.permute.xlu0 %2696 }
 0x4fc   : > { %v2635_v32 = vpop.permute.xlu1 %2634  ;;  %2720 = vst.msk [vmem:[#allocation3] sm:$0xff] %vm9963_vm13, %v2697_v37  ;;  %vm9974_vm13 = vcmask 228544  }
 0x4fd   : > { %2657 = vst.msk [vmem:[#allocation3 + $0x8] sm:$0xff] %vm9962_vm12, %v2635_v32  ;;  %vm9973_vm12 = vmmov %vm9972_vm11 }
 0x4ff   : > { %v2761_v12 = vpop.permute.xlu0 %2760 }
 0x500   : > { %v2699_v24 = vpop.permute.xlu1 %2698  ;;  %2784 = vst.msk [vmem:[#allocation3] sm:$0xff] %vm9965_vm15, %v2761_v12  ;;  %vm9976_vm15 = vcmask 261344  }
 0x501   : > { %2721 = vst.msk [vmem:[#allocation3 + $0x8] sm:$0xff] %vm9964_vm14, %v2699_v24  ;;  %vm9975_vm14 = vmmov %vm9974_vm13 }
 0x503   : > { %v2763_v31 = vpop.permute.xlu0 %2762 }
 0x504   : > { %v2317_v49 = vpop.permute.xlu1 %2316  ;;  %2785 = vst.msk [vmem:[#allocation3 + $0x8] sm:$0xff] %vm9966_vm0, %v2763_v31  ;;  %vm9977_vm0 = vmmov %vm9976_vm15 }
 0x505   : > { %2338 = vst.msk [vmem:[#allocation3 + $0x10] sm:$0xff] %vm981_vm2, %v2317_v49 }
 0x507   : > { %v2381_v61 = vpop.permute.xlu0 %2380  ;;  %v2792_v16 = vld [vmem:[#allocation3] sm:$0xff] }
 0x508   : > { %v2319_v21 = vpop.permute.xlu1 %2318  ;;  %2402 = vst.msk [vmem:[#allocation3 + $0x10] sm:$0xff] %vm1046_vm5, %v2381_v61  ;;  %6167 = vmatprep.mubr.msk.bf16.mxu0 %vm9967_vm1, %v2792_v16  ;;  %vm9978_vm1 = vcmask 294144  }
 0x509   : > { %2339 = vst.msk [vmem:[#allocation3 + $0x18] sm:$0xff] %vm981_vm2, %v2319_v21 }
 0x50b   : > { %v2445_v45 = vpop.permute.xlu0 %2444  ;;  %v2793_v34 = vld [vmem:[#allocation3 + $0x8] sm:$0xff] }
 0x50c   : > { %v2383_v20 = vpop.permute.xlu1 %2382  ;;  %2466 = vst.msk [vmem:[#allocation3 + $0x10] sm:$0xff] %vm9956_vm6, %v2445_v45  ;;  %6168 = vmatmul.mubr.msk.bf16.vlgmr.msra.gmra.mrb[8].mxu0 %vm9968_vm7, %v2793_v34  ;;  %vm9979_vm6 = vmmov %vm9978_vm1 }
 0x50d   : > { %2403 = vst.msk [vmem:[#allocation3 + $0x18] sm:$0xff] %vm1046_vm5, %v2383_v20 }
 0x50f   : > { %v2509_v36 = vpop.permute.xlu0 %2508 }
 0x510   : > { %v2447_v42 = vpop.permute.xlu1 %2446  ;;  %2530 = vst.msk [vmem:[#allocation3 + $0x10] sm:$0xff] %vm9970_vm9, %v2509_v36  ;;  %vm9980_vm9 = vmmov %vm9968_vm7 }
 0x511   : > { %2467 = vst.msk [vmem:[#allocation3 + $0x18] sm:$0xff] %vm9969_vm8, %v2447_v42 }
 0x513   : > { %v2573_v41 = vpop.permute.xlu0 %2572 }
 0x514   : > { %v2511_v47 = vpop.permute.xlu1 %2510  ;;  %2594 = vst.msk [vmem:[#allocation3 + $0x10] sm:$0xff] %vm9972_vm11, %v2573_v41  ;;  %vm9982_vm11 = vcmask 162944  }
 0x515   : > { %2531 = vst.msk [vmem:[#allocation3 + $0x18] sm:$0xff] %vm9971_vm10, %v2511_v47  ;;  %vm9981_vm10 = vmmov %vm9969_vm8 }
 0x517   : > { %v2637_v33 = vpop.permute.xlu0 %2636 }
 0x518   : > { %v2575_v7 = vpop.permute.xlu1 %2574  ;;  %2658 = vst.msk [vmem:[#allocation3 + $0x10] sm:$0xff] %vm9974_vm13, %v2637_v33  ;;  %vm9984_vm13 = vcmask 195744  }
 0x519   : > { %2595 = vst.msk [vmem:[#allocation3 + $0x18] sm:$0xff] %vm9973_vm12, %v2575_v7  ;;  %vm9983_vm12 = vmmov %vm9982_vm11 }
 0x51b   : > { %v2701_v8 = vpop.permute.xlu0 %2700 }
 0x51c   : > { %v2639_v4 = vpop.permute.xlu1 %2638  ;;  %2722 = vst.msk [vmem:[#allocation3 + $0x10] sm:$0xff] %vm9976_vm15, %v2701_v8  ;;  %vm9986_vm15 = vcmask 228544  }
 0x51d   : > { %2659 = vst.msk [vmem:[#allocation3 + $0x18] sm:$0xff] %vm9975_vm14, %v2639_v4  ;;  %vm9985_vm14 = vmmov %vm9984_vm13 }
 0x51f   : > { %v2765_v0 = vpop.permute.xlu0 %2764 }
 0x520   : > { %v2703_v51 = vpop.permute.xlu1 %2702  ;;  %2786 = vst.msk [vmem:[#allocation3 + $0x10] sm:$0xff] %vm9978_vm1, %v2765_v0  ;;  %vm9988_vm1 = vcmask 261344  }
 0x521   : > { %2723 = vst.msk [vmem:[#allocation3 + $0x18] sm:$0xff] %vm9977_vm0, %v2703_v51  ;;  %vm9987_vm0 = vmmov %vm9986_vm15 }
 0x523   : > { %v2767_v43 = vpop.permute.xlu0 %2766 }
 0x524   : > { %v2321_v6 = vpop.permute.xlu1 %2320  ;;  %2787 = vst.msk [vmem:[#allocation3 + $0x18] sm:$0xff] %vm9979_vm6, %v2767_v43  ;;  %vm9989_vm6 = vmmov %vm9988_vm1 }
 0x525   : > { %2340 = vst.msk [vmem:[#allocation3 + $0x20] sm:$0xff] %vm981_vm2, %v2321_v6 }
 0x527   : > { %v2385_v53 = vpop.permute.xlu0 %2384  ;;  %v2794_v50 = vld [vmem:[#allocation3 + $0x10] sm:$0xff] }
 0x528   : > { %v2323_v26 = vpop.permute.xlu1 %2322  ;;  %2404 = vst.msk [vmem:[#allocation3 + $0x20] sm:$0xff] %vm1046_vm5, %v2385_v53  ;;  %6171 = vmatprep.mubr.msk.bf16.mxu0 %vm9968_vm7, %v2794_v50  ;;  %vm9990_vm7 = vcmask 294144  }
 0x529   : > { %2341 = vst.msk [vmem:[#allocation3 + $0x28] sm:$0xff] %vm981_vm2, %v2323_v26 }
 0x52b   : > { %v2449_v39 = vpop.permute.xlu0 %2448  ;;  %v2795_v44 = vld [vmem:[#allocation3 + $0x18] sm:$0xff] }
 0x52c   : > { %v2387_v18 = vpop.permute.xlu1 %2386  ;;  %2468 = vst.msk [vmem:[#allocation3 + $0x20] sm:$0xff] %vm9969_vm8, %v2449_v39  ;;  %6172 = vmatmul.mubr.msk.bf16.gmra.mrb[12].mxu0 %vm9980_vm9, %v2795_v44  ;;  %vm9991_vm8 = vmmov %vm9990_vm7 }
 0x52d   : > { %2405 = vst.msk [vmem:[#allocation3 + $0x28] sm:$0xff] %vm1046_vm5, %v2387_v18 }
 0x52f   : > { %v2513_v62 = vpop.permute.xlu0 %2512 }
 0x530   : > { %v2451_v40 = vpop.permute.xlu1 %2450  ;;  %2532 = vst.msk [vmem:[#allocation3 + $0x20] sm:$0xff] %vm9982_vm11, %v2513_v62  ;;  %vm9992_vm11 = vmmov %vm9980_vm9 }
 0x531   : > { %2469 = vst.msk [vmem:[#allocation3 + $0x28] sm:$0xff] %vm9981_vm10, %v2451_v40 }
 0x533   : > { %v2577_v28 = vpop.permute.xlu0 %2576 }
 0x534   : > { %v2515_v23 = vpop.permute.xlu1 %2514  ;;  %2596 = vst.msk [vmem:[#allocation3 + $0x20] sm:$0xff] %vm9984_vm13, %v2577_v28  ;;  %vm9994_vm13 = vcmask 162944  }
 0x535   : > { %2533 = vst.msk [vmem:[#allocation3 + $0x28] sm:$0xff] %vm9983_vm12, %v2515_v23  ;;  %vm9993_vm12 = vmmov %vm9981_vm10 }
 0x537   : > { %v2641_v1 = vpop.permute.xlu0 %2640 }
 0x538   : > { %v2579_v60 = vpop.permute.xlu1 %2578  ;;  %2660 = vst.msk [vmem:[#allocation3 + $0x20] sm:$0xff] %vm9986_vm15, %v2641_v1  ;;  %vm9996_vm15 = vcmask 195744  }
 0x539   : > { %2597 = vst.msk [vmem:[#allocation3 + $0x28] sm:$0xff] %vm9985_vm14, %v2579_v60  ;;  %vm9995_vm14 = vmmov %vm9994_vm13 }
 0x53b   : > { %v2705_v17 = vpop.permute.xlu0 %2704 }
 0x53c   : > { %v2643_v19 = vpop.permute.xlu1 %2642  ;;  %2724 = vst.msk [vmem:[#allocation3 + $0x20] sm:$0xff] %vm9988_vm1, %v2705_v17  ;;  %vm9998_vm1 = vcmask 228544  }
 0x53d   : > { %2661 = vst.msk [vmem:[#allocation3 + $0x28] sm:$0xff] %vm9987_vm0, %v2643_v19  ;;  %vm9997_vm0 = vmmov %vm9996_vm15 }
 0x53f   : > { %v2769_v46 = vpop.permute.xlu0 %2768 }
 0x540   : > { %v2707_v13 = vpop.permute.xlu1 %2706  ;;  %2788 = vst.msk [vmem:[#allocation3 + $0x20] sm:$0xff] %vm9990_vm7, %v2769_v46  ;;  %vm10000_vm7 = vcmask 261344  }
 0x541   : > { %2725 = vst.msk [vmem:[#allocation3 + $0x28] sm:$0xff] %vm9989_vm6, %v2707_v13  ;;  %vm9999_vm6 = vmmov %vm9998_vm1 }
 0x543   : > { %v2771_v29 = vpop.permute.xlu0 %2770 }
 0x544   : > { %v2325_v58 = vpop.permute.xlu1 %2324  ;;  %2789 = vst.msk [vmem:[#allocation3 + $0x28] sm:$0xff] %vm9991_vm8, %v2771_v29  ;;  %vm10001_vm8 = vmmov %vm10000_vm7 }
 0x545   : > { %2342 = vst.msk [vmem:[#allocation3 + $0x30] sm:$0xff] %vm981_vm2, %v2325_v58 }
 0x547   : > { %v2389_v5 = vpop.permute.xlu0 %2388  ;;  %v2796_v15 = vld [vmem:[#allocation3 + $0x20] sm:$0xff] }
 0x548   : > { %v2327_v54 = vpop.permute.xlu1 %2326  ;;  %2406 = vst.msk [vmem:[#allocation3 + $0x30] sm:$0xff] %vm1046_vm5, %v2389_v5  ;;  %6175 = vmatprep.mubr.msk.bf16.mxu0 %vm9980_vm9, %v2796_v15  ;;  %vm10002_vm9 = vcmask 294144  }
 0x549   : > { %2343 = vst.msk [vmem:[#allocation3 + $0x38] sm:$0xff] %vm981_vm2, %v2327_v54 }
 0x54b   : > { %v2453_v55 = vpop.permute.xlu0 %2452  ;;  %v2797_v32 = vld [vmem:[#allocation3 + $0x28] sm:$0xff] }
 0x54c   : > { %v2391_v30 = vpop.permute.xlu1 %2390  ;;  %2470 = vst.msk [vmem:[#allocation3 + $0x30] sm:$0xff] %vm9981_vm10, %v2453_v55  ;;  %6176 = vmatmul.mubr.msk.bf16.gmra.mrb[16].mxu0 %vm9992_vm11, %v2797_v32  ;;  %vm10003_vm10 = vmmov %vm10002_vm9 }
 0x54d   : > { %2407 = vst.msk [vmem:[#allocation3 + $0x38] sm:$0xff] %vm1046_vm5, %v2391_v30 }
 0x54f   : > { %v2517_v24 = vpop.permute.xlu0 %2516 }
 0x550   : > { %v2455_v37 = vpop.permute.xlu1 %2454  ;;  %2534 = vst.msk [vmem:[#allocation3 + $0x30] sm:$0xff] %vm9994_vm13, %v2517_v24 }
 0x551   : > { %2471 = vst.msk [vmem:[#allocation3 + $0x38] sm:$0xff] %vm9993_vm12, %v2455_v37  ;;  %vm10004_vm12 = vmmov %vm9992_vm11 }
 0x553   : > { %v2581_v49 = vpop.permute.xlu0 %2580 }
 0x554   : > { %v2519_v12 = vpop.permute.xlu1 %2518  ;;  %2598 = vst.msk [vmem:[#allocation3 + $0x30] sm:$0xff] %vm9996_vm15, %v2581_v49 }
 0x555   : > { %2535 = vst.msk [vmem:[#allocation3 + $0x38] sm:$0xff] %vm9995_vm14, %v2519_v12 }
 0x557   : > { %v2645_v21 = vpop.permute.xlu0 %2644 }
 0x558   : > { %v2583_v31 = vpop.permute.xlu1 %2582  ;;  %2662 = vst.msk [vmem:[#allocation3 + $0x30] sm:$0xff] %vm9998_vm1, %v2645_v21 }
 0x559   : > { %2599 = vst.msk [vmem:[#allocation3 + $0x38] sm:$0xff] %vm9997_vm0, %v2583_v31 }
 0x55b   : > { %v2709_v16 = vpop.permute.xlu0 %2708 }
 0x55c   : > { %v2647_v61 = vpop.permute.xlu1 %2646  ;;  %2726 = vst.msk [vmem:[#allocation3 + $0x30] sm:$0xff] %vm10000_vm7, %v2709_v16 }
 0x55d   : > { %2663 = vst.msk [vmem:[#allocation3 + $0x38] sm:$0xff] %vm9999_vm6, %v2647_v61 }
 0x55e   : > { %2727 = vst.msk [vmem:[#allocation3 + $0x38] sm:$0xff] %vm10001_vm8, %v7735_v48 }
 0x55f   : > { %v2773_v20 = vpop.permute.xlu0 %2772 }
 0x560   : > { %v2775_v45 = vpop.permute.xlu1 %2774  ;;  %2790 = vst.msk [vmem:[#allocation3 + $0x30] sm:$0xff] %vm10002_vm9, %v2773_v20 }
 0x561   : > { %2791 = vst.msk [vmem:[#allocation3 + $0x38] sm:$0xff] %vm10003_vm10, %v2775_v45 }
 0x567   : > { %v2798_v34 = vld [vmem:[#allocation3 + $0x30] sm:$0xff] }
 0x568   : > { %v2799_v42 = vld [vmem:[#allocation3 + $0x38] sm:$0xff]  ;;  %6179 = vmatprep.mubr.msk.bf16.mxu0 %vm9992_vm11, %v2798_v34 }
 0x569   : > { %6180 = vmatmul.mubr.msk.bf16.gmra.mrb[20].mxu0 %vm10004_vm12, %v2799_v42 }
 0x5df   : > { %v6169_v36 = vpop.f32.mrb[8].mxu0 }
 0x5e0   : > { %v2881_v47 = vpop.f32.mrb[9].mxu0  ;;  %v7824_v43 = vmul.f32 %v6169_v36, %v9936_v35 }
 0x5e1   : > { %v6170_v41 = vpop.f32.mrb[10].mxu0  ;;  %v7819_v0 = vmul.f32 %v2881_v47, %v9934_v52 }
 0x5e2   : > { %v2884_v7 = vpop.f32.mrb[11].mxu0  ;;  %v3004_v44 = vmul.f32 %v7824_v43, %v7824_v43  ;;  %v7837_v62 = vmul.f32 %v6170_v41, %v9937_v2  ;;  %v2965_v60 = vsel %vm876_vm3, %v7824_v43, 0.0 }
 0x5e3   : > { %v7816_v51 = vmul.f32 %v2884_v7, %v9935_v22  ;;  %v3002_v26 = vmul.f32 %v7819_v0, %v7819_v0  ;;  %v2962_v50 = vsel %vm876_vm3, %v7819_v0, 0.0 }
 0x5e4   : > { %v3021_v17 = vsel %vm876_vm3, %v3004_v44, 0.0  ;;  %v3005_v13 = vmul.f32 %v7837_v62, %v7837_v62  ;;  %v2967_v15 = vsel %vm876_vm3, %v7837_v62, 0.0 }
 0x5e5   : > { %v3003_v6 = vmul.f32 %v7816_v51, %v7816_v51  ;;  %v2963_v53 = vsel %vm876_vm3, %v7816_v51, 0.0  ;;  %v3018_v40 = vsel %vm876_vm3, %v3002_v26, 0.0 }
 0x5e6   : > { %v2964_v39 = vadd.f32 %v2963_v53, %v2962_v50  ;;  %v3023_v37 = vsel %vm876_vm3, %v3005_v13, 0.0 }
 0x5e7   : > { %v3019_v18 = vsel %vm876_vm3, %v3003_v6, 0.0 }
 0x5e8   : > { %v3020_v28 = vadd.f32 %v3019_v18, %v3018_v40  ;;  %v2966_v1 = vadd.f32 %v2965_v60, %v2964_v39 }
 0x5ea   : > { %v3022_v54 = vadd.f32 %v3021_v17, %v3020_v28  ;;  %v2968_v32 = vadd.f32 %v2967_v15, %v2966_v1 }
 0x5ec   : > { %v3024_v31 = vadd.f32 %v3023_v37, %v3022_v54 }
 0x5ff   : > { %v6173_v33 = vpop.f32.mrb[12].mxu0 }
 0x600   : > { %v2897_v4 = vpop.f32.mrb[13].mxu0  ;;  %v7861_v21 = vmul.f32 %v6173_v33, %v9940_v3 }
 0x601   : > { %v6174_v8 = vpop.f32.mrb[14].mxu0  ;;  %v7840_v23 = vmul.f32 %v2897_v4, %v9938_v25 }
 0x602   : > { %v2900_v48 = vpop.f32.mrb[15].mxu0  ;;  %v3008_v34 = vmul.f32 %v7861_v21, %v7861_v21  ;;  %v7869_v42 = vmul.f32 %v6174_v8, %v9941_v14  ;;  %v2973_v41 = vsel %vm876_vm3, %v7861_v21, 0.0 }
 0x603   : > { %v3006_v46 = vmul.f32 %v7840_v23, %v7840_v23  ;;  %v7850_v58 = vmul.f32 %v2900_v48, %v9939_v27  ;;  %v2969_v30 = vsel %vm876_vm3, %v7840_v23, 0.0 }
 0x604   : > { %v2970_v49 = vadd.f32 %v2969_v30, %v2968_v32  ;;  %v3029_v33 = vsel %vm876_vm3, %v3008_v34, 0.0  ;;  %v3009_v4 = vmul.f32 %v7869_v42, %v7869_v42  ;;  %v2975_v26 = vsel %vm876_vm3, %v7869_v42, 0.0 }
 0x605   : > { %v3025_v24 = vsel %vm876_vm3, %v3006_v46, 0.0  ;;  %v3007_v12 = vmul.f32 %v7850_v58, %v7850_v58  ;;  %v2971_v61 = vsel %vm876_vm3, %v7850_v58, 0.0 }
 0x606   : > { %v3026_v16 = vadd.f32 %v3025_v24, %v3024_v31  ;;  %v2972_v45 = vadd.f32 %v2971_v61, %v2970_v49  ;;  %v3031_v18 = vsel %vm876_vm3, %v3009_v4, 0.0 }
 0x607   : > { %v3027_v20 = vsel %vm876_vm3, %v3007_v12, 0.0 }
 0x608   : > { %v3028_v47 = vadd.f32 %v3027_v20, %v3026_v16  ;;  %v2974_v7 = vadd.f32 %v2973_v41, %v2972_v45 }
 0x60a   : > { %v3030_v8 = vadd.f32 %v3029_v33, %v3028_v47  ;;  %v2976_v50 = vadd.f32 %v2975_v26, %v2974_v7 }
 0x60c   : > { %v3032_v28 = vadd.f32 %v3031_v18, %v3030_v8 }
 0x61f   : > { %v6177_v19 = vpop.f32.mrb[16].mxu0 }
 0x620   : > { %v2913_v29 = vpop.f32.mrb[17].mxu0  ;;  %v7893_v60 = vmul.f32 %v6177_v19, %v9944_v56 }
 0x621   : > { %v6178_v5 = vpop.f32.mrb[18].mxu0  ;;  %v7872_v36 = vmul.f32 %v2913_v29, %v9942_v63 }
 0x622   : > { %v2916_v55 = vpop.f32.mrb[19].mxu0  ;;  %v7899_v46 = vmul.f32 %v6178_v5, %v9945_v59  ;;  %v3012_v54 = vmul.f32 %v7893_v60, %v7893_v60  ;;  %v2981_v30 = vsel %vm876_vm3, %v7893_v60, 0.0 }
 0x623   : > { %v3010_v48 = vmul.f32 %v7872_v36, %v7872_v36  ;;  %v7882_v6 = vmul.f32 %v2916_v55, %v9943_v38  ;;  %v2977_v53 = vsel %vm876_vm3, %v7872_v36, 0.0 }
 0x624   : > { %v2978_v40 = vadd.f32 %v2977_v53, %v2976_v50  ;;  %v3013_v19 = vmul.f32 %v7899_v46, %v7899_v46  ;;  %v3037_v32 = vsel %vm876_vm3, %v3012_v54, 0.0  ;;  %v2983_v5 = vsel %vm876_vm3, %v7899_v46, 0.0 }
 0x625   : > { %v3033_v39 = vsel %vm876_vm3, %v3010_v48, 0.0  ;;  %v3011_v44 = vmul.f32 %v7882_v6, %v7882_v6  ;;  %v2979_v1 = vsel %vm876_vm3, %v7882_v6, 0.0 }
 0x626   : > { %v3034_v17 = vadd.f32 %v3033_v39, %v3032_v28  ;;  %v2980_v29 = vadd.f32 %v2979_v1, %v2978_v40  ;;  %v3039_v16 = vsel %vm876_vm3, %v3013_v19, 0.0 }
 0x627   : > { %v3035_v13 = vsel %vm876_vm3, %v3011_v44, 0.0 }
 0x628   : > { %v3036_v15 = vadd.f32 %v3035_v13, %v3034_v17  ;;  %v2982_v55 = vadd.f32 %v2981_v30, %v2980_v29 }
 0x62a   : > { %v3038_v24 = vadd.f32 %v3037_v32, %v3036_v15  ;;  %v2984_v20 = vadd.f32 %v2983_v5, %v2982_v55 }
 0x62c   : > { %v3040_v4 = vadd.f32 %v3039_v16, %v3038_v24 }
 0x63c   : > { %v6181_v37 = vpop.f32.mrb[20].mxu0 }
 0x63d   : > { %v2929_v12 = vpop.f32.mrb[21].mxu0  ;;  %v7911_v49 = vmul.f32 %v6181_v37, %v9948_v57 }
 0x63e   : > { %v7914_v31 = vmul.f32 %v2929_v12, %v9946_v10  ;;  %v6182_v61 = vpop.f32.mrb[22].mxu0 }
 0x63f   : > { %v2932_v45 = vpop.f32.mrb[23].mxu0  ;;  %v7922_v41 = vmul.f32 %v6182_v61, %v9949_v11  ;;  %v3016_v48 = vmul.f32 %v7911_v49, %v7911_v49  ;;  %v2989_v39 = vsel %vm876_vm3, %v7911_v49, 0.0 }
 0x640   : > { %v2985_v34 = vsel %vm876_vm3, %v7914_v31, 0.0  ;;  %v3014_v47 = vmul.f32 %v7914_v31, %v7914_v31  ;;  %v7925_v7 = vmul.f32 %v2932_v45, %v9947_v9 }
 0x641   : > { %v2986_v33 = vadd.f32 %v2985_v34, %v2984_v20  ;;  %v3017_v44 = vmul.f32 %v7922_v41, %v7922_v41  ;;  %v2991_v17 = vsel %vm876_vm3, %v7922_v41, 0.0  ;;  %v3045_v13 = vsel %vm876_vm3, %v3016_v48, 0.0 }
 0x642   : > { %v3041_v8 = vsel %vm876_vm3, %v3014_v47, 0.0  ;;  %v2987_v26 = vsel %vm876_vm3, %v7925_v7, 0.0  ;;  %v3015_v53 = vmul.f32 %v7925_v7, %v7925_v7 }
 0x643   : > { %v3042_v50 = vadd.f32 %v3041_v8, %v3040_v4  ;;  %v2988_v18 = vadd.f32 %v2987_v26, %v2986_v33  ;;  %v3047_v15 = vsel %vm876_vm3, %v3017_v44, 0.0 }
 0x644   : > { %v3043_v40 = vsel %vm876_vm3, %v3015_v53, 0.0 }
 0x645   : > { %v2990_v28 = vadd.f32 %v2989_v39, %v2988_v18  ;;  %v3044_v1 = vadd.f32 %v3043_v40, %v3042_v50 }
 0x647   : > { %v2992_v29 = vadd.f32 %v2991_v17, %v2990_v28  ;;  %v3046_v54 = vadd.f32 %v3045_v13, %v3044_v1 }
 0x649   : > { %2993 = vadd.xlane.f32.xlu0 %v2992_v29  ;;  %v3048_v30 = vadd.f32 %v3047_v15, %v3046_v54 }
 0x64b   : > { %3049 = vadd.xlane.f32.xlu1 %v3048_v30 }
 0x6d6   : > { %v2994_v19 = vpop.xlane.xlu0 %2993 }
 0x6d7   : > { %v2995_v55 = vrot.slane %v2994_v19, 4 }
 0x6d8   : > { %v3050_v32 = vpop.xlane.xlu1 %3049 }
 0x6d9   : > { %v2996_v37 = vadd.f32 %v2995_v55, %v2994_v19  ;;  %v3051_v24 = vrot.slane %v3050_v32, 4 }
 0x6db   : > { %v3052_v12 = vadd.f32 %v3051_v24, %v3050_v32  ;;  %v2997_v5 = vrot.slane %v2996_v37, 2  ;;  %v6032_v24 = vld [vmem:[%s9618_s10] ss:$0 sm:$0xff] }
 0x6dd   : > { %v2998_v61 = vadd.f32 %v2997_v5, %v2996_v37  ;;  %v3053_v16 = vrot.slane %v3052_v12, 2 }
 0x6df   : > { %v2999_v20 = vrot.slane %v2998_v61, 1  ;;  %v3054_v45 = vadd.f32 %v3053_v16, %v3052_v12 }
 0x6e1   : > { %v3000_v34 = vadd.f32 %v2999_v20, %v2998_v61  ;;  %v3055_v47 = vrot.slane %v3054_v45, 1 }
 0x6e3   : > { %6243 = vpush %v3000_v34  ;;  %v3056_v33 = vadd.f32 %v3055_v47, %v3054_v45 }
 0x6e5   : > { %6245 = vpush %v3056_v33 }
 0x714   : > { %s6244_s1 = spop %6243 }
 0x715   : > { %s3058_s22 = smul.f32 0.00390625, %s6244_s1  ;;  %s10036_s1 = smov 28  }
 0x716   : > { %s6246_s0 = spop %6245 }
 0x717   : > { %s3060_s18 = smul.f32 %s3058_s22, %s3058_s22  ;;  %v3063_v8 = vstv %s3058_s22  ;;  %s10041_s22 = smov 4  }
 0x718   : > { %s3059_s20 = smul.f32 0.00390625, %s6246_s0  ;;  %v3064_v26 = vsub.f32 %v7819_v0, %v3063_v8  ;;  %v3065_v53 = vsub.f32 %v7816_v51, %v3063_v8  ;;  %v3066_v50 = vsub.f32 %v7824_v43, %v3063_v8  ;;  %v3067_v18 = vsub.f32 %v7837_v62, %v3063_v8  ;;  %s10107_s0 = smov 8  }
 0x719   : > { %v3068_v44 = vsub.f32 %v7840_v23, %v3063_v8  ;;  %v3069_v40 = vsub.f32 %v7850_v58, %v3063_v8  ;;  %v3070_v28 = vsub.f32 %v7861_v21, %v3063_v8  ;;  %v3071_v1 = vsub.f32 %v7869_v42, %v3063_v8  ;;  %v6031_v58 = vld [vmem:[%s9617_s9] ss:$0 sm:$0xff] }
 0x71a   : > { %s3061_s21 = ssub.f32 %s3059_s20, %s3060_s18  ;;  %v3072_v17 = vsub.f32 %v7872_v36, %v3063_v8  ;;  %v3073_v0 = vsub.f32 %v7882_v6, %v3063_v8  ;;  %v3074_v13 = vsub.f32 %v7893_v60, %v3063_v8  ;;  %v3075_v51 = vsub.f32 %v7899_v46, %v3063_v8 }
 0x71b   : > { %v3076_v43 = vsub.f32 %v7914_v31, %v3063_v8  ;;  %v3077_v62 = vsub.f32 %v7925_v7, %v3063_v8  ;;  %v3078_v23 = vsub.f32 %v7911_v49, %v3063_v8  ;;  %v3079_v6 = vsub.f32 %v7922_v41, %v3063_v8 }
 0x71c   : > { %s3062_s30 = smax.f32 %s10005_s27, %s3061_s21 }
 0x71d   : > { %s3080_s2 = sadd.f32 1e-05, %s3062_s30  ;;  %s6528_s30 = smov 56  }
 0x71f   : > { %v3081_v4 = vstv %s3080_s2 }
 0x720   : > { %6375 = vrsqrt.f32 %v3081_v4 }
 0x72a   : > { %v6376_v48 = vpop.eup %6375 }
 0x72b   : > { %6247 = vpush %v6376_v48 }
 0x75c   : > { %s6248_s3 = spop %6247 }
 0x75d   : > { %v3084_v39 = vstv %s6248_s3 }
 0x75e   : > { %v3085_v29 = vmul.f32 %v3084_v39, %v3064_v26  ;;  %v3086_v21 = vmul.f32 %v3084_v39, %v3065_v53  ;;  %v3087_v42 = vmul.f32 %v3084_v39, %v3066_v50  ;;  %v3088_v36 = vmul.f32 %v3084_v39, %v3067_v18 }
 0x75f   : > { %v3089_v54 = vmul.f32 %v3084_v39, %v3068_v44  ;;  %v3090_v60 = vmul.f32 %v3084_v39, %v3069_v40  ;;  %v3091_v15 = vmul.f32 %v3084_v39, %v3070_v28  ;;  %v3092_v46 = vmul.f32 %v3084_v39, %v3071_v1 }
 0x760   : > { %v3093_v30 = vmul.f32 %v3084_v39, %v3072_v17  ;;  %v3094_v31 = vmul.f32 %v3084_v39, %v3073_v0  ;;  %v3095_v19 = vmul.f32 %v3084_v39, %v3074_v13  ;;  %v3096_v7 = vmul.f32 %v3084_v39, %v3075_v51 }
 0x761   : > { %v3097_v55 = vmul.f32 %v3084_v39, %v3076_v43  ;;  %v3098_v49 = vmul.f32 %v3084_v39, %v3077_v62  ;;  %v3099_v32 = vmul.f32 %v3084_v39, %v3078_v23  ;;  %v3107_v37 = vmul.f32 %v6031_v58, %v3085_v29 }
 0x762   : > { %v3108_v12 = vmul.f32 %v6031_v58, %v3086_v21  ;;  %v3109_v5 = vmul.f32 %v6031_v58, %v3087_v42  ;;  %v3110_v61 = vmul.f32 %v6031_v58, %v3088_v36  ;;  %v3111_v16 = vmul.f32 %v6031_v58, %v3089_v54  ;;  %v10006_v42 = vld [vmem:[#allocation20_spill] sm:$0xff] }
 0x763   : > { %v3100_v41 = vmul.f32 %v3084_v39, %v3079_v6  ;;  %v3112_v20 = vmul.f32 %v6031_v58, %v3090_v60  ;;  %v3113_v45 = vmul.f32 %v6031_v58, %v3091_v15  ;;  %v3114_v34 = vmul.f32 %v6031_v58, %v3092_v46  ;;  %v10007_v54 = vld [vmem:[#allocation24_spill] sm:$0xff]  ;;  %v10008_v60 = vld [vmem:[#allocation18_spill] sm:$0xff] }
 0x764   : > { %v3115_v47 = vmul.f32 %v6031_v58, %v3093_v30  ;;  %v3116_v33 = vmul.f32 %v6031_v58, %v3094_v31  ;;  %v3117_v4 = vmul.f32 %v6031_v58, %v3095_v19  ;;  %v3118_v48 = vmul.f32 %v6031_v58, %v3096_v7  ;;  %v10009_v46 = vld [vmem:[#allocation22_spill] sm:$0xff]  ;;  %v10010_v31 = vld [vmem:[#allocation29_spill] sm:$0xff] }
 0x765   : > { %v3119_v8 = vmul.f32 %v6031_v58, %v3097_v55  ;;  %v3120_v26 = vmul.f32 %v6031_v58, %v3098_v49  ;;  %v3121_v53 = vmul.f32 %v6031_v58, %v3099_v32  ;;  %v3129_v50 = vadd.f32 %v6032_v24, %v3107_v37  ;;  %v10011_v7 = vld [vmem:[#allocation33_spill] sm:$0xff]  ;;  %v10012_v49 = vld [vmem:[#allocation27_spill] sm:$0xff] }
 0x766   : > { %v3130_v18 = vadd.f32 %v6032_v24, %v3108_v12  ;;  %v3131_v44 = vadd.f32 %v6032_v24, %v3109_v5  ;;  %v3132_v40 = vadd.f32 %v6032_v24, %v3110_v61  ;;  %v3133_v28 = vadd.f32 %v6032_v24, %v3111_v16  ;;  %v10013_v37 = vld [vmem:[#allocation31_spill] sm:$0xff]  ;;  %v10014_v5 = vld [vmem:[#allocation21_spill] sm:$0xff] }
 0x767   : > { %v3122_v1 = vmul.f32 %v6031_v58, %v3100_v41  ;;  %v3134_v17 = vadd.f32 %v6032_v24, %v3112_v20  ;;  %v3135_v0 = vadd.f32 %v6032_v24, %v3113_v45  ;;  %v3136_v13 = vadd.f32 %v6032_v24, %v3114_v34  ;;  %v10015_v16 = vld [vmem:[#allocation25_spill] sm:$0xff]  ;;  %v10016_v20 = vld [vmem:[#allocation19_spill] sm:$0xff] }
 0x768   : > { %v3137_v39 = vadd.f32 %v6032_v24, %v3115_v47  ;;  %v3138_v51 = vadd.f32 %v6032_v24, %v3116_v33  ;;  %v3139_v43 = vadd.f32 %v6032_v24, %v3117_v4  ;;  %v3140_v62 = vadd.f32 %v6032_v24, %v3118_v48  ;;  %v10017_v34 = vld [vmem:[#allocation23_spill] sm:$0xff]  ;;  %v4039_v33 = vld [vmem:[#allocation2 + $0x98] sm:$0xff]  ;;  %v4040_v4 = vld [vmem:[#allocation2 + $0xa0] sm:$0xff] }
 0x769   : > { %v3141_v23 = vadd.f32 %v6032_v24, %v3119_v8  ;;  %v3142_v29 = vadd.f32 %v6032_v24, %v3120_v26  ;;  %v3143_v21 = vadd.f32 %v6032_v24, %v3121_v53  ;;  %v3145_v36 = vadd.f32 %v3129_v50, %v10006_v42  ;;  %v10018_v48 = vld [vmem:[#allocation30_spill] sm:$0xff]  ;;  %v10019_v26 = vld [vmem:[#allocation35_spill] sm:$0xff]  ;;  %v10020_v53 = vld [vmem:[#allocation28_spill] sm:$0xff] }
 0x76a   : > { %v3146_v6 = vadd.f32 %v3130_v18, %v10007_v54  ;;  %v3147_v15 = vadd.f32 %v3131_v44, %v10008_v60  ;;  %v3148_v30 = vadd.f32 %v3132_v40, %v10009_v46  ;;  %v3149_v58 = vadd.f32 %v3133_v28, %v10010_v31  ;;  %v3641_v44 = vld [vmem:[#allocation2 + $0x8] sm:$0xff]  ;;  %v3642_v40 = vld [vmem:[#allocation2 + $0x10] sm:$0xff] }
 0x76b   : > { %v3144_v19 = vadd.f32 %v6032_v24, %v3122_v1  ;;  %v3150_v55 = vadd.f32 %v3134_v17, %v10011_v7  ;;  %v3151_v32 = vadd.f32 %v3135_v0, %v10012_v49  ;;  %v3152_v12 = vadd.f32 %v3136_v13, %v10013_v37  ;;  %v10037_v31 = vld [vmem:[#allocation32_spill] sm:$0xff] }
 0x76c   : > { %v3153_v61 = vadd.f32 %v3137_v39, %v10014_v5  ;;  %v3154_v41 = vadd.f32 %v3138_v51, %v10015_v16  ;;  %v3155_v45 = vadd.f32 %v3139_v43, %v10016_v20  ;;  %v3156_v47 = vadd.f32 %v3140_v62, %v10017_v34 }
 0x76d   : > { %v3157_v8 = vadd.f32 %v3141_v23, %v10018_v48  ;;  %v3158_v24 = vadd.f32 %v3142_v29, %v10019_v26  ;;  %v7981_v50 = vadd.f32 %v3143_v21, %v10020_v53  ;;  %v7983_v18 = vmul.f32 0.5, %v3145_v36 }
 0x76e   : > { %v7985_v28 = vmul.f32 0.5, %v3146_v6  ;;  %v7987_v1 = vmul.f32 0.5, %v3147_v15  ;;  %v7989_v17 = vmul.f32 0.5, %v3148_v30  ;;  %v7991_v0 = vmul.f32 0.5, %v3149_v58 }
 0x76f   : > { %10021 = vst [vmem:[#allocation49_spill] sm:$0xff] %v7983_v18  ;;  %v7993_v13 = vmul.f32 0.5, %v3150_v55  ;;  %v7995_v39 = vmul.f32 0.5, %v3151_v32  ;;  %v7997_v51 = vmul.f32 0.5, %v3152_v12  ;;  %v4048_v43 = vpack.c.bf16 %v4040_v4, %v4039_v33 }
 0x770   : > { %10022 = vst [vmem:[#allocation50_spill] sm:$0xff] %v7985_v28  ;;  %10023 = vst [vmem:[#allocation51_spill] sm:$0xff] %v7987_v1  ;;  %v7999_v62 = vmul.f32 0.5, %v3153_v61  ;;  %v8001_v23 = vmul.f32 0.5, %v3154_v41  ;;  %v8003_v29 = vmul.f32 0.5, %v3155_v45  ;;  %v3657_v21 = vpack.c.bf16 %v3642_v40, %v3641_v44 }
 0x771   : > { %10024 = vst [vmem:[#allocation52_spill] sm:$0xff] %v7989_v17  ;;  %10025 = vst [vmem:[#allocation53_spill] sm:$0xff] %v7991_v0  ;;  %v8005_v42 = vmul.f32 0.5, %v3156_v47  ;;  %v8007_v54 = vmul.f32 0.5, %v3157_v8  ;;  %v8009_v60 = vmul.f32 0.70710677, %v3145_v36  ;;  %4071 = vrot.lane.b32.xlu1 %v4048_v43, %s10036_s1  ;;  %v3160_v7 = vadd.f32 %v3144_v19, %v10037_v31 }
 0x772   : > { %10026 = vst [vmem:[#allocation54_spill] sm:$0xff] %v7993_v13  ;;  %10027 = vst [vmem:[#allocation55_spill] sm:$0xff] %v7995_v39  ;;  %v8011_v46 = vmul.f32 0.70710677, %v3146_v6  ;;  %v8015_v49 = vmul.f32 0.70710677, %v3147_v15  ;;  %3673 = vrot.lane.b32.xlu0 %v3657_v21, %s10041_s22 }
 0x773   : > { %10028 = vst [vmem:[#allocation56_spill] sm:$0xff] %v7997_v51  ;;  %10029 = vst [vmem:[#allocation57_spill] sm:$0xff] %v7999_v62  ;;  %v8017_v37 = vmul.f32 0.70710677, %v3148_v30  ;;  %v8019_v5 = vmul.f32 0.70710677, %v3149_v58 }
 0x774   : > { %10030 = vst [vmem:[#allocation58_spill] sm:$0xff] %v8001_v23  ;;  %10031 = vst [vmem:[#allocation59_spill] sm:$0xff] %v8003_v29  ;;  %v8022_v16 = vmul.f32 0.70710677, %v3150_v55  ;;  %v8024_v20 = vmul.f32 0.70710677, %v3151_v32 }
 0x775   : > { %10032 = vst [vmem:[#allocation60_spill] sm:$0xff] %v8005_v42  ;;  %10033 = vst [vmem:[#allocation61_spill] sm:$0xff] %v8007_v54  ;;  %v8026_v36 = vmul.f32 0.70710677, %v3152_v12  ;;  %v8028_v6 = vmul.f32 0.70710677, %v3153_v61 }
 0x776   : > { %10034 = vst [vmem:[#allocation62_spill] sm:$0xff] %v8009_v60  ;;  %10035 = vst [vmem:[#allocation63_spill] sm:$0xff] %v8011_v46  ;;  %v8030_v34 = vmul.f32 0.70710677, %v3154_v41  ;;  %v8032_v33 = vmul.f32 0.70710677, %v3155_v45 }
 0x777   : > { %10038 = vst [vmem:[#allocation64_spill] sm:$0xff] %v8015_v49  ;;  %10039 = vst [vmem:[#allocation36_spill] sm:$0xff] %v8017_v37  ;;  %v8034_v15 = vmul.f32 0.70710677, %v3156_v47  ;;  %v8036_v30 = vmul.f32 0.70710677, %v3157_v8 }
 0x778   : > { %10040 = vst [vmem:[#allocation37_spill] sm:$0xff] %v8019_v5  ;;  %10042 = vst [vmem:[#allocation38_spill] sm:$0xff] %v8022_v16  ;;  %v8038_v58 = vmul.f32 0.70710677, %v3158_v24  ;;  %v8041_v19 = vmul.f32 0.70710677, %v7981_v50 }
 0x779   : > { %10043 = vst [vmem:[#allocation39_spill] sm:$0xff] %v8024_v20  ;;  %10044 = vst [vmem:[#allocation40_spill] sm:$0xff] %v8026_v36  ;;  %v8043_v55 = vmul.f32 0.70710677, %v3160_v7  ;;  %v8046_v32 = vand.u32 2147483647, %v8009_v60 }
 0x77a   : > { %10045 = vst [vmem:[#allocation41_spill] sm:$0xff] %v8028_v6  ;;  %10046 = vst [vmem:[#allocation42_spill] sm:$0xff] %v8030_v34  ;;  %v8049_v12 = vand.u32 2147483647, %v8011_v46  ;;  %v8052_v61 = vand.u32 2147483647, %v8015_v49 }
 0x77b   : > { %10047 = vst [vmem:[#allocation43_spill] sm:$0xff] %v8032_v33  ;;  %10048 = vst [vmem:[#allocation44_spill] sm:$0xff] %v8034_v15  ;;  %v8055_v41 = vand.u32 2147483647, %v8017_v37  ;;  %v8058_v45 = vand.u32 2147483647, %v8019_v5 }
 0x77c   : > { %10049 = vst [vmem:[#allocation45_spill] sm:$0xff] %v8036_v30  ;;  %10050 = vst [vmem:[#allocation46_spill] sm:$0xff] %v8038_v58  ;;  %v8061_v47 = vand.u32 2147483647, %v8022_v16  ;;  %v8064_v4 = vand.u32 2147483647, %v8024_v20 }
 0x77d   : > { %10051 = vst [vmem:[#allocation47_spill] sm:$0xff] %v8041_v19  ;;  %10052 = vst [vmem:[#allocation48_spill] sm:$0xff] %v8043_v55  ;;  %v8067_v48 = vand.u32 2147483647, %v8026_v36  ;;  %v8070_v8 = vand.u32 2147483647, %v8028_v6 }
 0x77e   : > { %v8073_v26 = vand.u32 2147483647, %v8030_v34  ;;  %v8076_v53 = vand.u32 2147483647, %v8032_v33  ;;  %v8079_v44 = vand.u32 2147483647, %v8034_v15 }
 0x77f   : > { %v8082_v40 = vand.u32 2147483647, %v8036_v30  ;;  %v8085_v43 = vand.u32 2147483647, %v8038_v58  ;;  %v8088_v21 = vand.u32 2147483647, %v8041_v19 }
 0x780   : > { %v3209_v31 = vmul.f32 0.3275911, %v8046_v32  ;;  %v8092_v11 = vand.u32 2147483647, %v8043_v55  ;;  %v3210_v57 = vmul.f32 0.3275911, %v8049_v12 }
 0x781   : > { %v3211_v9 = vmul.f32 0.3275911, %v8052_v61  ;;  %v3212_v10 = vmul.f32 0.3275911, %v8055_v41  ;;  %v3213_v59 = vmul.f32 0.3275911, %v8058_v45 }
 0x782   : > { %v3214_v56 = vmul.f32 0.3275911, %v8061_v47  ;;  %v3215_v38 = vmul.f32 0.3275911, %v8064_v4  ;;  %v3216_v63 = vmul.f32 0.3275911, %v8067_v48 }
 0x783   : > { %v3217_v14 = vmul.f32 0.3275911, %v8070_v8  ;;  %v8102_v3 = vmul.f32 0.5, %v3158_v24  ;;  %v3218_v27 = vmul.f32 0.3275911, %v8073_v26  ;;  %v3225_v2 = vadd.f32 1.0, %v3209_v31 }
 0x784   : > { %v3219_v25 = vmul.f32 0.3275911, %v8076_v53  ;;  %v8107_v35 = vmul.f32 0.5, %v7981_v50  ;;  %v3220_v22 = vmul.f32 0.3275911, %v8079_v44  ;;  %v3226_v54 = vadd.f32 1.0, %v3210_v57 }
 0x785   : > { %10053 = vst [vmem:[#allocation65_spill] sm:$0xff] %v8102_v3  ;;  %v3221_v52 = vmul.f32 0.3275911, %v8082_v40  ;;  %v8111_v42 = vmul.f32 0.5, %v3160_v7  ;;  %v3222_v29 = vmul.f32 0.3275911, %v8085_v43  ;;  %6377 = vrcp.f32 %v3225_v2 }
 0x786   : > { %10054 = vst [vmem:[#allocation66_spill] sm:$0xff] %v8107_v35  ;;  %v3223_v24 = vmul.f32 0.3275911, %v8088_v21  ;;  %v3227_v3 = vadd.f32 1.0, %v3211_v9  ;;  %v3224_v23 = vmul.f32 0.3275911, %v8092_v11  ;;  %6379 = vrcp.f32 %v3226_v54 }
 0x787   : > { %10055 = vst [vmem:[#allocation67_spill] sm:$0xff] %v8111_v42  ;;  %v3228_v62 = vadd.f32 1.0, %v3212_v10  ;;  %v3229_v51 = vadd.f32 1.0, %v3213_v59  ;;  %v3230_v31 = vadd.f32 1.0, %v3214_v56  ;;  %v3231_v39 = vadd.f32 1.0, %v3215_v38 }
 0x788   : > { %v3232_v50 = vadd.f32 1.0, %v3216_v63  ;;  %v3233_v35 = vadd.f32 1.0, %v3217_v14  ;;  %v3234_v13 = vadd.f32 1.0, %v3218_v27  ;;  %v3235_v0 = vadd.f32 1.0, %v3219_v25 }
 0x789   : > { %v3236_v17 = vadd.f32 1.0, %v3220_v22  ;;  %v3237_v57 = vadd.f32 1.0, %v3221_v52  ;;  %v3238_v7 = vadd.f32 1.0, %v3222_v29  ;;  %v3239_v42 = vadd.f32 1.0, %v3223_v24 }
 0x78a   : > { %6381 = vrcp.f32 %v3227_v3  ;;  %v3240_v1 = vadd.f32 1.0, %v3224_v23  ;;  %v3401_v9 = vsub.f32 0.0, %v8046_v32  ;;  %v3402_v10 = vsub.f32 0.0, %v8049_v12 }
 0x78b   : > { %6383 = vrcp.f32 %v3228_v62  ;;  %v3403_v38 = vsub.f32 0.0, %v8052_v61  ;;  %v3404_v14 = vsub.f32 0.0, %v8055_v41  ;;  %v3405_v2 = vsub.f32 0.0, %v8058_v45 }
 0x78c   : > { %6385 = vrcp.f32 %v3229_v51  ;;  %v3406_v22 = vsub.f32 0.0, %v8061_v47  ;;  %v3407_v52 = vsub.f32 0.0, %v8064_v4  ;;  %v3408_v25 = vsub.f32 0.0, %v8067_v48 }
 0x78d   : > { %6387 = vrcp.f32 %v3230_v31  ;;  %v3409_v27 = vsub.f32 0.0, %v8070_v8  ;;  %v3410_v3 = vsub.f32 0.0, %v8073_v26  ;;  %v3411_v63 = vsub.f32 0.0, %v8076_v53 }
 0x78e   : > { %6389 = vrcp.f32 %v3231_v39  ;;  %v3412_v56 = vsub.f32 0.0, %v8079_v44  ;;  %v3413_v59 = vsub.f32 0.0, %v8082_v40  ;;  %v3417_v39 = vmul.f32 %v3401_v9, %v8046_v32 }
 0x78f   : > { %6391 = vrcp.f32 %v3232_v50  ;;  %v3418_v29 = vmul.f32 %v3402_v10, %v8049_v12  ;;  %v3419_v54 = vmul.f32 %v3403_v38, %v8052_v61  ;;  %v3420_v24 = vmul.f32 %v3404_v14, %v8055_v41  ;;  %v8136_v31 = vpop.eup %6377 }
 0x790   : > { %6393 = vrcp.f32 %v3233_v35  ;;  %v3421_v50 = vmul.f32 %v3405_v2, %v8058_v45  ;;  %v3422_v35 = vmul.f32 %v3406_v22, %v8061_v47  ;;  %v3423_v62 = vmul.f32 %v3407_v52, %v8064_v4  ;;  %v8141_v51 = vpop.eup %6379 }
 0x791   : > { %6395 = vrcp.f32 %v3234_v13  ;;  %v3257_v13 = vmul.f32 1.0614054, %v8136_v31  ;;  %v8145_v32 = vmul.f32 %v3408_v25, %v8067_v48  ;;  %v8148_v12 = vmul.f32 %v3409_v27, %v8070_v8 }
 0x792   : > { %6397 = vrcp.f32 %v3235_v0  ;;  %v3258_v0 = vmul.f32 1.0614054, %v8141_v51  ;;  %v8154_v41 = vmul.f32 %v3410_v3, %v8073_v26  ;;  %v8157_v45 = vmul.f32 %v3411_v63, %v8076_v53 }
 0x793   : > { %6399 = vrcp.f32 %v3236_v17  ;;  %v3273_v4 = vadd.f32 -1.4531521, %v3257_v13  ;;  %v8162_v48 = vmul.f32 1.442695, %v3417_v39  ;;  %v8167_v10 = vmul.f32 1.442695, %v3418_v29 }
 0x794   : > { %v8150_v61 = vpop.eup %6381  ;;  %6401 = vrcp.f32 %v3237_v57  ;;  %v3274_v9 = vadd.f32 -1.4531521, %v3258_v0  ;;  %v8177_v22 = vmul.f32 %v3412_v56, %v8079_v44  ;;  %v8181_v52 = vmul.f32 1.442695, %v3420_v24 }
 0x795   : > { %v8159_v17 = vpop.eup %6383  ;;  %6403 = vrcp.f32 %v3238_v7  ;;  %v3259_v47 = vmul.f32 1.0614054, %v8150_v61  ;;  %v3289_v7 = vmul.f32 %v8136_v31, %v3273_v4  ;;  %v8187_v27 = vmul.f32 %v3413_v59, %v8082_v40 }
 0x796   : > { %v8164_v8 = vpop.eup %6385  ;;  %6405 = vrcp.f32 %v3239_v42  ;;  %v3260_v57 = vmul.f32 1.0614054, %v8159_v17  ;;  %v8179_v42 = vmul.f32 1.442695, %v3419_v54  ;;  %v8189_v3 = vmul.f32 1.442695, %v3421_v50 }
 0x797   : > { %v8169_v26 = vpop.eup %6387  ;;  %6407 = vrcp.f32 %v3240_v1  ;;  %v3261_v53 = vmul.f32 1.0614054, %v8164_v8  ;;  %v3275_v38 = vadd.f32 -1.4531521, %v3259_v47  ;;  %v8191_v63 = vmul.f32 1.442695, %v3422_v35 }
 0x798   : > { %v8173_v14 = vpop.eup %6389  ;;  %v3262_v2 = vmul.f32 1.0614054, %v8169_v26  ;;  %v3276_v56 = vadd.f32 -1.4531521, %v3260_v57  ;;  %v3290_v29 = vmul.f32 %v8141_v51, %v3274_v9  ;;  %v8197_v54 = vmul.f32 1.442695, %v3423_v62 }
 0x799   : > { %v8183_v25 = vpop.eup %6391  ;;  %v3263_v1 = vmul.f32 1.0614054, %v8173_v14  ;;  %v3277_v0 = vadd.f32 -1.4531521, %v3261_v53  ;;  %v3291_v40 = vmul.f32 %v8150_v61, %v3275_v38  ;;  %v3305_v59 = vadd.f32 1.4214138, %v3289_v7 }
 0x79a   : > { %v8193_v39 = vpop.eup %6393  ;;  %v3264_v44 = vmul.f32 1.0614054, %v8183_v25  ;;  %v3278_v47 = vadd.f32 -1.4531521, %v3262_v2  ;;  %v10056_v57 = vsub.f32 0.0, %v8085_v43  ;;  %v10057_v38 = vsub.f32 0.0, %v8088_v21 }
 0x79b   : > { %v8199_v24 = vpop.eup %6395  ;;  %v3265_v13 = vmul.f32 1.0614054, %v8193_v39  ;;  %v3279_v4 = vadd.f32 -1.4531521, %v3263_v1  ;;  %v3292_v55 = vmul.f32 %v8159_v17, %v3276_v56  ;;  %6409 = vpow2.f32 %v8162_v48 }
 0x79c   : > { %v8203_v50 = vpop.eup %6397  ;;  %v3266_v35 = vmul.f32 1.0614054, %v8199_v24  ;;  %v8209_v9 = vmul.f32 %v10056_v57, %v8085_v43  ;;  %v3280_v28 = vadd.f32 -1.4531521, %v3264_v44  ;;  %v8217_v7 = vmul.f32 %v10057_v38, %v8088_v21 }
 0x79d   : > { %v8211_v62 = vpop.eup %6399  ;;  %v3267_v23 = vmul.f32 1.0614054, %v8203_v50  ;;  %v3281_v53 = vadd.f32 -1.4531521, %v3265_v13  ;;  %v3306_v43 = vadd.f32 1.4214138, %v3290_v29  ;;  %v3293_v44 = vmul.f32 %v8164_v8, %v3277_v0 }
 0x79e   : > { %v8219_v18 = vpop.eup %6401  ;;  %v3268_v2 = vmul.f32 1.0614054, %v8211_v62  ;;  %v3282_v1 = vadd.f32 -1.4531521, %v3266_v35  ;;  %v3307_v13 = vadd.f32 1.4214138, %v3291_v40  ;;  %v3294_v15 = vmul.f32 %v8169_v26, %v3278_v47 }
 0x79f   : > { %v8223_v57 = vpop.eup %6403  ;;  %v3269_v19 = vmul.f32 1.0614054, %v8219_v18  ;;  %v3283_v58 = vadd.f32 -1.4531521, %v3267_v23  ;;  %v3295_v35 = vmul.f32 %v8173_v14, %v3279_v4  ;;  %v3296_v34 = vmul.f32 %v8183_v25, %v3280_v28 }
 0x7a0   : > { %v8227_v30 = vpop.eup %6405  ;;  %v3270_v21 = vmul.f32 1.0614054, %v8223_v57  ;;  %v3284_v38 = vadd.f32 -1.4531521, %v3268_v2  ;;  %v3297_v23 = vmul.f32 %v8193_v39, %v3281_v53  ;;  %v3298_v6 = vmul.f32 %v8199_v24, %v3282_v1 }
 0x7a1   : > { %v8232_v33 = vpop.eup %6407  ;;  %v3271_v56 = vmul.f32 1.0614054, %v8227_v30  ;;  %v3285_v29 = vadd.f32 -1.4531521, %v3269_v19  ;;  %v3299_v2 = vmul.f32 %v8203_v50, %v3283_v58  ;;  %v3308_v20 = vadd.f32 1.4214138, %v3292_v55 }
 0x7a2   : > { %v3272_v0 = vmul.f32 1.0614054, %v8232_v33  ;;  %v3286_v40 = vadd.f32 -1.4531521, %v3270_v21  ;;  %v3300_v47 = vmul.f32 %v8211_v62, %v3284_v38  ;;  %v3309_v5 = vadd.f32 1.4214138, %v3293_v44 }
 0x7a3   : > { %v3287_v36 = vadd.f32 -1.4531521, %v3271_v56  ;;  %v3301_v4 = vmul.f32 %v8219_v18, %v3285_v29  ;;  %v3310_v28 = vadd.f32 1.4214138, %v3294_v15  ;;  %v3311_v37 = vadd.f32 1.4214138, %v3295_v35 }
 0x7a4   : > { %v3288_v16 = vadd.f32 -1.4531521, %v3272_v0  ;;  %v3302_v19 = vmul.f32 %v8223_v57, %v3286_v40  ;;  %v3312_v49 = vadd.f32 1.4214138, %v3296_v34  ;;  %v3313_v21 = vadd.f32 1.4214138, %v3297_v23 }
 0x7a5   : > { %v3303_v53 = vmul.f32 %v8227_v30, %v3287_v36  ;;  %v3314_v46 = vadd.f32 1.4214138, %v3298_v6  ;;  %v3315_v58 = vadd.f32 1.4214138, %v3299_v2  ;;  %v3321_v56 = vmul.f32 %v8136_v31, %v3305_v59 }
 0x7a6   : > { %v3304_v1 = vmul.f32 %v8232_v33, %v3288_v16  ;;  %v3316_v38 = vadd.f32 1.4214138, %v3300_v47  ;;  %v3317_v60 = vadd.f32 1.4214138, %v3301_v4  ;;  %v3318_v29 = vadd.f32 1.4214138, %v3302_v19 }
 0x7a7   : > { %v3322_v55 = vmul.f32 %v8141_v51, %v3306_v43  ;;  %v3319_v0 = vadd.f32 1.4214138, %v3303_v53  ;;  %v3323_v15 = vmul.f32 %v8150_v61, %v3307_v13  ;;  %v3324_v36 = vmul.f32 %v8159_v17, %v3308_v20 }
 0x7a8   : > { %v3320_v40 = vadd.f32 1.4214138, %v3304_v1  ;;  %v3325_v34 = vmul.f32 %v8164_v8, %v3309_v5  ;;  %v3326_v44 = vmul.f32 %v8169_v26, %v3310_v28  ;;  %v3327_v16 = vmul.f32 %v8173_v14, %v3311_v37 }
 0x7a9   : > { %v3328_v6 = vmul.f32 %v8183_v25, %v3312_v49  ;;  %v3329_v59 = vmul.f32 %v8193_v39, %v3313_v21  ;;  %v3330_v35 = vmul.f32 %v8199_v24, %v3314_v46  ;;  %v3331_v43 = vmul.f32 %v8203_v50, %v3315_v58 }
 0x7aa   : > { %v3337_v23 = vadd.f32 -0.28449672, %v3321_v56  ;;  %v3332_v2 = vmul.f32 %v8211_v62, %v3316_v38  ;;  %v3333_v13 = vmul.f32 %v8219_v18, %v3317_v60  ;;  %v3334_v20 = vmul.f32 %v8223_v57, %v3318_v29 }
 0x7ab   : > { %v3338_v5 = vadd.f32 -0.28449672, %v3322_v55  ;;  %v3335_v47 = vmul.f32 %v8227_v30, %v3319_v0  ;;  %v3336_v37 = vmul.f32 %v8232_v33, %v3320_v40  ;;  %v3339_v4 = vadd.f32 -0.28449672, %v3323_v15 }
 0x7ac   : > { %v3340_v49 = vadd.f32 -0.28449672, %v3324_v36  ;;  %v3341_v19 = vadd.f32 -0.28449672, %v3325_v34  ;;  %v3342_v28 = vadd.f32 -0.28449672, %v3326_v44  ;;  %v3353_v58 = vmul.f32 %v8136_v31, %v3337_v23 }
 0x7ad   : > { %v3343_v53 = vadd.f32 -0.28449672, %v3327_v16  ;;  %v3344_v46 = vadd.f32 -0.28449672, %v3328_v6  ;;  %v3345_v21 = vadd.f32 -0.28449672, %v3329_v59  ;;  %v3354_v29 = vmul.f32 %v8141_v51, %v3338_v5 }
 0x7ae   : > { %v3346_v1 = vadd.f32 -0.28449672, %v3330_v35  ;;  %v3347_v60 = vadd.f32 -0.28449672, %v3331_v43  ;;  %v3348_v56 = vadd.f32 -0.28449672, %v3332_v2  ;;  %v3355_v15 = vmul.f32 %v8150_v61, %v3339_v4 }
 0x7af   : > { %v3349_v38 = vadd.f32 -0.28449672, %v3333_v13  ;;  %v3350_v55 = vadd.f32 -0.28449672, %v3334_v20  ;;  %v3351_v0 = vadd.f32 -0.28449672, %v3335_v47  ;;  %v3356_v36 = vmul.f32 %v8159_v17, %v3340_v49 }
 0x7b0   : > { %v3352_v40 = vadd.f32 -0.28449672, %v3336_v37  ;;  %v3357_v34 = vmul.f32 %v8164_v8, %v3341_v19  ;;  %v3358_v48 = vmul.f32 %v8169_v26, %v3342_v28  ;;  %v3359_v44 = vmul.f32 %v8173_v14, %v3343_v53 }
 0x7b1   : > { %v3360_v16 = vmul.f32 %v8183_v25, %v3344_v46  ;;  %v3361_v6 = vmul.f32 %v8193_v39, %v3345_v21  ;;  %v3362_v59 = vmul.f32 %v8199_v24, %v3346_v1  ;;  %6411 = vpow2.f32 %v8167_v10 }
 0x7b2   : > { %v3363_v35 = vmul.f32 %v8203_v50, %v3347_v60  ;;  %v3364_v43 = vmul.f32 %v8211_v62, %v3348_v56  ;;  %v3369_v23 = vadd.f32 0.2548296, %v3353_v58  ;;  %6413 = vpow2.f32 %v8179_v42  ;;  %v6410_v42 = vpop.eup %6409 }
 0x7b3   : > { %v3365_v2 = vmul.f32 %v8219_v18, %v3349_v38  ;;  %v3366_v13 = vmul.f32 %v8223_v57, %v3350_v55  ;;  %v3367_v20 = vmul.f32 %v8227_v30, %v3351_v0  ;;  %v3370_v5 = vadd.f32 0.2548296, %v3354_v29 }
 0x7b4   : > { %v3368_v47 = vmul.f32 %v8232_v33, %v3352_v40  ;;  %v3371_v37 = vadd.f32 0.2548296, %v3355_v15  ;;  %v3372_v4 = vadd.f32 0.2548296, %v3356_v36  ;;  %v3373_v49 = vadd.f32 0.2548296, %v3357_v34 }
 0x7b5   : > { %v3374_v10 = vadd.f32 0.2548296, %v3358_v48  ;;  %v3375_v19 = vadd.f32 0.2548296, %v3359_v44  ;;  %v3376_v28 = vadd.f32 0.2548296, %v3360_v16  ;;  %v3385_v60 = vmul.f32 %v8136_v31, %v3369_v23 }
 0x7b6   : > { %v10058_v53 = vsub.f32 0.0, %v8092_v11  ;;  %v3377_v21 = vadd.f32 0.2548296, %v3361_v6  ;;  %v3378_v1 = vadd.f32 0.2548296, %v3362_v59  ;;  %v3386_v55 = vmul.f32 %v8141_v51, %v3370_v5  ;;  %v10060_v59 = vld [vmem:[#allocation63_spill] sm:$0xff] }
 0x7b7   : > { %v3379_v58 = vadd.f32 0.2548296, %v3363_v35  ;;  %v3380_v56 = vadd.f32 0.2548296, %v3364_v43  ;;  %v3381_v38 = vadd.f32 0.2548296, %v3365_v2  ;;  %v3387_v15 = vmul.f32 %v8150_v61, %v3371_v37 }
 0x7b8   : > { %v3432_v46 = vmul.f32 %v10058_v53, %v8092_v11  ;;  %v3382_v29 = vadd.f32 0.2548296, %v3366_v13  ;;  %v3383_v0 = vadd.f32 0.2548296, %v3367_v20  ;;  %v3384_v40 = vadd.f32 0.2548296, %v3368_v47 }
 0x7b9   : > { %v3388_v36 = vmul.f32 %v8159_v17, %v3372_v4  ;;  %v3389_v34 = vmul.f32 %v8164_v8, %v3373_v49  ;;  %v3390_v11 = vmul.f32 %v8169_v26, %v3374_v10  ;;  %6415 = vpow2.f32 %v8181_v52  ;;  %v10064_v43 = vld [vmem:[#allocation38_spill] sm:$0xff]  ;;  %v10065_v2 = vld [vmem:[#allocation39_spill] sm:$0xff]  ;;  %v10066_v37 = vld [vmem:[#allocation40_spill] sm:$0xff] }
 0x7ba   : > { %v3447_v48 = vmul.f32 1.442695, %v8145_v32  ;;  %v3391_v31 = vmul.f32 %v8173_v14, %v3375_v19  ;;  %v8293_v44 = vmul.f32 %v8183_v25, %v3376_v28  ;;  %6417 = vpow2.f32 %v8189_v3  ;;  %v10067_v28 = vld [vmem:[#allocation41_spill] sm:$0xff] }
 0x7bb   : > { %v3449_v51 = vmul.f32 1.442695, %v8148_v12  ;;  %v6412_v61 = vpop.eup %6411  ;;  %v8298_v17 = vmul.f32 %v8193_v39, %v3377_v21  ;;  %v8301_v8 = vmul.f32 %v8199_v24, %v3378_v1  ;;  %6419 = vpow2.f32 %v8191_v63 }
 0x7bc   : > { %v3451_v32 = vmul.f32 1.442695, %v8154_v41  ;;  %v6414_v26 = vpop.eup %6413  ;;  %v8306_v14 = vmul.f32 %v8203_v50, %v3379_v58  ;;  %6421 = vpow2.f32 %v8197_v54  ;;  %v3453_v52 = vmul.f32 1.442695, %v8157_v45  ;;  %v10068_v58 = vld [vmem:[#allocation42_spill] sm:$0xff] }
 0x7bd   : > { %v3465_v12 = vmul.f32 %v6410_v42, %v3385_v60  ;;  %6423 = vpow2.f32 %v3447_v48  ;;  %v3455_v25 = vmul.f32 1.442695, %v8177_v22  ;;  %v3466_v3 = vmul.f32 %v6412_v61, %v3386_v55  ;;  %v10070_v48 = vld [vmem:[#allocation44_spill] sm:$0xff] }
 0x7be   : > { %v3467_v39 = vmul.f32 %v6414_v26, %v3387_v15  ;;  %v8312_v24 = vmul.f32 %v8211_v62, %v3380_v56  ;;  %v8315_v63 = vmul.f32 %v8219_v18, %v3381_v38  ;;  %6425 = vpow2.f32 %v3449_v51 }
 0x7bf   : > { %v3457_v41 = vmul.f32 1.442695, %v8187_v27  ;;  %v8319_v50 = vmul.f32 %v8223_v57, %v3382_v29  ;;  %v8322_v45 = vmul.f32 %v8227_v30, %v3383_v0  ;;  %6427 = vpow2.f32 %v3451_v32  ;;  %v10059_v57 = vld [vmem:[#allocation62_spill] sm:$0xff]  ;;  %v10061_v30 = vld [vmem:[#allocation64_spill] sm:$0xff]  ;;  %v10069_v0 = vld [vmem:[#allocation43_spill] sm:$0xff] }
 0x7c0   : > { %v3459_v22 = vmul.f32 1.442695, %v8209_v9  ;;  %6429 = vpow2.f32 %v3453_v52  ;;  %v3461_v54 = vmul.f32 1.442695, %v8217_v7  ;;  %v3481_v62 = vsub.f32 1.0, %v3465_v12  ;;  %v10062_v9 = vld [vmem:[#allocation36_spill] sm:$0xff] }
 0x7c1   : > { %v3482_v16 = vsub.f32 1.0, %v3466_v3  ;;  %v8327_v18 = vmul.f32 %v8232_v33, %v3384_v40  ;;  %6431 = vpow2.f32 %v3455_v25  ;;  %v3463_v6 = vmul.f32 1.442695, %v3432_v46  ;;  %v10063_v7 = vld [vmem:[#allocation37_spill] sm:$0xff] }
 0x7c2   : > { %v3483_v27 = vsub.f32 1.0, %v3467_v39  ;;  %6433 = vpow2.f32 %v3457_v41  ;;  %vm3497_vm13 = vcmp.lt.f32.partialorder %v10059_v57, 0.0  ;;  %vm3498_vm14 = vcmp.lt.f32.partialorder %v10060_v59, 0.0  ;;  %v10072_v39 = vld [vmem:[#allocation46_spill] sm:$0xff] }
 0x7c3   : > { %vm3499_vm15 = vcmp.lt.f32.partialorder %v10061_v30, 0.0  ;;  %v6416_v35 = vpop.eup %6415  ;;  %6435 = vpow2.f32 %v3459_v22  ;;  %vm3500_vm0 = vcmp.lt.f32.partialorder %v10062_v9, 0.0  ;;  %vm3501_vm1 = vcmp.lt.f32.partialorder %v10063_v7, 0.0  ;;  %v10074_v30 = vld [vmem:[#allocation48_spill] sm:$0xff] }
 0x7c4   : > { %vm3502_vm6 = vcmp.lt.f32.partialorder %v10064_v43, 0.0  ;;  %v6418_v33 = vpop.eup %6417  ;;  %6437 = vpow2.f32 %v3461_v54  ;;  %v3468_v23 = vmul.f32 %v6416_v35, %v3388_v36  ;;  %vm3503_vm7 = vcmp.lt.f32.partialorder %v10065_v2, 0.0 }
 0x7c5   : > { %v3513_v13 = vsub.f32 0.0, %v3481_v62  ;;  %v3514_v20 = vsub.f32 0.0, %v3482_v16  ;;  %v6420_v5 = vpop.eup %6419  ;;  %6439 = vpow2.f32 %v3463_v6  ;;  %v3469_v47 = vmul.f32 %v6418_v33, %v3389_v34 }
 0x7c6   : > { %vm3504_vm8 = vcmp.lt.f32.partialorder %v10066_v37, 0.0  ;;  %v3515_v4 = vsub.f32 0.0, %v3483_v27  ;;  %v6422_v49 = vpop.eup %6421  ;;  %v3470_v10 = vmul.f32 %v6420_v5, %v3390_v11  ;;  %v3484_v19 = vsub.f32 1.0, %v3468_v23 }
 0x7c7   : > { %vm3505_vm9 = vcmp.lt.f32.partialorder %v10067_v28, 0.0  ;;  %v3529_v53 = vsel %vm3497_vm13, %v3513_v13, %v3481_v62  ;;  %v3530_v46 = vsel %vm3498_vm14, %v3514_v20, %v3482_v16  ;;  %v6424_v42 = vpop.eup %6423  ;;  %v3471_v21 = vmul.f32 %v6422_v49, %v3391_v31  ;;  %v10073_v16 = vld [vmem:[#allocation47_spill] sm:$0xff] }
 0x7c8   : > { %v3485_v1 = vsub.f32 1.0, %v3469_v47  ;;  %vm3506_vm10 = vcmp.lt.f32.partialorder %v10068_v58, 0.0  ;;  %v3531_v60 = vsel %vm3499_vm15, %v3515_v4, %v3483_v27  ;;  %v8345_v56 = vadd.f32 1.0, %v3529_v53  ;;  %v6426_v38 = vpop.eup %6425 }
 0x7c9   : > { %v3472_v29 = vmul.f32 %v6424_v42, %v8293_v44  ;;  %v3486_v55 = vsub.f32 1.0, %v3470_v10  ;;  %vm3507_vm11 = vcmp.lt.f32.partialorder %v10069_v0, 0.0  ;;  %v3516_v40 = vsub.f32 0.0, %v3484_v19  ;;  %v6428_v36 = vpop.eup %6427  ;;  %v10071_v44 = vld [vmem:[#allocation45_spill] sm:$0xff] }
 0x7ca   : > { %v8349_v15 = vadd.f32 1.0, %v3530_v46  ;;  %v3473_v34 = vmul.f32 %v6426_v38, %v8298_v17  ;;  %v3487_v11 = vsub.f32 1.0, %v3471_v21  ;;  %vm3508_vm12 = vcmp.lt.f32.partialorder %v10070_v48, 0.0  ;;  %v6430_v61 = vpop.eup %6429 }
 0x7cb   : > { %v3517_v31 = vsub.f32 0.0, %v3485_v1  ;;  %v8353_v51 = vadd.f32 1.0, %v3531_v60  ;;  %v3474_v32 = vmul.f32 %v6428_v36, %v8301_v8  ;;  %v3488_v26 = vsub.f32 1.0, %v3472_v29  ;;  %v6432_v25 = vpop.eup %6431 }
 0x7cc   : > { %vm3509_vm13 = vcmp.lt.f32.partialorder %v10071_v44, 0.0  ;;  %v3518_v52 = vsub.f32 0.0, %v3486_v55  ;;  %v3532_v12 = vsel %vm3500_vm0, %v3516_v40, %v3484_v19  ;;  %v3475_v3 = vmul.f32 %v6430_v61, %v8306_v14  ;;  %v6434_v54 = vpop.eup %6433 }
 0x7cd   : > { %v3489_v17 = vsub.f32 1.0, %v3473_v34  ;;  %vm3510_vm14 = vcmp.lt.f32.partialorder %v10072_v39, 0.0  ;;  %v3519_v41 = vsub.f32 0.0, %v3487_v11  ;;  %v3533_v22 = vsel %vm3501_vm1, %v3517_v31, %v3485_v1  ;;  %v6436_v57 = vpop.eup %6435 }
 0x7ce   : > { %v3476_v8 = vmul.f32 %v6432_v25, %v8312_v24  ;;  %v3490_v62 = vsub.f32 1.0, %v3474_v32  ;;  %vm3511_vm15 = vcmp.lt.f32.partialorder %v10073_v16, 0.0  ;;  %v3520_v6 = vsub.f32 0.0, %v3488_v26  ;;  %v6438_v7 = vpop.eup %6437  ;;  %v10077_v25 = vld [vmem:[#allocation51_spill] sm:$0xff] }
 0x7cf   : > { %v3534_v27 = vsel %vm3502_vm6, %v3518_v52, %v3486_v55  ;;  %v3477_v14 = vmul.f32 %v6434_v54, %v8315_v63  ;;  %v3491_v59 = vsub.f32 1.0, %v3475_v3  ;;  %vm3512_vm0 = vcmp.lt.f32.partialorder %v10074_v30, 0.0  ;;  %v6440_v43 = vpop.eup %6439  ;;  %v10076_v52 = vld [vmem:[#allocation50_spill] sm:$0xff]  ;;  %v10085_v30 = vld [vmem:[#allocation59_spill] sm:$0xff] }
 0x7d0   : > { %v3521_v35 = vsub.f32 0.0, %v3489_v17  ;;  %v3535_v9 = vsel %vm3503_vm7, %v3519_v41, %v3487_v11  ;;  %v3478_v24 = vmul.f32 %v6436_v57, %v8319_v50  ;;  %v3492_v33 = vsub.f32 1.0, %v3476_v8  ;;  %v10079_v41 = vld [vmem:[#allocation53_spill] sm:$0xff]  ;;  %v10080_v54 = vld [vmem:[#allocation54_spill] sm:$0xff] }
 0x7d1   : > { %v3522_v23 = vsub.f32 0.0, %v3490_v62  ;;  %v3536_v13 = vsel %vm3504_vm8, %v3520_v6, %v3488_v26  ;;  %v3479_v20 = vmul.f32 %v6438_v7, %v8322_v45  ;;  %v3493_v5 = vsub.f32 1.0, %v3477_v14  ;;  %v10075_v26 = vld [vmem:[#allocation49_spill] sm:$0xff]  ;;  %v10082_v6 = vld [vmem:[#allocation56_spill] sm:$0xff] }
 0x7d2   : > { %v3523_v63 = vsub.f32 0.0, %v3491_v59  ;;  %v3537_v47 = vsel %vm3505_vm9, %v3521_v35, %v3489_v17  ;;  %v3480_v4 = vmul.f32 %v6440_v43, %v8327_v18  ;;  %v3494_v2 = vsub.f32 1.0, %v3478_v24  ;;  %v10078_v17 = vld [vmem:[#allocation52_spill] sm:$0xff]  ;;  %v10083_v57 = vld [vmem:[#allocation57_spill] sm:$0xff]  ;;  %v10090_v43 = vld [vmem:[#allocation67_spill] sm:$0xff] }
 0x7d3   : > { %v3524_v49 = vsub.f32 0.0, %v3492_v33  ;;  %v3538_v50 = vsel %vm3506_vm10, %v3522_v23, %v3490_v62  ;;  %v3495_v10 = vsub.f32 1.0, %v3479_v20  ;;  %v3525_v19 = vsub.f32 0.0, %v3493_v5  ;;  %v10081_v62 = vld [vmem:[#allocation55_spill] sm:$0xff]  ;;  %v10087_v7 = vld [vmem:[#allocation61_spill] sm:$0xff]  ;;  %v10089_v23 = vld [vmem:[#allocation66_spill] sm:$0xff] }
 0x7d4   : > { %v3539_v37 = vsel %vm3507_vm11, %v3523_v63, %v3491_v59  ;;  %v3548_v53 = vadd.f32 1.0, %v3532_v12  ;;  %v3496_v46 = vsub.f32 1.0, %v3480_v4  ;;  %v3526_v45 = vsub.f32 0.0, %v3494_v2  ;;  %v10084_v59 = vld [vmem:[#allocation58_spill] sm:$0xff]  ;;  %v10088_v24 = vld [vmem:[#allocation65_spill] sm:$0xff] }
 0x7d5   : > { %v3540_v42 = vsel %vm3508_vm12, %v3524_v49, %v3492_v33  ;;  %v3549_v28 = vadd.f32 1.0, %v3533_v22  ;;  %v3527_v21 = vsub.f32 0.0, %v3495_v10  ;;  %v3541_v18 = vsel %vm3509_vm13, %v3525_v19, %v3493_v5  ;;  %v10091_v5 = vld [vmem:[#allocation4_spill] sm:$0xff]  ;;  %v10095_v19 = vld [vmem:[#allocation6_spill] sm:$0xff] }
 0x7d6   : > { %v3550_v1 = vadd.f32 1.0, %v3534_v27  ;;  %v3551_v60 = vadd.f32 1.0, %v3535_v9  ;;  %v3528_v58 = vsub.f32 0.0, %v3496_v46  ;;  %v3542_v38 = vsel %vm3510_vm14, %v3526_v45, %v3494_v2  ;;  %v10093_v2 = vld [vmem:[#allocation7_spill] sm:$0xff]  ;;  %v10097_v45 = vld [vmem:[#allocation8_spill] sm:$0xff] }
 0x7d7   : > { %v3552_v29 = vadd.f32 1.0, %v3536_v13  ;;  %v3553_v55 = vadd.f32 1.0, %v3537_v47  ;;  %v3543_v0 = vsel %vm3511_vm15, %v3527_v21, %v3495_v10  ;;  %v3554_v40 = vadd.f32 1.0, %v3538_v50  ;;  %v10092_v47 = vld [vmem:[#allocation5_spill] sm:$0xff]  ;;  %v3610_v21 = vld [vmem:[#allocation2 + $0xf] sm:$0xff] }
 0x7d8   : > { %v3555_v36 = vadd.f32 1.0, %v3539_v37  ;;  %v3556_v34 = vadd.f32 1.0, %v3540_v42  ;;  %v3544_v11 = vsel %vm3512_vm0, %v3528_v58, %v3496_v46  ;;  %v3557_v48 = vadd.f32 1.0, %v3541_v18  ;;  %v10094_v50 = vld [vmem:[#allocation9_spill] sm:$0xff] }
 0x7d9   : > { %v3558_v31 = vadd.f32 1.0, %v3542_v38  ;;  %v3559_v61 = vadd.f32 1.0, %v3543_v0  ;;  %v3560_v32 = vadd.f32 1.0, %v3544_v11  ;;  %v3561_v44 = vmul.f32 %v8345_v56, %v10075_v26  ;;  %v10098_v18 = vld [vmem:[#allocation13_spill] sm:$0xff]  ;;  %v10100_v38 = vld [vmem:[#allocation15_spill] sm:$0xff]  ;;  %v10106_v26 = vld [vmem:[#allocation34_spill] sm:$0xff] }
 0x7da   : > { %v3562_v12 = vmul.f32 %v8349_v15, %v10076_v52  ;;  %v3563_v3 = vmul.f32 %v8353_v51, %v10077_v25  ;;  %v3564_v39 = vmul.f32 %v3548_v53, %v10078_v17  ;;  %v3565_v22 = vmul.f32 %v3549_v28, %v10079_v41  ;;  %v10086_v15 = vld [vmem:[#allocation60_spill] sm:$0xff]  ;;  %v10096_v53 = vld [vmem:[#allocation11_spill] sm:$0xff] }
 0x7db   : > { %v3566_v8 = vmul.f32 %v3550_v1, %v10080_v54  ;;  %v3567_v16 = vmul.f32 %v3551_v60, %v10081_v62  ;;  %v3568_v27 = vmul.f32 %v3552_v29, %v10082_v6  ;;  %v3569_v14 = vmul.f32 %v3553_v55, %v10083_v57  ;;  %v3609_v28 = vld [vmem:[#allocation2 + $0x7] sm:$0xff]  ;;  %v10101_v55 = vld [vmem:[#allocation12_spill] sm:$0xff] }
 0x7dc   : > { %v3570_v56 = vmul.f32 %v3554_v40, %v10084_v59  ;;  %v3571_v35 = vmul.f32 %v3555_v36, %v10085_v30  ;;  %v3572_v9 = vmul.f32 %v3556_v34, %v10086_v15  ;;  %v3573_v51 = vmul.f32 %v3557_v48, %v10087_v7  ;;  %v10099_v60 = vld [vmem:[#allocation10_spill] sm:$0xff]  ;;  %v10102_v40 = vld [vmem:[#allocation17_spill] sm:$0xff] }
 0x7dd   : > { %v3574_v33 = vmul.f32 %v3558_v31, %v10088_v24  ;;  %v3575_v13 = vmul.f32 %v3559_v61, %v10089_v23  ;;  %v3576_v20 = vmul.f32 %v3560_v32, %v10090_v43  ;;  %v3577_v63 = vmul.f32 %v3561_v44, %v10091_v5  ;;  %v10103_v34 = vld [vmem:[#allocation14_spill] sm:$0xff]  ;;  %v10105_v61 = vld [vmem:[#allocation16_spill] sm:$0xff] }
 0x7de   : > { %v3578_v4 = vmul.f32 %v3562_v12, %v10092_v47  ;;  %v3579_v49 = vmul.f32 %v3563_v3, %v10093_v2  ;;  %v3580_v10 = vmul.f32 %v3564_v39, %v10094_v50  ;;  %v3581_v37 = vmul.f32 %v3565_v22, %v10095_v19  ;;  %v10104_v48 = vld [vmem:[#allocation26_spill] sm:$0xff]  ;;  %v3705_v12 = vld [vmem:[#allocation2 + $0x9] sm:$0xff] }
 0x7df   : > { %v3582_v46 = vmul.f32 %v3566_v8, %v10096_v53  ;;  %v3583_v42 = vmul.f32 %v3567_v16, %v10097_v45  ;;  %v3584_v1 = vmul.f32 %v3568_v27, %v10098_v18  ;;  %v3585_v58 = vmul.f32 %v3569_v14, %v10099_v60  ;;  %3593 = vst.msk [vmem:[#allocation2 + $0x18] sm:$0xff] %vm876_vm3, %v3577_v63 }
 0x7e0   : > { %v3586_v29 = vmul.f32 %v3570_v56, %v10100_v38  ;;  %v3587_v0 = vmul.f32 %v3571_v35, %v10101_v55  ;;  %3594 = vst.msk [vmem:[#allocation2 + $0x20] sm:$0xff] %vm876_vm3, %v3578_v4  ;;  %3595 = vst.msk [vmem:[#allocation2 + $0x28] sm:$0xff] %vm876_vm3, %v3579_v49  ;;  %v3588_v36 = vmul.f32 %v3572_v9, %v10102_v40  ;;  %vm10110_vm1 = vcmask 162944  }
 0x7e1   : > { %v3589_v11 = vmul.f32 %v3573_v51, %v10103_v34  ;;  %v3590_v31 = vmul.f32 %v3574_v33, %v10104_v48  ;;  %v3591_v32 = vmul.f32 %v3575_v13, %v10105_v61  ;;  %3596 = vst.msk [vmem:[#allocation2 + $0x30] sm:$0xff] %vm876_vm3, %v3580_v10  ;;  %3597 = vst.msk [vmem:[#allocation2 + $0x38] sm:$0xff] %vm876_vm3, %v3581_v37  ;;  %vm10112_vm7 = vcmask 195744  }
 0x7e2   : > { %3598 = vst.msk [vmem:[#allocation2 + $0x40] sm:$0xff] %vm876_vm3, %v3582_v46  ;;  %3599 = vst.msk [vmem:[#allocation2 + $0x48] sm:$0xff] %vm876_vm3, %v3583_v42  ;;  %v3592_v44 = vmul.f32 %v3576_v20, %v10106_v26  ;;  %v3625_v52 = vpack.c.bf16 %v3610_v21, %v3609_v28  ;;  %v6301_v28 = vld [vmem:[%s9619_s11] sm:$0xff]   ;;  %vm10114_vm9 = vcmask 228544   ;;  %vm10116_vm11 = vcmask 261344  }
 0x7e3   : > { %3600 = vst.msk [vmem:[#allocation2 + $0x50] sm:$0xff] %vm876_vm3, %v3584_v1  ;;  %3601 = vst.msk [vmem:[#allocation2 + $0x58] sm:$0xff] %vm876_vm3, %v3585_v58  ;;  %6183 = vmatprep.subr.bf16.mxu1 %v6301_v28  ;;  %v6302_v1 = vld [vmem:[%s9619_s11 + $0x8] sm:$0xff]   ;;  %vm10118_vm13 = vcmask 294144   ;;  %vm10120_vm15 = vcmask 293888  }
 0x7e4   : > { %3602 = vst.msk [vmem:[#allocation2 + $0x60] sm:$0xff] %vm876_vm3, %v3586_v29  ;;  %3603 = vst.msk [vmem:[#allocation2 + $0x68] sm:$0xff] %vm876_vm3, %v3587_v0  ;;  %v3674_v56 = vpop.permute.xlu0 %3673  ;;  %6184 = vmatpush3.bf16.msra.mxu1 %v6301_v28  ;;  %v6303_v0 = vld [vmem:[%s9619_s11 + $0x10] ss:$0 sps:$4 sm:$0x33]   ;;  %v4104_v28 = vld [vmem:[#allocation2 + $0xa1] sm:$0xff] }
 0x7e5   : > { %3604 = vst.msk [vmem:[#allocation2 + $0x70] sm:$0xff] %vm876_vm3, %v3588_v36  ;;  %3605 = vst.msk [vmem:[#allocation2 + $0x78] sm:$0xff] %vm876_vm3, %v3589_v11  ;;  %6185 = vmatprep.subr.bf16.mxu1 %v6302_v1  ;;  %v4206_v11 = vsel %vm1498_vm4, %v6303_v0, 0 }
 0x7e6   : > { %3606 = vst.msk [vmem:[#allocation2 + $0x80] sm:$0xff] %vm876_vm3, %v3590_v31  ;;  %3607 = vst.msk [vmem:[#allocation2 + $0x88] sm:$0xff] %vm876_vm3, %v3591_v32  ;;  %v3706_v25 = vld [vmem:[#allocation2 + $0x11] sm:$0xff] }
 0x7e7   : > { %3608 = vst.msk [vmem:[#allocation2 + $0x90] sm:$0xff] %vm876_vm3, %v3592_v44  ;;  %3633 = vst.msk [vmem:[#allocation3] sm:$0xff] %vm876_vm3, %v3625_v52  ;;  %v3643_v3 = vld [vmem:[#allocation2 + $0x18] sm:$0xff]  ;;  %v3644_v17 = vld [vmem:[#allocation2 + $0x20] sm:$0xff]  ;;  %v3721_v39 = vpack.c.bf16 %v3706_v25, %v3705_v12 }
 0x7e8   : > { %v3658_v41 = vpack.c.bf16 %v3644_v17, %v3643_v3  ;;  %v3769_v22 = vld [vmem:[#allocation2 + $0x17] sm:$0xff]  ;;  %v3770_v54 = vld [vmem:[#allocation2 + $0x1f] sm:$0xff]  ;;  %v3771_v6 = vld [vmem:[#allocation2 + $0x27] sm:$0xff]  ;;  %3697 = vst.msk [vmem:[#allocation3] sm:$0xff] %vm981_vm2, %v3674_v56  ;;  %6186 = vmatpush3.bf16.msra.mxu1 %v6302_v1 }
 0x7e9   : > { %v3707_v8 = vld [vmem:[#allocation2 + $0x19] sm:$0xff]  ;;  %v3785_v62 = vpack.c.bf16 %v3770_v54, %v3769_v22  ;;  %v3708_v16 = vld [vmem:[#allocation2 + $0x21] sm:$0xff]  ;;  %v3772_v27 = vld [vmem:[#allocation2 + $0x2f] sm:$0xff]  ;;  %3737 = vrot.lane.b32.xlu0 %v3721_v39, %s10107_s0  ;;  %6235 = vmatprep.subr.msk.bf16.mxu1 %vm1498_vm4, %v6303_v0 }
 0x7ea   : > { %3675 = vrot.lane.b32.xlu1 %v3658_v41, %s10041_s22  ;;  %v3786_v57 = vpack.c.bf16 %v3772_v27, %v3771_v6  ;;  %v3963_v14 = vld [vmem:[#allocation2 + $0x37] sm:$0xff]  ;;  %v3964_v59 = vld [vmem:[#allocation2 + $0x3f] sm:$0xff]  ;;  %v3722_v30 = vpack.c.bf16 %v3708_v16, %v3707_v8  ;;  %v3775_v15 = vld [vmem:[#allocation2 + $0x47] sm:$0xff] }
 0x7eb   : > { %3634 = vst.msk [vmem:[#allocation3 + $0x8] sm:$0xff] %vm876_vm3, %v3785_v62  ;;  %v3978_v35 = vpack.c.bf16 %v3964_v59, %v3963_v14  ;;  %v3776_v9 = vld [vmem:[#allocation2 + $0x4f] sm:$0xff]  ;;  %v3967_v51 = vld [vmem:[#allocation2 + $0x57] sm:$0xff]  ;;  %v3968_v24 = vld [vmem:[#allocation2 + $0x5f] sm:$0xff] }
 0x7ec   : > { %3635 = vst.msk [vmem:[#allocation3 + $0x10] sm:$0xff] %vm876_vm3, %v3786_v57  ;;  %v8451_v7 = vpack.c.bf16 %v3776_v9, %v3775_v15  ;;  %v3835_v33 = vld [vmem:[#allocation2 + $0x28] sm:$0xff]  ;;  %v8454_v23 = vpack.c.bf16 %v3968_v24, %v3967_v51  ;;  %v3836_v13 = vld [vmem:[#allocation2 + $0x30] sm:$0xff]  ;;  %v4027_v58 = vld [vmem:[#allocation2 + $0x38] sm:$0xff]  ;;  %6188 = vmatpush3.bf16.msra.mxu1 %v4206_v11 }
 0x7ed   : > { %3801 = vrot.lane.b32.xlu0 %v3785_v62, %s9950_s23  ;;  %3636 = vst.msk [vmem:[#allocation3 + $0x18] sm:$0xff] %vm876_vm3, %v3978_v35  ;;  %v3779_v43 = vld [vmem:[#allocation2 + $0x67] sm:$0xff]  ;;  %v3780_v20 = vld [vmem:[#allocation2 + $0x6f] sm:$0xff]  ;;  %v3971_v4 = vld [vmem:[#allocation2 + $0x77] sm:$0xff]  ;;  %v3850_v10 = vpack.c.bf16 %v3836_v13, %v3835_v33 }
 0x7ee   : > { %3739 = vrot.lane.b32.xlu1 %v3722_v30, %s10107_s0  ;;  %3637 = vst.msk [vmem:[#allocation3 + $0x20] sm:$0xff] %vm876_vm3, %v8451_v7  ;;  %v8460_v63 = vpack.c.bf16 %v3780_v20, %v3779_v43  ;;  %3638 = vst.msk [vmem:[#allocation3 + $0x28] sm:$0xff] %vm876_vm3, %v8454_v23  ;;  %v3972_v49 = vld [vmem:[#allocation2 + $0x7f] sm:$0xff]  ;;  %v3899_v46 = vld [vmem:[#allocation2 + $0x29] sm:$0xff] }
 0x7ef   : > { %v8464_v37 = vpack.c.bf16 %v3972_v49, %v3971_v4  ;;  %v3900_v42 = vld [vmem:[#allocation2 + $0x31] sm:$0xff]  ;;  %v4028_v29 = vld [vmem:[#allocation2 + $0x40] sm:$0xff]  ;;  %v3839_v52 = vld [vmem:[#allocation2 + $0x48] sm:$0xff]  ;;  %v8539_v49 = vpop.permute.xlu1 %4071 }
 0x7f0   : > { %3639 = vst.msk [vmem:[#allocation3 + $0x30] sm:$0xff] %vm876_vm3, %v8460_v63  ;;  %v3914_v21 = vpack.c.bf16 %v3900_v42, %v3899_v46  ;;  %v4042_v36 = vpack.c.bf16 %v4028_v29, %v4027_v58  ;;  %v4091_v31 = vld [vmem:[#allocation2 + $0x39] sm:$0xff]  ;;  %v4092_v32 = vld [vmem:[#allocation2 + $0x41] sm:$0xff]  ;;  %v3840_v12 = vld [vmem:[#allocation2 + $0x50] sm:$0xff] }
 0x7f1   : > { %3865 = vrot.lane.b32.xlu0 %v3658_v41, %s9951_s26  ;;  %3640 = vst.msk [vmem:[#allocation3 + $0x38] sm:$0xff] %vm876_vm3, %v8464_v37  ;;  %v4106_v44 = vpack.c.bf16 %v4092_v32, %v4091_v31  ;;  %v3852_v25 = vpack.c.bf16 %v3840_v12, %v3839_v52  ;;  %v3903_v3 = vld [vmem:[#allocation2 + $0x49] sm:$0xff]  ;;  %v3904_v17 = vld [vmem:[#allocation2 + $0x51] sm:$0xff]  ;;  %v4032_v22 = vld [vmem:[#allocation2 + $0x60] sm:$0xff]  ;;  %vm10108_vm3 = vcmask 130144  }
 0x7f2   : > { %3803 = vrot.lane.b32.xlu1 %v3786_v57, %s9950_s23  ;;  %v3916_v39 = vpack.c.bf16 %v3904_v17, %v3903_v3  ;;  %v4031_v41 = vld [vmem:[#allocation2 + $0x58] sm:$0xff]  ;;  %v4096_v62 = vld [vmem:[#allocation2 + $0x61] sm:$0xff]  ;;  %v3844_v27 = vld [vmem:[#allocation2 + $0x70] sm:$0xff] }
 0x7f3   : > { %v4044_v54 = vpack.c.bf16 %v4032_v22, %v4031_v41  ;;  %v4095_v8 = vld [vmem:[#allocation2 + $0x59] sm:$0xff]  ;;  %v3843_v6 = vld [vmem:[#allocation2 + $0x68] sm:$0xff]  ;;  %v3908_v59 = vld [vmem:[#allocation2 + $0x71] sm:$0xff] }
 0x7f4   : > { %v4108_v16 = vpack.c.bf16 %v4096_v62, %v4095_v8  ;;  %v3907_v14 = vld [vmem:[#allocation2 + $0x69] sm:$0xff]  ;;  %v4099_v9 = vld [vmem:[#allocation2 + $0x79] sm:$0xff]  ;;  %v3912_v4 = vld [vmem:[#allocation2 + $0x91] sm:$0xff] }
 0x7f5   : > { %3929 = vrot.lane.b32.xlu0 %v3722_v30, %s9952_s28  ;;  %v3918_v56 = vpack.c.bf16 %v3908_v59, %v3907_v14  ;;  %v4035_v30 = vld [vmem:[#allocation2 + $0x78] sm:$0xff]  ;;  %v3783_v24 = vld [vmem:[#allocation2 + $0x87] sm:$0xff]  ;;  %v3784_v33 = vld [vmem:[#allocation2 + $0x8f] sm:$0xff] }
 0x7f6   : > { %3867 = vrot.lane.b32.xlu1 %v3850_v10, %s9951_s26  ;;  %v3847_v13 = vld [vmem:[#allocation2 + $0x88] sm:$0xff]  ;;  %v3848_v43 = vld [vmem:[#allocation2 + $0x90] sm:$0xff]  ;;  %v3976_v46 = vld [vmem:[#allocation2 + $0x9f] sm:$0xff] }
 0x7f7   : > { %v3856_v20 = vpack.c.bf16 %v3848_v43, %v3847_v13  ;;  %v4103_v42 = vld [vmem:[#allocation2 + $0x99] sm:$0xff]  ;;  %vm10109_vm4 = vmmov %vm10108_vm3 }
 0x7f8   : > { %v4112_v29 = vpack.c.bf16 %v4104_v28, %v4103_v42  ;;  %vm10111_vm6 = vmmov %vm10110_vm1 }
 0x7f9   : > { %3993 = vrot.lane.b32.xlu0 %v3786_v57, %s9953_s19  ;;  %v3854_v57 = vpack.c.bf16 %v3844_v27, %v3843_v6  ;;  %vm10113_vm8 = vmmov %vm10112_vm7 }
 0x7fa   : > { %3931 = vrot.lane.b32.xlu1 %v3914_v21, %s9952_s28  ;;  %vm10115_vm10 = vmmov %vm10114_vm9 }
 0x7fb   : > { %vm10117_vm12 = vmmov %vm10116_vm11 }
 0x7fc   : > { %vm10119_vm14 = vmmov %vm10118_vm13 }
 0x7fd   : > { %4057 = vrot.lane.b32.xlu0 %v3850_v10, %s10036_s1  ;;  %vm10121_vm0 = vmmov %vm10108_vm3 }
 0x7fe   : > { %3995 = vrot.lane.b32.xlu1 %v3978_v35, %s9953_s19 }
 0x801   : > { %4121 = vrot.lane.b32.xlu0 %v3914_v21, %s9954_s29 }
 0x802   : > { %4059 = vrot.lane.b32.xlu1 %v4042_v36, %s10036_s1 }
 0x805   : > { %4123 = vrot.lane.b32.xlu0 %v4106_v44, %s9954_s29 }
 0x806   : > { %3677 = vrot.lane.b32.xlu1 %v3850_v10, %s10041_s22 }
 0x809   : > { %3741 = vrot.lane.b32.xlu0 %v3914_v21, %s10107_s0 }
 0x80a   : > { %3679 = vrot.lane.b32.xlu1 %v4042_v36, %s10041_s22 }
 0x80d   : > { %3805 = vrot.lane.b32.xlu0 %v3978_v35, %s9950_s23  ;;  %v4036_v35 = vld [vmem:[#allocation2 + $0x80] sm:$0xff] }
 0x80e   : > { %3743 = vrot.lane.b32.xlu1 %v4106_v44, %s10107_s0  ;;  %v4046_v15 = vpack.c.bf16 %v4036_v35, %v4035_v30 }
 0x811   : > { %3869 = vrot.lane.b32.xlu0 %v4042_v36, %s9951_s26 }
 0x812   : > { %3807 = vrot.lane.b32.xlu1 %v8451_v7, %s9950_s23 }
 0x815   : > { %3933 = vrot.lane.b32.xlu0 %v4106_v44, %s9952_s28 }
 0x816   : > { %3871 = vrot.lane.b32.xlu1 %v3852_v25, %s9951_s26 }
 0x819   : > { %3997 = vrot.lane.b32.xlu0 %v8451_v7, %s9953_s19  ;;  %v4100_v7 = vld [vmem:[#allocation2 + $0x81] sm:$0xff] }
 0x81a   : > { %3935 = vrot.lane.b32.xlu1 %v3916_v39, %s9952_s28  ;;  %v4110_v51 = vpack.c.bf16 %v4100_v7, %v4099_v9 }
 0x81d   : > { %4061 = vrot.lane.b32.xlu0 %v3852_v25, %s10036_s1 }
 0x81e   : > { %3999 = vrot.lane.b32.xlu1 %v8454_v23, %s9953_s19 }
 0x821   : > { %4125 = vrot.lane.b32.xlu0 %v3916_v39, %s9954_s29 }
 0x822   : > { %4063 = vrot.lane.b32.xlu1 %v4044_v54, %s10036_s1 }
 0x825   : > { %4127 = vrot.lane.b32.xlu0 %v4108_v16, %s9954_s29 }
 0x826   : > { %3681 = vrot.lane.b32.xlu1 %v3852_v25, %s10041_s22 }
 0x829   : > { %3745 = vrot.lane.b32.xlu0 %v3916_v39, %s10107_s0 }
 0x82a   : > { %3683 = vrot.lane.b32.xlu1 %v4044_v54, %s10041_s22 }
 0x82d   : > { %3809 = vrot.lane.b32.xlu0 %v8454_v23, %s9950_s23  ;;  %v3792_v23 = vpack.c.bf16 %v3784_v33, %v3783_v24 }
 0x82e   : > { %3747 = vrot.lane.b32.xlu1 %v4108_v16, %s10107_s0 }
 0x831   : > { %3873 = vrot.lane.b32.xlu0 %v4044_v54, %s9951_s26 }
 0x832   : > { %3811 = vrot.lane.b32.xlu1 %v8460_v63, %s9950_s23 }
 0x835   : > { %3937 = vrot.lane.b32.xlu0 %v4108_v16, %s9952_s28 }
 0x836   : > { %3875 = vrot.lane.b32.xlu1 %v3854_v57, %s9951_s26 }
 0x839   : > { %4001 = vrot.lane.b32.xlu0 %v8460_v63, %s9953_s19  ;;  %v3911_v63 = vld [vmem:[#allocation2 + $0x89] sm:$0xff] }
 0x83a   : > { %3939 = vrot.lane.b32.xlu1 %v3918_v56, %s9952_s28  ;;  %v3920_v10 = vpack.c.bf16 %v3912_v4, %v3911_v63 }
 0x83d   : > { %4065 = vrot.lane.b32.xlu0 %v3854_v57, %s10036_s1 }
 0x83e   : > { %4003 = vrot.lane.b32.xlu1 %v8464_v37, %s9953_s19 }
 0x841   : > { %4129 = vrot.lane.b32.xlu0 %v3918_v56, %s9954_s29 }
 0x842   : > { %4067 = vrot.lane.b32.xlu1 %v4046_v15, %s10036_s1 }
 0x845   : > { %4131 = vrot.lane.b32.xlu0 %v4110_v51, %s9954_s29 }
 0x846   : > { %3685 = vrot.lane.b32.xlu1 %v3854_v57, %s10041_s22 }
 0x849   : > { %3749 = vrot.lane.b32.xlu0 %v3918_v56, %s10107_s0 }
 0x84a   : > { %3687 = vrot.lane.b32.xlu1 %v4046_v15, %s10041_s22 }
 0x84d   : > { %3813 = vrot.lane.b32.xlu0 %v8464_v37, %s9950_s23  ;;  %v3975_v37 = vld [vmem:[#allocation2 + $0x97] sm:$0xff] }
 0x84e   : > { %3751 = vrot.lane.b32.xlu1 %v4110_v51, %s10107_s0  ;;  %v3984_v58 = vpack.c.bf16 %v3976_v46, %v3975_v37 }
 0x851   : > { %3877 = vrot.lane.b32.xlu0 %v4046_v15, %s9951_s26 }
 0x852   : > { %3815 = vrot.lane.b32.xlu1 %v3792_v23, %s9950_s23 }
 0x855   : > { %3941 = vrot.lane.b32.xlu0 %v4110_v51, %s9952_s28 }
 0x856   : > { %3879 = vrot.lane.b32.xlu1 %v3856_v20, %s9951_s26 }
 0x859   : > { %4005 = vrot.lane.b32.xlu0 %v3792_v23, %s9953_s19 }
 0x85a   : > { %3943 = vrot.lane.b32.xlu1 %v3920_v10, %s9952_s28 }
 0x85b   : > { %v3738_v1 = vpop.permute.xlu0 %3737 }
 0x85c   : > { %v3676_v21 = vpop.permute.xlu1 %3675  ;;  %3761 = vst.msk [vmem:[#allocation3] sm:$0xff] %vm1046_vm5, %v3738_v1 }
 0x85d   : > { %3698 = vst.msk [vmem:[#allocation3 + $0x8] sm:$0xff] %vm981_vm2, %v3676_v21  ;;  %4069 = vrot.lane.b32.xlu0 %v3856_v20, %s10036_s1 }
 0x85e   : > { %4007 = vrot.lane.b32.xlu1 %v3984_v58, %s9953_s19 }
 0x85f   : > { %v3802_v36 = vpop.permute.xlu0 %3801 }
 0x860   : > { %v3740_v0 = vpop.permute.xlu1 %3739  ;;  %3825 = vst.msk [vmem:[#allocation3] sm:$0xff] %vm10108_vm3, %v3802_v36  ;;  %vm10122_vm3 = vmmov %vm10120_vm15 }
 0x861   : > { %3762 = vst.msk [vmem:[#allocation3 + $0x8] sm:$0xff] %vm1046_vm5, %v3740_v0  ;;  %4133 = vrot.lane.b32.xlu0 %v3920_v10, %s9954_s29 }
 0x862   : > { %4135 = vrot.lane.b32.xlu1 %v4112_v29, %s9954_s29 }
 0x863   : > { %v3866_v31 = vpop.permute.xlu0 %3865 }
 0x864   : > { %v3804_v11 = vpop.permute.xlu1 %3803  ;;  %3889 = vst.msk [vmem:[#allocation3] sm:$0xff] %vm10110_vm1, %v3866_v31 }
 0x865   : > { %3826 = vst.msk [vmem:[#allocation3 + $0x8] sm:$0xff] %vm10109_vm4, %v3804_v11  ;;  %vm10123_vm4 = vmmov %vm10121_vm0 }
 0x867   : > { %v3930_v44 = vpop.permute.xlu0 %3929 }
 0x868   : > { %v3868_v32 = vpop.permute.xlu1 %3867  ;;  %3953 = vst.msk [vmem:[#allocation3] sm:$0xff] %vm10112_vm7, %v3930_v44 }
 0x869   : > { %3890 = vst.msk [vmem:[#allocation3 + $0x8] sm:$0xff] %vm10111_vm6, %v3868_v32  ;;  %vm10124_vm6 = vmmov %vm10110_vm1 }
 0x86b   : > { %v3994_v12 = vpop.permute.xlu0 %3993 }
 0x86c   : > { %v3932_v52 = vpop.permute.xlu1 %3931  ;;  %4017 = vst.msk [vmem:[#allocation3] sm:$0xff] %vm10114_vm9, %v3994_v12 }
 0x86d   : > { %3954 = vst.msk [vmem:[#allocation3 + $0x8] sm:$0xff] %vm10113_vm8, %v3932_v52  ;;  %vm10125_vm8 = vmmov %vm10112_vm7 }
 0x86f   : > { %v4058_v3 = vpop.permute.xlu0 %4057 }
 0x870   : > { %v3996_v25 = vpop.permute.xlu1 %3995  ;;  %4081 = vst.msk [vmem:[#allocation3] sm:$0xff] %vm10116_vm11, %v4058_v3 }
 0x871   : > { %4018 = vst.msk [vmem:[#allocation3 + $0x8] sm:$0xff] %vm10115_vm10, %v3996_v25  ;;  %vm10126_vm10 = vmmov %vm10114_vm9 }
 0x873   : > { %v4122_v39 = vpop.permute.xlu0 %4121 }
 0x874   : > { %v4060_v17 = vpop.permute.xlu1 %4059  ;;  %4145 = vst.msk [vmem:[#allocation3] sm:$0xff] %vm10118_vm13, %v4122_v39 }
 0x875   : > { %4082 = vst.msk [vmem:[#allocation3 + $0x8] sm:$0xff] %vm10117_vm12, %v4060_v17  ;;  %vm10127_vm12 = vmmov %vm10116_vm11 }
 0x877   : > { %v4124_v22 = vpop.permute.xlu0 %4123 }
 0x878   : > { %v3678_v41 = vpop.permute.xlu1 %3677  ;;  %4146 = vst.msk [vmem:[#allocation3 + $0x8] sm:$0xff] %vm10119_vm14, %v4124_v22  ;;  %vm10128_vm14 = vmmov %vm10118_vm13 }
 0x879   : > { %3699 = vst.msk [vmem:[#allocation3 + $0x10] sm:$0xff] %vm981_vm2, %v3678_v41 }
 0x87b   : > { %v3742_v8 = vpop.permute.xlu0 %3741  ;;  %v4153_v62 = vld [vmem:[#allocation3] sm:$0xff] }
 0x87c   : > { %v3680_v54 = vpop.permute.xlu1 %3679  ;;  %3763 = vst.msk [vmem:[#allocation3 + $0x10] sm:$0xff] %vm1046_vm5, %v3742_v8  ;;  %6189 = vmatprep.mubr.msk.bf16.mxu1 %vm10120_vm15, %v4153_v62  ;;  %vm10129_vm15 = vmmov %vm10122_vm3 }
 0x87d   : > { %3700 = vst.msk [vmem:[#allocation3 + $0x18] sm:$0xff] %vm981_vm2, %v3680_v54 }
 0x87f   : > { %v3806_v6 = vpop.permute.xlu0 %3805  ;;  %v4154_v27 = vld [vmem:[#allocation3 + $0x8] sm:$0xff] }
 0x880   : > { %v3744_v16 = vpop.permute.xlu1 %3743  ;;  %3827 = vst.msk [vmem:[#allocation3 + $0x10] sm:$0xff] %vm10121_vm0, %v3806_v6  ;;  %6190 = vmatmul.mubr.msk.bf16.vlgmr.msra.gmra.mrb[24].mxu1 %vm10122_vm3, %v4154_v27 }
 0x881   : > { %3764 = vst.msk [vmem:[#allocation3 + $0x18] sm:$0xff] %vm1046_vm5, %v3744_v16 }
 0x883   : > { %v3870_v14 = vpop.permute.xlu0 %3869 }
 0x884   : > { %v3808_v57 = vpop.permute.xlu1 %3807  ;;  %3891 = vst.msk [vmem:[#allocation3 + $0x10] sm:$0xff] %vm10110_vm1, %v3870_v14 }
 0x885   : > { %3828 = vst.msk [vmem:[#allocation3 + $0x18] sm:$0xff] %vm10123_vm4, %v3808_v57  ;;  %vm10130_vm4 = vmmov %vm10121_vm0 }
 0x887   : > { %v3934_v56 = vpop.permute.xlu0 %3933 }
 0x888   : > { %v3872_v59 = vpop.permute.xlu1 %3871  ;;  %3955 = vst.msk [vmem:[#allocation3 + $0x10] sm:$0xff] %vm10112_vm7, %v3934_v56 }
 0x889   : > { %3892 = vst.msk [vmem:[#allocation3 + $0x18] sm:$0xff] %vm10124_vm6, %v3872_v59  ;;  %vm10131_vm6 = vmmov %vm10110_vm1 }
 0x88b   : > { %v3998_v35 = vpop.permute.xlu0 %3997 }
 0x88c   : > { %v3936_v30 = vpop.permute.xlu1 %3935  ;;  %4019 = vst.msk [vmem:[#allocation3 + $0x10] sm:$0xff] %vm10114_vm9, %v3998_v35 }
 0x88d   : > { %3956 = vst.msk [vmem:[#allocation3 + $0x18] sm:$0xff] %vm10125_vm8, %v3936_v30  ;;  %vm10132_vm8 = vmmov %vm10112_vm7 }
 0x88f   : > { %v4062_v9 = vpop.permute.xlu0 %4061 }
 0x890   : > { %v4000_v15 = vpop.permute.xlu1 %3999  ;;  %4083 = vst.msk [vmem:[#allocation3 + $0x10] sm:$0xff] %vm10116_vm11, %v4062_v9 }
 0x891   : > { %4020 = vst.msk [vmem:[#allocation3 + $0x18] sm:$0xff] %vm10126_vm10, %v4000_v15  ;;  %vm10133_vm10 = vmmov %vm10114_vm9 }
 0x893   : > { %v4126_v51 = vpop.permute.xlu0 %4125 }
 0x894   : > { %v4064_v7 = vpop.permute.xlu1 %4063  ;;  %4147 = vst.msk [vmem:[#allocation3 + $0x10] sm:$0xff] %vm10118_vm13, %v4126_v51 }
 0x895   : > { %4084 = vst.msk [vmem:[#allocation3 + $0x18] sm:$0xff] %vm10127_vm12, %v4064_v7  ;;  %vm10134_vm12 = vmmov %vm10116_vm11 }
 0x897   : > { %v4128_v33 = vpop.permute.xlu0 %4127 }
 0x898   : > { %v3682_v24 = vpop.permute.xlu1 %3681  ;;  %4148 = vst.msk [vmem:[#allocation3 + $0x18] sm:$0xff] %vm10128_vm14, %v4128_v33  ;;  %vm10135_vm14 = vmmov %vm10118_vm13 }
 0x899   : > { %3701 = vst.msk [vmem:[#allocation3 + $0x20] sm:$0xff] %vm981_vm2, %v3682_v24 }
 0x89b   : > { %v3746_v13 = vpop.permute.xlu0 %3745  ;;  %v4155_v43 = vld [vmem:[#allocation3 + $0x10] sm:$0xff] }
 0x89c   : > { %v3684_v23 = vpop.permute.xlu1 %3683  ;;  %3765 = vst.msk [vmem:[#allocation3 + $0x20] sm:$0xff] %vm1046_vm5, %v3746_v13  ;;  %6193 = vmatprep.mubr.msk.bf16.mxu1 %vm10129_vm15, %v4155_v43  ;;  %vm10136_vm15 = vmmov %vm10122_vm3 }
 0x89d   : > { %3702 = vst.msk [vmem:[#allocation3 + $0x28] sm:$0xff] %vm981_vm2, %v3684_v23 }
 0x89f   : > { %v3810_v63 = vpop.permute.xlu0 %3809  ;;  %v4156_v4 = vld [vmem:[#allocation3 + $0x18] sm:$0xff] }
 0x8a0   : > { %v3748_v20 = vpop.permute.xlu1 %3747  ;;  %3829 = vst.msk [vmem:[#allocation3 + $0x20] sm:$0xff] %vm10121_vm0, %v3810_v63  ;;  %6194 = vmatmul.mubr.msk.bf16.gmra.mrb[28].mxu1 %vm10122_vm3, %v4156_v4 }
 0x8a1   : > { %3766 = vst.msk [vmem:[#allocation3 + $0x28] sm:$0xff] %vm1046_vm5, %v3748_v20 }
 0x8a3   : > { %v3874_v37 = vpop.permute.xlu0 %3873 }
 0x8a4   : > { %v3812_v10 = vpop.permute.xlu1 %3811  ;;  %3893 = vst.msk [vmem:[#allocation3 + $0x20] sm:$0xff] %vm10110_vm1, %v3874_v37 }
 0x8a5   : > { %3830 = vst.msk [vmem:[#allocation3 + $0x28] sm:$0xff] %vm10130_vm4, %v3812_v10  ;;  %vm10137_vm4 = vmmov %vm10121_vm0 }
 0x8a7   : > { %v3938_v42 = vpop.permute.xlu0 %3937 }
 0x8a8   : > { %v3876_v46 = vpop.permute.xlu1 %3875  ;;  %3957 = vst.msk [vmem:[#allocation3 + $0x20] sm:$0xff] %vm10112_vm7, %v3938_v42 }
 0x8a9   : > { %3894 = vst.msk [vmem:[#allocation3 + $0x28] sm:$0xff] %vm10131_vm6, %v3876_v46  ;;  %vm10139_vm6 = vmmov %vm10112_vm7 }
 0x8aa   : > { %vm10140_vm7 = vmmov %vm10139_vm6 }
 0x8ab   : > { %v4002_v21 = vpop.permute.xlu0 %4001 }
 0x8ac   : > { %v3940_v28 = vpop.permute.xlu1 %3939  ;;  %4021 = vst.msk [vmem:[#allocation3 + $0x20] sm:$0xff] %vm10114_vm9, %v4002_v21 }
 0x8ad   : > { %3958 = vst.msk [vmem:[#allocation3 + $0x28] sm:$0xff] %vm10132_vm8, %v3940_v28 }
 0x8af   : > { %v4066_v58 = vpop.permute.xlu0 %4065 }
 0x8b0   : > { %v4004_v1 = vpop.permute.xlu1 %4003  ;;  %4085 = vst.msk [vmem:[#allocation3 + $0x20] sm:$0xff] %vm10116_vm11, %v4066_v58 }
 0x8b1   : > { %4022 = vst.msk [vmem:[#allocation3 + $0x28] sm:$0xff] %vm10133_vm10, %v4004_v1 }
 0x8b3   : > { %v4130_v0 = vpop.permute.xlu0 %4129 }
 0x8b4   : > { %v4068_v29 = vpop.permute.xlu1 %4067  ;;  %4149 = vst.msk [vmem:[#allocation3 + $0x20] sm:$0xff] %vm10118_vm13, %v4130_v0 }
 0x8b5   : > { %4086 = vst.msk [vmem:[#allocation3 + $0x28] sm:$0xff] %vm10134_vm12, %v4068_v29 }
 0x8b7   : > { %v4132_v11 = vpop.permute.xlu0 %4131 }
 0x8b8   : > { %v3686_v36 = vpop.permute.xlu1 %3685  ;;  %4150 = vst.msk [vmem:[#allocation3 + $0x28] sm:$0xff] %vm10135_vm14, %v4132_v11  ;;  %vm10148_vm14 = vmmov %vm10122_vm3 }
 0x8b9   : > { %3703 = vst.msk [vmem:[#allocation3 + $0x30] sm:$0xff] %vm981_vm2, %v3686_v36 }
 0x8bb   : > { %v3750_v32 = vpop.permute.xlu0 %3749  ;;  %v4157_v44 = vld [vmem:[#allocation3 + $0x20] sm:$0xff] }
 0x8bc   : > { %v3688_v31 = vpop.permute.xlu1 %3687  ;;  %3767 = vst.msk [vmem:[#allocation3 + $0x30] sm:$0xff] %vm1046_vm5, %v3750_v32  ;;  %6197 = vmatprep.mubr.msk.bf16.mxu1 %vm10136_vm15, %v4157_v44  ;;  %vm10149_vm15 = vcmask 64512  }
 0x8bd   : > { %3704 = vst.msk [vmem:[#allocation3 + $0x38] sm:$0xff] %vm981_vm2, %v3688_v31  ;;  %vm10138_vm2 = vmmov %vm10110_vm1 }
 0x8bf   : > { %v3814_v12 = vpop.permute.xlu0 %3813  ;;  %v4158_v25 = vld [vmem:[#allocation3 + $0x28] sm:$0xff] }
 0x8c0   : > { %v3752_v52 = vpop.permute.xlu1 %3751  ;;  %3831 = vst.msk [vmem:[#allocation3 + $0x30] sm:$0xff] %vm10121_vm0, %v3814_v12  ;;  %6198 = vmatmul.mubr.msk.bf16.gmra.mrb[32].mxu1 %vm10122_vm3, %v4158_v25  ;;  %vm10150_vm0 = vmmov %vm10149_vm15 }
 0x8c1   : > { %3768 = vst.msk [vmem:[#allocation3 + $0x38] sm:$0xff] %vm1046_vm5, %v3752_v52  ;;  %vm10141_vm5 = vmmov %vm10114_vm9 }
 0x8c2   : > { %vm10142_vm8 = vmmov %vm10141_vm5 }
 0x8c3   : > { %v3878_v17 = vpop.permute.xlu0 %3877  ;;  %vm10143_vm9 = vmmov %vm10116_vm11 }
 0x8c4   : > { %v3816_v3 = vpop.permute.xlu1 %3815  ;;  %3895 = vst.msk [vmem:[#allocation3 + $0x30] sm:$0xff] %vm10110_vm1, %v3878_v17  ;;  %vm10144_vm10 = vmmov %vm10143_vm9 }
 0x8c5   : > { %3832 = vst.msk [vmem:[#allocation3 + $0x38] sm:$0xff] %vm10137_vm4, %v3816_v3  ;;  %vm10145_vm11 = vmmov %vm10118_vm13 }
 0x8c6   : > { %vm10146_vm12 = vmmov %vm10145_vm11 }
 0x8c7   : > { %v3942_v41 = vpop.permute.xlu0 %3941  ;;  %vm10147_vm13 = vmmov %vm10122_vm3 }
 0x8c8   : > { %v3880_v39 = vpop.permute.xlu1 %3879  ;;  %3959 = vst.msk [vmem:[#allocation3 + $0x30] sm:$0xff] %vm10139_vm6, %v3942_v41  ;;  %vm10151_vm3 = vmmov %vm10150_vm0 }
 0x8c9   : > { %3896 = vst.msk [vmem:[#allocation3 + $0x38] sm:$0xff] %vm10138_vm2, %v3880_v39  ;;  %vm10152_vm4 = vmmov %vm10150_vm0 }
 0x8ca   : > { %vm10153_vm1 = vmmov %vm10150_vm0 }
 0x8cb   : > { %v4006_v54 = vpop.permute.xlu0 %4005  ;;  %vm10154_vm2 = vmmov %vm10150_vm0 }
 0x8cc   : > { %v3944_v22 = vpop.permute.xlu1 %3943  ;;  %4023 = vst.msk [vmem:[#allocation3 + $0x30] sm:$0xff] %vm10141_vm5, %v4006_v54  ;;  %vm10155_vm6 = vmmov %vm10150_vm0 }
 0x8cd   : > { %3960 = vst.msk [vmem:[#allocation3 + $0x38] sm:$0xff] %vm10140_vm7, %v3944_v22  ;;  %vm10156_vm7 = vmmov %vm10150_vm0 }
 0x8ce   : > { %vm10157_vm5 = vmmov %vm10150_vm0 }
 0x8cf   : > { %v4070_v62 = vpop.permute.xlu0 %4069 }
 0x8d0   : > { %v4008_v8 = vpop.permute.xlu1 %4007  ;;  %4087 = vst.msk [vmem:[#allocation3 + $0x30] sm:$0xff] %vm10143_vm9, %v4070_v62  ;;  %vm10159_vm9 = vmmov %vm10150_vm0 }
 0x8d1   : > { %4024 = vst.msk [vmem:[#allocation3 + $0x38] sm:$0xff] %vm10142_vm8, %v4008_v8  ;;  %vm10158_vm8 = vmmov %vm10150_vm0 }
 0x8d2   : > { %4088 = vst.msk [vmem:[#allocation3 + $0x38] sm:$0xff] %vm10144_vm10, %v8539_v49  ;;  %vm10160_vm10 = vmmov %vm10150_vm0 }
 0x8d3   : > { %v4134_v16 = vpop.permute.xlu0 %4133 }
 0x8d4   : > { %v4136_v6 = vpop.permute.xlu1 %4135  ;;  %4151 = vst.msk [vmem:[#allocation3 + $0x30] sm:$0xff] %vm10145_vm11, %v4134_v16  ;;  %vm10161_vm11 = vmmov %vm10150_vm0 }
 0x8d5   : > { %4152 = vst.msk [vmem:[#allocation3 + $0x38] sm:$0xff] %vm10146_vm12, %v4136_v6  ;;  %vm10162_vm12 = vmmov %vm10150_vm0 }
 0x8db   : > { %v4159_v27 = vld [vmem:[#allocation3 + $0x30] sm:$0xff] }
 0x8dc   : > { %v4160_v57 = vld [vmem:[#allocation3 + $0x38] sm:$0xff]  ;;  %6201 = vmatprep.mubr.msk.bf16.mxu1 %vm10147_vm13, %v4159_v27  ;;  %vm10163_vm13 = vmmov %vm10150_vm0 }
 0x8dd   : > { %6202 = vmatmul.mubr.msk.bf16.gmra.mrb[36].mxu1 %vm10148_vm14, %v4160_v57  ;;  %vm10164_vm14 = vmmov %vm10150_vm0 }
 0x953   : > { %v6191_v14 = vpop.f32.mrb[24].mxu1 }
 0x954   : > { %v4242_v59 = vpop.f32.mrb[25].mxu1  ;;  %v8628_v33 = vmul.f32 %v6191_v14, %v10093_v2 }
 0x955   : > { %v6192_v56 = vpop.f32.mrb[26].mxu1  ;;  %v8623_v51 = vmul.f32 %v4242_v59, %v10091_v5 }
 0x956   : > { %v4245_v30 = vpop.f32.mrb[27].mxu1  ;;  %v4365_v4 = vmul.f32 %v8628_v33, %v8628_v33  ;;  %v8641_v37 = vmul.f32 %v6192_v56, %v10094_v50  ;;  %v4326_v28 = vsel %vm10153_vm1, %v8628_v33, 0.0  ;;  %vm10168_vm1 = vmmov %vm10150_vm0 }
 0x957   : > { %v8620_v7 = vmul.f32 %v4245_v30, %v10092_v47  ;;  %v4363_v23 = vmul.f32 %v8623_v51, %v8623_v51  ;;  %v4323_v43 = vsel %vm10150_vm0, %v8623_v51, 0.0 }
 0x958   : > { %v4382_v58 = vsel %vm10154_vm2, %v4365_v4, 0.0  ;;  %v4366_v29 = vmul.f32 %v8641_v37, %v8641_v37  ;;  %v4328_v44 = vsel %vm10155_vm6, %v8641_v37, 0.0  ;;  %vm10169_vm2 = vmmov %vm10150_vm0 }
 0x959   : > { %v4364_v24 = vmul.f32 %v8620_v7, %v8620_v7  ;;  %v4324_v13 = vsel %vm10149_vm15, %v8620_v7, 0.0  ;;  %v4379_v10 = vsel %vm10152_vm4, %v4363_v23, 0.0  ;;  %vm10165_vm15 = vmmov %vm10150_vm0 }
 0x95a   : > { %v4325_v63 = vadd.f32 %v4324_v13, %v4323_v43  ;;  %v4384_v3 = vsel %vm10157_vm5, %v4366_v29, 0.0  ;;  %vm10167_vm4 = vmmov %vm10150_vm0 }
 0x95b   : > { %v4380_v20 = vsel %vm10151_vm3, %v4364_v24, 0.0  ;;  %vm10166_vm3 = vmmov %vm10150_vm0 }
 0x95c   : > { %v4381_v42 = vadd.f32 %v4380_v20, %v4379_v10  ;;  %v4327_v21 = vadd.f32 %v4326_v28, %v4325_v63  ;;  %vm10170_vm6 = vmmov %vm10150_vm0 }
 0x95d   : > { %vm10172_vm5 = vmmov %vm10150_vm0 }
 0x95e   : > { %v4383_v31 = vadd.f32 %v4382_v58, %v4381_v42  ;;  %v4329_v25 = vadd.f32 %v4328_v44, %v4327_v21 }
 0x960   : > { %v4385_v22 = vadd.f32 %v4384_v3, %v4383_v31 }
 0x973   : > { %v6195_v35 = vpop.f32.mrb[28].mxu1 }
 0x974   : > { %v4258_v15 = vpop.f32.mrb[29].mxu1  ;;  %v8665_v54 = vmul.f32 %v6195_v35, %v10097_v45 }
 0x975   : > { %v6196_v9 = vpop.f32.mrb[30].mxu1  ;;  %v8644_v46 = vmul.f32 %v4258_v15, %v10095_v19 }
 0x976   : > { %v4261_v49 = vpop.f32.mrb[31].mxu1  ;;  %v4369_v27 = vmul.f32 %v8665_v54, %v8665_v54  ;;  %v8673_v57 = vmul.f32 %v6196_v9, %v10098_v18  ;;  %v4334_v56 = vsel %vm10161_vm11, %v8665_v54, 0.0  ;;  %vm10176_vm11 = vmmov %vm10150_vm0 }
 0x977   : > { %v4367_v0 = vmul.f32 %v8644_v46, %v8644_v46  ;;  %v8654_v36 = vmul.f32 %v4261_v49, %v10096_v53  ;;  %v4330_v52 = vsel %vm10156_vm7, %v8644_v46, 0.0  ;;  %vm10171_vm7 = vmmov %vm10150_vm0 }
 0x978   : > { %v4331_v41 = vadd.f32 %v4330_v52, %v4329_v25  ;;  %v4390_v35 = vsel %vm10162_vm12, %v4369_v27, 0.0  ;;  %v4370_v15 = vmul.f32 %v8673_v57, %v8673_v57  ;;  %v4336_v23 = vsel %vm10163_vm13, %v8673_v57, 0.0  ;;  %vm10177_vm12 = vmmov %vm10150_vm0 }
 0x979   : > { %v4386_v17 = vsel %vm10158_vm8, %v4367_v0, 0.0  ;;  %v4368_v39 = vmul.f32 %v8654_v36, %v8654_v36  ;;  %v4332_v8 = vsel %vm10159_vm9, %v8654_v36, 0.0  ;;  %vm10173_vm8 = vmmov %vm10150_vm0 }
 0x97a   : > { %v4387_v62 = vadd.f32 %v4386_v17, %v4385_v22  ;;  %v4333_v6 = vadd.f32 %v4332_v8, %v4331_v41  ;;  %v4392_v20 = vsel %vm10165_vm15, %v4370_v15, 0.0  ;;  %vm10174_vm9 = vmmov %vm10150_vm0 }
 0x97b   : > { %v4388_v16 = vsel %vm10160_vm10, %v4368_v39, 0.0  ;;  %vm10175_vm10 = vmmov %vm10150_vm0 }
 0x97c   : > { %v4389_v59 = vadd.f32 %v4388_v16, %v4387_v62  ;;  %v4335_v30 = vadd.f32 %v4334_v56, %v4333_v6  ;;  %vm10178_vm13 = vmmov %vm10150_vm0 }
 0x97e   : > { %v4391_v9 = vadd.f32 %v4390_v35, %v4389_v59  ;;  %v4337_v43 = vadd.f32 %v4336_v23, %v4335_v30 }
 0x980   : > { %v4393_v42 = vadd.f32 %v4392_v20, %v4391_v9 }
 0x993   : > { %v6199_v1 = vpop.f32.mrb[32].mxu1 }
 0x994   : > { %v4274_v11 = vpop.f32.mrb[33].mxu1  ;;  %v8697_v28 = vmul.f32 %v6199_v1, %v10101_v55 }
 0x995   : > { %v6200_v32 = vpop.f32.mrb[34].mxu1  ;;  %v8676_v14 = vmul.f32 %v4274_v11, %v10099_v60 }
 0x996   : > { %v4277_v12 = vpop.f32.mrb[35].mxu1  ;;  %v8703_v0 = vmul.f32 %v6200_v32, %v10102_v40  ;;  %v4373_v31 = vmul.f32 %v8697_v28, %v8697_v28  ;;  %v4342_v52 = vsel %vm10168_vm1, %v8697_v28, 0.0 }
 0x997   : > { %v4371_v49 = vmul.f32 %v8676_v14, %v8676_v14  ;;  %v8686_v24 = vmul.f32 %v4277_v12, %v10100_v38  ;;  %v4338_v13 = vsel %vm10164_vm14, %v8676_v14, 0.0  ;;  %vm10179_vm14 = vmmov %vm10150_vm0 }
 0x998   : > { %v4339_v10 = vadd.f32 %v4338_v13, %v4337_v43  ;;  %v4374_v1 = vmul.f32 %v8703_v0, %v8703_v0  ;;  %v4398_v25 = vsel %vm10169_vm2, %v4373_v31, 0.0  ;;  %v4344_v32 = vsel %vm10170_vm6, %v8703_v0, 0.0 }
 0x999   : > { %v4394_v63 = vsel %vm10150_vm0, %v4371_v49, 0.0  ;;  %v4372_v4 = vmul.f32 %v8686_v24, %v8686_v24  ;;  %v4340_v21 = vsel %vm10166_vm3, %v8686_v24, 0.0 }
 0x99a   : > { %v4395_v58 = vadd.f32 %v4394_v63, %v4393_v42  ;;  %v4341_v11 = vadd.f32 %v4340_v21, %v4339_v10  ;;  %v4400_v62 = vsel %vm10171_vm7, %v4374_v1, 0.0 }
 0x99b   : > { %v4396_v29 = vsel %vm10167_vm4, %v4372_v4, 0.0 }
 0x99c   : > { %v4397_v44 = vadd.f32 %v4396_v29, %v4395_v58  ;;  %v4343_v12 = vadd.f32 %v4342_v52, %v4341_v11 }
 0x99e   : > { %v4399_v17 = vadd.f32 %v4398_v25, %v4397_v44  ;;  %v4345_v16 = vadd.f32 %v4344_v32, %v4343_v12 }
 0x9a0   : > { %v4401_v15 = vadd.f32 %v4400_v62, %v4399_v17 }
 0x9b0   : > { %v6203_v3 = vpop.f32.mrb[36].mxu1 }
 0x9b1   : > { %v4290_v39 = vpop.f32.mrb[37].mxu1  ;;  %v8715_v41 = vmul.f32 %v6203_v3, %v10105_v61 }
 0x9b2   : > { %v8718_v22 = vmul.f32 %v4290_v39, %v10103_v34  ;;  %v6204_v8 = vpop.f32.mrb[38].mxu1 }
 0x9b3   : > { %v4293_v6 = vpop.f32.mrb[39].mxu1  ;;  %v8726_v56 = vmul.f32 %v6204_v8, %v10106_v26  ;;  %v4377_v49 = vmul.f32 %v8715_v41, %v8715_v41  ;;  %v4350_v63 = vsel %vm10175_vm10, %v8715_v41, 0.0 }
 0x9b4   : > { %v4346_v27 = vsel %vm10172_vm5, %v8718_v22, 0.0  ;;  %v4375_v59 = vmul.f32 %v8718_v22, %v8718_v22  ;;  %v8729_v30 = vmul.f32 %v4293_v6, %v10104_v48 }
 0x9b5   : > { %v4347_v35 = vadd.f32 %v4346_v27, %v4345_v16  ;;  %v4378_v4 = vmul.f32 %v8726_v56, %v8726_v56  ;;  %v4352_v58 = vsel %vm10177_vm12, %v8726_v56, 0.0  ;;  %v4406_v29 = vsel %vm10178_vm13, %v4377_v49, 0.0 }
 0x9b6   : > { %v4402_v9 = vsel %vm10173_vm8, %v4375_v59, 0.0  ;;  %v4348_v23 = vsel %vm10174_vm9, %v8729_v30, 0.0  ;;  %v4376_v13 = vmul.f32 %v8729_v30, %v8729_v30 }
 0x9b7   : > { %v4403_v43 = vadd.f32 %v4402_v9, %v4401_v15  ;;  %v4349_v20 = vadd.f32 %v4348_v23, %v4347_v35  ;;  %v4408_v44 = vsel %vm10179_vm14, %v4378_v4, 0.0 }
 0x9b8   : > { %v4404_v10 = vsel %vm10176_vm11, %v4376_v13, 0.0  ;;  %v5390_v13 = vld [vmem:[#allocation2 + $0x98] sm:$0xff] }
 0x9b9   : > { %v4351_v42 = vadd.f32 %v4350_v63, %v4349_v20  ;;  %v4405_v21 = vadd.f32 %v4404_v10, %v4403_v43  ;;  %v5391_v43 = vld [vmem:[#allocation2 + $0xa0] sm:$0xff] }
 0x9ba   : > { %v5399_v10 = vpack.c.bf16 %v5391_v43, %v5390_v13 }
 0x9bb   : > { %v4353_v11 = vadd.f32 %v4352_v58, %v4351_v42  ;;  %v4407_v31 = vadd.f32 %v4406_v29, %v4405_v21 }
 0x9bd   : > { %4354 = vadd.xlane.f32.xlu0 %v4353_v11  ;;  %v4409_v52 = vadd.f32 %v4408_v44, %v4407_v31 }
 0x9bf   : > { %4410 = vadd.xlane.f32.xlu1 %v4409_v52 }
 0x9d0   : > { %5422 = vrot.lane.b32.xlu1 %v5399_v10, %s6528_s30 }
 0xa4a   : > { %v4355_v1 = vpop.xlane.xlu0 %4354 }
 0xa4b   : > { %v4356_v12 = vrot.slane %v4355_v1, 4 }
 0xa4c   : > { %v4411_v25 = vpop.xlane.xlu1 %4410 }
 0xa4d   : > { %v4357_v3 = vadd.f32 %v4356_v12, %v4355_v1  ;;  %v4412_v17 = vrot.slane %v4411_v25, 4 }
 0xa4f   : > { %v4358_v39 = vrot.slane %v4357_v3, 2  ;;  %v4413_v32 = vadd.f32 %v4412_v17, %v4411_v25 }
 0xa51   : > { %v4414_v8 = vrot.slane %v4413_v32, 2  ;;  %v4359_v62 = vadd.f32 %v4358_v39, %v4357_v3 }
 0xa53   : > { %v4360_v16 = vrot.slane %v4359_v62, 1  ;;  %v4415_v6 = vadd.f32 %v4414_v8, %v4413_v32 }
 0xa55   : > { %v4361_v27 = vadd.f32 %v4360_v16, %v4359_v62  ;;  %v4416_v59 = vrot.slane %v4415_v6, 1 }
 0xa57   : > { %6249 = vpush %v4361_v27  ;;  %v4417_v35 = vadd.f32 %v4416_v59, %v4415_v6  ;;  %v6045_v6 = vld [vmem:[%s9621_s13] ss:$0 sm:$0xff] }
 0xa59   : > { %6251 = vpush %v4417_v35 }
 0xa88   : > { %s6250_s23 = spop %6249 }
 0xa89   : > { %s4419_s28 = smul.f32 0.001953125, %s6250_s23  ;;  %s6530_s23 = smov 48  }
 0xa8a   : > { %s6252_s1 = spop %6251 }
 0xa8b   : > { %s4421_s22 = smul.f32 %s4419_s28, %s4419_s28  ;;  %v4424_v9 = vstv %s4419_s28 }
 0xa8c   : > { %s4420_s18 = smul.f32 0.001953125, %s6252_s1  ;;  %v4425_v23 = vsub.f32 %v8623_v51, %v4424_v9  ;;  %v4426_v20 = vsub.f32 %v8620_v7, %v4424_v9  ;;  %v4427_v63 = vsub.f32 %v8628_v33, %v4424_v9  ;;  %v4428_v4 = vsub.f32 %v8641_v37, %v4424_v9 }
 0xa8d   : > { %v4429_v42 = vsub.f32 %v8644_v46, %v4424_v9  ;;  %v4430_v21 = vsub.f32 %v8654_v36, %v4424_v9  ;;  %v4431_v58 = vsub.f32 %v8665_v54, %v4424_v9  ;;  %v4432_v11 = vsub.f32 %v8673_v57, %v4424_v9 }
 0xa8e   : > { %s4422_s20 = ssub.f32 %s4420_s18, %s4421_s22  ;;  %v4433_v51 = vsub.f32 %v8676_v14, %v4424_v9  ;;  %v4434_v31 = vsub.f32 %v8686_v24, %v4424_v9  ;;  %v4435_v7 = vsub.f32 %v8697_v28, %v4424_v9  ;;  %v4436_v33 = vsub.f32 %v8703_v0, %v4424_v9  ;;  %v6044_v14 = vld [vmem:[%s9620_s12] ss:$0 sm:$0xff]  ;;  %s6529_s18 = smov 40  }
 0xa8f   : > { %v4437_v37 = vsub.f32 %v8718_v22, %v4424_v9  ;;  %v4438_v46 = vsub.f32 %v8729_v30, %v4424_v9  ;;  %v4439_v36 = vsub.f32 %v8715_v41, %v4424_v9  ;;  %v4440_v24 = vsub.f32 %v8726_v56, %v4424_v9 }
 0xa90   : > { %s4423_s2 = smax.f32 %s10005_s27, %s4422_s20 }
 0xa91   : > { %s4441_s3 = sadd.f32 1e-05, %s4423_s2  ;;  %s6531_s2 = smov 64  }
 0xa93   : > { %v4442_v15 = vstv %s4441_s3 }
 0xa94   : > { %6441 = vrsqrt.f32 %v4442_v15 }
 0xa9e   : > { %v6442_v49 = vpop.eup %6441 }
 0xa9f   : > { %6253 = vpush %v6442_v49 }
 0xad0   : > { %s6254_s21 = spop %6253 }
 0xad1   : > { %v4445_v29 = vstv %s6254_s21 }
 0xad2   : > { %v4446_v54 = vmul.f32 %v4445_v29, %v4425_v23  ;;  %v4447_v44 = vmul.f32 %v4445_v29, %v4426_v20  ;;  %v4448_v57 = vmul.f32 %v4445_v29, %v4427_v63  ;;  %v4449_v52 = vmul.f32 %v4445_v29, %v4428_v4 }
 0xad3   : > { %v4450_v28 = vmul.f32 %v4445_v29, %v4429_v42  ;;  %v4451_v1 = vmul.f32 %v4445_v29, %v4430_v21  ;;  %v4452_v12 = vmul.f32 %v4445_v29, %v4431_v58  ;;  %v4453_v0 = vmul.f32 %v4445_v29, %v4432_v11 }
 0xad4   : > { %v4454_v25 = vmul.f32 %v4445_v29, %v4433_v51  ;;  %v4455_v22 = vmul.f32 %v4445_v29, %v4434_v31  ;;  %v4456_v3 = vmul.f32 %v4445_v29, %v4435_v7  ;;  %v4457_v30 = vmul.f32 %v4445_v29, %v4436_v33 }
 0xad5   : > { %v4458_v17 = vmul.f32 %v4445_v29, %v4437_v37  ;;  %v4459_v41 = vmul.f32 %v4445_v29, %v4438_v46  ;;  %v4460_v39 = vmul.f32 %v4445_v29, %v4439_v36  ;;  %v4468_v32 = vmul.f32 %v6044_v14, %v4446_v54  ;;  %v4986_v46 = vld [vmem:[#allocation2 + $0x8] sm:$0xff]  ;;  %v4987_v36 = vld [vmem:[#allocation2 + $0x10] sm:$0xff] }
 0xad6   : > { %v4469_v8 = vmul.f32 %v6044_v14, %v4447_v44  ;;  %v4470_v62 = vmul.f32 %v6044_v14, %v4448_v57  ;;  %v4471_v16 = vmul.f32 %v6044_v14, %v4449_v52  ;;  %v4461_v56 = vmul.f32 %v4445_v29, %v4440_v24 }
 0xad7   : > { %v4472_v27 = vmul.f32 %v6044_v14, %v4450_v28  ;;  %v4473_v59 = vmul.f32 %v6044_v14, %v4451_v1  ;;  %v4474_v35 = vmul.f32 %v6044_v14, %v4452_v12  ;;  %v4475_v15 = vmul.f32 %v6044_v14, %v4453_v0 }
 0xad8   : > { %v4476_v49 = vmul.f32 %v6044_v14, %v4454_v25  ;;  %v4477_v9 = vmul.f32 %v6044_v14, %v4455_v22  ;;  %v4478_v23 = vmul.f32 %v6044_v14, %v4456_v3  ;;  %v4479_v13 = vmul.f32 %v6044_v14, %v4457_v30 }
 0xad9   : > { %v4480_v43 = vmul.f32 %v6044_v14, %v4458_v17  ;;  %v4481_v20 = vmul.f32 %v6044_v14, %v4459_v41  ;;  %v4482_v63 = vmul.f32 %v6044_v14, %v4460_v39  ;;  %v4490_v4 = vadd.f32 %v6045_v6, %v4468_v32 }
 0xada   : > { %v4491_v10 = vadd.f32 %v6045_v6, %v4469_v8  ;;  %v4492_v42 = vadd.f32 %v6045_v6, %v4470_v62  ;;  %v4493_v21 = vadd.f32 %v6045_v6, %v4471_v16  ;;  %v4483_v58 = vmul.f32 %v6044_v14, %v4461_v56 }
 0xadb   : > { %v4494_v11 = vadd.f32 %v6045_v6, %v4472_v27  ;;  %v4495_v51 = vadd.f32 %v6045_v6, %v4473_v59  ;;  %v4496_v31 = vadd.f32 %v6045_v6, %v4474_v35  ;;  %v4497_v29 = vadd.f32 %v6045_v6, %v4475_v15 }
 0xadc   : > { %v4498_v7 = vadd.f32 %v6045_v6, %v4476_v49  ;;  %v4499_v33 = vadd.f32 %v6045_v6, %v4477_v9  ;;  %v4500_v37 = vadd.f32 %v6045_v6, %v4478_v23  ;;  %v4501_v54 = vadd.f32 %v6045_v6, %v4479_v13 }
 0xadd   : > { %v4502_v44 = vadd.f32 %v6045_v6, %v4480_v43  ;;  %v4503_v57 = vadd.f32 %v6045_v6, %v4481_v20  ;;  %v4504_v52 = vadd.f32 %v6045_v6, %v4482_v63  ;;  %v8771_v24 = vmul.f32 0.5, %v4490_v4 }
 0xade   : > { %v8773_v28 = vmul.f32 0.5, %v4491_v10  ;;  %v8775_v1 = vmul.f32 0.5, %v4492_v42  ;;  %v8777_v14 = vmul.f32 0.5, %v4493_v21  ;;  %v8779_v12 = vmul.f32 0.5, %v4494_v11 }
 0xadf   : > { %10180 = vst [vmem:[#allocation20_spill] sm:$0xff] %v8771_v24  ;;  %v8781_v0 = vmul.f32 0.5, %v4495_v51  ;;  %v8783_v25 = vmul.f32 0.5, %v4496_v31  ;;  %v5002_v22 = vpack.c.bf16 %v4987_v36, %v4986_v46  ;;  %v8785_v3 = vmul.f32 0.5, %v4497_v29 }
 0xae0   : > { %10181 = vst [vmem:[#allocation24_spill] sm:$0xff] %v8773_v28  ;;  %10182 = vst [vmem:[#allocation18_spill] sm:$0xff] %v8775_v1  ;;  %v8787_v30 = vmul.f32 0.5, %v4498_v7  ;;  %v8789_v17 = vmul.f32 0.5, %v4499_v33  ;;  %v8791_v41 = vmul.f32 0.5, %v4500_v37  ;;  %v8793_v39 = vmul.f32 0.5, %v4501_v54 }
 0xae1   : > { %10183 = vst [vmem:[#allocation22_spill] sm:$0xff] %v8777_v14  ;;  %10184 = vst [vmem:[#allocation29_spill] sm:$0xff] %v8779_v12  ;;  %v8795_v32 = vmul.f32 0.5, %v4502_v44  ;;  %v8797_v8 = vmul.f32 0.70710677, %v4490_v4  ;;  %5018 = vrot.lane.b32.xlu0 %v5002_v22, %s10107_s0  ;;  %v4505_v16 = vadd.f32 %v6045_v6, %v4483_v58  ;;  %v8887_v45 = vmul.f32 0.5, %v4503_v57 }
 0xae2   : > { %10185 = vst [vmem:[#allocation33_spill] sm:$0xff] %v8781_v0  ;;  %10186 = vst [vmem:[#allocation27_spill] sm:$0xff] %v8783_v25  ;;  %v8799_v62 = vmul.f32 0.70710677, %v4491_v10  ;;  %v8802_v56 = vmul.f32 0.70710677, %v4492_v42 }
 0xae3   : > { %10187 = vst [vmem:[#allocation31_spill] sm:$0xff] %v8785_v3  ;;  %10188 = vst [vmem:[#allocation21_spill] sm:$0xff] %v8787_v30  ;;  %v8804_v27 = vmul.f32 0.70710677, %v4493_v21  ;;  %v8806_v59 = vmul.f32 0.70710677, %v4494_v11 }
 0xae4   : > { %10189 = vst [vmem:[#allocation25_spill] sm:$0xff] %v8789_v17  ;;  %10190 = vst [vmem:[#allocation19_spill] sm:$0xff] %v8791_v41  ;;  %v8808_v35 = vmul.f32 0.70710677, %v4495_v51  ;;  %v8810_v15 = vmul.f32 0.70710677, %v4496_v31 }
 0xae5   : > { %10191 = vst [vmem:[#allocation23_spill] sm:$0xff] %v8793_v39  ;;  %10192 = vst [vmem:[#allocation30_spill] sm:$0xff] %v8795_v32  ;;  %v8812_v49 = vmul.f32 0.70710677, %v4497_v29  ;;  %v8814_v9 = vmul.f32 0.70710677, %v4498_v7 }
 0xae6   : > { %10193 = vst [vmem:[#allocation35_spill] sm:$0xff] %v8797_v8  ;;  %10194 = vst [vmem:[#allocation28_spill] sm:$0xff] %v8799_v62  ;;  %v8816_v23 = vmul.f32 0.70710677, %v4499_v33  ;;  %v8818_v13 = vmul.f32 0.70710677, %v4500_v37 }
 0xae7   : > { %10195 = vst [vmem:[#allocation32_spill] sm:$0xff] %v8802_v56  ;;  %10196 = vst [vmem:[#allocation62_spill] sm:$0xff] %v8804_v27  ;;  %v8820_v43 = vmul.f32 0.70710677, %v4501_v54  ;;  %v8822_v6 = vmul.f32 0.70710677, %v4502_v44 }
 0xae8   : > { %10197 = vst [vmem:[#allocation63_spill] sm:$0xff] %v8806_v59  ;;  %10198 = vst [vmem:[#allocation64_spill] sm:$0xff] %v8808_v35  ;;  %v8824_v20 = vmul.f32 0.70710677, %v4503_v57  ;;  %v8826_v63 = vmul.f32 0.70710677, %v4504_v52 }
 0xae9   : > { %10199 = vst [vmem:[#allocation36_spill] sm:$0xff] %v8810_v15  ;;  %10200 = vst [vmem:[#allocation37_spill] sm:$0xff] %v8812_v49  ;;  %v8828_v4 = vmul.f32 0.70710677, %v4505_v16  ;;  %v8831_v10 = vand.u32 2147483647, %v8797_v8 }
 0xaea   : > { %10201 = vst [vmem:[#allocation38_spill] sm:$0xff] %v8814_v9  ;;  %10202 = vst [vmem:[#allocation39_spill] sm:$0xff] %v8816_v23  ;;  %v8834_v42 = vand.u32 2147483647, %v8799_v62  ;;  %v8837_v21 = vand.u32 2147483647, %v8802_v56 }
 0xaeb   : > { %10203 = vst [vmem:[#allocation40_spill] sm:$0xff] %v8818_v13  ;;  %10204 = vst [vmem:[#allocation41_spill] sm:$0xff] %v8820_v43  ;;  %v8840_v58 = vand.u32 2147483647, %v8804_v27  ;;  %v8843_v11 = vand.u32 2147483647, %v8806_v59 }
 0xaec   : > { %10205 = vst [vmem:[#allocation42_spill] sm:$0xff] %v8822_v6  ;;  %10206 = vst [vmem:[#allocation43_spill] sm:$0xff] %v8824_v20  ;;  %v8846_v51 = vand.u32 2147483647, %v8808_v35  ;;  %v8849_v31 = vand.u32 2147483647, %v8810_v15 }
 0xaed   : > { %10207 = vst [vmem:[#allocation44_spill] sm:$0xff] %v8826_v63  ;;  %10208 = vst [vmem:[#allocation45_spill] sm:$0xff] %v8828_v4  ;;  %v8852_v29 = vand.u32 2147483647, %v8812_v49  ;;  %v8855_v7 = vand.u32 2147483647, %v8814_v9 }
 0xaee   : > { %v8858_v33 = vand.u32 2147483647, %v8816_v23  ;;  %v8861_v37 = vand.u32 2147483647, %v8818_v13  ;;  %v8864_v46 = vand.u32 2147483647, %v8820_v43 }
 0xaef   : > { %v8867_v36 = vand.u32 2147483647, %v8822_v6  ;;  %v8870_v54 = vand.u32 2147483647, %v8824_v20  ;;  %v8873_v44 = vand.u32 2147483647, %v8826_v63 }
 0xaf0   : > { %v4554_v22 = vmul.f32 0.3275911, %v8831_v10  ;;  %v8877_v26 = vand.u32 2147483647, %v8828_v4  ;;  %v4555_v61 = vmul.f32 0.3275911, %v8834_v42 }
 0xaf1   : > { %v4556_v48 = vmul.f32 0.3275911, %v8837_v21  ;;  %v4557_v34 = vmul.f32 0.3275911, %v8840_v58  ;;  %v4558_v40 = vmul.f32 0.3275911, %v8843_v11 }
 0xaf2   : > { %v4559_v55 = vmul.f32 0.3275911, %v8846_v51  ;;  %v4560_v38 = vmul.f32 0.3275911, %v8849_v31  ;;  %v4561_v60 = vmul.f32 0.3275911, %v8852_v29 }
 0xaf3   : > { %v4562_v18 = vmul.f32 0.3275911, %v8855_v7  ;;  %10209 = vst [vmem:[#allocation46_spill] sm:$0xff] %v8887_v45  ;;  %v4563_v53 = vmul.f32 0.3275911, %v8858_v33  ;;  %v4570_v50 = vadd.f32 1.0, %v4554_v22 }
 0xaf4   : > { %v4564_v19 = vmul.f32 0.3275911, %v8861_v37  ;;  %v8891_v2 = vmul.f32 0.5, %v4504_v52  ;;  %v4565_v47 = vmul.f32 0.3275911, %v8864_v46  ;;  %v4571_v32 = vadd.f32 1.0, %v4555_v61 }
 0xaf5   : > { %v4566_v5 = vmul.f32 0.3275911, %v8867_v36  ;;  %v8895_v39 = vmul.f32 0.5, %v4505_v16  ;;  %v4567_v41 = vmul.f32 0.3275911, %v8870_v54  ;;  %v4572_v57 = vadd.f32 1.0, %v4556_v48 }
 0xaf6   : > { %10210 = vst [vmem:[#allocation47_spill] sm:$0xff] %v8891_v2  ;;  %v4568_v17 = vmul.f32 0.3275911, %v8873_v44  ;;  %v4569_v45 = vmul.f32 0.3275911, %v8877_v26  ;;  %v4573_v30 = vadd.f32 1.0, %v4557_v34  ;;  %6443 = vrcp.f32 %v4570_v50 }
 0xaf7   : > { %10211 = vst [vmem:[#allocation48_spill] sm:$0xff] %v8895_v39  ;;  %v4574_v3 = vadd.f32 1.0, %v4558_v40  ;;  %v4575_v25 = vadd.f32 1.0, %v4559_v55  ;;  %v4576_v22 = vadd.f32 1.0, %v4560_v38  ;;  %v4577_v52 = vadd.f32 1.0, %v4561_v60 }
 0xaf8   : > { %v4578_v2 = vadd.f32 1.0, %v4562_v18  ;;  %v4579_v0 = vadd.f32 1.0, %v4563_v53  ;;  %v4580_v12 = vadd.f32 1.0, %v4564_v19  ;;  %v4581_v14 = vadd.f32 1.0, %v4565_v47 }
 0xaf9   : > { %6445 = vrcp.f32 %v4571_v32  ;;  %v4582_v61 = vadd.f32 1.0, %v4566_v5  ;;  %v4583_v16 = vadd.f32 1.0, %v4567_v41  ;;  %v4584_v39 = vadd.f32 1.0, %v4568_v17 }
 0xafa   : > { %6447 = vrcp.f32 %v4572_v57  ;;  %v4585_v1 = vadd.f32 1.0, %v4569_v45  ;;  %v4746_v48 = vsub.f32 0.0, %v8831_v10  ;;  %v4747_v34 = vsub.f32 0.0, %v8834_v42 }
 0xafb   : > { %6449 = vrcp.f32 %v4573_v30  ;;  %v4748_v38 = vsub.f32 0.0, %v8837_v21  ;;  %v4749_v18 = vsub.f32 0.0, %v8840_v58  ;;  %v4750_v50 = vsub.f32 0.0, %v8843_v11 }
 0xafc   : > { %6451 = vrcp.f32 %v4574_v3  ;;  %v4751_v47 = vsub.f32 0.0, %v8846_v51  ;;  %v4752_v5 = vsub.f32 0.0, %v8849_v31  ;;  %v4753_v19 = vsub.f32 0.0, %v8852_v29 }
 0xafd   : > { %6453 = vrcp.f32 %v4575_v25  ;;  %v4754_v53 = vsub.f32 0.0, %v8855_v7  ;;  %v4755_v45 = vsub.f32 0.0, %v8858_v33  ;;  %v4756_v60 = vsub.f32 0.0, %v8861_v37 }
 0xafe   : > { %6455 = vrcp.f32 %v4576_v22  ;;  %v4757_v55 = vsub.f32 0.0, %v8864_v46  ;;  %v4758_v40 = vsub.f32 0.0, %v8867_v36  ;;  %v4762_v17 = vmul.f32 %v4746_v48, %v8831_v10 }
 0xaff   : > { %6457 = vrcp.f32 %v4577_v52  ;;  %v4763_v41 = vmul.f32 %v4747_v34, %v8834_v42  ;;  %v4764_v32 = vmul.f32 %v4748_v38, %v8837_v21  ;;  %v4765_v57 = vmul.f32 %v4749_v18, %v8840_v58 }
 0xb00   : > { %6459 = vrcp.f32 %v4578_v2  ;;  %v8920_v22 = vpop.eup %6443  ;;  %v4766_v52 = vmul.f32 %v4750_v50, %v8843_v11  ;;  %v4767_v2 = vmul.f32 %v4751_v47, %v8846_v51  ;;  %v4768_v3 = vmul.f32 %v4752_v5, %v8849_v31 }
 0xb01   : > { %6461 = vrcp.f32 %v4579_v0  ;;  %v4602_v0 = vmul.f32 1.0614054, %v8920_v22  ;;  %v8929_v10 = vmul.f32 %v4753_v19, %v8852_v29  ;;  %v8932_v42 = vmul.f32 %v4754_v53, %v8855_v7 }
 0xb02   : > { %6463 = vrcp.f32 %v4580_v12  ;;  %v8938_v58 = vmul.f32 %v4755_v45, %v8858_v33  ;;  %v8941_v11 = vmul.f32 %v4756_v60, %v8861_v37  ;;  %v8946_v29 = vmul.f32 1.442695, %v4762_v17 }
 0xb03   : > { %v8925_v25 = vpop.eup %6445  ;;  %6465 = vrcp.f32 %v4581_v14  ;;  %v4618_v31 = vadd.f32 -1.4531521, %v4602_v0  ;;  %v8951_v34 = vmul.f32 1.442695, %v4763_v41  ;;  %v8961_v47 = vmul.f32 %v4757_v55, %v8864_v46 }
 0xb04   : > { %v8934_v21 = vpop.eup %6447  ;;  %6467 = vrcp.f32 %v4582_v61  ;;  %v4603_v12 = vmul.f32 1.0614054, %v8925_v25  ;;  %v8965_v5 = vmul.f32 1.442695, %v4765_v57  ;;  %v8971_v53 = vmul.f32 %v4758_v40, %v8867_v36 }
 0xb05   : > { %v8943_v14 = vpop.eup %6449  ;;  %6469 = vrcp.f32 %v4583_v16  ;;  %v4604_v51 = vmul.f32 1.0614054, %v8934_v21  ;;  %v4634_v16 = vmul.f32 %v8920_v22, %v4618_v31  ;;  %v8973_v45 = vmul.f32 1.442695, %v4766_v52 }
 0xb06   : > { %v8948_v7 = vpop.eup %6451  ;;  %6471 = vrcp.f32 %v4584_v39  ;;  %v4605_v61 = vmul.f32 1.0614054, %v8943_v14  ;;  %v4619_v48 = vadd.f32 -1.4531521, %v4603_v12  ;;  %v8963_v39 = vmul.f32 1.442695, %v4764_v32 }
 0xb07   : > { %v8953_v33 = vpop.eup %6453  ;;  %6473 = vrcp.f32 %v4585_v1  ;;  %v4606_v37 = vmul.f32 1.0614054, %v8948_v7  ;;  %v4620_v38 = vadd.f32 -1.4531521, %v4604_v51  ;;  %v8975_v60 = vmul.f32 1.442695, %v4767_v2 }
 0xb08   : > { %v8957_v18 = vpop.eup %6455  ;;  %v4607_v50 = vmul.f32 1.0614054, %v8953_v33  ;;  %v4621_v55 = vadd.f32 -1.4531521, %v4605_v61  ;;  %v4635_v41 = vmul.f32 %v8925_v25, %v4619_v48  ;;  %v8981_v32 = vmul.f32 1.442695, %v4768_v3 }
 0xb09   : > { %v8967_v19 = vpop.eup %6457  ;;  %v4608_v1 = vmul.f32 1.0614054, %v8957_v18  ;;  %v4622_v12 = vadd.f32 -1.4531521, %v4606_v37  ;;  %v4636_v36 = vmul.f32 %v8934_v21, %v4620_v38  ;;  %v4650_v40 = vadd.f32 1.4214138, %v4634_v16 }
 0xb0a   : > { %v8977_v17 = vpop.eup %6459  ;;  %v4609_v46 = vmul.f32 1.0614054, %v8967_v19  ;;  %v4623_v51 = vadd.f32 -1.4531521, %v4607_v50  ;;  %v10212_v61 = vsub.f32 0.0, %v8870_v54  ;;  %v10213_v38 = vsub.f32 0.0, %v8873_v44 }
 0xb0b   : > { %v8983_v57 = vpop.eup %6461  ;;  %v4610_v0 = vmul.f32 1.0614054, %v8977_v17  ;;  %v4624_v31 = vadd.f32 -1.4531521, %v4608_v1  ;;  %v4637_v4 = vmul.f32 %v8943_v14, %v4621_v55  ;;  %6475 = vpow2.f32 %v8946_v29 }
 0xb0c   : > { %v8987_v52 = vpop.eup %6463  ;;  %v4611_v2 = vmul.f32 1.0614054, %v8983_v57  ;;  %v8993_v48 = vmul.f32 %v10212_v61, %v8870_v54  ;;  %v4625_v28 = vadd.f32 -1.4531521, %v4609_v46  ;;  %v9001_v16 = vmul.f32 %v10213_v38, %v8873_v44 }
 0xb0d   : > { %v8995_v3 = vpop.eup %6465  ;;  %v4612_v30 = vmul.f32 1.0614054, %v8987_v52  ;;  %v4626_v37 = vadd.f32 -1.4531521, %v4610_v0  ;;  %v4651_v54 = vadd.f32 1.4214138, %v4635_v41  ;;  %v4638_v46 = vmul.f32 %v8948_v7, %v4622_v12 }
 0xb0e   : > { %v9003_v24 = vpop.eup %6467  ;;  %v4613_v50 = vmul.f32 1.0614054, %v8995_v3  ;;  %v4627_v1 = vadd.f32 -1.4531521, %v4611_v2  ;;  %v4652_v0 = vadd.f32 1.4214138, %v4636_v36  ;;  %v4639_v43 = vmul.f32 %v8953_v33, %v4623_v51 }
 0xb0f   : > { %v9007_v61 = vpop.eup %6469  ;;  %v4614_v63 = vmul.f32 1.0614054, %v9003_v24  ;;  %v4628_v20 = vadd.f32 -1.4531521, %v4612_v30  ;;  %v4640_v2 = vmul.f32 %v8957_v18, %v4624_v31  ;;  %v4641_v23 = vmul.f32 %v8967_v19, %v4625_v28 }
 0xb10   : > { %v9011_v6 = vpop.eup %6471  ;;  %v4615_v44 = vmul.f32 1.0614054, %v9007_v61  ;;  %v4629_v38 = vadd.f32 -1.4531521, %v4613_v50  ;;  %v4642_v30 = vmul.f32 %v8977_v17, %v4626_v37  ;;  %v4643_v9 = vmul.f32 %v8983_v57, %v4627_v1 }
 0xb11   : > { %v9016_v13 = vpop.eup %6473  ;;  %v4616_v55 = vmul.f32 1.0614054, %v9011_v6  ;;  %v4630_v41 = vadd.f32 -1.4531521, %v4614_v63  ;;  %v4644_v50 = vmul.f32 %v8987_v52, %v4628_v20  ;;  %v4653_v15 = vadd.f32 1.4214138, %v4637_v4 }
 0xb12   : > { %v4617_v12 = vmul.f32 1.0614054, %v9016_v13  ;;  %v4631_v36 = vadd.f32 -1.4531521, %v4615_v44  ;;  %v4645_v51 = vmul.f32 %v8995_v3, %v4629_v38  ;;  %v4654_v59 = vadd.f32 1.4214138, %v4638_v46 }
 0xb13   : > { %v4632_v49 = vadd.f32 -1.4531521, %v4616_v55  ;;  %v4646_v31 = vmul.f32 %v9003_v24, %v4630_v41  ;;  %v4655_v28 = vadd.f32 1.4214138, %v4639_v43  ;;  %v4656_v27 = vadd.f32 1.4214138, %v4640_v2 }
 0xb14   : > { %v4633_v35 = vadd.f32 -1.4531521, %v4617_v12  ;;  %v4647_v63 = vmul.f32 %v9007_v61, %v4631_v36  ;;  %v4657_v56 = vadd.f32 1.4214138, %v4641_v23  ;;  %v4658_v44 = vadd.f32 1.4214138, %v4642_v30 }
 0xb15   : > { %v4648_v37 = vmul.f32 %v9011_v6, %v4632_v49  ;;  %v4659_v62 = vadd.f32 1.4214138, %v4643_v9  ;;  %v4660_v20 = vadd.f32 1.4214138, %v4644_v50  ;;  %v4666_v55 = vmul.f32 %v8920_v22, %v4650_v40 }
 0xb16   : > { %v4649_v1 = vmul.f32 %v9016_v13, %v4633_v35  ;;  %v4661_v38 = vadd.f32 1.4214138, %v4645_v51  ;;  %v4662_v8 = vadd.f32 1.4214138, %v4646_v31  ;;  %v4663_v41 = vadd.f32 1.4214138, %v4647_v63 }
 0xb17   : > { %v4667_v4 = vmul.f32 %v8925_v25, %v4651_v54  ;;  %v4664_v12 = vadd.f32 1.4214138, %v4648_v37  ;;  %v4668_v43 = vmul.f32 %v8934_v21, %v4652_v0  ;;  %v4669_v49 = vmul.f32 %v8943_v14, %v4653_v15 }
 0xb18   : > { %v4665_v36 = vadd.f32 1.4214138, %v4649_v1  ;;  %v4670_v23 = vmul.f32 %v8948_v7, %v4654_v59  ;;  %v4671_v46 = vmul.f32 %v8953_v33, %v4655_v28  ;;  %v4672_v35 = vmul.f32 %v8957_v18, %v4656_v27 }
 0xb19   : > { %v4673_v9 = vmul.f32 %v8967_v19, %v4657_v56  ;;  %v4674_v40 = vmul.f32 %v8977_v17, %v4658_v44  ;;  %v4675_v2 = vmul.f32 %v8983_v57, %v4659_v62  ;;  %v4676_v54 = vmul.f32 %v8987_v52, %v4660_v20 }
 0xb1a   : > { %v4682_v30 = vadd.f32 -0.28449672, %v4666_v55  ;;  %v4677_v50 = vmul.f32 %v8995_v3, %v4661_v38  ;;  %v4678_v0 = vmul.f32 %v9003_v24, %v4662_v8  ;;  %v4679_v15 = vmul.f32 %v9007_v61, %v4663_v41 }
 0xb1b   : > { %v4683_v59 = vadd.f32 -0.28449672, %v4667_v4  ;;  %v4680_v51 = vmul.f32 %v9011_v6, %v4664_v12  ;;  %v4681_v27 = vmul.f32 %v9016_v13, %v4665_v36  ;;  %v4684_v31 = vadd.f32 -0.28449672, %v4668_v43 }
 0xb1c   : > { %v4685_v56 = vadd.f32 -0.28449672, %v4669_v49  ;;  %v4686_v63 = vadd.f32 -0.28449672, %v4670_v23  ;;  %v4687_v28 = vadd.f32 -0.28449672, %v4671_v46  ;;  %v4698_v20 = vmul.f32 %v8920_v22, %v4682_v30 }
 0xb1d   : > { %v4688_v37 = vadd.f32 -0.28449672, %v4672_v35  ;;  %v4689_v62 = vadd.f32 -0.28449672, %v4673_v9  ;;  %v4690_v44 = vadd.f32 -0.28449672, %v4674_v40  ;;  %v4699_v41 = vmul.f32 %v8925_v25, %v4683_v59 }
 0xb1e   : > { %v4691_v1 = vadd.f32 -0.28449672, %v4675_v2  ;;  %v4692_v8 = vadd.f32 -0.28449672, %v4676_v54  ;;  %v4693_v55 = vadd.f32 -0.28449672, %v4677_v50  ;;  %v4700_v43 = vmul.f32 %v8934_v21, %v4684_v31 }
 0xb1f   : > { %v4694_v38 = vadd.f32 -0.28449672, %v4678_v0  ;;  %v4695_v4 = vadd.f32 -0.28449672, %v4679_v15  ;;  %v4696_v12 = vadd.f32 -0.28449672, %v4680_v51  ;;  %v4701_v49 = vmul.f32 %v8943_v14, %v4685_v56 }
 0xb20   : > { %v4697_v36 = vadd.f32 -0.28449672, %v4681_v27  ;;  %v4702_v23 = vmul.f32 %v8948_v7, %v4686_v63  ;;  %v4703_v29 = vmul.f32 %v8953_v33, %v4687_v28  ;;  %v4704_v46 = vmul.f32 %v8957_v18, %v4688_v37 }
 0xb21   : > { %v4705_v35 = vmul.f32 %v8967_v19, %v4689_v62  ;;  %v4706_v9 = vmul.f32 %v8977_v17, %v4690_v44  ;;  %v4707_v40 = vmul.f32 %v8983_v57, %v4691_v1  ;;  %6477 = vpow2.f32 %v8951_v34 }
 0xb22   : > { %v4708_v2 = vmul.f32 %v8987_v52, %v4692_v8  ;;  %v4709_v54 = vmul.f32 %v8995_v3, %v4693_v55  ;;  %v4714_v30 = vadd.f32 0.2548296, %v4698_v20  ;;  %6479 = vpow2.f32 %v8963_v39  ;;  %v6476_v39 = vpop.eup %6475 }
 0xb23   : > { %v4710_v50 = vmul.f32 %v9003_v24, %v4694_v38  ;;  %v4711_v0 = vmul.f32 %v9007_v61, %v4695_v4  ;;  %v4712_v15 = vmul.f32 %v9011_v6, %v4696_v12  ;;  %v4715_v59 = vadd.f32 0.2548296, %v4699_v41 }
 0xb24   : > { %v4713_v51 = vmul.f32 %v9016_v13, %v4697_v36  ;;  %v4716_v27 = vadd.f32 0.2548296, %v4700_v43  ;;  %v4717_v31 = vadd.f32 0.2548296, %v4701_v49  ;;  %v4718_v56 = vadd.f32 0.2548296, %v4702_v23 }
 0xb25   : > { %v4719_v34 = vadd.f32 0.2548296, %v4703_v29  ;;  %v4720_v63 = vadd.f32 0.2548296, %v4704_v46  ;;  %v4721_v28 = vadd.f32 0.2548296, %v4705_v35  ;;  %v4730_v8 = vmul.f32 %v8920_v22, %v4714_v30 }
 0xb26   : > { %v10214_v37 = vsub.f32 0.0, %v8877_v26  ;;  %v4722_v44 = vadd.f32 0.2548296, %v4706_v9  ;;  %v4723_v1 = vadd.f32 0.2548296, %v4707_v40  ;;  %v4731_v4 = vmul.f32 %v8925_v25, %v4715_v59  ;;  %v10216_v40 = vld [vmem:[#allocation28_spill] sm:$0xff] }
 0xb27   : > { %v4724_v20 = vadd.f32 0.2548296, %v4708_v2  ;;  %v4725_v55 = vadd.f32 0.2548296, %v4709_v54  ;;  %v4726_v38 = vadd.f32 0.2548296, %v4710_v50  ;;  %v4732_v43 = vmul.f32 %v8934_v21, %v4716_v27 }
 0xb28   : > { %v4777_v62 = vmul.f32 %v10214_v37, %v8877_v26  ;;  %v4727_v41 = vadd.f32 0.2548296, %v4711_v0  ;;  %v4728_v12 = vadd.f32 0.2548296, %v4712_v15  ;;  %v4729_v36 = vadd.f32 0.2548296, %v4713_v51 }
 0xb29   : > { %v4733_v49 = vmul.f32 %v8943_v14, %v4717_v31  ;;  %v4734_v23 = vmul.f32 %v8948_v7, %v4718_v56  ;;  %v4735_v26 = vmul.f32 %v8953_v33, %v4719_v34  ;;  %6481 = vpow2.f32 %v8965_v5  ;;  %v10220_v54 = vld [vmem:[#allocation64_spill] sm:$0xff]  ;;  %v10222_v27 = vld [vmem:[#allocation37_spill] sm:$0xff] }
 0xb2a   : > { %v4792_v29 = vmul.f32 1.442695, %v8929_v10  ;;  %v4736_v22 = vmul.f32 %v8957_v18, %v4720_v63  ;;  %v9077_v46 = vmul.f32 %v8967_v19, %v4721_v28  ;;  %6483 = vpow2.f32 %v8973_v45  ;;  %v10221_v50 = vld [vmem:[#allocation36_spill] sm:$0xff]  ;;  %v10223_v28 = vld [vmem:[#allocation38_spill] sm:$0xff] }
 0xb2b   : > { %v4794_v25 = vmul.f32 1.442695, %v8932_v42  ;;  %v6478_v21 = vpop.eup %6477  ;;  %v9082_v14 = vmul.f32 %v8977_v17, %v4722_v44  ;;  %v9085_v7 = vmul.f32 %v8983_v57, %v4723_v1  ;;  %6485 = vpow2.f32 %v8975_v60 }
 0xb2c   : > { %v4796_v10 = vmul.f32 1.442695, %v8938_v58  ;;  %v6480_v33 = vpop.eup %6479  ;;  %v9090_v18 = vmul.f32 %v8987_v52, %v4724_v20  ;;  %6487 = vpow2.f32 %v8981_v32  ;;  %v4798_v5 = vmul.f32 1.442695, %v8941_v11  ;;  %v10224_v20 = vld [vmem:[#allocation39_spill] sm:$0xff] }
 0xb2d   : > { %v4810_v42 = vmul.f32 %v6476_v39, %v4730_v8  ;;  %6489 = vpow2.f32 %v4792_v29  ;;  %v4800_v19 = vmul.f32 1.442695, %v8961_v47  ;;  %v4811_v45 = vmul.f32 %v6478_v21, %v4731_v4  ;;  %v10226_v29 = vld [vmem:[#allocation41_spill] sm:$0xff] }
 0xb2e   : > { %v4812_v17 = vmul.f32 %v6480_v33, %v4732_v43  ;;  %v9096_v57 = vmul.f32 %v8995_v3, %v4725_v55  ;;  %v9099_v60 = vmul.f32 %v9003_v24, %v4726_v38  ;;  %6491 = vpow2.f32 %v4794_v25 }
 0xb2f   : > { %v4802_v58 = vmul.f32 1.442695, %v8971_v53  ;;  %v9103_v52 = vmul.f32 %v9007_v61, %v4727_v41  ;;  %v9106_v11 = vmul.f32 %v9011_v6, %v4728_v12  ;;  %6493 = vpow2.f32 %v4796_v10  ;;  %v10215_v61 = vld [vmem:[#allocation35_spill] sm:$0xff]  ;;  %v10217_v6 = vld [vmem:[#allocation32_spill] sm:$0xff] }
 0xb30   : > { %v4804_v47 = vmul.f32 1.442695, %v8993_v48  ;;  %6495 = vpow2.f32 %v4798_v5  ;;  %v4806_v32 = vmul.f32 1.442695, %v9001_v16  ;;  %v4826_v3 = vsub.f32 1.0, %v4810_v42  ;;  %v10218_v48 = vld [vmem:[#allocation62_spill] sm:$0xff] }
 0xb31   : > { %v4827_v35 = vsub.f32 1.0, %v4811_v45  ;;  %v9111_v24 = vmul.f32 %v9016_v13, %v4729_v36  ;;  %6497 = vpow2.f32 %v4800_v19  ;;  %v4808_v9 = vmul.f32 1.442695, %v4777_v62  ;;  %v10219_v16 = vld [vmem:[#allocation63_spill] sm:$0xff]  ;;  %v10225_v12 = vld [vmem:[#allocation40_spill] sm:$0xff] }
 0xb32   : > { %v4828_v53 = vsub.f32 1.0, %v4812_v17  ;;  %6499 = vpow2.f32 %v4802_v58  ;;  %vm4842_vm15 = vcmp.lt.f32.partialorder %v10215_v61, 0.0  ;;  %vm4843_vm0 = vcmp.lt.f32.partialorder %v10216_v40, 0.0  ;;  %v10228_v17 = vld [vmem:[#allocation43_spill] sm:$0xff] }
 0xb33   : > { %vm4844_vm3 = vcmp.lt.f32.partialorder %v10217_v6, 0.0  ;;  %v6482_v2 = vpop.eup %6481  ;;  %6501 = vpow2.f32 %v4804_v47  ;;  %vm4845_vm4 = vcmp.lt.f32.partialorder %v10218_v48, 0.0  ;;  %vm4846_vm1 = vcmp.lt.f32.partialorder %v10219_v16, 0.0  ;;  %v10230_v6 = vld [vmem:[#allocation45_spill] sm:$0xff] }
 0xb34   : > { %vm4847_vm2 = vcmp.lt.f32.partialorder %v10220_v54, 0.0  ;;  %v6484_v13 = vpop.eup %6483  ;;  %6503 = vpow2.f32 %v4806_v32  ;;  %v4813_v30 = vmul.f32 %v6482_v2, %v4733_v49  ;;  %vm4848_vm6 = vcmp.lt.f32.partialorder %v10221_v50, 0.0 }
 0xb35   : > { %v4858_v0 = vsub.f32 0.0, %v4826_v3  ;;  %v4859_v15 = vsub.f32 0.0, %v4827_v35  ;;  %v6486_v59 = vpop.eup %6485  ;;  %6505 = vpow2.f32 %v4808_v9  ;;  %v4814_v51 = vmul.f32 %v6484_v13, %v4734_v23 }
 0xb36   : > { %vm4849_vm7 = vcmp.lt.f32.partialorder %v10222_v27, 0.0  ;;  %v4860_v31 = vsub.f32 0.0, %v4828_v53  ;;  %v6488_v56 = vpop.eup %6487  ;;  %v4815_v34 = vmul.f32 %v6486_v59, %v4735_v26  ;;  %v4829_v63 = vsub.f32 1.0, %v4813_v30 }
 0xb37   : > { %vm4850_vm5 = vcmp.lt.f32.partialorder %v10223_v28, 0.0  ;;  %v4874_v37 = vsel %vm4842_vm15, %v4858_v0, %v4826_v3  ;;  %v4875_v62 = vsel %vm4843_vm0, %v4859_v15, %v4827_v35  ;;  %v6490_v39 = vpop.eup %6489  ;;  %v4816_v44 = vmul.f32 %v6488_v56, %v4736_v22  ;;  %v10229_v35 = vld [vmem:[#allocation44_spill] sm:$0xff] }
 0xb38   : > { %v4830_v1 = vsub.f32 1.0, %v4814_v51  ;;  %vm4851_vm8 = vcmp.lt.f32.partialorder %v10224_v20, 0.0  ;;  %v4876_v8 = vsel %vm4844_vm3, %v4860_v31, %v4828_v53  ;;  %v9129_v55 = vadd.f32 1.0, %v4874_v37  ;;  %v6492_v38 = vpop.eup %6491 }
 0xb39   : > { %v4817_v41 = vmul.f32 %v6490_v39, %v9077_v46  ;;  %v4831_v4 = vsub.f32 1.0, %v4815_v34  ;;  %vm4852_vm9 = vcmp.lt.f32.partialorder %v10225_v12, 0.0  ;;  %v4861_v36 = vsub.f32 0.0, %v4829_v63  ;;  %v6494_v49 = vpop.eup %6493  ;;  %v10227_v46 = vld [vmem:[#allocation42_spill] sm:$0xff] }
 0xb3a   : > { %v9133_v43 = vadd.f32 1.0, %v4875_v62  ;;  %v4818_v23 = vmul.f32 %v6492_v38, %v9082_v14  ;;  %v4832_v26 = vsub.f32 1.0, %v4816_v44  ;;  %vm4853_vm10 = vcmp.lt.f32.partialorder %v10226_v29, 0.0  ;;  %v6496_v21 = vpop.eup %6495 }
 0xb3b   : > { %v4862_v22 = vsub.f32 0.0, %v4830_v1  ;;  %v9137_v25 = vadd.f32 1.0, %v4876_v8  ;;  %v4819_v10 = vmul.f32 %v6494_v49, %v9085_v7  ;;  %v4833_v33 = vsub.f32 1.0, %v4817_v41  ;;  %v6498_v19 = vpop.eup %6497 }
 0xb3c   : > { %vm4854_vm11 = vcmp.lt.f32.partialorder %v10227_v46, 0.0  ;;  %v4863_v5 = vsub.f32 0.0, %v4831_v4  ;;  %v4877_v42 = vsel %vm4845_vm4, %v4861_v36, %v4829_v63  ;;  %v4820_v45 = vmul.f32 %v6496_v21, %v9090_v18  ;;  %v6500_v32 = vpop.eup %6499 }
 0xb3d   : > { %v4834_v14 = vsub.f32 1.0, %v4818_v23  ;;  %vm4855_vm12 = vcmp.lt.f32.partialorder %v10228_v17, 0.0  ;;  %v4864_v58 = vsub.f32 0.0, %v4832_v26  ;;  %v4878_v47 = vsel %vm4846_vm1, %v4862_v22, %v4830_v1  ;;  %v6502_v61 = vpop.eup %6501 }
 0xb3e   : > { %v4821_v7 = vmul.f32 %v6498_v19, %v9096_v57  ;;  %v4835_v3 = vsub.f32 1.0, %v4819_v10  ;;  %vm4856_vm13 = vcmp.lt.f32.partialorder %v10229_v35, 0.0  ;;  %v4865_v9 = vsub.f32 0.0, %v4833_v33  ;;  %v6504_v16 = vpop.eup %6503  ;;  %v10233_v19 = vld [vmem:[#allocation18_spill] sm:$0xff] }
 0xb3f   : > { %v4879_v53 = vsel %vm4847_vm2, %v4863_v5, %v4831_v4  ;;  %v4822_v18 = vmul.f32 %v6500_v32, %v9099_v60  ;;  %v4836_v40 = vsub.f32 1.0, %v4820_v45  ;;  %vm4857_vm14 = vcmp.lt.f32.partialorder %v10230_v6, 0.0  ;;  %v6506_v54 = vpop.eup %6505  ;;  %v10232_v5 = vld [vmem:[#allocation24_spill] sm:$0xff]  ;;  %v10236_v32 = vld [vmem:[#allocation33_spill] sm:$0xff]  ;;  %v10241_v6 = vld [vmem:[#allocation19_spill] sm:$0xff] }
 0xb40   : > { %v4866_v2 = vsub.f32 0.0, %v4834_v14  ;;  %v4880_v48 = vsel %vm4848_vm6, %v4864_v58, %v4832_v26  ;;  %v4823_v57 = vmul.f32 %v6502_v61, %v9103_v52  ;;  %v4837_v13 = vsub.f32 1.0, %v4821_v7  ;;  %v10235_v58 = vld [vmem:[#allocation29_spill] sm:$0xff] }
 0xb41   : > { %v4867_v30 = vsub.f32 0.0, %v4835_v3  ;;  %v4881_v0 = vsel %vm4849_vm7, %v4865_v9, %v4833_v33  ;;  %v4824_v15 = vmul.f32 %v6504_v16, %v9106_v11  ;;  %v4838_v59 = vsub.f32 1.0, %v4822_v18  ;;  %v10231_v33 = vld [vmem:[#allocation20_spill] sm:$0xff]  ;;  %v10238_v9 = vld [vmem:[#allocation31_spill] sm:$0xff]  ;;  %v10239_v61 = vld [vmem:[#allocation21_spill] sm:$0xff] }
 0xb42   : > { %v4868_v60 = vsub.f32 0.0, %v4836_v40  ;;  %v4882_v51 = vsel %vm4850_vm5, %v4866_v2, %v4834_v14  ;;  %v4825_v31 = vmul.f32 %v6506_v54, %v9111_v24  ;;  %v4839_v50 = vsub.f32 1.0, %v4823_v57  ;;  %v10234_v14 = vld [vmem:[#allocation22_spill] sm:$0xff]  ;;  %v10246_v54 = vld [vmem:[#allocation48_spill] sm:$0xff] }
 0xb43   : > { %v4869_v56 = vsub.f32 0.0, %v4837_v13  ;;  %v4883_v52 = vsel %vm4851_vm8, %v4867_v30, %v4835_v3  ;;  %v4840_v34 = vsub.f32 1.0, %v4824_v15  ;;  %v4870_v63 = vsub.f32 0.0, %v4838_v59  ;;  %v10237_v3 = vld [vmem:[#allocation27_spill] sm:$0xff]  ;;  %v10243_v16 = vld [vmem:[#allocation30_spill] sm:$0xff] }
 0xb44   : > { %v4884_v27 = vsel %vm4852_vm9, %v4868_v60, %v4836_v40  ;;  %v4893_v37 = vadd.f32 1.0, %v4877_v42  ;;  %v4841_v62 = vsub.f32 1.0, %v4825_v31  ;;  %v4871_v11 = vsub.f32 0.0, %v4839_v50  ;;  %v10240_v40 = vld [vmem:[#allocation25_spill] sm:$0xff]  ;;  %v10244_v57 = vld [vmem:[#allocation46_spill] sm:$0xff]  ;;  %v10245_v30 = vld [vmem:[#allocation47_spill] sm:$0xff] }
 0xb45   : > { %v4885_v39 = vsel %vm4853_vm10, %v4869_v56, %v4837_v13  ;;  %v4894_v28 = vadd.f32 1.0, %v4878_v47  ;;  %v4872_v44 = vsub.f32 0.0, %v4840_v34  ;;  %v4886_v24 = vsel %vm4854_vm11, %v4870_v63, %v4838_v59  ;;  %v10247_v59 = vld [vmem:[#allocation4_spill] sm:$0xff]  ;;  %v10251_v63 = vld [vmem:[#allocation6_spill] sm:$0xff] }
 0xb46   : > { %v4895_v1 = vadd.f32 1.0, %v4879_v53  ;;  %v4896_v8 = vadd.f32 1.0, %v4880_v48  ;;  %v4873_v20 = vsub.f32 0.0, %v4841_v62  ;;  %v4887_v38 = vsel %vm4855_vm12, %v4871_v11, %v4839_v50  ;;  %v10249_v50 = vld [vmem:[#allocation7_spill] sm:$0xff]  ;;  %v10253_v11 = vld [vmem:[#allocation8_spill] sm:$0xff] }
 0xb47   : > { %v4897_v41 = vadd.f32 1.0, %v4881_v0  ;;  %v4898_v4 = vadd.f32 1.0, %v4882_v51  ;;  %v4888_v12 = vsel %vm4856_vm13, %v4872_v44, %v4840_v34  ;;  %v4899_v36 = vadd.f32 1.0, %v4883_v52  ;;  %v10248_v51 = vld [vmem:[#allocation5_spill] sm:$0xff]  ;;  %v4955_v44 = vld [vmem:[#allocation2 + $0xf] sm:$0xff] }
 0xb48   : > { %v4900_v49 = vadd.f32 1.0, %v4884_v27  ;;  %v4901_v23 = vadd.f32 1.0, %v4885_v39  ;;  %v4889_v26 = vsel %vm4857_vm14, %v4873_v20, %v4841_v62  ;;  %v4902_v29 = vadd.f32 1.0, %v4886_v24  ;;  %v10250_v52 = vld [vmem:[#allocation9_spill] sm:$0xff] }
 0xb49   : > { %v4903_v22 = vadd.f32 1.0, %v4887_v38  ;;  %v4904_v21 = vadd.f32 1.0, %v4888_v12  ;;  %v4905_v10 = vadd.f32 1.0, %v4889_v26  ;;  %v4906_v46 = vmul.f32 %v9129_v55, %v10231_v33  ;;  %v10254_v24 = vld [vmem:[#allocation13_spill] sm:$0xff]  ;;  %v10256_v38 = vld [vmem:[#allocation15_spill] sm:$0xff]  ;;  %v10269_v33 = vld [vmem:[#allocation34_spill] sm:$0xff] }
 0xb4a   : > { %v4907_v42 = vmul.f32 %v9133_v43, %v10232_v5  ;;  %v4908_v45 = vmul.f32 %v9137_v25, %v10233_v19  ;;  %v4909_v17 = vmul.f32 %v4893_v37, %v10234_v14  ;;  %v4910_v47 = vmul.f32 %v4894_v28, %v10235_v58  ;;  %v10242_v43 = vld [vmem:[#allocation23_spill] sm:$0xff] }
 0xb4b   : > { %v4911_v7 = vmul.f32 %v4895_v1, %v10236_v32  ;;  %v4912_v35 = vmul.f32 %v4896_v8, %v10237_v3  ;;  %v4913_v53 = vmul.f32 %v4897_v41, %v10238_v9  ;;  %v4914_v18 = vmul.f32 %v4898_v4, %v10239_v61  ;;  %v10252_v37 = vld [vmem:[#allocation11_spill] sm:$0xff]  ;;  %v10255_v8 = vld [vmem:[#allocation10_spill] sm:$0xff]  ;;  %v10257_v4 = vld [vmem:[#allocation12_spill] sm:$0xff] }
 0xb4c   : > { %v4915_v55 = vmul.f32 %v4899_v36, %v10240_v40  ;;  %v4916_v2 = vmul.f32 %v4900_v49, %v10241_v6  ;;  %v4917_v48 = vmul.f32 %v4901_v23, %v10242_v43  ;;  %v4918_v25 = vmul.f32 %v4902_v29, %v10243_v16  ;;  %v4954_v28 = vld [vmem:[#allocation2 + $0x7] sm:$0xff]  ;;  %v10261_v36 = vld [vmem:[#allocation17_spill] sm:$0xff] }
 0xb4d   : > { %v4919_v13 = vmul.f32 %v4903_v22, %v10244_v57  ;;  %v4920_v0 = vmul.f32 %v4904_v21, %v10245_v30  ;;  %v4921_v15 = vmul.f32 %v4905_v10, %v10246_v54  ;;  %v4922_v60 = vmul.f32 %v4906_v46, %v10247_v59  ;;  %v10262_v23 = vld [vmem:[#allocation14_spill] sm:$0xff]  ;;  %v10264_v21 = vld [vmem:[#allocation16_spill] sm:$0xff] }
 0xb4e   : > { %v4923_v31 = vmul.f32 %v4907_v42, %v10248_v51  ;;  %v4924_v56 = vmul.f32 %v4908_v45, %v10249_v50  ;;  %v4925_v34 = vmul.f32 %v4909_v17, %v10250_v52  ;;  %v4926_v27 = vmul.f32 %v4910_v47, %v10251_v63  ;;  %v10263_v29 = vld [vmem:[#allocation26_spill] sm:$0xff]  ;;  %v5051_v42 = vld [vmem:[#allocation2 + $0x9] sm:$0xff] }
 0xb4f   : > { %v4927_v62 = vmul.f32 %v4911_v7, %v10252_v37  ;;  %v4928_v39 = vmul.f32 %v4912_v35, %v10253_v11  ;;  %v4929_v1 = vmul.f32 %v4913_v53, %v10254_v24  ;;  %v4930_v20 = vmul.f32 %v4914_v18, %v10255_v8 }
 0xb50   : > { %v4931_v41 = vmul.f32 %v4915_v55, %v10256_v38  ;;  %v4932_v12 = vmul.f32 %v4916_v2, %v10257_v4  ;;  %vm10258_vm15 = vcmask 64512   ;;  %v4933_v49 = vmul.f32 %v4917_v48, %v10261_v36 }
 0xb51   : > { %4938 = vst.msk [vmem:[#allocation2 + $0x18] sm:$0xff] %vm10258_vm15, %v4922_v60  ;;  %vm10259_vm0 = vmmov %vm10258_vm15  ;;  %v4934_v26 = vmul.f32 %v4918_v25, %v10262_v23  ;;  %v4935_v22 = vmul.f32 %v4919_v13, %v10263_v29  ;;  %v4936_v10 = vmul.f32 %v4920_v0, %v10264_v21  ;;  %v4937_v46 = vmul.f32 %v4921_v15, %v10269_v33 }
 0xb52   : > { %4939 = vst.msk [vmem:[#allocation2 + $0x20] sm:$0xff] %vm10259_vm0, %v4923_v31  ;;  %vm10260_vm3 = vmmov %vm10259_vm0  ;;  %v4970_v5 = vpack.c.bf16 %v4955_v44, %v4954_v28  ;;  %v6304_v28 = vld [vmem:[%s9622_s14] sm:$0xff]  }
 0xb53   : > { %4940 = vst.msk [vmem:[#allocation2 + $0x28] sm:$0xff] %vm10260_vm3, %v4924_v56  ;;  %vm10265_vm4 = vmmov %vm10259_vm0  ;;  %v5019_v18 = vpop.permute.xlu0 %5018  ;;  %6205 = vmatprep.subr.bf16.mxu0 %v6304_v28 }
 0xb54   : > { %4941 = vst.msk [vmem:[#allocation2 + $0x30] sm:$0xff] %vm10265_vm4, %v4925_v34  ;;  %vm10266_vm1 = vmmov %vm10259_vm0  ;;  %6206 = vmatpush3.bf16.msra.mxu0 %v6304_v28  ;;  %v5326_v28 = vld [vmem:[#allocation2 + $0x9f] sm:$0xff] }
 0xb55   : > { %4942 = vst.msk [vmem:[#allocation2 + $0x38] sm:$0xff] %vm10266_vm1, %v4926_v27  ;;  %vm10267_vm2 = vmmov %vm10259_vm0 }
 0xb56   : > { %4943 = vst.msk [vmem:[#allocation2 + $0x40] sm:$0xff] %vm10267_vm2, %v4927_v62  ;;  %vm10268_vm6 = vmmov %vm10259_vm0 }
 0xb57   : > { %4944 = vst.msk [vmem:[#allocation2 + $0x48] sm:$0xff] %vm10268_vm6, %v4928_v39  ;;  %vm10270_vm7 = vmmov %vm10259_vm0 }
 0xb58   : > { %4945 = vst.msk [vmem:[#allocation2 + $0x50] sm:$0xff] %vm10270_vm7, %v4929_v1  ;;  %vm10271_vm5 = vmmov %vm10259_vm0  ;;  %v5052_v19 = vld [vmem:[#allocation2 + $0x11] sm:$0xff]  ;;  %v6305_v1 = vld [vmem:[%s9622_s14 + $0x8] sm:$0xff]  }
 0xb59   : > { %4946 = vst.msk [vmem:[#allocation2 + $0x58] sm:$0xff] %vm10271_vm5, %v4930_v20  ;;  %vm10272_vm8 = vmmov %vm10259_vm0  ;;  %v4988_v45 = vld [vmem:[#allocation2 + $0x18] sm:$0xff]  ;;  %v4989_v14 = vld [vmem:[#allocation2 + $0x20] sm:$0xff]  ;;  %v5067_v17 = vpack.c.bf16 %v5052_v19, %v5051_v42  ;;  %6207 = vmatprep.subr.bf16.mxu0 %v6305_v1 }
 0xb5a   : > { %4947 = vst.msk [vmem:[#allocation2 + $0x60] sm:$0xff] %vm10272_vm8, %v4931_v41  ;;  %vm10273_vm9 = vmmov %vm10259_vm0  ;;  %v5003_v58 = vpack.c.bf16 %v4989_v14, %v4988_v45  ;;  %v5116_v47 = vld [vmem:[#allocation2 + $0x17] sm:$0xff]  ;;  %v5117_v32 = vld [vmem:[#allocation2 + $0x1f] sm:$0xff]  ;;  %6208 = vmatpush3.bf16.msra.mxu0 %v6305_v1  ;;  %vm5575_vm8 = vcmask 1043456  }
 0xb5b   : > { %4948 = vst.msk [vmem:[#allocation2 + $0x68] sm:$0xff] %vm10273_vm9, %v4932_v12  ;;  %vm10274_vm10 = vmmov %vm10259_vm0  ;;  %v5053_v7 = vld [vmem:[#allocation2 + $0x19] sm:$0xff]  ;;  %v5132_v3 = vpack.c.bf16 %v5117_v32, %v5116_v47  ;;  %v5054_v35 = vld [vmem:[#allocation2 + $0x21] sm:$0xff]  ;;  %5083 = vrot.lane.b32.xlu0 %v5067_v17, %s9951_s26  ;;  %vm5107_vm9 = vcmask 195712  }
 0xb5c   : > { %4949 = vst.msk [vmem:[#allocation2 + $0x70] sm:$0xff] %vm10274_vm10, %v4933_v49  ;;  %vm10275_vm11 = vmmov %vm10259_vm0  ;;  %v5118_v9 = vld [vmem:[#allocation2 + $0x27] sm:$0xff]  ;;  %v5119_v53 = vld [vmem:[#allocation2 + $0x2f] sm:$0xff]  ;;  %5020 = vrot.lane.b32.xlu1 %v5003_v58, %s10107_s0  ;;  %v5068_v6 = vpack.c.bf16 %v5054_v35, %v5053_v7  ;;  %vm5172_vm10 = vcmask 261312  }
 0xb5d   : > { %4950 = vst.msk [vmem:[#allocation2 + $0x78] sm:$0xff] %vm10275_vm11, %v4934_v26  ;;  %vm10276_vm12 = vmmov %vm10259_vm0  ;;  %v5133_v61 = vpack.c.bf16 %v5119_v53, %v5118_v9  ;;  %v5313_v40 = vld [vmem:[#allocation2 + $0x37] sm:$0xff]  ;;  %v5314_v55 = vld [vmem:[#allocation2 + $0x3f] sm:$0xff]  ;;  %vm5237_vm11 = vcmask 326912  }
 0xb5e   : > { %4951 = vst.msk [vmem:[#allocation2 + $0x80] sm:$0xff] %vm10276_vm12, %v4935_v22  ;;  %vm10277_vm13 = vmmov %vm10259_vm0  ;;  %v9232_v2 = vpack.c.bf16 %v5314_v55, %v5313_v40  ;;  %v5122_v43 = vld [vmem:[#allocation2 + $0x47] sm:$0xff]  ;;  %v5184_v0 = vld [vmem:[#allocation2 + $0x30] sm:$0xff]  ;;  %vm5302_vm12 = vcmask 392512  }
 0xb5f   : > { %4952 = vst.msk [vmem:[#allocation2 + $0x88] sm:$0xff] %vm10277_vm13, %v4936_v10  ;;  %vm10278_vm14 = vmmov %vm10259_vm0  ;;  %v5123_v48 = vld [vmem:[#allocation2 + $0x4f] sm:$0xff]  ;;  %5148 = vrot.lane.b32.xlu0 %v5132_v3, %s9953_s19  ;;  %v5378_v41 = vld [vmem:[#allocation2 + $0x38] sm:$0xff]  ;;  %vm5367_vm13 = vcmask 458112  }
 0xb60   : > { %4953 = vst.msk [vmem:[#allocation2 + $0x90] sm:$0xff] %vm10278_vm14, %v4937_v46  ;;  %vm10279_vm15 = vmmov %vm10259_vm0  ;;  %vm5042_vm0 = vcmask 130112   ;;  %5085 = vrot.lane.b32.xlu1 %v5068_v6, %s9951_s26  ;;  %v9237_v16 = vpack.c.bf16 %v5123_v48, %v5122_v43  ;;  %v5317_v25 = vld [vmem:[#allocation2 + $0x57] sm:$0xff]  ;;  %v5183_v13 = vld [vmem:[#allocation2 + $0x28] sm:$0xff]  ;;  %vm5432_vm14 = vcmask 523712  }
 0xb61   : > { %4978 = vst.msk [vmem:[#allocation3] sm:$0xff] %vm10279_vm15, %v4970_v5  ;;  %vm10280_vm3 = vmmov %vm10266_vm1  ;;  %v5318_v57 = vld [vmem:[#allocation2 + $0x5f] sm:$0xff]  ;;  %v5198_v34 = vpack.c.bf16 %v5184_v0, %v5183_v13  ;;  %v5248_v62 = vld [vmem:[#allocation2 + $0x29] sm:$0xff]  ;;  %vm5497_vm15 = vcmask 589312  }
 0xb62   : > { %5043 = vst.msk [vmem:[#allocation3] sm:$0xff] %vm5042_vm0, %v5019_v18  ;;  %vm10281_vm4 = vmmov %vm10266_vm1  ;;  %v9241_v30 = vpack.c.bf16 %v5318_v57, %v5317_v25  ;;  %v5126_v54 = vld [vmem:[#allocation2 + $0x67] sm:$0xff]  ;;  %v5249_v39 = vld [vmem:[#allocation2 + $0x31] sm:$0xff] }
 0xb63   : > { %4979 = vst.msk [vmem:[#allocation3 + $0x8] sm:$0xff] %vm10280_vm3, %v5132_v3  ;;  %vm10282_vm2 = vmmov %vm10266_vm1  ;;  %v5127_v15 = vld [vmem:[#allocation2 + $0x6f] sm:$0xff]  ;;  %5213 = vrot.lane.b32.xlu0 %v5003_v58, %s9954_s29  ;;  %v5263_v44 = vpack.c.bf16 %v5249_v39, %v5248_v62  ;;  %v5379_v12 = vld [vmem:[#allocation2 + $0x40] sm:$0xff]  ;;  %v9332_v62 = vpop.permute.xlu1 %5422  ;;  %vm5550_vm3 = vcmask 588800  }
 0xb64   : > { %4980 = vst.msk [vmem:[#allocation3 + $0x10] sm:$0xff] %vm10281_vm4, %v5133_v61  ;;  %5150 = vrot.lane.b32.xlu1 %v5133_v61, %s9953_s19  ;;  %v9247_v60 = vpack.c.bf16 %v5127_v15, %v5126_v54  ;;  %vm10283_vm6 = vmmov %vm10266_vm1  ;;  %v5321_v31 = vld [vmem:[#allocation2 + $0x77] sm:$0xff]  ;;  %v5393_v49 = vpack.c.bf16 %v5379_v12, %v5378_v41  ;;  %v5444_v10 = vld [vmem:[#allocation2 + $0x41] sm:$0xff] }
 0xb65   : > { %4981 = vst.msk [vmem:[#allocation3 + $0x18] sm:$0xff] %vm10266_vm1, %v9232_v2  ;;  %v5322_v56 = vld [vmem:[#allocation2 + $0x7f] sm:$0xff]  ;;  %vm10284_vm7 = vmmov %vm10266_vm1  ;;  %v6306_v20 = vld [vmem:[%s9622_s14 + $0x10] sm:$0xff]  }
 0xb66   : > { %4982 = vst.msk [vmem:[#allocation3 + $0x20] sm:$0xff] %vm10282_vm2, %v9237_v16  ;;  %v9251_v27 = vpack.c.bf16 %v5322_v56, %v5321_v31  ;;  %vm10285_vm5 = vmmov %vm10266_vm1  ;;  %6209 = vmatprep.subr.bf16.mxu0 %v6306_v20  ;;  %v6307_v26 = vld [vmem:[%s9622_s14 + $0x18] sm:$0xff]   ;;  %v6308_v5 = vld [vmem:[%s9622_s14 + $0x20] ss:$0 sps:$4 sm:$0xff]  }
 0xb67   : > { %4983 = vst.msk [vmem:[#allocation3 + $0x28] sm:$0xff] %vm10283_vm6, %v9241_v30  ;;  %5278 = vrot.lane.b32.xlu0 %v5068_v6, %s6529_s18  ;;  %v5443_v22 = vld [vmem:[#allocation2 + $0x39] sm:$0xff]  ;;  %6210 = vmatpush3.bf16.msra.mxu0 %v6306_v20  ;;  %v5577_v42 = vsel %vm5575_vm8, %v6308_v5, 0  ;;  %v5187_v19 = vld [vmem:[#allocation2 + $0x48] sm:$0xff]  ;;  %v5188_v45 = vld [vmem:[#allocation2 + $0x50] sm:$0xff] }
 0xb68   : > { %4984 = vst.msk [vmem:[#allocation3 + $0x30] sm:$0xff] %vm10284_vm7, %v9247_v60  ;;  %5215 = vrot.lane.b32.xlu1 %v5198_v34, %s9954_s29  ;;  %v5458_v46 = vpack.c.bf16 %v5444_v10, %v5443_v22  ;;  %6211 = vmatprep.subr.bf16.mxu0 %v6307_v26  ;;  %v5200_v14 = vpack.c.bf16 %v5188_v45, %v5187_v19  ;;  %v5252_v17 = vld [vmem:[#allocation2 + $0x49] sm:$0xff]  ;;  %v5253_v58 = vld [vmem:[#allocation2 + $0x51] sm:$0xff]  ;;  %v5383_v7 = vld [vmem:[#allocation2 + $0x60] sm:$0xff] }
 0xb69   : > { %4985 = vst.msk [vmem:[#allocation3 + $0x38] sm:$0xff] %vm10285_vm5, %v9251_v27  ;;  %v5265_v47 = vpack.c.bf16 %v5253_v58, %v5252_v17  ;;  %v5382_v32 = vld [vmem:[#allocation2 + $0x58] sm:$0xff]  ;;  %v5448_v9 = vld [vmem:[#allocation2 + $0x61] sm:$0xff]  ;;  %v5192_v18 = vld [vmem:[#allocation2 + $0x70] sm:$0xff] }
 0xb6a   : > { %v5395_v3 = vpack.c.bf16 %v5383_v7, %v5382_v32  ;;  %v5447_v35 = vld [vmem:[#allocation2 + $0x59] sm:$0xff]  ;;  %v5256_v55 = vld [vmem:[#allocation2 + $0x69] sm:$0xff]  ;;  %v5257_v6 = vld [vmem:[#allocation2 + $0x71] sm:$0xff] }
 0xb6b   : > { %5343 = vrot.lane.b32.xlu0 %v5133_v61, %s6530_s23  ;;  %6212 = vmatpush3.bf16.msra.mxu0 %v6307_v26  ;;  %v5460_v53 = vpack.c.bf16 %v5448_v9, %v5447_v35  ;;  %v5191_v61 = vld [vmem:[#allocation2 + $0x68] sm:$0xff]  ;;  %v5386_v43 = vld [vmem:[#allocation2 + $0x78] sm:$0xff]  ;;  %v5387_v48 = vld [vmem:[#allocation2 + $0x80] sm:$0xff] }
 0xb6c   : > { %5280 = vrot.lane.b32.xlu1 %v5263_v44, %s6529_s18  ;;  %6236 = vmatprep.subr.msk.bf16.mxu0 %vm5575_vm8, %v6308_v5  ;;  %v5202_v40 = vpack.c.bf16 %v5192_v18, %v5191_v61  ;;  %v5451_v25 = vld [vmem:[#allocation2 + $0x79] sm:$0xff]  ;;  %v5452_v57 = vld [vmem:[#allocation2 + $0x81] sm:$0xff]  ;;  %v5131_v0 = vld [vmem:[#allocation2 + $0x8f] sm:$0xff] }
 0xb6d   : > { %v5462_v13 = vpack.c.bf16 %v5452_v57, %v5451_v25  ;;  %v5195_v15 = vld [vmem:[#allocation2 + $0x88] sm:$0xff] }
 0xb6e   : > { %v5260_v56 = vld [vmem:[#allocation2 + $0x89] sm:$0xff]  ;;  %v5456_v1 = vld [vmem:[#allocation2 + $0xa1] sm:$0xff] }
 0xb6f   : > { %5408 = vrot.lane.b32.xlu0 %v5198_v34, %s6528_s30  ;;  %6214 = vmatpush3.bf16.msra.mxu0 %v5577_v42 }
 0xb70   : > { %5345 = vrot.lane.b32.xlu1 %v9232_v2, %s6530_s23 }
 0xb73   : > { %5473 = vrot.lane.b32.xlu0 %v5263_v44, %s6531_s2 }
 0xb74   : > { %5410 = vrot.lane.b32.xlu1 %v5393_v49, %s6528_s30 }
 0xb77   : > { %5475 = vrot.lane.b32.xlu0 %v5458_v46, %s6531_s2 }
 0xb78   : > { %5022 = vrot.lane.b32.xlu1 %v5198_v34, %s10107_s0  ;;  %v5261_v34 = vld [vmem:[#allocation2 + $0x91] sm:$0xff] }
 0xb79   : > { %v5269_v39 = vpack.c.bf16 %v5261_v34, %v5260_v56 }
 0xb7b   : > { %5087 = vrot.lane.b32.xlu0 %v5263_v44, %s9951_s26  ;;  %v5455_v44 = vld [vmem:[#allocation2 + $0x99] sm:$0xff] }
 0xb7c   : > { %5024 = vrot.lane.b32.xlu1 %v5393_v49, %s10107_s0 }
 0xb7f   : > { %5152 = vrot.lane.b32.xlu0 %v9232_v2, %s9953_s19  ;;  %v5267_v2 = vpack.c.bf16 %v5257_v6, %v5256_v55 }
 0xb80   : > { %5089 = vrot.lane.b32.xlu1 %v5458_v46, %s9951_s26 }
 0xb83   : > { %5217 = vrot.lane.b32.xlu0 %v5393_v49, %s9954_s29  ;;  %v5464_v49 = vpack.c.bf16 %v5456_v1, %v5455_v44 }
 0xb84   : > { %5154 = vrot.lane.b32.xlu1 %v9237_v16, %s9953_s19 }
 0xb87   : > { %5282 = vrot.lane.b32.xlu0 %v5458_v46, %s6529_s18 }
 0xb88   : > { %5219 = vrot.lane.b32.xlu1 %v5200_v14, %s9954_s29 }
 0xb8b   : > { %5347 = vrot.lane.b32.xlu0 %v9237_v16, %s6530_s23  ;;  %v5397_v16 = vpack.c.bf16 %v5387_v48, %v5386_v43 }
 0xb8c   : > { %5284 = vrot.lane.b32.xlu1 %v5265_v47, %s6529_s18 }
 0xb8f   : > { %5412 = vrot.lane.b32.xlu0 %v5200_v14, %s6528_s30 }
 0xb90   : > { %5349 = vrot.lane.b32.xlu1 %v9241_v30, %s6530_s23 }
 0xb93   : > { %5477 = vrot.lane.b32.xlu0 %v5265_v47, %s6531_s2 }
 0xb94   : > { %5414 = vrot.lane.b32.xlu1 %v5395_v3, %s6528_s30 }
 0xb97   : > { %5479 = vrot.lane.b32.xlu0 %v5460_v53, %s6531_s2 }
 0xb98   : > { %5026 = vrot.lane.b32.xlu1 %v5200_v14, %s10107_s0 }
 0xb9b   : > { %5091 = vrot.lane.b32.xlu0 %v5265_v47, %s9951_s26 }
 0xb9c   : > { %5028 = vrot.lane.b32.xlu1 %v5395_v3, %s10107_s0 }
 0xb9f   : > { %5156 = vrot.lane.b32.xlu0 %v9241_v30, %s9953_s19  ;;  %v5130_v30 = vld [vmem:[#allocation2 + $0x87] sm:$0xff] }
 0xba0   : > { %5093 = vrot.lane.b32.xlu1 %v5460_v53, %s9951_s26  ;;  %v5139_v54 = vpack.c.bf16 %v5131_v0, %v5130_v30 }
 0xba3   : > { %5221 = vrot.lane.b32.xlu0 %v5395_v3, %s9954_s29 }
 0xba4   : > { %5158 = vrot.lane.b32.xlu1 %v9247_v60, %s9953_s19 }
 0xba7   : > { %5286 = vrot.lane.b32.xlu0 %v5460_v53, %s6529_s18 }
 0xba8   : > { %5223 = vrot.lane.b32.xlu1 %v5202_v40, %s9954_s29 }
 0xbab   : > { %5351 = vrot.lane.b32.xlu0 %v9247_v60, %s6530_s23  ;;  %v5196_v60 = vld [vmem:[#allocation2 + $0x90] sm:$0xff] }
 0xbac   : > { %5288 = vrot.lane.b32.xlu1 %v5267_v2, %s6529_s18  ;;  %v5204_v31 = vpack.c.bf16 %v5196_v60, %v5195_v15 }
 0xbaf   : > { %5416 = vrot.lane.b32.xlu0 %v5202_v40, %s6528_s30 }
 0xbb0   : > { %5353 = vrot.lane.b32.xlu1 %v9251_v27, %s6530_s23 }
 0xbb3   : > { %5481 = vrot.lane.b32.xlu0 %v5267_v2, %s6531_s2 }
 0xbb4   : > { %5418 = vrot.lane.b32.xlu1 %v5397_v16, %s6528_s30 }
 0xbb7   : > { %5483 = vrot.lane.b32.xlu0 %v5462_v13, %s6531_s2 }
 0xbb8   : > { %5030 = vrot.lane.b32.xlu1 %v5202_v40, %s10107_s0 }
 0xbbb   : > { %5095 = vrot.lane.b32.xlu0 %v5267_v2, %s9951_s26 }
 0xbbc   : > { %5032 = vrot.lane.b32.xlu1 %v5397_v16, %s10107_s0 }
 0xbbf   : > { %5160 = vrot.lane.b32.xlu0 %v9251_v27, %s9953_s19  ;;  %v5325_v27 = vld [vmem:[#allocation2 + $0x97] sm:$0xff] }
 0xbc0   : > { %5097 = vrot.lane.b32.xlu1 %v5462_v13, %s9951_s26  ;;  %v5334_v12 = vpack.c.bf16 %v5326_v28, %v5325_v27 }
 0xbc3   : > { %5225 = vrot.lane.b32.xlu0 %v5397_v16, %s9954_s29 }
 0xbc4   : > { %5162 = vrot.lane.b32.xlu1 %v5139_v54, %s9953_s19 }
 0xbc7   : > { %5290 = vrot.lane.b32.xlu0 %v5462_v13, %s6529_s18 }
 0xbc8   : > { %5227 = vrot.lane.b32.xlu1 %v5204_v31, %s9954_s29 }
 0xbcb   : > { %5355 = vrot.lane.b32.xlu0 %v5139_v54, %s6530_s23 }
 0xbcc   : > { %5292 = vrot.lane.b32.xlu1 %v5269_v39, %s6529_s18 }
 0xbcd   : > { %v5084_v41 = vpop.permute.xlu0 %5083 }
 0xbce   : > { %v5021_v20 = vpop.permute.xlu1 %5020  ;;  %5108 = vst.msk [vmem:[#allocation3] sm:$0xff] %vm5107_vm9, %v5084_v41 }
 0xbcf   : > { %5044 = vst.msk [vmem:[#allocation3 + $0x8] sm:$0xff] %vm5042_vm0, %v5021_v20  ;;  %5420 = vrot.lane.b32.xlu0 %v5204_v31, %s6528_s30 }
 0xbd0   : > { %5357 = vrot.lane.b32.xlu1 %v5334_v12, %s6530_s23 }
 0xbd1   : > { %v5149_v22 = vpop.permute.xlu0 %5148 }
 0xbd2   : > { %v5086_v26 = vpop.permute.xlu1 %5085  ;;  %5173 = vst.msk [vmem:[#allocation3] sm:$0xff] %vm5172_vm10, %v5149_v22 }
 0xbd3   : > { %5109 = vst.msk [vmem:[#allocation3 + $0x8] sm:$0xff] %vm5107_vm9, %v5086_v26  ;;  %5485 = vrot.lane.b32.xlu0 %v5269_v39, %s6531_s2 }
 0xbd4   : > { %5487 = vrot.lane.b32.xlu1 %v5464_v49, %s6531_s2 }
 0xbd5   : > { %v5214_v46 = vpop.permute.xlu0 %5213 }
 0xbd6   : > { %v5151_v10 = vpop.permute.xlu1 %5150  ;;  %5238 = vst.msk [vmem:[#allocation3] sm:$0xff] %vm5237_vm11, %v5214_v46 }
 0xbd7   : > { %5174 = vst.msk [vmem:[#allocation3 + $0x8] sm:$0xff] %vm5172_vm10, %v5151_v10 }
 0xbd9   : > { %v5279_v42 = vpop.permute.xlu0 %5278 }
 0xbda   : > { %v5216_v5 = vpop.permute.xlu1 %5215  ;;  %5303 = vst.msk [vmem:[#allocation3] sm:$0xff] %vm5302_vm12, %v5279_v42 }
 0xbdb   : > { %5239 = vst.msk [vmem:[#allocation3 + $0x8] sm:$0xff] %vm5237_vm11, %v5216_v5 }
 0xbdd   : > { %v5344_v45 = vpop.permute.xlu0 %5343 }
 0xbde   : > { %v5281_v19 = vpop.permute.xlu1 %5280  ;;  %5368 = vst.msk [vmem:[#allocation3] sm:$0xff] %vm5367_vm13, %v5344_v45 }
 0xbdf   : > { %5304 = vst.msk [vmem:[#allocation3 + $0x8] sm:$0xff] %vm5302_vm12, %v5281_v19 }
 0xbe1   : > { %v5409_v17 = vpop.permute.xlu0 %5408 }
 0xbe2   : > { %v5346_v14 = vpop.permute.xlu1 %5345  ;;  %5433 = vst.msk [vmem:[#allocation3] sm:$0xff] %vm5432_vm14, %v5409_v17 }
 0xbe3   : > { %5369 = vst.msk [vmem:[#allocation3 + $0x8] sm:$0xff] %vm5367_vm13, %v5346_v14 }
 0xbe5   : > { %v5474_v47 = vpop.permute.xlu0 %5473 }
 0xbe6   : > { %v5411_v58 = vpop.permute.xlu1 %5410  ;;  %5498 = vst.msk [vmem:[#allocation3] sm:$0xff] %vm5497_vm15, %v5474_v47 }
 0xbe7   : > { %5434 = vst.msk [vmem:[#allocation3 + $0x8] sm:$0xff] %vm5432_vm14, %v5411_v58 }
 0xbe9   : > { %v5476_v7 = vpop.permute.xlu0 %5475 }
 0xbea   : > { %v5023_v32 = vpop.permute.xlu1 %5022  ;;  %5499 = vst.msk [vmem:[#allocation3 + $0x8] sm:$0xff] %vm5497_vm15, %v5476_v7 }
 0xbeb   : > { %5045 = vst.msk [vmem:[#allocation3 + $0x10] sm:$0xff] %vm5042_vm0, %v5023_v32 }
 0xbed   : > { %v5088_v35 = vpop.permute.xlu0 %5087  ;;  %v5506_v9 = vld [vmem:[#allocation3] sm:$0xff] }
 0xbee   : > { %v5025_v3 = vpop.permute.xlu1 %5024  ;;  %5110 = vst.msk [vmem:[#allocation3 + $0x10] sm:$0xff] %vm5107_vm9, %v5088_v35  ;;  %6215 = vmatprep.mubr.msk.bf16.mxu0 %vm5550_vm3, %v5506_v9 }
 0xbef   : > { %5046 = vst.msk [vmem:[#allocation3 + $0x18] sm:$0xff] %vm5042_vm0, %v5025_v3 }
 0xbf1   : > { %v5153_v61 = vpop.permute.xlu0 %5152  ;;  %v5507_v18 = vld [vmem:[#allocation3 + $0x8] sm:$0xff] }
 0xbf2   : > { %v5090_v53 = vpop.permute.xlu1 %5089  ;;  %5175 = vst.msk [vmem:[#allocation3 + $0x10] sm:$0xff] %vm5172_vm10, %v5153_v61  ;;  %6216 = vmatmul.mubr.msk.bf16.vlgmr.msra.gmra.mrb[24].mxu0 %vm5550_vm3, %v5507_v18 }
 0xbf3   : > { %5111 = vst.msk [vmem:[#allocation3 + $0x18] sm:$0xff] %vm5107_vm9, %v5090_v53 }
 0xbf5   : > { %v5218_v55 = vpop.permute.xlu0 %5217 }
 0xbf6   : > { %v5155_v40 = vpop.permute.xlu1 %5154  ;;  %5240 = vst.msk [vmem:[#allocation3 + $0x10] sm:$0xff] %vm5237_vm11, %v5218_v55 }
 0xbf7   : > { %5176 = vst.msk [vmem:[#allocation3 + $0x18] sm:$0xff] %vm5172_vm10, %v5155_v40 }
 0xbf9   : > { %v5283_v2 = vpop.permute.xlu0 %5282 }
 0xbfa   : > { %v5220_v6 = vpop.permute.xlu1 %5219  ;;  %5305 = vst.msk [vmem:[#allocation3 + $0x10] sm:$0xff] %vm5302_vm12, %v5283_v2 }
 0xbfb   : > { %5241 = vst.msk [vmem:[#allocation3 + $0x18] sm:$0xff] %vm5237_vm11, %v5220_v6 }
 0xbfd   : > { %v5348_v48 = vpop.permute.xlu0 %5347 }
 0xbfe   : > { %v5285_v43 = vpop.permute.xlu1 %5284  ;;  %5370 = vst.msk [vmem:[#allocation3 + $0x10] sm:$0xff] %vm5367_vm13, %v5348_v48 }
 0xbff   : > { %5306 = vst.msk [vmem:[#allocation3 + $0x18] sm:$0xff] %vm5302_vm12, %v5285_v43 }
 0xc01   : > { %v5413_v25 = vpop.permute.xlu0 %5412 }
 0xc02   : > { %v5350_v16 = vpop.permute.xlu1 %5349  ;;  %5435 = vst.msk [vmem:[#allocation3 + $0x10] sm:$0xff] %vm5432_vm14, %v5413_v25 }
 0xc03   : > { %5371 = vst.msk [vmem:[#allocation3 + $0x18] sm:$0xff] %vm5367_vm13, %v5350_v16 }
 0xc05   : > { %v5478_v13 = vpop.permute.xlu0 %5477 }
 0xc06   : > { %v5415_v57 = vpop.permute.xlu1 %5414  ;;  %5500 = vst.msk [vmem:[#allocation3 + $0x10] sm:$0xff] %vm5497_vm15, %v5478_v13 }
 0xc07   : > { %5436 = vst.msk [vmem:[#allocation3 + $0x18] sm:$0xff] %vm5432_vm14, %v5415_v57 }
 0xc09   : > { %v5480_v0 = vpop.permute.xlu0 %5479 }
 0xc0a   : > { %v5027_v30 = vpop.permute.xlu1 %5026  ;;  %5501 = vst.msk [vmem:[#allocation3 + $0x18] sm:$0xff] %vm5497_vm15, %v5480_v0 }
 0xc0b   : > { %5047 = vst.msk [vmem:[#allocation3 + $0x20] sm:$0xff] %vm5042_vm0, %v5027_v30 }
 0xc0d   : > { %v5092_v15 = vpop.permute.xlu0 %5091  ;;  %v5508_v60 = vld [vmem:[#allocation3 + $0x10] sm:$0xff] }
 0xc0e   : > { %v5029_v54 = vpop.permute.xlu1 %5028  ;;  %5112 = vst.msk [vmem:[#allocation3 + $0x20] sm:$0xff] %vm5107_vm9, %v5092_v15  ;;  %6219 = vmatprep.mubr.msk.bf16.mxu0 %vm5550_vm3, %v5508_v60 }
 0xc0f   : > { %5048 = vst.msk [vmem:[#allocation3 + $0x28] sm:$0xff] %vm5042_vm0, %v5029_v54 }
 0xc11   : > { %v5157_v56 = vpop.permute.xlu0 %5156  ;;  %v5509_v34 = vld [vmem:[#allocation3 + $0x18] sm:$0xff] }
 0xc12   : > { %v5094_v31 = vpop.permute.xlu1 %5093  ;;  %5177 = vst.msk [vmem:[#allocation3 + $0x20] sm:$0xff] %vm5172_vm10, %v5157_v56  ;;  %6220 = vmatmul.mubr.msk.bf16.gmra.mrb[28].mxu0 %vm5550_vm3, %v5509_v34 }
 0xc13   : > { %5113 = vst.msk [vmem:[#allocation3 + $0x28] sm:$0xff] %vm5107_vm9, %v5094_v31 }
 0xc15   : > { %v5222_v27 = vpop.permute.xlu0 %5221 }
 0xc16   : > { %v5159_v39 = vpop.permute.xlu1 %5158  ;;  %5242 = vst.msk [vmem:[#allocation3 + $0x20] sm:$0xff] %vm5237_vm11, %v5222_v27 }
 0xc17   : > { %5178 = vst.msk [vmem:[#allocation3 + $0x28] sm:$0xff] %vm5172_vm10, %v5159_v39 }
 0xc19   : > { %v5287_v44 = vpop.permute.xlu0 %5286 }
 0xc1a   : > { %v5224_v28 = vpop.permute.xlu1 %5223  ;;  %5307 = vst.msk [vmem:[#allocation3 + $0x20] sm:$0xff] %vm5302_vm12, %v5287_v44 }
 0xc1b   : > { %5243 = vst.msk [vmem:[#allocation3 + $0x28] sm:$0xff] %vm5237_vm11, %v5224_v28 }
 0xc1d   : > { %v5352_v20 = vpop.permute.xlu0 %5351 }
 0xc1e   : > { %v5289_v1 = vpop.permute.xlu1 %5288  ;;  %5372 = vst.msk [vmem:[#allocation3 + $0x20] sm:$0xff] %vm5367_vm13, %v5352_v20 }
 0xc1f   : > { %5308 = vst.msk [vmem:[#allocation3 + $0x28] sm:$0xff] %vm5302_vm12, %v5289_v1 }
 0xc21   : > { %v5417_v12 = vpop.permute.xlu0 %5416 }
 0xc22   : > { %v5354_v41 = vpop.permute.xlu1 %5353  ;;  %5437 = vst.msk [vmem:[#allocation3 + $0x20] sm:$0xff] %vm5432_vm14, %v5417_v12 }
 0xc23   : > { %5373 = vst.msk [vmem:[#allocation3 + $0x28] sm:$0xff] %vm5367_vm13, %v5354_v41 }
 0xc25   : > { %v5482_v26 = vpop.permute.xlu0 %5481 }
 0xc26   : > { %v5419_v49 = vpop.permute.xlu1 %5418  ;;  %5502 = vst.msk [vmem:[#allocation3 + $0x20] sm:$0xff] %vm5497_vm15, %v5482_v26 }
 0xc27   : > { %5438 = vst.msk [vmem:[#allocation3 + $0x28] sm:$0xff] %vm5432_vm14, %v5419_v49 }
 0xc29   : > { %v5484_v10 = vpop.permute.xlu0 %5483 }
 0xc2a   : > { %v5031_v22 = vpop.permute.xlu1 %5030  ;;  %5503 = vst.msk [vmem:[#allocation3 + $0x28] sm:$0xff] %vm5497_vm15, %v5484_v10 }
 0xc2b   : > { %5049 = vst.msk [vmem:[#allocation3 + $0x30] sm:$0xff] %vm5042_vm0, %v5031_v22 }
 0xc2d   : > { %v5096_v5 = vpop.permute.xlu0 %5095  ;;  %v5510_v42 = vld [vmem:[#allocation3 + $0x20] sm:$0xff] }
 0xc2e   : > { %v5033_v46 = vpop.permute.xlu1 %5032  ;;  %5114 = vst.msk [vmem:[#allocation3 + $0x30] sm:$0xff] %vm5107_vm9, %v5096_v5  ;;  %6223 = vmatprep.mubr.msk.bf16.mxu0 %vm5550_vm3, %v5510_v42 }
 0xc2f   : > { %5050 = vst.msk [vmem:[#allocation3 + $0x38] sm:$0xff] %vm5042_vm0, %v5033_v46  ;;  %vm10286_vm0 = vmmov %vm10266_vm1 }
 0xc30   : > { %vm10287_vm4 = vmmov %vm10286_vm0 }
 0xc31   : > { %v5161_v45 = vpop.permute.xlu0 %5160  ;;  %v5511_v14 = vld [vmem:[#allocation3 + $0x28] sm:$0xff]  ;;  %vm10288_vm1 = vmmov %vm10286_vm0 }
 0xc32   : > { %v5098_v19 = vpop.permute.xlu1 %5097  ;;  %5179 = vst.msk [vmem:[#allocation3 + $0x30] sm:$0xff] %vm5172_vm10, %v5161_v45  ;;  %6224 = vmatmul.mubr.msk.bf16.gmra.mrb[32].mxu0 %vm5550_vm3, %v5511_v14  ;;  %vm10289_vm2 = vmmov %vm10286_vm0 }
 0xc33   : > { %5115 = vst.msk [vmem:[#allocation3 + $0x38] sm:$0xff] %vm5107_vm9, %v5098_v19  ;;  %vm10290_vm6 = vmmov %vm10286_vm0 }
 0xc34   : > { %vm10291_vm7 = vmmov %vm10286_vm0 }
 0xc35   : > { %v5226_v58 = vpop.permute.xlu0 %5225  ;;  %vm10292_vm5 = vmmov %vm10286_vm0 }
 0xc36   : > { %v5163_v17 = vpop.permute.xlu1 %5162  ;;  %5244 = vst.msk [vmem:[#allocation3 + $0x30] sm:$0xff] %vm5237_vm11, %v5226_v58  ;;  %vm10293_vm8 = vmmov %vm10286_vm0 }
 0xc37   : > { %5180 = vst.msk [vmem:[#allocation3 + $0x38] sm:$0xff] %vm5172_vm10, %v5163_v17  ;;  %vm10294_vm9 = vmmov %vm10286_vm0 }
 0xc38   : > { %vm10295_vm10 = vmmov %vm10286_vm0 }
 0xc39   : > { %v5291_v32 = vpop.permute.xlu0 %5290 }
 0xc3a   : > { %v5228_v47 = vpop.permute.xlu1 %5227  ;;  %5309 = vst.msk [vmem:[#allocation3 + $0x30] sm:$0xff] %vm5302_vm12, %v5291_v32 }
 0xc3b   : > { %5245 = vst.msk [vmem:[#allocation3 + $0x38] sm:$0xff] %vm5237_vm11, %v5228_v47  ;;  %vm10296_vm11 = vmmov %vm10286_vm0 }
 0xc3d   : > { %v5356_v3 = vpop.permute.xlu0 %5355 }
 0xc3e   : > { %v5293_v7 = vpop.permute.xlu1 %5292  ;;  %5374 = vst.msk [vmem:[#allocation3 + $0x30] sm:$0xff] %vm5367_vm13, %v5356_v3 }
 0xc3f   : > { %5310 = vst.msk [vmem:[#allocation3 + $0x38] sm:$0xff] %vm5302_vm12, %v5293_v7  ;;  %vm10297_vm12 = vmmov %vm10286_vm0 }
 0xc41   : > { %v5421_v9 = vpop.permute.xlu0 %5420 }
 0xc42   : > { %v5358_v35 = vpop.permute.xlu1 %5357  ;;  %5439 = vst.msk [vmem:[#allocation3 + $0x30] sm:$0xff] %vm5432_vm14, %v5421_v9 }
 0xc43   : > { %5375 = vst.msk [vmem:[#allocation3 + $0x38] sm:$0xff] %vm5367_vm13, %v5358_v35  ;;  %vm10298_vm13 = vmmov %vm10286_vm0 }
 0xc44   : > { %5440 = vst.msk [vmem:[#allocation3 + $0x38] sm:$0xff] %vm5432_vm14, %v9332_v62  ;;  %vm10299_vm14 = vmmov %vm10286_vm0 }
 0xc45   : > { %v5486_v53 = vpop.permute.xlu0 %5485 }
 0xc46   : > { %v5488_v61 = vpop.permute.xlu1 %5487  ;;  %5504 = vst.msk [vmem:[#allocation3 + $0x30] sm:$0xff] %vm5497_vm15, %v5486_v53 }
 0xc47   : > { %5505 = vst.msk [vmem:[#allocation3 + $0x38] sm:$0xff] %vm5497_vm15, %v5488_v61  ;;  %vm10300_vm15 = vmmov %vm10286_vm0 }
 0xc4d   : > { %v5512_v18 = vld [vmem:[#allocation3 + $0x30] sm:$0xff] }
 0xc4e   : > { %v5513_v40 = vld [vmem:[#allocation3 + $0x38] sm:$0xff]  ;;  %6227 = vmatprep.mubr.msk.bf16.mxu0 %vm5550_vm3, %v5512_v18 }
 0xc4f   : > { %6228 = vmatmul.mubr.msk.bf16.gmra.mrb[36].mxu0 %vm5550_vm3, %v5513_v40  ;;  %vm10301_vm3 = vmmov %vm10286_vm0 }
 0xcc5   : > { %v6217_v55 = vpop.f32.mrb[24].mxu0 }
 0xcc6   : > { %v5613_v6 = vpop.f32.mrb[25].mxu0  ;;  %v9421_v0 = vmul.f32 %v6217_v55, %v10249_v50 }
 0xcc7   : > { %v6218_v2 = vpop.f32.mrb[26].mxu0  ;;  %v9416_v13 = vmul.f32 %v5613_v6, %v10247_v59 }
 0xcc8   : > { %v5616_v43 = vpop.f32.mrb[27].mxu0  ;;  %v5736_v59 = vmul.f32 %v9421_v0, %v9421_v0  ;;  %v9434_v50 = vmul.f32 %v6218_v2, %v10250_v52  ;;  %v5697_v27 = vsel %vm10290_vm6, %v9421_v0, 0.0  ;;  %vm10305_vm6 = vmmov %vm10286_vm0 }
 0xcc9   : > { %v9413_v57 = vmul.f32 %v5616_v43, %v10248_v51  ;;  %v5734_v54 = vmul.f32 %v9416_v13, %v9416_v13  ;;  %v5694_v60 = vsel %vm10287_vm4, %v9416_v13, 0.0  ;;  %vm10302_vm4 = vmmov %vm10286_vm0 }
 0xcca   : > { %v5753_v1 = vsel %vm10291_vm7, %v5736_v59, 0.0  ;;  %v5737_v20 = vmul.f32 %v9434_v50, %v9434_v50  ;;  %v5699_v26 = vsel %vm10292_vm5, %v9434_v50, 0.0  ;;  %vm10306_vm7 = vmmov %vm10286_vm0 }
 0xccb   : > { %v5735_v30 = vmul.f32 %v9413_v57, %v9413_v57  ;;  %v5695_v15 = vsel %vm10286_vm0, %v9413_v57, 0.0  ;;  %v5750_v56 = vsel %vm10289_vm2, %v5734_v54, 0.0  ;;  %vm10304_vm2 = vmmov %vm10286_vm0 }
 0xccc   : > { %v5696_v31 = vadd.f32 %v5695_v15, %v5694_v60  ;;  %v5755_v5 = vsel %vm10294_vm9, %v5737_v20, 0.0  ;;  %vm10307_vm5 = vmmov %vm10286_vm0 }
 0xccd   : > { %v5751_v51 = vsel %vm10288_vm1, %v5735_v30, 0.0  ;;  %vm10303_vm1 = vmmov %vm10286_vm0 }
 0xcce   : > { %v5752_v39 = vadd.f32 %v5751_v51, %v5750_v56  ;;  %v5698_v28 = vadd.f32 %v5697_v27, %v5696_v31  ;;  %vm10309_vm9 = vmmov %vm10286_vm0 }
 0xcd0   : > { %v5700_v46 = vadd.f32 %v5699_v26, %v5698_v28 }
 0xce5   : > { %v6221_v48 = vpop.f32.mrb[28].mxu0 }
 0xce6   : > { %v5629_v16 = vpop.f32.mrb[29].mxu0  ;;  %v9458_v14 = vmul.f32 %v6221_v48, %v10253_v11 }
 0xce7   : > { %v6222_v25 = vpop.f32.mrb[30].mxu0  ;;  %v9437_v34 = vmul.f32 %v5629_v16, %v10251_v63  ;;  %v5754_v63 = vadd.f32 %v5753_v1, %v5752_v39 }
 0xce8   : > { %v5632_v62 = vpop.f32.mrb[31].mxu0  ;;  %v5740_v7 = vmul.f32 %v9458_v14, %v9458_v14  ;;  %v9466_v3 = vmul.f32 %v6222_v25, %v10254_v24  ;;  %v5705_v11 = vsel %vm10298_vm13, %v9458_v14, 0.0  ;;  %vm10313_vm13 = vmmov %vm10286_vm0 }
 0xce9   : > { %v5738_v41 = vmul.f32 %v9437_v34, %v9437_v34  ;;  %v9447_v52 = vmul.f32 %v5632_v62, %v10252_v37  ;;  %v5701_v22 = vsel %vm10293_vm8, %v9437_v34, 0.0  ;;  %v5756_v45 = vadd.f32 %v5755_v5, %v5754_v63  ;;  %vm10308_vm8 = vmmov %vm10286_vm0 }
 0xcea   : > { %v5702_v37 = vadd.f32 %v5701_v22, %v5700_v46  ;;  %v5761_v61 = vsel %vm10299_vm14, %v5740_v7, 0.0  ;;  %v5741_v18 = vmul.f32 %v9466_v3, %v9466_v3  ;;  %vm10314_vm14 = vmmov %vm10286_vm0 }
 0xceb   : > { %v5757_v42 = vsel %vm10295_vm10, %v5738_v41, 0.0  ;;  %v5739_v19 = vmul.f32 %v9447_v52, %v9447_v52  ;;  %v5703_v17 = vsel %vm10296_vm11, %v9447_v52, 0.0  ;;  %vm10310_vm10 = vmmov %vm10286_vm0 }
 0xcec   : > { %v5758_v58 = vadd.f32 %v5757_v42, %v5756_v45  ;;  %v5704_v32 = vadd.f32 %v5703_v17, %v5702_v37  ;;  %v5763_v43 = vsel %vm10286_vm0, %v5741_v18, 0.0  ;;  %vm10311_vm11 = vmmov %vm10286_vm0 }
 0xced   : > { %v5759_v47 = vsel %vm10297_vm12, %v5739_v19, 0.0  ;;  %vm10312_vm12 = vmmov %vm10286_vm0 }
 0xcee   : > { %v5760_v9 = vadd.f32 %v5759_v47, %v5758_v58  ;;  %v5706_v53 = vadd.f32 %v5705_v11, %v5704_v32 }
 0xcf0   : > { %v5762_v24 = vadd.f32 %v5761_v61, %v5760_v9 }
 0xcf2   : > { %v5764_v62 = vadd.f32 %v5763_v43, %v5762_v24 }
 0xd05   : > { %v6225_v44 = vpop.f32.mrb[32].mxu0 }
 0xd06   : > { %v5645_v12 = vpop.f32.mrb[33].mxu0 }
 0xd07   : > { %v6226_v49 = vpop.f32.mrb[34].mxu0  ;;  %v9469_v35 = vmul.f32 %v5645_v12, %v10255_v8  ;;  %v5707_v8 = vsel %vm10300_vm15, %v9466_v3, 0.0  ;;  %vm10315_vm15 = vmmov %vm10286_vm0 }
 0xd08   : > { %v5648_v10 = vpop.f32.mrb[35].mxu0  ;;  %v5708_v2 = vadd.f32 %v5707_v8, %v5706_v53  ;;  %v9496_v60 = vmul.f32 %v6226_v49, %v10261_v36 }
 0xd09   : > { %v5742_v40 = vmul.f32 %v9469_v35, %v9469_v35  ;;  %v9479_v55 = vmul.f32 %v5648_v10, %v10256_v38  ;;  %v5709_v6 = vsel %vm10301_vm3, %v9469_v35, 0.0  ;;  %v9490_v38 = vmul.f32 %v6225_v44, %v10257_v4  ;;  %vm10316_vm3 = vmmov %vm10286_vm0 }
 0xd0a   : > { %v5710_v25 = vadd.f32 %v5709_v6, %v5708_v2  ;;  %v5745_v4 = vmul.f32 %v9496_v60, %v9496_v60  ;;  %v5715_v36 = vsel %vm10307_vm5, %v9496_v60, 0.0  ;;  %vm10323_vm5 = vmmov %vm10286_vm0 }
 0xd0b   : > { %v5765_v48 = vsel %vm10302_vm4, %v5742_v40, 0.0  ;;  %v5743_v16 = vmul.f32 %v9479_v55, %v9479_v55  ;;  %v5711_v30 = vsel %vm10303_vm1, %v9479_v55, 0.0  ;;  %v5744_v31 = vmul.f32 %v9490_v38, %v9490_v38  ;;  %vm10318_vm4 = vmmov %vm10286_vm0 }
 0xd0c   : > { %v5766_v54 = vadd.f32 %v5765_v48, %v5764_v62  ;;  %v5712_v51 = vadd.f32 %v5711_v30, %v5710_v25  ;;  %v5713_v56 = vsel %vm10305_vm6, %v9490_v38, 0.0  ;;  %v5771_v63 = vsel %vm10308_vm8, %v5745_v4, 0.0  ;;  %vm10319_vm1 = vmmov %vm10286_vm0 }
 0xd0d   : > { %v5767_v15 = vsel %vm10304_vm2, %v5743_v16, 0.0  ;;  %v5769_v27 = vsel %vm10306_vm7, %v5744_v31, 0.0  ;;  %vm10320_vm2 = vmmov %vm10286_vm0 }
 0xd0e   : > { %v5768_v59 = vadd.f32 %v5767_v15, %v5766_v54  ;;  %v5714_v39 = vadd.f32 %v5713_v56, %v5712_v51  ;;  %vm10321_vm6 = vmmov %vm10286_vm0 }
 0xd0f   : > { %vm10322_vm7 = vmmov %vm10286_vm0 }
 0xd10   : > { %v5770_v44 = vadd.f32 %v5769_v27, %v5768_v59  ;;  %v5716_v49 = vadd.f32 %v5715_v36, %v5714_v39  ;;  %vm10324_vm8 = vmmov %vm10286_vm0 }
 0xd22   : > { %v6229_v28 = vpop.f32.mrb[36].mxu0 }
 0xd23   : > { %v5661_v1 = vpop.f32.mrb[37].mxu0  ;;  %v9508_v20 = vmul.f32 %v6229_v28, %v10264_v21 }
 0xd24   : > { %v9511_v41 = vmul.f32 %v5661_v1, %v10262_v23  ;;  %v6230_v12 = vpop.f32.mrb[38].mxu0  ;;  %v5772_v23 = vadd.f32 %v5771_v63, %v5770_v44 }
 0xd25   : > { %v5664_v26 = vpop.f32.mrb[39].mxu0  ;;  %v9519_v46 = vmul.f32 %v6230_v12, %v10269_v33  ;;  %v5748_v42 = vmul.f32 %v9508_v20, %v9508_v20  ;;  %v5721_v33 = vsel %vm10312_vm12, %v9508_v20, 0.0  ;;  %vm10328_vm12 = vmmov %vm10286_vm0 }
 0xd26   : > { %v5717_v22 = vsel %vm10309_vm9, %v9511_v41, 0.0  ;;  %v5746_v10 = vmul.f32 %v9511_v41, %v9511_v41  ;;  %v9522_v21 = vmul.f32 %v5664_v26, %v10263_v29  ;;  %vm10325_vm9 = vmmov %vm10286_vm0 }
 0xd27   : > { %v5718_v5 = vadd.f32 %v5717_v22, %v5716_v49  ;;  %v5749_v29 = vmul.f32 %v9519_v46, %v9519_v46  ;;  %v5723_v9 = vsel %vm10314_vm14, %v9519_v46, 0.0  ;;  %v5777_v11 = vsel %vm10315_vm15, %v5748_v42, 0.0  ;;  %vm10330_vm14 = vmmov %vm10286_vm0 }
 0xd28   : > { %v5773_v19 = vsel %vm10310_vm10, %v5746_v10, 0.0  ;;  %v5719_v37 = vsel %vm10311_vm11, %v9522_v21, 0.0  ;;  %v5747_v45 = vmul.f32 %v9522_v21, %v9522_v21  ;;  %vm10326_vm10 = vmmov %vm10286_vm0 }
 0xd29   : > { %v5774_v17 = vadd.f32 %v5773_v19, %v5772_v23  ;;  %v5720_v58 = vadd.f32 %v5719_v37, %v5718_v5  ;;  %v5779_v18 = vsel %vm10316_vm3, %v5749_v29, 0.0  ;;  %vm10327_vm11 = vmmov %vm10286_vm0 }
 0xd2a   : > { %v5775_v47 = vsel %vm10313_vm13, %v5747_v45, 0.0  ;;  %vm10329_vm13 = vmmov %vm10286_vm0 }
 0xd2b   : > { %v5722_v32 = vadd.f32 %v5721_v33, %v5720_v58  ;;  %v5776_v7 = vadd.f32 %v5775_v47, %v5774_v17  ;;  %v6060_v47 = vld [vmem:[%s9624_s16] ss:$0 sm:$0xff]  ;;  %vm10331_vm15 = vmmov %vm10286_vm0 }
 0xd2c   : > { %vm10332_vm3 = vmmov %vm10286_vm0 }
 0xd2d   : > { %v5724_v53 = vadd.f32 %v5723_v9, %v5722_v32  ;;  %v5778_v61 = vadd.f32 %v5777_v11, %v5776_v7 }
 0xd2f   : > { %5725 = vadd.xlane.f32.xlu0 %v5724_v53  ;;  %v5780_v40 = vadd.f32 %v5779_v18, %v5778_v61 }
 0xd31   : > { %5781 = vadd.xlane.f32.xlu1 %v5780_v40 }
 0xdbc   : > { %v5726_v24 = vpop.xlane.xlu0 %5725 }
 0xdbd   : > { %v5727_v8 = vrot.slane %v5726_v24, 4 }
 0xdbe   : > { %v5782_v6 = vpop.xlane.xlu1 %5781 }
 0xdbf   : > { %v5728_v2 = vadd.f32 %v5727_v8, %v5726_v24  ;;  %v5783_v43 = vrot.slane %v5782_v6, 4 }
 0xdc1   : > { %v5729_v48 = vrot.slane %v5728_v2, 2  ;;  %v5784_v16 = vadd.f32 %v5783_v43, %v5782_v6 }
 0xdc3   : > { %v5730_v25 = vadd.f32 %v5729_v48, %v5728_v2  ;;  %v5785_v62 = vrot.slane %v5784_v16, 2 }
 0xdc5   : > { %v5786_v30 = vadd.f32 %v5785_v62, %v5784_v16  ;;  %v5731_v54 = vrot.slane %v5730_v25, 1 }
 0xdc7   : > { %v5732_v15 = vadd.f32 %v5731_v54, %v5730_v25  ;;  %v5787_v51 = vrot.slane %v5786_v30, 1 }
 0xdc9   : > { %6255 = vpush %v5732_v15  ;;  %v5788_v31 = vadd.f32 %v5787_v51, %v5786_v30 }
 0xdcb   : > { %6257 = vpush %v5788_v31 }
 0xdfa   : > { %s6256_s26 = spop %6255 }
 0xdfb   : > { %s5790_s19 = smul.f32 0.001953125, %s6256_s26  ;;  %s10317_s26 = sld [smem:[#allocation69_spill]] }
 0xdfc   : > { %s6258_s29 = spop %6257 }
 0xdfd   : > { %s5792_s0 = smul.f32 %s5790_s19, %s5790_s19  ;;  %v5795_v4 = vstv %s5790_s19 }
 0xdfe   : > { %s5791_s30 = smul.f32 0.001953125, %s6258_s29  ;;  %v5796_v39 = vsub.f32 %v9416_v13, %v5795_v4  ;;  %v5797_v27 = vsub.f32 %v9413_v57, %v5795_v4  ;;  %v5798_v28 = vsub.f32 %v9421_v0, %v5795_v4  ;;  %v5799_v44 = vsub.f32 %v9434_v50, %v5795_v4  ;;  %s6065_s29 = sshll.u32 %s10334_s25, 7 }
 0xdff   : > { %v5800_v1 = vsub.f32 %v9437_v34, %v5795_v4  ;;  %v5801_v36 = vsub.f32 %v9447_v52, %v5795_v4  ;;  %v5802_v12 = vsub.f32 %v9458_v14, %v5795_v4  ;;  %v5803_v63 = vsub.f32 %v9466_v3, %v5795_v4 }
 0xe00   : > { %s5793_s18 = ssub.f32 %s5791_s30, %s5792_s0  ;;  %v5804_v49 = vsub.f32 %v9469_v35, %v5795_v4  ;;  %v5805_v26 = vsub.f32 %v9479_v55, %v5795_v4  ;;  %v5806_v13 = vsub.f32 %v9490_v38, %v5795_v4  ;;  %v5807_v57 = vsub.f32 %v9496_v60, %v5795_v4  ;;  %v6059_v55 = vld [vmem:[%s9623_s15] ss:$0 sm:$0xff] }
 0xe01   : > { %v5808_v0 = vsub.f32 %v9511_v41, %v5795_v4  ;;  %v5809_v50 = vsub.f32 %v9522_v21, %v5795_v4  ;;  %v5810_v34 = vsub.f32 %v9508_v20, %v5795_v4  ;;  %v5811_v52 = vsub.f32 %v9519_v46, %v5795_v4  ;;  %s557_s19 = scalar_lea.vmem %s10317_s26, %s10334_s25 }
 0xe02   : > { %s5794_s23 = smax.f32 %s10005_s27, %s5793_s18  ;;  %v6061_v62 = vld [vmem:[%s557_s19] ss:$0 sm:$0xff]  ;;  %s9571_s18 = scalar_lea.vmem %s9625_s17, %s6065_s29 }
 0xe03   : > { %s5812_s28 = sadd.f32 1e-05, %s5794_s23 }
 0xe05   : > { %v5813_v59 = vstv %s5812_s28 }
 0xe06   : > { %6507 = vrsqrt.f32 %v5813_v59 }
 0xe10   : > { %v6508_v56 = vpop.eup %6507 }
 0xe11   : > { %6259 = vpush %v6508_v56 }
 0xe42   : > { %s6260_s27 = spop %6259 }
 0xe43   : > { %v5816_v14 = vstv %s6260_s27 }
 0xe44   : > { %v5817_v22 = vmul.f32 %v5816_v14, %v5796_v39  ;;  %v5818_v3 = vmul.f32 %v5816_v14, %v5797_v27  ;;  %v5819_v10 = vmul.f32 %v5816_v14, %v5798_v28  ;;  %v5820_v35 = vmul.f32 %v5816_v14, %v5799_v44 }
 0xe45   : > { %v5821_v38 = vmul.f32 %v5816_v14, %v5800_v1  ;;  %v5822_v60 = vmul.f32 %v5816_v14, %v5801_v36  ;;  %v5823_v5 = vmul.f32 %v5816_v14, %v5802_v12  ;;  %v5824_v41 = vmul.f32 %v5816_v14, %v5803_v63 }
 0xe46   : > { %v5825_v23 = vmul.f32 %v5816_v14, %v5804_v49  ;;  %v5826_v42 = vmul.f32 %v5816_v14, %v5805_v26  ;;  %v5827_v21 = vmul.f32 %v5816_v14, %v5806_v13  ;;  %v5828_v20 = vmul.f32 %v5816_v14, %v5807_v57 }
 0xe47   : > { %v5829_v19 = vmul.f32 %v5816_v14, %v5808_v0  ;;  %v5830_v46 = vmul.f32 %v5816_v14, %v5809_v50  ;;  %v5831_v37 = vmul.f32 %v5816_v14, %v5810_v34  ;;  %v5832_v45 = vmul.f32 %v5816_v14, %v5811_v52 }
 0xe48   : > { %v5839_v17 = vmul.f32 %v6059_v55, %v5817_v22  ;;  %v5840_v58 = vmul.f32 %v6059_v55, %v5818_v3  ;;  %v5841_v33 = vmul.f32 %v6059_v55, %v5819_v10  ;;  %v5842_v29 = vmul.f32 %v6059_v55, %v5820_v35 }
 0xe49   : > { %v5843_v32 = vmul.f32 %v6059_v55, %v5821_v38  ;;  %v5844_v7 = vmul.f32 %v6059_v55, %v5822_v60  ;;  %v5845_v9 = vmul.f32 %v6059_v55, %v5823_v5  ;;  %v5846_v11 = vmul.f32 %v6059_v55, %v5824_v41 }
 0xe4a   : > { %v5847_v53 = vmul.f32 %v6059_v55, %v5825_v23  ;;  %v5848_v61 = vmul.f32 %v6059_v55, %v5826_v42  ;;  %v5849_v18 = vmul.f32 %v6059_v55, %v5827_v21  ;;  %v5850_v40 = vmul.f32 %v6059_v55, %v5828_v20 }
 0xe4b   : > { %v5851_v24 = vmul.f32 %v6059_v55, %v5829_v19  ;;  %v5852_v8 = vmul.f32 %v6059_v55, %v5830_v46  ;;  %v5853_v6 = vmul.f32 %v6059_v55, %v5831_v37  ;;  %v5854_v2 = vmul.f32 %v6059_v55, %v5832_v45 }
 0xe4c   : > { %v5861_v43 = vadd.f32 %v6060_v47, %v5839_v17  ;;  %v5862_v48 = vadd.f32 %v6060_v47, %v5840_v58  ;;  %v5863_v16 = vadd.f32 %v6060_v47, %v5841_v33  ;;  %v5864_v25 = vadd.f32 %v6060_v47, %v5842_v29 }
 0xe4d   : > { %v5865_v30 = vadd.f32 %v6060_v47, %v5843_v32  ;;  %v5866_v54 = vadd.f32 %v6060_v47, %v5844_v7  ;;  %v5867_v15 = vadd.f32 %v6060_v47, %v5845_v9  ;;  %v5868_v51 = vadd.f32 %v6060_v47, %v5846_v11 }
 0xe4e   : > { %v5869_v31 = vadd.f32 %v6060_v47, %v5847_v53  ;;  %v5870_v59 = vadd.f32 %v6060_v47, %v5848_v61  ;;  %v5871_v56 = vadd.f32 %v6060_v47, %v5849_v18  ;;  %v5872_v4 = vadd.f32 %v6060_v47, %v5850_v40 }
 0xe4f   : > { %v5873_v39 = vadd.f32 %v6060_v47, %v5851_v24  ;;  %v5874_v27 = vadd.f32 %v6060_v47, %v5852_v8  ;;  %v5875_v28 = vadd.f32 %v6060_v47, %v5853_v6  ;;  %v5876_v44 = vadd.f32 %v6060_v47, %v5854_v2 }
 0xe50   : > { %v5884_v1 = vadd.f32 %v6061_v62, %v5861_v43  ;;  %v5885_v36 = vadd.f32 %v6061_v62, %v5862_v48  ;;  %v5886_v12 = vadd.f32 %v6061_v62, %v5863_v16  ;;  %v5887_v63 = vadd.f32 %v6061_v62, %v5864_v25 }
 0xe51   : > { %v5888_v49 = vadd.f32 %v6061_v62, %v5865_v30  ;;  %v5889_v26 = vadd.f32 %v6061_v62, %v5866_v54  ;;  %v5890_v13 = vadd.f32 %v6061_v62, %v5867_v15  ;;  %v5891_v57 = vadd.f32 %v6061_v62, %v5868_v51 }
 0xe52   : > { %v5892_v0 = vadd.f32 %v6061_v62, %v5869_v31  ;;  %v5893_v50 = vadd.f32 %v6061_v62, %v5870_v59  ;;  %v5894_v34 = vadd.f32 %v6061_v62, %v5871_v56  ;;  %v5895_v52 = vadd.f32 %v6061_v62, %v5872_v4  ;;  %5900 = vst.msk [vmem:[%s9571_s18] sm:$0xff] %vm10286_vm0, %v5884_v1 }
 0xe53   : > { %5901 = vst.msk [vmem:[%s9571_s18 + $0x8] sm:$0xff] %vm10318_vm4, %v5885_v36  ;;  %v5896_v14 = vadd.f32 %v6061_v62, %v5873_v39  ;;  %v5897_v22 = vadd.f32 %v6061_v62, %v5874_v27  ;;  %v5898_v3 = vadd.f32 %v6061_v62, %v5875_v28  ;;  %v5899_v10 = vadd.f32 %v6061_v62, %v5876_v44 }
 0xe54   : > { %5902 = vst.msk [vmem:[%s9571_s18 + $0x10] sm:$0xff] %vm10319_vm1, %v5886_v12 }
 0xe55   : > { %5903 = vst.msk [vmem:[%s9571_s18 + $0x18] sm:$0xff] %vm10320_vm2, %v5887_v63 }
 0xe56   : > { %5904 = vst.msk [vmem:[%s9571_s18 + $0x20] sm:$0xff] %vm10321_vm6, %v5888_v49 }
 0xe57   : > { %5905 = vst.msk [vmem:[%s9571_s18 + $0x28] sm:$0xff] %vm10322_vm7, %v5889_v26 }
 0xe58   : > { %5906 = vst.msk [vmem:[%s9571_s18 + $0x30] sm:$0xff] %vm10323_vm5, %v5890_v13 }
 0xe59   : > { %5907 = vst.msk [vmem:[%s9571_s18 + $0x38] sm:$0xff] %vm10324_vm8, %v5891_v57 }
 0xe5a   : > { %5908 = vst.msk [vmem:[%s9571_s18 + $0x40] sm:$0xff] %vm10325_vm9, %v5892_v0 }
 0xe5b   : > { %5909 = vst.msk [vmem:[%s9571_s18 + $0x48] sm:$0xff] %vm10326_vm10, %v5893_v50 }
 0xe5c   : > { %5910 = vst.msk [vmem:[%s9571_s18 + $0x50] sm:$0xff] %vm10327_vm11, %v5894_v34 }
 0xe5d   : > { %5911 = vst.msk [vmem:[%s9571_s18 + $0x58] sm:$0xff] %vm10328_vm12, %v5895_v52 }
 0xe5e   : > { %5912 = vst.msk [vmem:[%s9571_s18 + $0x60] sm:$0xff] %vm10329_vm13, %v5896_v14 }
 0xe5f   : > { %5913 = vst.msk [vmem:[%s9571_s18 + $0x68] sm:$0xff] %vm10330_vm14, %v5897_v22 }
 0xe60   : > { %5914 = vst.msk [vmem:[%s9571_s18 + $0x70] sm:$0xff] %vm10331_vm15, %v5898_v3 }
 0xe61   : > { %5915 = vst.msk [vmem:[%s9571_s18 + $0x78] sm:$0xff] %vm10332_vm3, %v5899_v10 }
 0xe62 PF: > { %s27_s24 = sadd.s32 1, %s6515_s24  }
 0xe63   : > { %p24_p4 = scmp.ge.s32.totalorder %s27_s24, 4  }
 0xe65   :  { %26 = sbr.rel (!%p24_p4) target bundleno = 5 (0x5), region = 121 }

</bundles_post_ra>
